<compile_context>
chip_gen: v7x
topology: tpu7x:2x2x1
jax: 0.10.0
libtpu: 0.0.40
codegen_flags: <defaults>
</compile_context>

<pallas_src>
import math

import jax
import jax.numpy as jnp
from jax import lax
from jax.experimental import pallas as pl
from jax.experimental.pallas import tpu as pltpu

# ---------------- model dims (implied by the PyTorch module) ----------------
B = 2
L_R = 90            # rx nodes (ROI stream)
L_G = 68            # gx nodes (graph stream)
E = 116             # true feat_dim
EP = 128            # lane-padded feat_dim
N = L_R + L_G       # 158 graph nodes
NHEAD = 2
DH = E // NHEAD     # 58  true head dim -> softmax scale
DHP = EP // NHEAD   # 64  padded per-head lane slot
HIDDEN = 8          # gcn hidden_size
NUM_CLASSES = 2
D0 = N * HIDDEN     # 1264 flattened gcn features
D1 = D0 // 2        # 632
D2 = D0 // 4        # 316
D1P = 640           # lane-padded fc1 width  (5 * 128)
D2P = 384           # lane-padded fc2 width  (3 * 128)
CLSP = 128          # lane-padded logits width
NS_PACK = 256       # packed node-score row width (>= N, multiple of 128)
SCALE = 1.0 / math.sqrt(DH)
LN_EPS = 1e-5

_NT = (((1,), (1,)), ((), ()))      # dot_general dims: contract last dim of both (A @ B^T)


# =============================================================================
# Kernel 1: one grid step == one batch element (attention + LN residual + GCN).
# =============================================================================
def _mca_kernel(r_ref, g_ref, adjt_ref, pe_ref,
                wrx_ref, brx_ref, wgx_ref, bgx_ref,
                wo1_ref, bo1_ref, wo2_ref, bo2_ref,
                gamma_ref, beta_ref, wgt_ref,
                ns_ref, gcnt_ref):
    f32, bf16 = jnp.float32, jnp.bfloat16

    rx = r_ref[...] + pe_ref[...]                 # (90, 128) f32, pad lanes stay zero
    gx = g_ref[...]                               # (68, 128) f32

    # fused projections: rx -> [Q1 | K2 | V2] ; gx -> [Q2 | K1 | V1]
    rx_p = jnp.dot(rx.astype(bf16), wrx_ref[...], preferred_element_type=f32) + brx_ref[...]
    gx_p = jnp.dot(gx.astype(bf16), wgx_ref[...], preferred_element_type=f32) + bgx_ref[...]
    q1, k2, v2 = rx_p[:, :EP], rx_p[:, EP:2 * EP], rx_p[:, 2 * EP:]
    q2, k1, v1 = gx_p[:, :EP], gx_p[:, EP:2 * EP], gx_p[:, 2 * EP:]

    ones_row = jnp.ones((1, EP), f32)

    def attend(q, k, v, kv_raw, wo_ref, bo_ref):
        """Multi-head cross attention output + softmaxed node-score ROW (1, L)."""
        L, S = q.shape[0], k.shape[0]
        out = bo_ref[...]                                   # (1, EP) broadcast-added
        attn_sum = jnp.zeros((L, S), f32)
        for h in range(NHEAD):                              # unrolled, NHEAD == 2
            sl = slice(h * DHP, (h + 1) * DHP)              # 64-lane aligned head slot
            qh = (q[:, sl] * SCALE).astype(bf16)            # (L, 64)
            kh = k[:, sl].astype(bf16)                      # (S, 64)
            vh = v[:, sl].astype(bf16)                      # (S, 64)
            s = lax.dot_general(qh, kh, _NT, preferred_element_type=f32)   # (L, S)
            s = s - jnp.max(s, axis=-1, keepdims=True)
            e = jnp.exp(s)
            p = e * pl.reciprocal(jnp.sum(e, axis=-1, keepdims=True), approx=True)
            attn_sum = attn_sum + p
            ctx = jnp.dot(p.astype(bf16), vh, preferred_element_type=f32)  # (L, 64)
            out = out + jnp.dot(ctx.astype(bf16), wo_ref[sl, :],
                                preferred_element_type=f32)                # (L, EP)
        attn_avg = attn_sum * (1.0 / NHEAD)                 # averaged attention weights
        # node scores, lane-dense:  kv_row[0,s] = sum_f kv[s,f]
        #                           ns[0,l]     = sum_s attn_avg[l,s] * kv_row[0,s]
        kv_row = lax.dot_general(ones_row, kv_raw, _NT, preferred_element_type=f32)  # (1, S)
        ns = lax.dot_general(kv_row, attn_avg, _NT, preferred_element_type=f32)      # (1, L)
        ns = ns - jnp.max(ns, axis=-1, keepdims=True)       # exact softmax (returned output)
        en = jnp.exp(ns)
        ns = en / jnp.sum(en, axis=-1, keepdims=True)
        return out, ns

    attn1, ns1 = attend(q1, k1, v1, gx, wo1_ref, bo1_ref)   # queries rx, kv gx: (90,128),(1,90)
    attn2, ns2 = attend(q2, k2, v2, rx, wo2_ref, bo2_ref)   # queries gx, kv rx: (68,128),(1,68)

    # packed lane-dense per-batch output row: [softmax(ns1) | softmax(ns2) | 0-pad]
    ns_ref[...] = jnp.concatenate(
        [ns1, ns2, jnp.zeros((1, NS_PACK - N), f32)], axis=-1)

    # LayerNorm over the true 116 features (two-pass; padded lanes masked out;
    # gamma/beta are zero on padded lanes so pads stay zero).
    gamma, beta = gamma_ref[...], beta_ref[...]
    lane_ok = (lax.broadcasted_iota(jnp.int32, (1, EP), 1) < E).astype(f32)

    def layernorm(a):
        mu = jnp.sum(a, axis=-1, keepdims=True) * (1.0 / E)
        d = (a - mu) * lane_ok
        var = jnp.sum(d * d, axis=-1, keepdims=True) * (1.0 / E)
        return d * lax.rsqrt(var + LN_EPS) * gamma + beta

    ln1 = layernorm(attn1)                                  # (90, 128)
    ln2 = layernorm(attn2)                                  # (68, 128)

    # residual exactly as torch: cat(gx, rx) + LN(cat(attn1, attn2)), positional
    # row-wise add => streams mix at row offsets 68 and 90:
    x1 = gx + ln1[0:L_G, :]                                 # graph nodes 0..67
    x2 = rx[0:L_R - L_G, :] + ln1[L_G:L_R, :]               # roi   nodes 0..21
    x3 = rx[L_R - L_G:L_R, :] + ln2                         # roi   nodes 22..89

    # GraphConvolution in transposed form: gcn^T = relu( (W_g^T @ x^T) @ adj^T ).
    # support^T is built per residual piece (lane ranges) -> no 158-row scratch.
    wgt = wgt_ref[...]                                      # (8, 128) bf16
    s1 = lax.dot_general(wgt, x1.astype(bf16), _NT, preferred_element_type=f32)  # (8, 68)
    s2 = lax.dot_general(wgt, x2.astype(bf16), _NT, preferred_element_type=f32)  # (8, 22)
    s3 = lax.dot_general(wgt, x3.astype(bf16), _NT, preferred_element_type=f32)  # (8, 68)
    supT = jnp.concatenate([s1, s2, s3], axis=-1)           # (8, 158) == support^T
    # adj arrives pre-transposed + bf16 from the host -> plain MK,KN matmul.
    gcnT = jnp.dot(supT.astype(bf16), adjt_ref[...], preferred_element_type=f32)  # (8, 158)
    gcnt_ref[...] = jnp.maximum(gcnT, 0.0)


# =============================================================================
# Kernel 2: FC head once over the whole batch (M = B rows).
# =============================================================================
def _fc_head_kernel(x_ref, w1_ref, b1_ref, w2_ref, b2_ref, w3_ref, b3_ref, o_ref):
    f32, bf16 = jnp.float32, jnp.bfloat16
    h = jnp.dot(x_ref[...].astype(bf16), w1_ref[...], preferred_element_type=f32) + b1_ref[...]
    h = jnp.maximum(h, 0.0)
    h = jnp.dot(h.astype(bf16), w2_ref[...], preferred_element_type=f32) + b2_ref[...]
    h = jnp.maximum(h, 0.0)
    o_ref[...] = jnp.dot(h.astype(bf16), w3_ref[...], preferred_element_type=f32) + b3_ref[...]


# =============================================================================
# Wrapper
# =============================================================================
def _const_spec(shape):
    """Constant-index weight block: fetched once; single-buffered when supported."""
    idx = lambda b: (0,) * len(shape)
    try:
        return pl.BlockSpec(shape, idx, pipeline_mode=pl.Buffered(1))
    except (TypeError, AttributeError, ValueError):
        return pl.BlockSpec(shape, idx)


def mca_gcn_forward(params, r_feat, g_feat, adj):
    p = params
    Bq = r_feat.shape[0]
    r_pad = jnp.pad(r_feat, ((0, 0), (0, 0), (0, EP - E)))
    g_pad = jnp.pad(g_feat, ((0, 0), (0, 0), (0, EP - E)))
    # adjacency: transpose + bf16 cast on the host (halves the largest per-step DMA
    # and removes the in-kernel 158x158 transpose).
    adj_t = jnp.swapaxes(adj, 1, 2).astype(jnp.bfloat16)

    def per_b(rows, cols):
        return pl.BlockSpec((None, rows, cols), lambda b: (b, 0, 0))

    main_cost = pl.CostEstimate(
        flops=int(2.8e7) * Bq,
        transcendentals=int(2.6e4) * Bq,
        bytes_accessed=int(3.2e5) + int(1.4e5) * Bq)

    ns_packed, gcn_t = pl.pallas_call(
        _mca_kernel,
        grid=(Bq,),
        in_specs=[
            per_b(L_R, EP),                                          # r_feat (padded)
            per_b(L_G, EP),                                          # g_feat (padded)
            per_b(N, N),                                             # adj^T  (bf16)
            _const_spec((L_R, EP)),                                  # positional encoding
            _const_spec((EP, 3 * EP)), _const_spec((1, 3 * EP)),     # w_rx, b_rx
            _const_spec((EP, 3 * EP)), _const_spec((1, 3 * EP)),     # w_gx, b_gx
            _const_spec((EP, EP)), _const_spec((1, EP)),             # wo1, bo1
            _const_spec((EP, EP)), _const_spec((1, EP)),             # wo2, bo2
            _const_spec((1, EP)), _const_spec((1, EP)),              # ln gamma, beta
            _const_spec((HIDDEN, EP)),                               # W_gcn^T (padded)
        ],
        out_specs=(
            pl.BlockSpec((None, 1, NS_PACK), lambda b: (b, 0, 0)),   # packed node scores
            pl.BlockSpec((None, HIDDEN, N), lambda b: (b, 0, 0)),    # gcn output^T
        ),
        out_shape=(
            jax.ShapeDtypeStruct((Bq, 1, NS_PACK), jnp.float32),
            jax.ShapeDtypeStruct((Bq, HIDDEN, N), jnp.float32),
        ),
        compiler_params=pltpu.CompilerParams(dimension_semantics=("parallel",)),
        cost_estimate=main_cost,
    )(r_pad, g_pad, adj_t, p["pe"],
      p["w_rx"], p["b_rx"], p["w_gx"], p["b_gx"],
      p["wo1"], p["bo1"], p["wo2"], p["bo2"],
      p["ln_gamma"], p["ln_beta"], p["w_gcn_t"])

    # node scores: packed row already ordered [softmax(ns1) | softmax(ns2)]
    node_scores = ns_packed[:, 0, :N]                        # (B, 158)
    normalized_node_scores = jnp.mean(node_scores, axis=0)   # (158,)

    # FC head once over the whole batch.  torch flattens node-major (n*8 + j);
    # gcn_t flattens hidden-major (j*158 + n) -- the host-side row permutation of
    # w_fc1 accounts for the difference.
    gcn_flat = gcn_t.reshape(Bq, HIDDEN * N)                 # (B, 1264)
    fc_cost = pl.CostEstimate(
        flops=int(2.3e6) * Bq, transcendentals=0,
        bytes_accessed=int(2.3e6) + 6144 * Bq)
    logits = pl.pallas_call(
        _fc_head_kernel,
        out_shape=jax.ShapeDtypeStruct((Bq, CLSP), jnp.float32),
        cost_estimate=fc_cost,
    )(gcn_flat, p["w_fc1"], p["b_fc1"], p["w_fc2"], p["b_fc2"], p["w_fc3"], p["b_fc3"])
    prediction_scores = logits[:, :NUM_CLASSES]              # (B, 2)

    return prediction_scores, normalized_node_scores


# =============================================================================
# Deterministic parameter construction (synthetic; no checkpoint) plus the
# padding / fusion / rearrangement the kernels expect.
# =============================================================================
def make_params(key):
    keys = iter(jax.random.split(key, 48))

    def u(shape, scale):
        return jax.random.uniform(next(keys), shape, jnp.float32, -scale, scale)

    s_attn = math.sqrt(1.0 / E)

    def mha_raw():
        return dict(
            wq=u((E, E), s_attn), wk=u((E, E), s_attn), wv=u((E, E), s_attn),
            bq=u((E,), s_attn), bk=u((E,), s_attn), bv=u((E,), s_attn),
            wo=u((E, E), s_attn), bo=u((E,), s_attn))

    m1, m2 = mha_raw(), mha_raw()
    pe = u((L_R, E), 0.1)
    gamma = u((E,), 0.5) + 1.0
    beta = u((E,), 0.1)
    w_gcn = u((E, HIDDEN), math.sqrt(1.0 / (E + HIDDEN)))
    w1 = u((D0, D1), math.sqrt(1.0 / D0)); b1 = u((D1,), math.sqrt(1.0 / D0))
    w2 = u((D1, D2), math.sqrt(1.0 / D1)); b2 = u((D2,), math.sqrt(1.0 / D1))
    w3 = u((D2, NUM_CLASSES), math.sqrt(1.0 / D2))
    b3 = u((NUM_CLASSES,), math.sqrt(1.0 / D2))

    bf16 = jnp.bfloat16

    def head_slot_cols(w):    # (..., E) -> (..., EP), head h in lanes [h*64, h*64+58)
        out = jnp.zeros(w.shape[:-1] + (EP,), jnp.float32)
        for h in range(NHEAD):
            out = out.at[..., h * DHP:h * DHP + DH].set(w[..., h * DH:(h + 1) * DH])
        return out

    def head_slot_rows(w):    # (E, n) -> (EP, n), head h rows in [h*64, h*64+58)
        out = jnp.zeros((EP,) + w.shape[1:], jnp.float32)
        for h in range(NHEAD):
            out = out.at[h * DHP:h * DHP + DH].set(w[h * DH:(h + 1) * DH])
        return out

    def pad_in(w):            # (E, n) -> (EP, n): zero rows for padded input lanes
        return jnp.pad(w, ((0, EP - E), (0, 0)))

    def pad_feat(v):          # (E,) or (r, E) -> (r, EP): zero-padded feature lanes
        v2 = v.reshape(-1, E)
        return jnp.pad(v2, ((0, 0), (0, EP - E)))

    def proj(w):              # (E, E) in-projection -> (EP, EP)
        return head_slot_cols(pad_in(w))

    def proj_b(b):            # (E,) bias -> (1, EP) in head slots
        return head_slot_cols(b.reshape(1, E))

    # fused projection weights: rx stream produces [Q1|K2|V2], gx stream [Q2|K1|V1]
    w_rx = jnp.concatenate([proj(m1["wq"]), proj(m2["wk"]), proj(m2["wv"])], axis=1)
    b_rx = jnp.concatenate([proj_b(m1["bq"]), proj_b(m2["bk"]), proj_b(m2["bv"])], axis=1)
    w_gx = jnp.concatenate([proj(m2["wq"]), proj(m1["wk"]), proj(m1["wv"])], axis=1)
    b_gx = jnp.concatenate([proj_b(m2["bq"]), proj_b(m1["bk"]), proj_b(m1["bv"])], axis=1)

    def out_proj(w):          # (E, E) -> (EP, EP): head-slot rows, zero-padded cols
        return jnp.pad(head_slot_rows(w), ((0, 0), (0, EP - E)))

    # fc1: permute rows so that flat index (j*158 + n) picks up torch-flat row (n*8 + j),
    # then pad output lanes 632 -> 640.  fc2/fc3 lane-padded to 384 / 128.
    w1p = w1.reshape(N, HIDDEN, D1).transpose(1, 0, 2).reshape(D0, D1)
    w1p = jnp.pad(w1p, ((0, 0), (0, D1P - D1)))
    w2p = jnp.pad(w2, ((0, D1P - D1), (0, D2P - D2)))
    w3p = jnp.pad(w3, ((0, D2P - D2), (0, CLSP - NUM_CLASSES)))

    return dict(
        pe=pad_feat(pe),                                           # (90, 128) f32
        w_rx=w_rx.astype(bf16), b_rx=b_rx,                         # (128, 384), (1, 384)
        w_gx=w_gx.astype(bf16), b_gx=b_gx,
        wo1=out_proj(m1["wo"]).astype(bf16), bo1=pad_feat(m1["bo"]),
        wo2=out_proj(m2["wo"]).astype(bf16), bo2=pad_feat(m2["bo"]),
        ln_gamma=pad_feat(gamma), ln_beta=pad_feat(beta),          # (1, 128)
        w_gcn_t=pad_in(w_gcn).T.astype(bf16),                      # (8, 128)
        w_fc1=w1p.astype(bf16), b_fc1=jnp.pad(b1, (0, D1P - D1)).reshape(1, D1P),
        w_fc2=w2p.astype(bf16), b_fc2=jnp.pad(b2, (0, D2P - D2)).reshape(1, D2P),
        w_fc3=w3p.astype(bf16), b_fc3=jnp.pad(b3, (0, CLSP - NUM_CLASSES)).reshape(1, CLSP),
    )


if __name__ == "__main__":
    key = jax.random.PRNGKey(0)
    k_p, k_r, k_g, k_a = jax.random.split(key, 4)

    params = make_params(k_p)
    r_feat = jax.random.normal(k_r, (B, L_R, E), jnp.float32)
    g_feat = jax.random.normal(k_g, (B, L_G, E), jnp.float32)
    adj_raw = jax.random.uniform(k_a, (B, N, N), jnp.float32)
    adj = adj_raw / jnp.sum(adj_raw, axis=-1, keepdims=True)   # row-normalized adjacency

    fwd = jax.jit(mca_gcn_forward)
    preds, node_scores = fwd(params, r_feat, g_feat, adj)
    jax.block_until_ready((preds, node_scores))

    assert preds.shape == (B, NUM_CLASSES), preds.shape
    assert node_scores.shape == (N,), node_scores.shape
    assert bool(jnp.all(jnp.isfinite(preds))) and bool(jnp.all(jnp.isfinite(node_scores)))
    print("KERNEL_OK")
</pallas_src>

<mosaic_0001>
module attributes {stable_mosaic.version = 11 : i64} {
  func.func @_mca_kernel(%arg0: i32, %arg1: memref<1x90x128xf32, #tpu.memory_space<vmem>>, %arg2: memref<1x68x128xf32, #tpu.memory_space<vmem>>, %arg3: memref<1x158x158xbf16, #tpu.memory_space<vmem>>, %arg4: memref<90x128xf32, #tpu.memory_space<vmem>>, %arg5: memref<128x384xbf16, #tpu.memory_space<vmem>>, %arg6: memref<1x384xf32, #tpu.memory_space<vmem>>, %arg7: memref<128x384xbf16, #tpu.memory_space<vmem>>, %arg8: memref<1x384xf32, #tpu.memory_space<vmem>>, %arg9: memref<128x128xbf16, #tpu.memory_space<vmem>>, %arg10: memref<1x128xf32, #tpu.memory_space<vmem>>, %arg11: memref<128x128xbf16, #tpu.memory_space<vmem>>, %arg12: memref<1x128xf32, #tpu.memory_space<vmem>>, %arg13: memref<1x128xf32, #tpu.memory_space<vmem>>, %arg14: memref<1x128xf32, #tpu.memory_space<vmem>>, %arg15: memref<8x128xbf16, #tpu.memory_space<vmem>>, %arg16: memref<1x1x256xf32, #tpu.memory_space<vmem>>, %arg17: memref<1x8x158xf32, #tpu.memory_space<vmem>>) attributes {dimension_semantics = [#tpu.dimension_semantics<parallel>], iteration_bounds = array<i64: 2>, scalar_prefetch = 0 : i64, scratch_operands = 0 : i64, tpu.core_type = #tpu.core_type<tc>, window_params = [{transform_indices = @transform_0, window_bounds = array<i64: 1, 90, 128>}, {transform_indices = @transform_1, window_bounds = array<i64: 1, 68, 128>}, {transform_indices = @transform_2, window_bounds = array<i64: 1, 158, 158>}, {pipeline_mode = #tpu.pipeline_mode<synchronous>, transform_indices = @transform_3, window_bounds = array<i64: 90, 128>}, {pipeline_mode = #tpu.pipeline_mode<synchronous>, transform_indices = @transform_4, window_bounds = array<i64: 128, 384>}, {pipeline_mode = #tpu.pipeline_mode<synchronous>, transform_indices = @transform_5, window_bounds = array<i64: 1, 384>}, {pipeline_mode = #tpu.pipeline_mode<synchronous>, transform_indices = @transform_6, window_bounds = array<i64: 128, 384>}, {pipeline_mode = #tpu.pipeline_mode<synchronous>, transform_indices = @transform_7, window_bounds = array<i64: 1, 384>}, {pipeline_mode = #tpu.pipeline_mode<synchronous>, transform_indices = @transform_8, window_bounds = array<i64: 128, 128>}, {pipeline_mode = #tpu.pipeline_mode<synchronous>, transform_indices = @transform_9, window_bounds = array<i64: 1, 128>}, {pipeline_mode = #tpu.pipeline_mode<synchronous>, transform_indices = @transform_10, window_bounds = array<i64: 128, 128>}, {pipeline_mode = #tpu.pipeline_mode<synchronous>, transform_indices = @transform_11, window_bounds = array<i64: 1, 128>}, {pipeline_mode = #tpu.pipeline_mode<synchronous>, transform_indices = @transform_12, window_bounds = array<i64: 1, 128>}, {pipeline_mode = #tpu.pipeline_mode<synchronous>, transform_indices = @transform_13, window_bounds = array<i64: 1, 128>}, {pipeline_mode = #tpu.pipeline_mode<synchronous>, transform_indices = @transform_14, window_bounds = array<i64: 8, 128>}, {transform_indices = @transform_15, window_bounds = array<i64: 1, 1, 256>}, {transform_indices = @transform_16, window_bounds = array<i64: 1, 8, 158>}]} {
    %c0 = arith.constant 0 : index
    %c0_0 = arith.constant 0 : index
    %c0_1 = arith.constant 0 : index
    %0 = vector.load %arg1[%c0, %c0_0, %c0_1] : memref<1x90x128xf32, #tpu.memory_space<vmem>>, vector<1x90x128xf32>
    %1 = vector.shape_cast %0 : vector<1x90x128xf32> to vector<90x128xf32>
    %c0_2 = arith.constant 0 : index
    %c0_3 = arith.constant 0 : index
    %2 = vector.load %arg4[%c0_2, %c0_3] : memref<90x128xf32, #tpu.memory_space<vmem>>, vector<90x128xf32>
    %3 = arith.addf %1, %2 : vector<90x128xf32>
    %c0_4 = arith.constant 0 : index
    %c0_5 = arith.constant 0 : index
    %c0_6 = arith.constant 0 : index
    %4 = vector.load %arg2[%c0_4, %c0_5, %c0_6] : memref<1x68x128xf32, #tpu.memory_space<vmem>>, vector<1x68x128xf32>
    %5 = vector.shape_cast %4 : vector<1x68x128xf32> to vector<68x128xf32>
    %6 = arith.truncf %3 : vector<90x128xf32> to vector<90x128xbf16>
    %c0_7 = arith.constant 0 : index
    %c0_8 = arith.constant 0 : index
    %7 = vector.load %arg5[%c0_7, %c0_8] : memref<128x384xbf16, #tpu.memory_space<vmem>>, vector<128x384xbf16>
    %cst = arith.constant dense<0.000000e+00> : vector<90x384xf32>
    %8 = tpu.matmul %6, %7, %cst {dimension_numbers = #tpu.dot_dimension_numbers<[1], [0], [0], [1], [0, 0, 1, 1], [], []>} : vector<90x128xbf16>, vector<128x384xbf16>, vector<90x384xf32> -> vector<90x384xf32>
    %c0_9 = arith.constant 0 : index
    %c0_10 = arith.constant 0 : index
    %9 = vector.load %arg6[%c0_9, %c0_10] : memref<1x384xf32, #tpu.memory_space<vmem>>, vector<1x384xf32>
    %10 = vector.broadcast %9 : vector<1x384xf32> to vector<90x384xf32>
    %11 = arith.addf %8, %10 : vector<90x384xf32>
    %12 = arith.truncf %5 : vector<68x128xf32> to vector<68x128xbf16>
    %c0_11 = arith.constant 0 : index
    %c0_12 = arith.constant 0 : index
    %13 = vector.load %arg7[%c0_11, %c0_12] : memref<128x384xbf16, #tpu.memory_space<vmem>>, vector<128x384xbf16>
    %cst_13 = arith.constant dense<0.000000e+00> : vector<68x384xf32>
    %14 = tpu.matmul %12, %13, %cst_13 {dimension_numbers = #tpu.dot_dimension_numbers<[1], [0], [0], [1], [0, 0, 1, 1], [], []>} : vector<68x128xbf16>, vector<128x384xbf16>, vector<68x384xf32> -> vector<68x384xf32>
    %c0_14 = arith.constant 0 : index
    %c0_15 = arith.constant 0 : index
    %15 = vector.load %arg8[%c0_14, %c0_15] : memref<1x384xf32, #tpu.memory_space<vmem>>, vector<1x384xf32>
    %16 = vector.broadcast %15 : vector<1x384xf32> to vector<68x384xf32>
    %17 = arith.addf %14, %16 : vector<68x384xf32>
    %18 = vector.extract_strided_slice %11 {offsets = [0, 0], sizes = [90, 128], strides = [1, 1]} : vector<90x384xf32> to vector<90x128xf32>
    %19 = vector.extract_strided_slice %11 {offsets = [0, 128], sizes = [90, 128], strides = [1, 1]} : vector<90x384xf32> to vector<90x128xf32>
    %20 = vector.extract_strided_slice %11 {offsets = [0, 256], sizes = [90, 128], strides = [1, 1]} : vector<90x384xf32> to vector<90x128xf32>
    %21 = vector.extract_strided_slice %17 {offsets = [0, 0], sizes = [68, 128], strides = [1, 1]} : vector<68x384xf32> to vector<68x128xf32>
    %22 = vector.extract_strided_slice %17 {offsets = [0, 128], sizes = [68, 128], strides = [1, 1]} : vector<68x384xf32> to vector<68x128xf32>
    %23 = vector.extract_strided_slice %17 {offsets = [0, 256], sizes = [68, 128], strides = [1, 1]} : vector<68x384xf32> to vector<68x128xf32>
    %cst_16 = arith.constant 1.000000e+00 : f32
    %24 = vector.broadcast %cst_16 : f32 to vector<1x128xf32>
    %c0_17 = arith.constant 0 : index
    %c0_18 = arith.constant 0 : index
    %25 = vector.load %arg10[%c0_17, %c0_18] : memref<1x128xf32, #tpu.memory_space<vmem>>, vector<1x128xf32>
    %cst_19 = arith.constant 0.000000e+00 : f32
    %26 = vector.broadcast %cst_19 : f32 to vector<90x68xf32>
    %27 = vector.extract_strided_slice %18 {offsets = [0, 0], sizes = [90, 64], strides = [1, 1]} : vector<90x128xf32> to vector<90x64xf32>
    %cst_20 = arith.constant 0.13130644 : f32
    %28 = vector.broadcast %cst_20 : f32 to vector<90x64xf32>
    %29 = arith.mulf %27, %28 : vector<90x64xf32>
    %30 = arith.truncf %29 : vector<90x64xf32> to vector<90x64xbf16>
    %31 = vector.extract_strided_slice %22 {offsets = [0, 0], sizes = [68, 64], strides = [1, 1]} : vector<68x128xf32> to vector<68x64xf32>
    %32 = arith.truncf %31 : vector<68x64xf32> to vector<68x64xbf16>
    %33 = vector.extract_strided_slice %23 {offsets = [0, 0], sizes = [68, 64], strides = [1, 1]} : vector<68x128xf32> to vector<68x64xf32>
    %34 = arith.truncf %33 : vector<68x64xf32> to vector<68x64xbf16>
    %cst_21 = arith.constant dense<0.000000e+00> : vector<90x68xf32>
    %35 = tpu.matmul %30, %32, %cst_21 {dimension_numbers = #tpu.dot_dimension_numbers<[1], [1], [0], [0], [0, 0, 1, 0], [], []>} : vector<90x64xbf16>, vector<68x64xbf16>, vector<90x68xf32> -> vector<90x68xf32>
    %cst_22 = arith.constant dense<0xFF800000> : vector<90xf32>
    %36 = vector.multi_reduction <maximumf>, %35, %cst_22 [1] : vector<90x68xf32> to vector<90xf32>
    %37 = vector.shape_cast %36 : vector<90xf32> to vector<90x1xf32>
    %38 = vector.broadcast %37 : vector<90x1xf32> to vector<90x68xf32>
    %39 = arith.subf %35, %38 : vector<90x68xf32>
    %40 = math.exp %39 : vector<90x68xf32>
    %cst_23 = arith.constant dense<0.000000e+00> : vector<90xf32>
    %41 = vector.multi_reduction <add>, %40, %cst_23 [1] : vector<90x68xf32> to vector<90xf32>
    %42 = vector.shape_cast %41 : vector<90xf32> to vector<90x1xf32>
    %43 = tpu.reciprocal %42 {approx = true} : vector<90x1xf32> -> vector<90x1xf32>
    %44 = vector.broadcast %43 : vector<90x1xf32> to vector<90x68xf32>
    %45 = arith.mulf %40, %44 : vector<90x68xf32>
    %46 = arith.addf %26, %45 : vector<90x68xf32>
    %47 = arith.truncf %45 : vector<90x68xf32> to vector<90x68xbf16>
    %cst_24 = arith.constant dense<0.000000e+00> : vector<90x64xf32>
    %48 = tpu.matmul %47, %34, %cst_24 {dimension_numbers = #tpu.dot_dimension_numbers<[1], [0], [0], [1], [0, 0, 1, 1], [], []>} : vector<90x68xbf16>, vector<68x64xbf16>, vector<90x64xf32> -> vector<90x64xf32>
    %49 = arith.truncf %48 : vector<90x64xf32> to vector<90x64xbf16>
    %c0_25 = arith.constant 0 : index
    %c0_26 = arith.constant 0 : index
    %50 = vector.load %arg9[%c0_25, %c0_26] : memref<128x128xbf16, #tpu.memory_space<vmem>>, vector<64x128xbf16>
    %cst_27 = arith.constant dense<0.000000e+00> : vector<90x128xf32>
    %51 = tpu.matmul %49, %50, %cst_27 {dimension_numbers = #tpu.dot_dimension_numbers<[1], [0], [0], [1], [0, 0, 1, 1], [], []>} : vector<90x64xbf16>, vector<64x128xbf16>, vector<90x128xf32> -> vector<90x128xf32>
    %52 = vector.broadcast %25 : vector<1x128xf32> to vector<90x128xf32>
    %53 = arith.addf %52, %51 : vector<90x128xf32>
    %54 = vector.extract_strided_slice %18 {offsets = [0, 64], sizes = [90, 64], strides = [1, 1]} : vector<90x128xf32> to vector<90x64xf32>
    %cst_28 = arith.constant 0.13130644 : f32
    %55 = vector.broadcast %cst_28 : f32 to vector<90x64xf32>
    %56 = arith.mulf %54, %55 : vector<90x64xf32>
    %57 = arith.truncf %56 : vector<90x64xf32> to vector<90x64xbf16>
    %58 = vector.extract_strided_slice %22 {offsets = [0, 64], sizes = [68, 64], strides = [1, 1]} : vector<68x128xf32> to vector<68x64xf32>
    %59 = arith.truncf %58 : vector<68x64xf32> to vector<68x64xbf16>
    %60 = vector.extract_strided_slice %23 {offsets = [0, 64], sizes = [68, 64], strides = [1, 1]} : vector<68x128xf32> to vector<68x64xf32>
    %61 = arith.truncf %60 : vector<68x64xf32> to vector<68x64xbf16>
    %cst_29 = arith.constant dense<0.000000e+00> : vector<90x68xf32>
    %62 = tpu.matmul %57, %59, %cst_29 {dimension_numbers = #tpu.dot_dimension_numbers<[1], [1], [0], [0], [0, 0, 1, 0], [], []>} : vector<90x64xbf16>, vector<68x64xbf16>, vector<90x68xf32> -> vector<90x68xf32>
    %cst_30 = arith.constant dense<0xFF800000> : vector<90xf32>
    %63 = vector.multi_reduction <maximumf>, %62, %cst_30 [1] : vector<90x68xf32> to vector<90xf32>
    %64 = vector.shape_cast %63 : vector<90xf32> to vector<90x1xf32>
    %65 = vector.broadcast %64 : vector<90x1xf32> to vector<90x68xf32>
    %66 = arith.subf %62, %65 : vector<90x68xf32>
    %67 = math.exp %66 : vector<90x68xf32>
    %cst_31 = arith.constant dense<0.000000e+00> : vector<90xf32>
    %68 = vector.multi_reduction <add>, %67, %cst_31 [1] : vector<90x68xf32> to vector<90xf32>
    %69 = vector.shape_cast %68 : vector<90xf32> to vector<90x1xf32>
    %70 = tpu.reciprocal %69 {approx = true} : vector<90x1xf32> -> vector<90x1xf32>
    %71 = vector.broadcast %70 : vector<90x1xf32> to vector<90x68xf32>
    %72 = arith.mulf %67, %71 : vector<90x68xf32>
    %73 = arith.addf %46, %72 : vector<90x68xf32>
    %74 = arith.truncf %72 : vector<90x68xf32> to vector<90x68xbf16>
    %cst_32 = arith.constant dense<0.000000e+00> : vector<90x64xf32>
    %75 = tpu.matmul %74, %61, %cst_32 {dimension_numbers = #tpu.dot_dimension_numbers<[1], [0], [0], [1], [0, 0, 1, 1], [], []>} : vector<90x68xbf16>, vector<68x64xbf16>, vector<90x64xf32> -> vector<90x64xf32>
    %76 = arith.truncf %75 : vector<90x64xf32> to vector<90x64xbf16>
    %c64 = arith.constant 64 : index
    %c0_33 = arith.constant 0 : index
    %77 = vector.load %arg9[%c64, %c0_33] : memref<128x128xbf16, #tpu.memory_space<vmem>>, vector<64x128xbf16>
    %cst_34 = arith.constant dense<0.000000e+00> : vector<90x128xf32>
    %78 = tpu.matmul %76, %77, %cst_34 {dimension_numbers = #tpu.dot_dimension_numbers<[1], [0], [0], [1], [0, 0, 1, 1], [], []>} : vector<90x64xbf16>, vector<64x128xbf16>, vector<90x128xf32> -> vector<90x128xf32>
    %79 = arith.addf %53, %78 : vector<90x128xf32>
    %cst_35 = arith.constant 5.000000e-01 : f32
    %80 = vector.broadcast %cst_35 : f32 to vector<90x68xf32>
    %81 = arith.mulf %73, %80 : vector<90x68xf32>
    %cst_36 = arith.constant dense<0.000000e+00> : vector<1x68xf32>
    %82 = tpu.matmul %24, %5, %cst_36 {dimension_numbers = #tpu.dot_dimension_numbers<[1], [1], [0], [0], [0, 0, 1, 0], [], []>} : vector<1x128xf32>, vector<68x128xf32>, vector<1x68xf32> -> vector<1x68xf32>
    %cst_37 = arith.constant dense<0.000000e+00> : vector<1x90xf32>
    %83 = tpu.matmul %82, %81, %cst_37 {dimension_numbers = #tpu.dot_dimension_numbers<[1], [1], [0], [0], [0, 0, 1, 0], [], []>} : vector<1x68xf32>, vector<90x68xf32>, vector<1x90xf32> -> vector<1x90xf32>
    %cst_38 = arith.constant dense<0xFF800000> : vector<1xf32>
    %84 = vector.multi_reduction <maximumf>, %83, %cst_38 [1] : vector<1x90xf32> to vector<1xf32>
    %85 = vector.shape_cast %84 : vector<1xf32> to vector<1x1xf32>
    %86 = vector.broadcast %85 : vector<1x1xf32> to vector<1x90xf32>
    %87 = arith.subf %83, %86 : vector<1x90xf32>
    %88 = math.exp %87 : vector<1x90xf32>
    %cst_39 = arith.constant dense<0.000000e+00> : vector<1xf32>
    %89 = vector.multi_reduction <add>, %88, %cst_39 [1] : vector<1x90xf32> to vector<1xf32>
    %90 = vector.shape_cast %89 : vector<1xf32> to vector<1x1xf32>
    %91 = vector.broadcast %90 : vector<1x1xf32> to vector<1x90xf32>
    %92 = arith.divf %88, %91 : vector<1x90xf32>
    %c0_40 = arith.constant 0 : index
    %c0_41 = arith.constant 0 : index
    %93 = vector.load %arg12[%c0_40, %c0_41] : memref<1x128xf32, #tpu.memory_space<vmem>>, vector<1x128xf32>
    %cst_42 = arith.constant 0.000000e+00 : f32
    %94 = vector.broadcast %cst_42 : f32 to vector<68x90xf32>
    %95 = vector.extract_strided_slice %21 {offsets = [0, 0], sizes = [68, 64], strides = [1, 1]} : vector<68x128xf32> to vector<68x64xf32>
    %cst_43 = arith.constant 0.13130644 : f32
    %96 = vector.broadcast %cst_43 : f32 to vector<68x64xf32>
    %97 = arith.mulf %95, %96 : vector<68x64xf32>
    %98 = arith.truncf %97 : vector<68x64xf32> to vector<68x64xbf16>
    %99 = vector.extract_strided_slice %19 {offsets = [0, 0], sizes = [90, 64], strides = [1, 1]} : vector<90x128xf32> to vector<90x64xf32>
    %100 = arith.truncf %99 : vector<90x64xf32> to vector<90x64xbf16>
    %101 = vector.extract_strided_slice %20 {offsets = [0, 0], sizes = [90, 64], strides = [1, 1]} : vector<90x128xf32> to vector<90x64xf32>
    %102 = arith.truncf %101 : vector<90x64xf32> to vector<90x64xbf16>
    %cst_44 = arith.constant dense<0.000000e+00> : vector<68x90xf32>
    %103 = tpu.matmul %98, %100, %cst_44 {dimension_numbers = #tpu.dot_dimension_numbers<[1], [1], [0], [0], [0, 0, 1, 0], [], []>} : vector<68x64xbf16>, vector<90x64xbf16>, vector<68x90xf32> -> vector<68x90xf32>
    %cst_45 = arith.constant dense<0xFF800000> : vector<68xf32>
    %104 = vector.multi_reduction <maximumf>, %103, %cst_45 [1] : vector<68x90xf32> to vector<68xf32>
    %105 = vector.shape_cast %104 : vector<68xf32> to vector<68x1xf32>
    %106 = vector.broadcast %105 : vector<68x1xf32> to vector<68x90xf32>
    %107 = arith.subf %103, %106 : vector<68x90xf32>
    %108 = math.exp %107 : vector<68x90xf32>
    %cst_46 = arith.constant dense<0.000000e+00> : vector<68xf32>
    %109 = vector.multi_reduction <add>, %108, %cst_46 [1] : vector<68x90xf32> to vector<68xf32>
    %110 = vector.shape_cast %109 : vector<68xf32> to vector<68x1xf32>
    %111 = tpu.reciprocal %110 {approx = true} : vector<68x1xf32> -> vector<68x1xf32>
    %112 = vector.broadcast %111 : vector<68x1xf32> to vector<68x90xf32>
    %113 = arith.mulf %108, %112 : vector<68x90xf32>
    %114 = arith.addf %94, %113 : vector<68x90xf32>
    %115 = arith.truncf %113 : vector<68x90xf32> to vector<68x90xbf16>
    %cst_47 = arith.constant dense<0.000000e+00> : vector<68x64xf32>
    %116 = tpu.matmul %115, %102, %cst_47 {dimension_numbers = #tpu.dot_dimension_numbers<[1], [0], [0], [1], [0, 0, 1, 1], [], []>} : vector<68x90xbf16>, vector<90x64xbf16>, vector<68x64xf32> -> vector<68x64xf32>
    %117 = arith.truncf %116 : vector<68x64xf32> to vector<68x64xbf16>
    %c0_48 = arith.constant 0 : index
    %c0_49 = arith.constant 0 : index
    %118 = vector.load %arg11[%c0_48, %c0_49] : memref<128x128xbf16, #tpu.memory_space<vmem>>, vector<64x128xbf16>
    %cst_50 = arith.constant dense<0.000000e+00> : vector<68x128xf32>
    %119 = tpu.matmul %117, %118, %cst_50 {dimension_numbers = #tpu.dot_dimension_numbers<[1], [0], [0], [1], [0, 0, 1, 1], [], []>} : vector<68x64xbf16>, vector<64x128xbf16>, vector<68x128xf32> -> vector<68x128xf32>
    %120 = vector.broadcast %93 : vector<1x128xf32> to vector<68x128xf32>
    %121 = arith.addf %120, %119 : vector<68x128xf32>
    %122 = vector.extract_strided_slice %21 {offsets = [0, 64], sizes = [68, 64], strides = [1, 1]} : vector<68x128xf32> to vector<68x64xf32>
    %cst_51 = arith.constant 0.13130644 : f32
    %123 = vector.broadcast %cst_51 : f32 to vector<68x64xf32>
    %124 = arith.mulf %122, %123 : vector<68x64xf32>
    %125 = arith.truncf %124 : vector<68x64xf32> to vector<68x64xbf16>
    %126 = vector.extract_strided_slice %19 {offsets = [0, 64], sizes = [90, 64], strides = [1, 1]} : vector<90x128xf32> to vector<90x64xf32>
    %127 = arith.truncf %126 : vector<90x64xf32> to vector<90x64xbf16>
    %128 = vector.extract_strided_slice %20 {offsets = [0, 64], sizes = [90, 64], strides = [1, 1]} : vector<90x128xf32> to vector<90x64xf32>
    %129 = arith.truncf %128 : vector<90x64xf32> to vector<90x64xbf16>
    %cst_52 = arith.constant dense<0.000000e+00> : vector<68x90xf32>
    %130 = tpu.matmul %125, %127, %cst_52 {dimension_numbers = #tpu.dot_dimension_numbers<[1], [1], [0], [0], [0, 0, 1, 0], [], []>} : vector<68x64xbf16>, vector<90x64xbf16>, vector<68x90xf32> -> vector<68x90xf32>
    %cst_53 = arith.constant dense<0xFF800000> : vector<68xf32>
    %131 = vector.multi_reduction <maximumf>, %130, %cst_53 [1] : vector<68x90xf32> to vector<68xf32>
    %132 = vector.shape_cast %131 : vector<68xf32> to vector<68x1xf32>
    %133 = vector.broadcast %132 : vector<68x1xf32> to vector<68x90xf32>
    %134 = arith.subf %130, %133 : vector<68x90xf32>
    %135 = math.exp %134 : vector<68x90xf32>
    %cst_54 = arith.constant dense<0.000000e+00> : vector<68xf32>
    %136 = vector.multi_reduction <add>, %135, %cst_54 [1] : vector<68x90xf32> to vector<68xf32>
    %137 = vector.shape_cast %136 : vector<68xf32> to vector<68x1xf32>
    %138 = tpu.reciprocal %137 {approx = true} : vector<68x1xf32> -> vector<68x1xf32>
    %139 = vector.broadcast %138 : vector<68x1xf32> to vector<68x90xf32>
    %140 = arith.mulf %135, %139 : vector<68x90xf32>
    %141 = arith.addf %114, %140 : vector<68x90xf32>
    %142 = arith.truncf %140 : vector<68x90xf32> to vector<68x90xbf16>
    %cst_55 = arith.constant dense<0.000000e+00> : vector<68x64xf32>
    %143 = tpu.matmul %142, %129, %cst_55 {dimension_numbers = #tpu.dot_dimension_numbers<[1], [0], [0], [1], [0, 0, 1, 1], [], []>} : vector<68x90xbf16>, vector<90x64xbf16>, vector<68x64xf32> -> vector<68x64xf32>
    %144 = arith.truncf %143 : vector<68x64xf32> to vector<68x64xbf16>
    %c64_56 = arith.constant 64 : index
    %c0_57 = arith.constant 0 : index
    %145 = vector.load %arg11[%c64_56, %c0_57] : memref<128x128xbf16, #tpu.memory_space<vmem>>, vector<64x128xbf16>
    %cst_58 = arith.constant dense<0.000000e+00> : vector<68x128xf32>
    %146 = tpu.matmul %144, %145, %cst_58 {dimension_numbers = #tpu.dot_dimension_numbers<[1], [0], [0], [1], [0, 0, 1, 1], [], []>} : vector<68x64xbf16>, vector<64x128xbf16>, vector<68x128xf32> -> vector<68x128xf32>
    %147 = arith.addf %121, %146 : vector<68x128xf32>
    %cst_59 = arith.constant 5.000000e-01 : f32
    %148 = vector.broadcast %cst_59 : f32 to vector<68x90xf32>
    %149 = arith.mulf %141, %148 : vector<68x90xf32>
    %cst_60 = arith.constant dense<0.000000e+00> : vector<1x90xf32>
    %150 = tpu.matmul %24, %3, %cst_60 {dimension_numbers = #tpu.dot_dimension_numbers<[1], [1], [0], [0], [0, 0, 1, 0], [], []>} : vector<1x128xf32>, vector<90x128xf32>, vector<1x90xf32> -> vector<1x90xf32>
    %cst_61 = arith.constant dense<0.000000e+00> : vector<1x68xf32>
    %151 = tpu.matmul %150, %149, %cst_61 {dimension_numbers = #tpu.dot_dimension_numbers<[1], [1], [0], [0], [0, 0, 1, 0], [], []>} : vector<1x90xf32>, vector<68x90xf32>, vector<1x68xf32> -> vector<1x68xf32>
    %cst_62 = arith.constant dense<0xFF800000> : vector<1xf32>
    %152 = vector.multi_reduction <maximumf>, %151, %cst_62 [1] : vector<1x68xf32> to vector<1xf32>
    %153 = vector.shape_cast %152 : vector<1xf32> to vector<1x1xf32>
    %154 = vector.broadcast %153 : vector<1x1xf32> to vector<1x68xf32>
    %155 = arith.subf %151, %154 : vector<1x68xf32>
    %156 = math.exp %155 : vector<1x68xf32>
    %cst_63 = arith.constant dense<0.000000e+00> : vector<1xf32>
    %157 = vector.multi_reduction <add>, %156, %cst_63 [1] : vector<1x68xf32> to vector<1xf32>
    %158 = vector.shape_cast %157 : vector<1xf32> to vector<1x1xf32>
    %159 = vector.broadcast %158 : vector<1x1xf32> to vector<1x68xf32>
    %160 = arith.divf %156, %159 : vector<1x68xf32>
    %cst_64 = arith.constant 0.000000e+00 : f32
    %161 = vector.broadcast %cst_64 : f32 to vector<1x98xf32>
    %162 = tpu.concatenate %92, %160, %161 in 1 : vector<1x90xf32>, vector<1x68xf32>, vector<1x98xf32> -> vector<1x256xf32>
    %c0_65 = arith.constant 0 : index
    %c0_66 = arith.constant 0 : index
    %c0_67 = arith.constant 0 : index
    %163 = vector.load %arg16[%c0_65, %c0_66, %c0_67] : memref<1x1x256xf32, #tpu.memory_space<vmem>>, vector<1x1x256xf32>
    %164 = vector.shape_cast %163 : vector<1x1x256xf32> to vector<1x256xf32>
    %165 = vector.shape_cast %162 : vector<1x256xf32> to vector<1x1x256xf32>
    tpu.vector_store %arg16[%c0_65, %c0_66, %c0_67], %165 {strides = array<i32>} : memref<1x1x256xf32, #tpu.memory_space<vmem>>, vector<1x1x256xf32>,
    %c0_68 = arith.constant 0 : index
    %c0_69 = arith.constant 0 : index
    %166 = vector.load %arg13[%c0_68, %c0_69] : memref<1x128xf32, #tpu.memory_space<vmem>>, vector<1x128xf32>
    %c0_70 = arith.constant 0 : index
    %c0_71 = arith.constant 0 : index
    %167 = vector.load %arg14[%c0_70, %c0_71] : memref<1x128xf32, #tpu.memory_space<vmem>>, vector<1x128xf32>
    %168 = tpu.iota {dimensions = array<i32: 1>} : vector<1x128xi32>
    %c116_i32 = arith.constant 116 : i32
    %169 = vector.broadcast %c116_i32 : i32 to vector<1x128xi32>
    %170 = arith.cmpi slt, %168, %169 : vector<1x128xi32>
    %171 = arith.extui %170 : vector<1x128xi1> to vector<1x128xi32>
    %172 = arith.sitofp %171 : vector<1x128xi32> to vector<1x128xf32>
    %cst_72 = arith.constant dense<0.000000e+00> : vector<90xf32>
    %173 = vector.multi_reduction <add>, %79, %cst_72 [1] : vector<90x128xf32> to vector<90xf32>
    %174 = vector.shape_cast %173 : vector<90xf32> to vector<90x1xf32>
    %cst_73 = arith.constant 8.620690e-03 : f32
    %175 = vector.broadcast %cst_73 : f32 to vector<90x1xf32>
    %176 = arith.mulf %174, %175 : vector<90x1xf32>
    %177 = vector.broadcast %176 : vector<90x1xf32> to vector<90x128xf32>
    %178 = arith.subf %79, %177 : vector<90x128xf32>
    %179 = vector.broadcast %172 : vector<1x128xf32> to vector<90x128xf32>
    %180 = arith.mulf %178, %179 : vector<90x128xf32>
    %181 = arith.mulf %180, %180 : vector<90x128xf32>
    %cst_74 = arith.constant dense<0.000000e+00> : vector<90xf32>
    %182 = vector.multi_reduction <add>, %181, %cst_74 [1] : vector<90x128xf32> to vector<90xf32>
    %183 = vector.shape_cast %182 : vector<90xf32> to vector<90x1xf32>
    %cst_75 = arith.constant 8.620690e-03 : f32
    %184 = vector.broadcast %cst_75 : f32 to vector<90x1xf32>
    %185 = arith.mulf %183, %184 : vector<90x1xf32>
    %cst_76 = arith.constant 9.99999974E-6 : f32
    %186 = vector.broadcast %cst_76 : f32 to vector<90x1xf32>
    %187 = arith.addf %185, %186 : vector<90x1xf32>
    %188 = math.rsqrt %187 : vector<90x1xf32>
    %189 = vector.broadcast %188 : vector<90x1xf32> to vector<90x128xf32>
    %190 = arith.mulf %180, %189 : vector<90x128xf32>
    %191 = vector.broadcast %166 : vector<1x128xf32> to vector<90x128xf32>
    %192 = arith.mulf %190, %191 : vector<90x128xf32>
    %193 = vector.broadcast %167 : vector<1x128xf32> to vector<90x128xf32>
    %194 = arith.addf %192, %193 : vector<90x128xf32>
    %cst_77 = arith.constant dense<0.000000e+00> : vector<68xf32>
    %195 = vector.multi_reduction <add>, %147, %cst_77 [1] : vector<68x128xf32> to vector<68xf32>
    %196 = vector.shape_cast %195 : vector<68xf32> to vector<68x1xf32>
    %cst_78 = arith.constant 8.620690e-03 : f32
    %197 = vector.broadcast %cst_78 : f32 to vector<68x1xf32>
    %198 = arith.mulf %196, %197 : vector<68x1xf32>
    %199 = vector.broadcast %198 : vector<68x1xf32> to vector<68x128xf32>
    %200 = arith.subf %147, %199 : vector<68x128xf32>
    %201 = vector.broadcast %172 : vector<1x128xf32> to vector<68x128xf32>
    %202 = arith.mulf %200, %201 : vector<68x128xf32>
    %203 = arith.mulf %202, %202 : vector<68x128xf32>
    %cst_79 = arith.constant dense<0.000000e+00> : vector<68xf32>
    %204 = vector.multi_reduction <add>, %203, %cst_79 [1] : vector<68x128xf32> to vector<68xf32>
    %205 = vector.shape_cast %204 : vector<68xf32> to vector<68x1xf32>
    %cst_80 = arith.constant 8.620690e-03 : f32
    %206 = vector.broadcast %cst_80 : f32 to vector<68x1xf32>
    %207 = arith.mulf %205, %206 : vector<68x1xf32>
    %cst_81 = arith.constant 9.99999974E-6 : f32
    %208 = vector.broadcast %cst_81 : f32 to vector<68x1xf32>
    %209 = arith.addf %207, %208 : vector<68x1xf32>
    %210 = math.rsqrt %209 : vector<68x1xf32>
    %211 = vector.broadcast %210 : vector<68x1xf32> to vector<68x128xf32>
    %212 = arith.mulf %202, %211 : vector<68x128xf32>
    %213 = vector.broadcast %166 : vector<1x128xf32> to vector<68x128xf32>
    %214 = arith.mulf %212, %213 : vector<68x128xf32>
    %215 = vector.broadcast %167 : vector<1x128xf32> to vector<68x128xf32>
    %216 = arith.addf %214, %215 : vector<68x128xf32>
    %217 = vector.extract_strided_slice %194 {offsets = [0, 0], sizes = [68, 128], strides = [1, 1]} : vector<90x128xf32> to vector<68x128xf32>
    %218 = arith.addf %5, %217 : vector<68x128xf32>
    %219 = vector.extract_strided_slice %3 {offsets = [0, 0], sizes = [22, 128], strides = [1, 1]} : vector<90x128xf32> to vector<22x128xf32>
    %220 = vector.extract_strided_slice %194 {offsets = [68, 0], sizes = [22, 128], strides = [1, 1]} : vector<90x128xf32> to vector<22x128xf32>
    %221 = arith.addf %219, %220 : vector<22x128xf32>
    %222 = vector.extract_strided_slice %3 {offsets = [22, 0], sizes = [68, 128], strides = [1, 1]} : vector<90x128xf32> to vector<68x128xf32>
    %223 = arith.addf %222, %216 : vector<68x128xf32>
    %c0_82 = arith.constant 0 : index
    %c0_83 = arith.constant 0 : index
    %224 = vector.load %arg15[%c0_82, %c0_83] : memref<8x128xbf16, #tpu.memory_space<vmem>>, vector<8x128xbf16>
    %225 = arith.truncf %218 : vector<68x128xf32> to vector<68x128xbf16>
    %cst_84 = arith.constant dense<0.000000e+00> : vector<8x68xf32>
    %226 = tpu.matmul %224, %225, %cst_84 {dimension_numbers = #tpu.dot_dimension_numbers<[1], [1], [0], [0], [0, 0, 1, 0], [], []>} : vector<8x128xbf16>, vector<68x128xbf16>, vector<8x68xf32> -> vector<8x68xf32>
    %227 = arith.truncf %221 : vector<22x128xf32> to vector<22x128xbf16>
    %cst_85 = arith.constant dense<0.000000e+00> : vector<8x22xf32>
    %228 = tpu.matmul %224, %227, %cst_85 {dimension_numbers = #tpu.dot_dimension_numbers<[1], [1], [0], [0], [0, 0, 1, 0], [], []>} : vector<8x128xbf16>, vector<22x128xbf16>, vector<8x22xf32> -> vector<8x22xf32>
    %229 = arith.truncf %223 : vector<68x128xf32> to vector<68x128xbf16>
    %cst_86 = arith.constant dense<0.000000e+00> : vector<8x68xf32>
    %230 = tpu.matmul %224, %229, %cst_86 {dimension_numbers = #tpu.dot_dimension_numbers<[1], [1], [0], [0], [0, 0, 1, 0], [], []>} : vector<8x128xbf16>, vector<68x128xbf16>, vector<8x68xf32> -> vector<8x68xf32>
    %231 = tpu.concatenate %226, %228, %230 in 1 : vector<8x68xf32>, vector<8x22xf32>, vector<8x68xf32> -> vector<8x158xf32>
    %232 = arith.truncf %231 : vector<8x158xf32> to vector<8x158xbf16>
    %c0_87 = arith.constant 0 : index
    %c0_88 = arith.constant 0 : index
    %c0_89 = arith.constant 0 : index
    %233 = vector.load %arg3[%c0_87, %c0_88, %c0_89] : memref<1x158x158xbf16, #tpu.memory_space<vmem>>, vector<1x158x158xbf16>
    %234 = vector.shape_cast %233 : vector<1x158x158xbf16> to vector<158x158xbf16>
    %cst_90 = arith.constant dense<0.000000e+00> : vector<8x158xf32>
    %235 = tpu.matmul %232, %234, %cst_90 {dimension_numbers = #tpu.dot_dimension_numbers<[1], [0], [0], [1], [0, 0, 1, 1], [], []>} : vector<8x158xbf16>, vector<158x158xbf16>, vector<8x158xf32> -> vector<8x158xf32>
    %cst_91 = arith.constant 0.000000e+00 : f32
    %236 = vector.broadcast %cst_91 : f32 to vector<8x158xf32>
    %237 = arith.maximumf %235, %236 : vector<8x158xf32>
    %c0_92 = arith.constant 0 : index
    %c0_93 = arith.constant 0 : index
    %c0_94 = arith.constant 0 : index
    %238 = vector.load %arg17[%c0_92, %c0_93, %c0_94] : memref<1x8x158xf32, #tpu.memory_space<vmem>>, vector<1x8x158xf32>
    %239 = vector.shape_cast %238 : vector<1x8x158xf32> to vector<8x158xf32>
    %240 = vector.shape_cast %237 : vector<8x158xf32> to vector<1x8x158xf32>
    tpu.vector_store %arg17[%c0_92, %c0_93, %c0_94], %240 {strides = array<i32>} : memref<1x8x158xf32, #tpu.memory_space<vmem>>, vector<1x8x158xf32>,
    return
  }
  func.func @transform_0(%arg0: i32) -> (i32, i32, i32) {
    %c0_i32 = arith.constant 0 : i32
    %c0_i32_0 = arith.constant 0 : i32
    %c0_i32_1 = arith.constant 0 : i32
    return %arg0, %c0_i32, %c0_i32_0 : i32, i32, i32
  }
  func.func @transform_1(%arg0: i32) -> (i32, i32, i32) {
    %c0_i32 = arith.constant 0 : i32
    %c0_i32_0 = arith.constant 0 : i32
    %c0_i32_1 = arith.constant 0 : i32
    return %arg0, %c0_i32, %c0_i32_0 : i32, i32, i32
  }
  func.func @transform_2(%arg0: i32) -> (i32, i32, i32) {
    %c0_i32 = arith.constant 0 : i32
    %c0_i32_0 = arith.constant 0 : i32
    %c0_i32_1 = arith.constant 0 : i32
    return %arg0, %c0_i32, %c0_i32_0 : i32, i32, i32
  }
  func.func @transform_3(%arg0: i32) -> (i32, i32) {
    %c0_i32 = arith.constant 0 : i32
    %c0_i32_0 = arith.constant 0 : i32
    %c0_i32_1 = arith.constant 0 : i32
    return %c0_i32, %c0_i32_0 : i32, i32
  }
  func.func @transform_4(%arg0: i32) -> (i32, i32) {
    %c0_i32 = arith.constant 0 : i32
    %c0_i32_0 = arith.constant 0 : i32
    %c0_i32_1 = arith.constant 0 : i32
    return %c0_i32, %c0_i32_0 : i32, i32
  }
  func.func @transform_5(%arg0: i32) -> (i32, i32) {
    %c0_i32 = arith.constant 0 : i32
    %c0_i32_0 = arith.constant 0 : i32
    %c0_i32_1 = arith.constant 0 : i32
    return %c0_i32, %c0_i32_0 : i32, i32
  }
  func.func @transform_6(%arg0: i32) -> (i32, i32) {
    %c0_i32 = arith.constant 0 : i32
    %c0_i32_0 = arith.constant 0 : i32
    %c0_i32_1 = arith.constant 0 : i32
    return %c0_i32, %c0_i32_0 : i32, i32
  }
  func.func @transform_7(%arg0: i32) -> (i32, i32) {
    %c0_i32 = arith.constant 0 : i32
    %c0_i32_0 = arith.constant 0 : i32
    %c0_i32_1 = arith.constant 0 : i32
    return %c0_i32, %c0_i32_0 : i32, i32
  }
  func.func @transform_8(%arg0: i32) -> (i32, i32) {
    %c0_i32 = arith.constant 0 : i32
    %c0_i32_0 = arith.constant 0 : i32
    %c0_i32_1 = arith.constant 0 : i32
    return %c0_i32, %c0_i32_0 : i32, i32
  }
  func.func @transform_9(%arg0: i32) -> (i32, i32) {
    %c0_i32 = arith.constant 0 : i32
    %c0_i32_0 = arith.constant 0 : i32
    %c0_i32_1 = arith.constant 0 : i32
    return %c0_i32, %c0_i32_0 : i32, i32
  }
  func.func @transform_10(%arg0: i32) -> (i32, i32) {
    %c0_i32 = arith.constant 0 : i32
    %c0_i32_0 = arith.constant 0 : i32
    %c0_i32_1 = arith.constant 0 : i32
    return %c0_i32, %c0_i32_0 : i32, i32
  }
  func.func @transform_11(%arg0: i32) -> (i32, i32) {
    %c0_i32 = arith.constant 0 : i32
    %c0_i32_0 = arith.constant 0 : i32
    %c0_i32_1 = arith.constant 0 : i32
    return %c0_i32, %c0_i32_0 : i32, i32
  }
  func.func @transform_12(%arg0: i32) -> (i32, i32) {
    %c0_i32 = arith.constant 0 : i32
    %c0_i32_0 = arith.constant 0 : i32
    %c0_i32_1 = arith.constant 0 : i32
    return %c0_i32, %c0_i32_0 : i32, i32
  }
  func.func @transform_13(%arg0: i32) -> (i32, i32) {
    %c0_i32 = arith.constant 0 : i32
    %c0_i32_0 = arith.constant 0 : i32
    %c0_i32_1 = arith.constant 0 : i32
    return %c0_i32, %c0_i32_0 : i32, i32
  }
  func.func @transform_14(%arg0: i32) -> (i32, i32) {
    %c0_i32 = arith.constant 0 : i32
    %c0_i32_0 = arith.constant 0 : i32
    %c0_i32_1 = arith.constant 0 : i32
    return %c0_i32, %c0_i32_0 : i32, i32
  }
  func.func @transform_15(%arg0: i32) -> (i32, i32, i32) {
    %c0_i32 = arith.constant 0 : i32
    %c0_i32_0 = arith.constant 0 : i32
    %c0_i32_1 = arith.constant 0 : i32
    return %arg0, %c0_i32, %c0_i32_0 : i32, i32, i32
  }
  func.func @transform_16(%arg0: i32) -> (i32, i32, i32) {
    %c0_i32 = arith.constant 0 : i32
    %c0_i32_0 = arith.constant 0 : i32
    %c0_i32_1 = arith.constant 0 : i32
    return %arg0, %c0_i32, %c0_i32_0 : i32, i32, i32
  }
}

module attributes {stable_mosaic.version = 11 : i64} {
  func.func @_fc_head_kernel(%arg0: memref<2x1264xf32, #tpu.memory_space<vmem>>, %arg1: memref<1264x640xbf16, #tpu.memory_space<vmem>>, %arg2: memref<1x640xf32, #tpu.memory_space<vmem>>, %arg3: memref<640x384xbf16, #tpu.memory_space<vmem>>, %arg4: memref<1x384xf32, #tpu.memory_space<vmem>>, %arg5: memref<384x128xbf16, #tpu.memory_space<vmem>>, %arg6: memref<1x128xf32, #tpu.memory_space<vmem>>, %arg7: memref<2x128xf32, #tpu.memory_space<vmem>>) attributes {dimension_semantics = [], scalar_prefetch = 0 : i64, scratch_operands = 0 : i64, tpu.core_type = #tpu.core_type<tc>} {
    %c0 = arith.constant 0 : index
    %c0_0 = arith.constant 0 : index
    %0 = vector.load %arg0[%c0, %c0_0] : memref<2x1264xf32, #tpu.memory_space<vmem>>, vector<2x1264xf32>
    %1 = arith.truncf %0 : vector<2x1264xf32> to vector<2x1264xbf16>
    %c0_1 = arith.constant 0 : index
    %c0_2 = arith.constant 0 : index
    %2 = vector.load %arg1[%c0_1, %c0_2] : memref<1264x640xbf16, #tpu.memory_space<vmem>>, vector<1264x640xbf16>
    %cst = arith.constant dense<0.000000e+00> : vector<2x640xf32>
    %3 = tpu.matmul %1, %2, %cst {dimension_numbers = #tpu.dot_dimension_numbers<[1], [0], [0], [1], [0, 0, 1, 1], [], []>} : vector<2x1264xbf16>, vector<1264x640xbf16>, vector<2x640xf32> -> vector<2x640xf32>
    %c0_3 = arith.constant 0 : index
    %c0_4 = arith.constant 0 : index
    %4 = vector.load %arg2[%c0_3, %c0_4] : memref<1x640xf32, #tpu.memory_space<vmem>>, vector<1x640xf32>
    %5 = vector.broadcast %4 : vector<1x640xf32> to vector<2x640xf32>
    %6 = arith.addf %3, %5 : vector<2x640xf32>
    %cst_5 = arith.constant 0.000000e+00 : f32
    %7 = vector.broadcast %cst_5 : f32 to vector<2x640xf32>
    %8 = arith.maximumf %6, %7 : vector<2x640xf32>
    %9 = arith.truncf %8 : vector<2x640xf32> to vector<2x640xbf16>
    %c0_6 = arith.constant 0 : index
    %c0_7 = arith.constant 0 : index
    %10 = vector.load %arg3[%c0_6, %c0_7] : memref<640x384xbf16, #tpu.memory_space<vmem>>, vector<640x384xbf16>
    %cst_8 = arith.constant dense<0.000000e+00> : vector<2x384xf32>
    %11 = tpu.matmul %9, %10, %cst_8 {dimension_numbers = #tpu.dot_dimension_numbers<[1], [0], [0], [1], [0, 0, 1, 1], [], []>} : vector<2x640xbf16>, vector<640x384xbf16>, vector<2x384xf32> -> vector<2x384xf32>
    %c0_9 = arith.constant 0 : index
    %c0_10 = arith.constant 0 : index
    %12 = vector.load %arg4[%c0_9, %c0_10] : memref<1x384xf32, #tpu.memory_space<vmem>>, vector<1x384xf32>
    %13 = vector.broadcast %12 : vector<1x384xf32> to vector<2x384xf32>
    %14 = arith.addf %11, %13 : vector<2x384xf32>
    %cst_11 = arith.constant 0.000000e+00 : f32
    %15 = vector.broadcast %cst_11 : f32 to vector<2x384xf32>
    %16 = arith.maximumf %14, %15 : vector<2x384xf32>
    %17 = arith.truncf %16 : vector<2x384xf32> to vector<2x384xbf16>
    %c0_12 = arith.constant 0 : index
    %c0_13 = arith.constant 0 : index
    %18 = vector.load %arg5[%c0_12, %c0_13] : memref<384x128xbf16, #tpu.memory_space<vmem>>, vector<384x128xbf16>
    %cst_14 = arith.constant dense<0.000000e+00> : vector<2x128xf32>
    %19 = tpu.matmul %17, %18, %cst_14 {dimension_numbers = #tpu.dot_dimension_numbers<[1], [0], [0], [1], [0, 0, 1, 1], [], []>} : vector<2x384xbf16>, vector<384x128xbf16>, vector<2x128xf32> -> vector<2x128xf32>
    %c0_15 = arith.constant 0 : index
    %c0_16 = arith.constant 0 : index
    %20 = vector.load %arg6[%c0_15, %c0_16] : memref<1x128xf32, #tpu.memory_space<vmem>>, vector<1x128xf32>
    %21 = vector.broadcast %20 : vector<1x128xf32> to vector<2x128xf32>
    %22 = arith.addf %19, %21 : vector<2x128xf32>
    %c0_17 = arith.constant 0 : index
    %c0_18 = arith.constant 0 : index
    %23 = vector.load %arg7[%c0_17, %c0_18] : memref<2x128xf32, #tpu.memory_space<vmem>>, vector<2x128xf32>
    tpu.vector_store %arg7[%c0_17, %c0_18], %22 {strides = array<i32>} : memref<2x128xf32, #tpu.memory_space<vmem>>, vector<2x128xf32>,
    return
  }
}

</mosaic_0001>

<bundles_post_ra>
// kernel: mca_gcn_forward.2
= control target key start
LH: loop header
LB: loop body
LE: loop exit
PB: predicated region body
PF: predicated region fallthrough
CT: control target
= control target key end

     0   :  { %s8926_s0 = inlined_call_operand.vmem [shape: f32[2,90,128], index: 0, kind: input, shape index: {}]   ;;  %s8927_s1 = inlined_call_operand.vmem [shape: f32[2,68,128], index: 1, kind: input, shape index: {}]   ;;  %s8928_s2 = inlined_call_operand.vmem [shape: bf16[2,158,158], index: 2, kind: input, shape index: {}]   ;;  %s8929_s3 = inlined_call_operand.hbm [shape: f32[90,128], index: 3, kind: input, shape index: {}]   ;;  %s8930_s4 = inlined_call_operand.hbm [shape: bf16[128,384], index: 4, kind: input, shape index: {}]   ;;  %s8931_s5 = inlined_call_operand.hbm [shape: f32[1,384], index: 5, kind: input, shape index: {}]   ;;  %s8932_s6 = inlined_call_operand.hbm [shape: bf16[128,384], index: 6, kind: input, shape index: {}]   ;;  %s8933_s7 = inlined_call_operand.hbm [shape: f32[1,384], index: 7, kind: input, shape index: {}]   ;;  %s8934_s8 = inlined_call_operand.hbm [shape: bf16[128,128], index: 8, kind: input, shape index: {}]   ;;  %s8935_s9 = inlined_call_operand.hbm [shape: f32[1,128], index: 9, kind: input, shape index: {}]   ;;  %s8936_s10 = inlined_call_operand.hbm [shape: bf16[128,128], index: 10, kind: input, shape index: {}]   ;;  %s8937_s11 = inlined_call_operand.hbm [shape: f32[1,128], index: 11, kind: input, shape index: {}]   ;;  %s8938_s12 = inlined_call_operand.hbm [shape: f32[1,128], index: 12, kind: input, shape index: {}]   ;;  %s8939_s13 = inlined_call_operand.hbm [shape: f32[1,128], index: 13, kind: input, shape index: {}]   ;;  %s8940_s14 = inlined_call_operand.hbm [shape: bf16[8,128], index: 14, kind: input, shape index: {}]   ;;  %s8941_s15 = inlined_call_operand.vmem [shape: f32[2,1,256], index: 15, kind: output, shape index: {0}]   ;;  %s8942_s16 = inlined_call_operand.vmem [shape: f32[2,8,158], index: 16, kind: output, shape index: {1}]  }
   0x1   :  { %8980 = sst [smem:[#allocation55_spill]] %s8926_s0 }
   0x2   :  { %8981 = sst [smem:[#allocation56_spill]] %s8928_s2 }
   0x3   :  { %8982 = sst [smem:[#allocation57_spill]] %s8930_s4 }
   0x4   :  { %8983 = sst [smem:[#allocation58_spill]] %s8932_s6 }
   0x5   :  { %8984 = sst [smem:[#allocation59_spill]] %s8941_s15 }
   0x6   :  { %8985 = sst [smem:[#allocation60_spill]] %s8942_s16 }
   0x7   :  { %22 = vsyncpa [#allocation3], 0 }
   0x8   :  { %23 = vsyncpa [#allocation5], 0 }
   0x9   :  { %24 = vsyncpa [#allocation8], 0 }
   0xa   :  { %25 = vsyncpa [#allocation11], 0 }
   0xb   :  { %26 = vsyncpa [#allocation14], 0 }
   0xc   :  { %27 = vsyncpa [#allocation17], 0 }
   0xd   :  { %28 = vsyncpa [#allocation20], 0  ;;  %s6991_s21 = smov 0  }
   0xe LB: > { %8986 = sst [smem:[#allocation28_spill]] %s6877_s21  ;;  %s6879_s22 = smov [#allocation4]   ;;  %s6877_s21 = sphi %s6991_s21, %s34_s21  }
   0xf   : > { %s446_s23 = sshll.u32 %s6879_s22, 4  ;;  %s6997_s24 = sadd.s32 4294967295, %s6877_s21   ;;  %s7002_s23 = int_to_ptr.vmem [resolvable:$true] %s446_s23 }
  0x10   : > { %p4949_p0 = scmp.ge.s32.totalorder %s6877_s21, 1  ;;  %p421_p1 = scmp.lt.s32.totalorder %s6877_s21, 3 }
  0x11   : > { %p8944_p2 = scmp.eq.s32.totalorder %s6997_s24, 0  ;;  %s6880_s26 = smov [#allocation7]  }
  0x12   : > { %p7004_p3 = pnand %p4949_p0, %p421_p1  ;;  %s470_s27 = sshll.u32 %s6880_s26, 4  ;;  %s7010_s27 = int_to_ptr.vmem [resolvable:$true] %s470_s27 }
  0x13   : > { %s6881_s29 = smov [#allocation10]   ;;  %s8989_s4 = sld [smem:[#allocation57_spill]] }
  0x14   : > { %s8987_s25 = scalar_select %p7004_p3, 1, 0 }
  0x15   : > { %p6073_p4 = pneg %p7004_p3  ;;  %s494_s30 = sshll.u32 %s6881_s29, 4  ;;  %s7018_s30 = int_to_ptr.vmem [resolvable:$true] %s494_s30 }
  0x17   : > { %p7014_p5 = pnand %p8944_p2, %p6073_p4 }
  0x19   : > { %s6507_s18 = scalar_lea.hbm %s8989_s4, 3072  ;;  %p7028_p7 = pneg %p7014_p5 }
  0x1a   : > { %p6508_p6 = scmp.ne.s32.totalorder %s8989_s4, %s6507_s18  ;;  %p6514_p10 = scmp.lt.u32.totalorder %s6507_s18, %s8989_s4 }
  0x1c   : > { %p6510_p8 = pnand %p7028_p7, %p6508_p6 }
  0x1e   : > { %p6511_p9 = pneg %p6510_p8 }
  0x20   : > { %p6516_p11 = pnand %p6514_p10, %p6511_p9 }
  0x22   : > { %6519 = shalt.err (!%p6516_p11)
}
  0x23   : > { %s6520_s0 = scalar_lea.vmem %s7002_s23, 3072  ;;  %p6528_p1 = scmp.lt.s32.totalorder %s7002_s23, %s7002_s23 }
  0x24   : > { %p6521_p12 = scmp.ne.s32.totalorder %s7002_s23, %s6520_s0  ;;  %p6529_p4 = scmp.lt.s32.totalorder %s6520_s0, %s6520_s0 }
  0x26   : > { %p6523_p13 = pnand %p6521_p12, %p7028_p7  ;;  %p6530_p6 = por %p6529_p4, %p6528_p1 }
  0x28   : > { %p6524_p0 = pneg %p6523_p13 }
  0x2a   : > { %p6531_p8 = pnand %p6530_p6, %p6524_p0 }
  0x2c   : > { %6534 = shalt.err (!%p6531_p8)
}
  0x2d   : > { %s6882_s17 = smov 192   ;;  %s6883_s18 = smov 12  }
  0x2e   : > { %6079 = dma.hbm_to_vmem [thread:$0]  (!%p7014_p5), %s8989_s4, 3072, %s7002_s23, [#allocation5], %s6882_s17, %s6882_s17, %s6883_s18  }
  0x2f   : > { %s8991_s6 = sld [smem:[#allocation58_spill]] }
  0x35   : > { %s6535_s21 = scalar_lea.hbm %s8991_s6, 3072 }
  0x36   : > { %p6536_p9 = scmp.ne.s32.totalorder %s8991_s6, %s6535_s21  ;;  %p6542_p12 = scmp.lt.u32.totalorder %s6535_s21, %s8991_s6 }
  0x38   : > { %p6538_p10 = pnand %p6536_p9, %p7028_p7 }
  0x3a   : > { %p6539_p11 = pneg %p6538_p10 }
  0x3c   : > { %p6544_p13 = pnand %p6542_p12, %p6539_p11 }
  0x3e   : > { %6547 = shalt.err (!%p6544_p13)
}
  0x3f   : > { %s6548_s23 = scalar_lea.vmem %s7010_s27, 3072  ;;  %p6556_p6 = scmp.lt.s32.totalorder %s7010_s27, %s7010_s27 }
  0x40   : > { %p6549_p0 = scmp.ne.s32.totalorder %s7010_s27, %s6548_s23  ;;  %p6557_p8 = scmp.lt.s32.totalorder %s6548_s23, %s6548_s23 }
  0x42   : > { %p6551_p1 = pnand %p6549_p0, %p7028_p7  ;;  %p6558_p9 = por %p6557_p8, %p6556_p6 }
  0x44   : > { %p6552_p4 = pneg %p6551_p1 }
  0x46   : > { %p6559_p10 = pnand %p6558_p9, %p6552_p4 }
  0x48   : > { %6562 = shalt.err (!%p6559_p10)
}
  0x49   : > { %6085 = dma.hbm_to_vmem [thread:$0]  (!%p7014_p5), %s8991_s6, 3072, %s7010_s27, [#allocation8], %s6882_s17, %s6882_s17, %s6883_s18  }
  0x4a   : > { %s6563_s19 = scalar_lea.hbm %s8934_s8, 1024 }
  0x4b   : > { %p6564_p11 = scmp.ne.s32.totalorder %s8934_s8, %s6563_s19  ;;  %p6570_p0 = scmp.lt.u32.totalorder %s6563_s19, %s8934_s8 }
  0x4d   : > { %p6566_p12 = pnand %p6564_p11, %p7028_p7 }
  0x4f   : > { %p6567_p13 = pneg %p6566_p12 }
  0x51   : > { %p6572_p1 = pnand %p6570_p0, %p6567_p13 }
  0x53   : > { %6575 = shalt.err (!%p6572_p1)
}
  0x54   : > { %s6576_s27 = scalar_lea.vmem %s7018_s30, 1024  ;;  %p6584_p9 = scmp.lt.s32.totalorder %s7018_s30, %s7018_s30 }
  0x55   : > { %p6577_p4 = scmp.ne.s32.totalorder %s7018_s30, %s6576_s27  ;;  %p6585_p10 = scmp.lt.s32.totalorder %s6576_s27, %s6576_s27 }
  0x57   : > { %p6579_p6 = pnand %p6577_p4, %p7028_p7  ;;  %p6586_p11 = por %p6585_p10, %p6584_p9 }
  0x59   : > { %p6580_p8 = pneg %p6579_p6 }
  0x5b   : > { %p6587_p12 = pnand %p6586_p11, %p6580_p8 }
  0x5d   : > { %6590 = shalt.err (!%p6587_p12)
}
  0x5e   : > { %s6884_s17 = smov 64   ;;  %s6885_s18 = smov 4  }
  0x5f   : > { %6091 = dma.hbm_to_vmem [thread:$0]  (!%p7014_p5), %s8934_s8, 1024, %s7018_s30, [#allocation11], %s6884_s17, %s6884_s17, %s6885_s18  }
  0x60   : > { %s6886_s15 = smov [#allocation13]   ;;  %s6887_s21 = smov [#allocation16]  }
  0x61   : > { %s518_s16 = sshll.u32 %s6886_s15, 4  ;;  %s543_s19 = sshll.u32 %s6887_s21, 4  ;;  %s519_s16 = int_to_ptr.vmem [resolvable:$true] %s518_s16  ;;  %s7095_s19 = int_to_ptr.vmem [resolvable:$true] %s543_s19 }
  0x62   : > { %s6591_s29 = scalar_lea.hbm %s8936_s10, 1024 }
  0x63   : > { %p6592_p13 = scmp.ne.s32.totalorder %s8936_s10, %s6591_s29  ;;  %p6598_p4 = scmp.lt.u32.totalorder %s6591_s29, %s8936_s10 }
  0x65   : > { %p6594_p0 = pnand %p6592_p13, %p7028_p7 }
  0x67   : > { %p6595_p1 = pneg %p6594_p0 }
  0x69   : > { %p6600_p6 = pnand %p6598_p4, %p6595_p1 }
  0x6b   : > { %6603 = shalt.err (!%p6600_p6)
}
  0x6c   : > { %s6604_s2 = scalar_lea.vmem %s519_s16, 1024  ;;  %p6612_p11 = scmp.lt.s32.totalorder %s519_s16, %s519_s16 }
  0x6d   : > { %p6605_p8 = scmp.ne.s32.totalorder %s519_s16, %s6604_s2  ;;  %p6613_p12 = scmp.lt.s32.totalorder %s6604_s2, %s6604_s2 }
  0x6f   : > { %p6607_p9 = pnand %p6605_p8, %p7028_p7  ;;  %p6614_p2 = por %p6613_p12, %p6612_p11 }
  0x71   : > { %p6608_p10 = pneg %p6607_p9 }
  0x73   : > { %p6615_p3 = pnand %p6614_p2, %p6608_p10 }
  0x75   : > { %6618 = shalt.err (!%p6615_p3)
}
  0x76   : > { %6097 = dma.hbm_to_vmem [thread:$0]  (!%p7014_p5), %s8936_s10, 1024, %s519_s16, [#allocation14], %s6884_s17, %s6884_s17, %s6885_s18  }
  0x77   : > { %s6619_s29 = scalar_lea.hbm %s8938_s12, 16 }
  0x78   : > { %p6620_p13 = scmp.ne.s32.totalorder %s8938_s12, %s6619_s29  ;;  %p6626_p2 = scmp.lt.u32.totalorder %s6619_s29, %s8938_s12 }
  0x7a   : > { %p6622_p0 = pnand %p6620_p13, %p7028_p7 }
  0x7c   : > { %p6623_p1 = pneg %p6622_p0 }
  0x7e   : > { %p6628_p3 = pnand %p6626_p2, %p6623_p1 }
  0x80   : > { %6631 = shalt.err (!%p6628_p3)
}
  0x81   : > { %s6632_s17 = scalar_lea.vmem %s7095_s19, 16  ;;  %s6639_s18 = scalar_lea.vmem %s7095_s19, 32 }
  0x82   : > { %p6633_p4 = scmp.ne.s32.totalorder %s7095_s19, %s6632_s17  ;;  %p6640_p9 = scmp.lt.s32.totalorder %s7095_s19, %s7095_s19 }
  0x83   : > { %p6641_p10 = scmp.lt.s32.totalorder %s6639_s18, %s6632_s17 }
  0x84   : > { %p6635_p6 = pnand %p6633_p4, %p7028_p7 }
  0x85   : > { %p6642_p11 = por %p6641_p10, %p6640_p9 }
  0x86   : > { %p6636_p8 = pneg %p6635_p6 }
  0x88   : > { %p6643_p12 = pnand %p6642_p11, %p6636_p8 }
  0x8a   : > { %6646 = shalt.err (!%p6643_p12)
}
  0x8b   : > { %6103 = dma.hbm_to_vmem [thread:$0]  (!%p7014_p5), %s8938_s12, 16, %s7095_s19, [#allocation17]  }
  0x8c   : > { %s6888_s15 = smov [#allocation2]   ;;  %s6647_s29 = scalar_lea.hbm %s8929_s3, 1536 }
  0x8d   : > { %s433_s21 = sshll.u32 %s6888_s15, 4  ;;  %p6648_p13 = scmp.ne.s32.totalorder %s8929_s3, %s6647_s29  ;;  %s434_s21 = int_to_ptr.vmem [resolvable:$true] %s433_s21 }
  0x8e   : > { %p6654_p2 = scmp.lt.u32.totalorder %s6647_s29, %s8929_s3 }
  0x8f   : > { %p6650_p0 = pnand %p6648_p13, %p7028_p7 }
  0x91   : > { %p6651_p1 = pneg %p6650_p0 }
  0x93   : > { %p6656_p3 = pnand %p6654_p2, %p6651_p1 }
  0x95   : > { %6659 = shalt.err (!%p6656_p3)
}
  0x96   : > { %s6660_s19 = scalar_lea.vmem %s434_s21, 1536  ;;  %p6668_p9 = scmp.lt.s32.totalorder %s434_s21, %s434_s21 }
  0x97   : > { %p6661_p4 = scmp.ne.s32.totalorder %s434_s21, %s6660_s19  ;;  %p6669_p10 = scmp.lt.s32.totalorder %s6660_s19, %s6660_s19 }
  0x99   : > { %p6663_p6 = pnand %p6661_p4, %p7028_p7  ;;  %p6670_p11 = por %p6669_p10, %p6668_p9 }
  0x9b   : > { %p6664_p8 = pneg %p6663_p6 }
  0x9d   : > { %p6671_p12 = pnand %p6670_p11, %p6664_p8 }
  0x9f   : > { %6674 = shalt.err (!%p6671_p12)
}
  0xa0   : > { %s6889_s17 = smov 128   ;;  %s6890_s18 = smov 8  }
  0xa1   : > { %6076 = dma.hbm_to_vmem [thread:$0]  (!%p7014_p5), %s8929_s3, 1536, %s434_s21, [#allocation3], %s6889_s17, %s6889_s17, %s6890_s18  }
  0xa2   : > { %s6891_s15 = smov [#allocation6]   ;;  %s6892_s26 = smov [#allocation9]  }
  0xa3   : > { %s460_s20 = sshll.u32 %s6891_s15, 4  ;;  %s484_s29 = sshll.u32 %s6892_s26, 4  ;;  %s461_s20 = int_to_ptr.vmem [resolvable:$true] %s460_s20  ;;  %s485_s29 = int_to_ptr.vmem [resolvable:$true] %s484_s29 }
  0xa4   : > { %s6675_s23 = scalar_lea.hbm %s8931_s5, 48 }
  0xa5   : > { %p6676_p13 = scmp.ne.s32.totalorder %s8931_s5, %s6675_s23  ;;  %p6682_p2 = scmp.lt.u32.totalorder %s6675_s23, %s8931_s5 }
  0xa7   : > { %p6678_p0 = pnand %p6676_p13, %p7028_p7 }
  0xa9   : > { %p6679_p1 = pneg %p6678_p0 }
  0xab   : > { %p6684_p3 = pnand %p6682_p2, %p6679_p1 }
  0xad   : > { %6687 = shalt.err (!%p6684_p3)
}
  0xae   : > { %s6688_s21 = scalar_lea.vmem %s461_s20, 48  ;;  %s6695_s17 = scalar_lea.vmem %s461_s20, 64 }
  0xaf   : > { %p6689_p4 = scmp.ne.s32.totalorder %s461_s20, %s6688_s21  ;;  %p6696_p9 = scmp.lt.s32.totalorder %s461_s20, %s461_s20 }
  0xb0   : > { %p6697_p10 = scmp.lt.s32.totalorder %s6695_s17, %s6688_s21 }
  0xb1   : > { %p6691_p6 = pnand %p6689_p4, %p7028_p7 }
  0xb2   : > { %p6698_p11 = por %p6697_p10, %p6696_p9 }
  0xb3   : > { %p6692_p8 = pneg %p6691_p6 }
  0xb5   : > { %p6699_p12 = pnand %p6698_p11, %p6692_p8 }
  0xb7   : > { %6702 = shalt.err (!%p6699_p12)
}
  0xb8   : > { %6082 = dma.hbm_to_vmem [thread:$0]  (!%p7014_p5), %s8931_s5, 48, %s461_s20, [#allocation5]  }
  0xb9   : > { %s6703_s2 = scalar_lea.hbm %s8933_s7, 48 }
  0xba   : > { %p6704_p13 = scmp.ne.s32.totalorder %s8933_s7, %s6703_s2  ;;  %p6710_p2 = scmp.lt.u32.totalorder %s6703_s2, %s8933_s7 }
  0xbc   : > { %p6706_p0 = pnand %p6704_p13, %p7028_p7 }
  0xbe   : > { %p6707_p1 = pneg %p6706_p0 }
  0xc0   : > { %p6712_p3 = pnand %p6710_p2, %p6707_p1 }
  0xc2   : > { %6715 = shalt.err (!%p6712_p3)
}
  0xc3   : > { %s6716_s23 = scalar_lea.vmem %s485_s29, 48  ;;  %s6723_s20 = scalar_lea.vmem %s485_s29, 64 }
  0xc4   : > { %p6717_p4 = scmp.ne.s32.totalorder %s485_s29, %s6716_s23  ;;  %p6724_p9 = scmp.lt.s32.totalorder %s485_s29, %s485_s29 }
  0xc5   : > { %p6725_p10 = scmp.lt.s32.totalorder %s6723_s20, %s6716_s23 }
  0xc6   : > { %p6719_p6 = pnand %p6717_p4, %p7028_p7 }
  0xc7   : > { %p6726_p11 = por %p6725_p10, %p6724_p9 }
  0xc8   : > { %p6720_p8 = pneg %p6719_p6 }
  0xca   : > { %p6727_p12 = pnand %p6726_p11, %p6720_p8 }
  0xcc   : > { %6730 = shalt.err (!%p6727_p12)
}
  0xcd   : > { %6088 = dma.hbm_to_vmem [thread:$0]  (!%p7014_p5), %s8933_s7, 48, %s485_s29, [#allocation8]  }
  0xce   : > { %s6893_s21 = smov [#allocation12]   ;;  %s6894_s18 = smov [#allocation15]  }
  0xcf   : > { %s508_s17 = sshll.u32 %s6893_s21, 4  ;;  %s532_s16 = sshll.u32 %s6894_s18, 4  ;;  %s509_s17 = int_to_ptr.vmem [resolvable:$true] %s508_s17  ;;  %s533_s16 = int_to_ptr.vmem [resolvable:$true] %s532_s16 }
  0xd0   : > { %s6731_s2 = scalar_lea.hbm %s8935_s9, 16 }
  0xd1   : > { %p6732_p13 = scmp.ne.s32.totalorder %s8935_s9, %s6731_s2  ;;  %p6738_p2 = scmp.lt.u32.totalorder %s6731_s2, %s8935_s9 }
  0xd3   : > { %p6734_p0 = pnand %p6732_p13, %p7028_p7 }
  0xd5   : > { %p6735_p1 = pneg %p6734_p0 }
  0xd7   : > { %p6740_p3 = pnand %p6738_p2, %p6735_p1 }
  0xd9   : > { %6743 = shalt.err (!%p6740_p3)
}
  0xda   : > { %s6744_s29 = scalar_lea.vmem %s509_s17, 16  ;;  %s6751_s23 = scalar_lea.vmem %s509_s17, 32 }
  0xdb   : > { %p6745_p4 = scmp.ne.s32.totalorder %s509_s17, %s6744_s29  ;;  %p6752_p9 = scmp.lt.s32.totalorder %s509_s17, %s509_s17 }
  0xdc   : > { %p6753_p10 = scmp.lt.s32.totalorder %s6751_s23, %s6744_s29 }
  0xdd   : > { %p6747_p6 = pnand %p6745_p4, %p7028_p7 }
  0xde   : > { %p6754_p11 = por %p6753_p10, %p6752_p9 }
  0xdf   : > { %p6748_p8 = pneg %p6747_p6 }
  0xe1   : > { %p6755_p12 = pnand %p6754_p11, %p6748_p8 }
  0xe3   : > { %6758 = shalt.err (!%p6755_p12)
}
  0xe4   : > { %6094 = dma.hbm_to_vmem [thread:$0]  (!%p7014_p5), %s8935_s9, 16, %s509_s17, [#allocation11]  }
  0xe5   : > { %s6759_s18 = scalar_lea.hbm %s8937_s11, 16 }
  0xe6   : > { %p6760_p13 = scmp.ne.s32.totalorder %s8937_s11, %s6759_s18  ;;  %p6766_p2 = scmp.lt.u32.totalorder %s6759_s18, %s8937_s11 }
  0xe8   : > { %p6762_p0 = pnand %p6760_p13, %p7028_p7 }
  0xea   : > { %p6763_p1 = pneg %p6762_p0 }
  0xec   : > { %p6768_p3 = pnand %p6766_p2, %p6763_p1 }
  0xee   : > { %6771 = shalt.err (!%p6768_p3)
}
  0xef   : > { %s6772_s26 = scalar_lea.vmem %s533_s16, 16  ;;  %s6779_s17 = scalar_lea.vmem %s533_s16, 32 }
  0xf0   : > { %p6773_p4 = scmp.ne.s32.totalorder %s533_s16, %s6772_s26  ;;  %p6780_p9 = scmp.lt.s32.totalorder %s533_s16, %s533_s16 }
  0xf1   : > { %p6781_p10 = scmp.lt.s32.totalorder %s6779_s17, %s6772_s26 }
  0xf2   : > { %p6775_p6 = pnand %p6773_p4, %p7028_p7 }
  0xf3   : > { %p6782_p11 = por %p6781_p10, %p6780_p9 }
  0xf4   : > { %p6776_p8 = pneg %p6775_p6 }
  0xf6   : > { %p6783_p12 = pnand %p6782_p11, %p6776_p8 }
  0xf8   : > { %6786 = shalt.err (!%p6783_p12)
}
  0xf9   : > { %6100 = dma.hbm_to_vmem [thread:$0]  (!%p7014_p5), %s8937_s11, 16, %s533_s16, [#allocation14]  }
  0xfa   : > { %s6895_s29 = smov [#allocation18]   ;;  %s6896_s20 = smov [#allocation19]  }
  0xfb   : > { %s554_s23 = sshll.u32 %s6895_s29, 4  ;;  %s565_s30 = sshll.u32 %s6896_s20, 4  ;;  %s555_s23 = int_to_ptr.vmem [resolvable:$true] %s554_s23  ;;  %s566_s30 = int_to_ptr.vmem [resolvable:$true] %s565_s30 }
  0xfc   : > { %s6787_s18 = scalar_lea.hbm %s8939_s13, 16 }
  0xfd   : > { %p6788_p13 = scmp.ne.s32.totalorder %s8939_s13, %s6787_s18  ;;  %p6794_p2 = scmp.lt.u32.totalorder %s6787_s18, %s8939_s13 }
  0xff   : > { %p6790_p0 = pnand %p6788_p13, %p7028_p7 }
 0x101   : > { %p6791_p1 = pneg %p6790_p0 }
 0x103   : > { %p6796_p3 = pnand %p6794_p2, %p6791_p1 }
 0x105   : > { %6799 = shalt.err (!%p6796_p3)
}
 0x106   : > { %s6800_s16 = scalar_lea.vmem %s555_s23, 16  ;;  %s6807_s26 = scalar_lea.vmem %s555_s23, 32 }
 0x107   : > { %p6801_p4 = scmp.ne.s32.totalorder %s555_s23, %s6800_s16  ;;  %p6808_p9 = scmp.lt.s32.totalorder %s555_s23, %s555_s23 }
 0x108   : > { %p6809_p10 = scmp.lt.s32.totalorder %s6807_s26, %s6800_s16 }
 0x109   : > { %p6803_p6 = pnand %p6801_p4, %p7028_p7 }
 0x10a   : > { %p6810_p11 = por %p6809_p10, %p6808_p9 }
 0x10b   : > { %p6804_p8 = pneg %p6803_p6 }
 0x10d   : > { %p6811_p12 = pnand %p6810_p11, %p6804_p8 }
 0x10f   : > { %6814 = shalt.err (!%p6811_p12)
}
 0x110   : > { %6106 = dma.hbm_to_vmem [thread:$0]  (!%p7014_p5), %s8939_s13, 16, %s555_s23, [#allocation17]  }
 0x111   : > { %s6815_s20 = scalar_lea.hbm %s8940_s14, 64 }
 0x112   : > { %p6816_p13 = scmp.ne.s32.totalorder %s8940_s14, %s6815_s20  ;;  %p6822_p2 = scmp.lt.u32.totalorder %s6815_s20, %s8940_s14 }
 0x114   : > { %p6818_p0 = pnand %p6816_p13, %p7028_p7 }
 0x116   : > { %p6819_p1 = pneg %p6818_p0 }
 0x118   : > { %p6824_p3 = pnand %p6822_p2, %p6819_p1 }
 0x11a   : > { %6827 = shalt.err (!%p6824_p3)
}
 0x11b   : > { %s6828_s6 = scalar_lea.vmem %s566_s30, 64  ;;  %p6836_p9 = scmp.lt.s32.totalorder %s566_s30, %s566_s30 }
 0x11c   : > { %p6829_p4 = scmp.ne.s32.totalorder %s566_s30, %s6828_s6  ;;  %p6837_p10 = scmp.lt.s32.totalorder %s6828_s6, %s6828_s6 }
 0x11e   : > { %p6831_p6 = pnand %p6829_p4, %p7028_p7  ;;  %p6838_p11 = por %p6837_p10, %p6836_p9 }
 0x120   : > { %p6832_p8 = pneg %p6831_p6 }
 0x122   : > { %p6839_p12 = pnand %p6838_p11, %p6832_p8 }
 0x124   : > { %6842 = shalt.err (!%p6839_p12)
}
 0x125   : > { %6109 = dma.hbm_to_vmem [thread:$0]  (!%p7014_p5), %s8940_s14, 64, %s566_s30, [#allocation20]  }
 0x126   : > { %p8992_p13 = scmp.ne.s32.totalorder %s8987_s25, 0 }
 0x128   : > { %602 = sbr.rel (%p8992_p13) target bundleno = 4148 (0x1034), region = 80 }
 0x12f   : > { %p8993_p0 = scmp.eq.s32.totalorder %s6997_s24, 0 }
 0x131   : > { %6848 = dma.done.wait (%p8993_p0), [#allocation3], 1536   ;;  %p8994_p7 = pmov %p8993_p0 }
 0x132   : > { %p8995_p1 = pmov %p8993_p0 }
 0x133   : > { %6850 = vsyncadd (%p8994_p7), [#allocation3], 4294965760 }
 0x134   : > { %6852 = dma.done.wait (%p8995_p1), [#allocation5], 3120   ;;  %p8996_p2 = pmov %p8993_p0 }
 0x135   : > { %p8997_p3 = pmov %p8993_p0 }
 0x136   : > { %6854 = vsyncadd (%p8996_p2), [#allocation5], 4294964176 }
 0x137   : > { %6856 = dma.done.wait (%p8997_p3), [#allocation8], 3120   ;;  %p8998_p5 = pmov %p8993_p0 }
 0x138   : > { %p8999_p4 = pmov %p8993_p0 }
 0x139   : > { %6858 = vsyncadd (%p8998_p5), [#allocation8], 4294964176 }
 0x13a   : > { %6860 = dma.done.wait (%p8999_p4), [#allocation11], 1040   ;;  %p9000_p6 = pmov %p8993_p0 }
 0x13b   : > { %p9001_p8 = pmov %p8993_p0 }
 0x13c   : > { %6862 = vsyncadd (%p9000_p6), [#allocation11], 4294966256 }
 0x13d   : > { %6864 = dma.done.wait (%p9001_p8), [#allocation14], 1040   ;;  %p9002_p9 = pmov %p8993_p0 }
 0x13e   : > { %p9003_p10 = pmov %p8993_p0 }
 0x13f   : > { %6866 = vsyncadd (%p9002_p9), [#allocation14], 4294966256 }
 0x140   : > { %6868 = dma.done.wait (%p9003_p10), [#allocation17], 32   ;;  %p9004_p11 = pmov %p8993_p0 }
 0x141   : > { %p9005_p12 = pmov %p8993_p0 }
 0x142   : > { %6870 = vsyncadd (%p9004_p11), [#allocation17], 4294967264 }
 0x143   : > { %6872 = dma.done.wait (%p9005_p12), [#allocation20], 64   ;;  %p9006_p13 = pmov %p8993_p0 }
 0x144   : > { %p710_p0 = scmp.lt.s32.totalorder %s6997_s24, 1  ;;  %v6897_v0 = vmov 0   ;;  %v6169_v1 = vld [vmem:[#allocation4 + $0x8] ss:$12 sps:$4 sm:$0xff]   ;;  %v6170_v2 = vld [vmem:[#allocation4 + $0x20] ss:$12 sps:$4 sm:$0xff]  }
 0x145   : > { %6874 = vsyncadd (%p9006_p13), [#allocation20], 4294967232  ;;  %995 = vmatprep.mubr.bf16.mxu0 %v6897_v0  ;;  %5379 = vmatprep.subr.bf16.mxu1 %v6169_v1  ;;  %v6171_v3 = vld [vmem:[#allocation4 + $0x38] ss:$12 sps:$4 sm:$0xff]   ;;  %s9007_s30 = sld [smem:[#allocation55_spill]]  ;;  %v748_v8 = vld [vmem:[#allocation2 + $0x8] sm:$0xff] }
 0x146   : > { %s9072_s24 = smov (!%p710_p0, %s6997_s24), 1  ;;  %5380 = vmatpush3.bf16.msra.mxu1 %v6169_v1  ;;  %v6172_v4 = vld [vmem:[#allocation4 + $0x50] ss:$12 sps:$4 sm:$0xff]   ;;  %v747_v7 = vld [vmem:[#allocation2] sm:$0xff]  ;;  %v6173_v11 = vld [vmem:[#allocation4 + $0x68] ss:$12 sps:$4 sm:$0xff]  }
 0x147   : > { %s6022_s25 = smul.u32 96, %s9072_s24  ;;  %5381 = vmatprep.subr.bf16.mxu1 %v6170_v2  ;;  %v6174_v13 = vld [vmem:[#allocation4 + $0x80] ss:$12 sps:$4 sm:$0xff]   ;;  %v6189_v14 = vld [vmem:[#allocation4 + $0x4] ss:$12 sps:$4 sm:$0xff]   ;;  %v750_v21 = vld [vmem:[#allocation2 + $0x18] sm:$0xff] }
 0x148   : > { %v6191_v15 = vld [vmem:[#allocation4] ss:$12 sps:$4 sm:$0xff]   ;;  %v6175_v16 = vld [vmem:[#allocation4 + $0x98] ss:$12 sps:$4 sm:$0xff]   ;;  %v749_v19 = vld [vmem:[#allocation2 + $0x10] sm:$0xff]  ;;  %963 = vmatprep.subr.bf16.mxu0 %v6189_v14  ;;  %s6024_s16 = smul.u32 160, %s9072_s24 }
 0x149   : > { %v6176_v20 = vld [vmem:[#allocation4 + $0xb0] ss:$12 sps:$4 sm:$0xff]   ;;  %964 = vmatpush1.bf16.msra.mxu0 %v6191_v15  ;;  %v6197_v23 = vld [vmem:[#allocation4 + $0x18] ss:$12 sps:$4 sm:$0xff]   ;;  %v752_v27 = vld [vmem:[#allocation2 + $0x28] sm:$0xff]  ;;  %s6023_s26 = smul.u32 72, %s9072_s24 }
 0x14a   : > { %5382 = vmatpush3.bf16.msra.mxu1 %v6170_v2  ;;  %v6195_v22 = vld [vmem:[#allocation4 + $0x1c] ss:$12 sps:$4 sm:$0xff]   ;;  %v751_v26 = vld [vmem:[#allocation2 + $0x20] sm:$0xff]  ;;  %v753_v38 = vld [vmem:[#allocation2 + $0x30] sm:$0xff]  ;;  %s9026_s19 = sld [smem:[#allocation56_spill]]  ;;  %vm1501_vm0 = vcmask 523264  }
 0x14b   : > { %s7304_s15 = scalar_lea.vmem %s9007_s30, %s6022_s25  ;;  %5383 = vmatprep.subr.bf16.mxu1 %v6171_v3  ;;  %965 = vmatprep.subr.bf16.mxu0 %v6195_v22  ;;  %v6201_v32 = vld [vmem:[#allocation4 + $0x34] ss:$12 sps:$4 sm:$0xff]   ;;  %v6203_v33 = vld [vmem:[#allocation4 + $0x30] ss:$12 sps:$4 sm:$0xff]   ;;  %v6207_v44 = vld [vmem:[#allocation4 + $0x4c] ss:$12 sps:$4 sm:$0xff]   ;;  %s7381_s27 = scalar_lea.vmem %s8927_s1, %s6023_s26 }
 0x14c   : > { %v735_v5 = vld [vmem:[%s7304_s15] sm:$0xff]  ;;  %v736_v6 = vld [vmem:[%s7304_s15 + $0x8] sm:$0xff]  ;;  %v737_v17 = vld [vmem:[%s7304_s15 + $0x10] sm:$0xff]  ;;  %vm6899_vm1 = vmmov 0   ;;  %vm1616_vm2 = vcmask 556032   ;;  %vm1650_vm3 = vcmask 549888  }
 0x14d   : > { %v7308_v9 = vadd.f32 %v747_v7, %v735_v5  ;;  %v7310_v10 = vadd.f32 %v748_v8, %v736_v6  ;;  %v738_v18 = vld [vmem:[%s7304_s15 + $0x18] sm:$0xff]  ;;  %v739_v24 = vld [vmem:[%s7304_s15 + $0x20] sm:$0xff]  ;;  %v740_v25 = vld [vmem:[%s7304_s15 + $0x28] sm:$0xff]  ;;  %v7321_v28 = vadd.f32 %v749_v19, %v737_v17  ;;  %966 = vmatpush1.bf16.msra.mxu0 %v6197_v23  ;;  %vm1786_vm4 = vcmask 1041408   ;;  %s6900_s18 = smov 64   ;;  %s6903_s4 = smov 68  }
 0x14e   : > { %5384 = vmatpush3.bf16.msra.mxu1 %v6171_v3  ;;  %v7323_v29 = vadd.f32 %v750_v21, %v738_v18  ;;  %v7325_v30 = vadd.f32 %v751_v26, %v739_v24  ;;  %v7327_v31 = vadd.f32 %v752_v27, %v740_v25  ;;  %v6179_v34 = vld [vmem:[#allocation7 + $0x4] ss:$12 sps:$4 sm:$0xff]   ;;  %v6177_v35 = vld [vmem:[#allocation7] ss:$12 sps:$4 sm:$0xff]   ;;  %v742_v37 = vld [vmem:[%s7304_s15 + $0x38] sm:$0xff]  ;;  %967 = vmatprep.subr.bf16.mxu0 %v6201_v32  ;;  %vm2928_vm5 = vcmask 736256  }
 0x14f   : > { %9008 = vst [vmem:[#allocation29_spill] sm:$0xff] %v7308_v9  ;;  %9009 = vst [vmem:[#allocation30_spill] sm:$0xff] %v7310_v10  ;;  %5385 = vmatprep.subr.bf16.mxu1 %v6172_v4  ;;  %v7314_v12 = vpack.c.bf16 %v7310_v10, %v7308_v9  ;;  %v741_v36 = vld [vmem:[%s7304_s15 + $0x30] sm:$0xff]  ;;  %v754_v39 = vld [vmem:[#allocation2 + $0x38] sm:$0xff]  ;;  %vm2953_vm6 = vcmask 732160   ;;  %vm3058_vm8 = vcmask 1044480  }
 0x150   : > { %9011 = vst [vmem:[#allocation32_spill] sm:$0xff] %v7321_v28  ;;  %9012 = vst [vmem:[#allocation33_spill] sm:$0xff] %v7323_v29  ;;  %v7333_v40 = vpack.c.bf16 %v7323_v29, %v7321_v28  ;;  %v6182_v41 = vld [vmem:[#allocation7 + $0x1c] ss:$12 sps:$4 sm:$0xff]   ;;  %v6209_v45 = vld [vmem:[#allocation4 + $0x48] ss:$12 sps:$4 sm:$0xff]   ;;  %v7339_v46 = vpack.c.bf16 %v7327_v31, %v7325_v30  ;;  %v7342_v51 = vadd.f32 %v753_v38, %v741_v36  ;;  %s7389_s21 = scalar_lea.vmem %s9026_s19, %s6024_s16 }
 0x151   : > { %9010 = vst [vmem:[#allocation31_spill] sm:$0xff] %v7314_v12  ;;  %5395 = vmatprep.mubr.bf16.mxu1 %v7314_v12  ;;  %9013 = vst [vmem:[#allocation34_spill] sm:$0xff] %v7325_v30  ;;  %v743_v42 = vld [vmem:[%s7304_s15 + $0x40] sm:$0xff]  ;;  %v744_v43 = vld [vmem:[%s7304_s15 + $0x48] sm:$0xff]  ;;  %968 = vmatpush1.bf16.msra.mxu0 %v6203_v33  ;;  %v7344_v52 = vadd.f32 %v754_v39, %v742_v37  ;;  %vm4196_vm11 = vcmask 1043456   ;;  %vm4344_vm12 = vcmask 1045504  }
 0x152   : > { %5386 = vmatpush3.bf16.msra.mxu1 %v6172_v4  ;;  %9014 = vst [vmem:[#allocation35_spill] sm:$0xff] %v7327_v31  ;;  %9015 = vst [vmem:[#allocation36_spill] sm:$0xff] %v7333_v40  ;;  %v755_v47 = vld [vmem:[#allocation2 + $0x40] sm:$0xff]  ;;  %v756_v48 = vld [vmem:[#allocation2 + $0x48] sm:$0xff]  ;;  %969 = vmatprep.subr.bf16.mxu0 %v6207_v44  ;;  %vm3949_vm13 = vcmask 548864   ;;  %vm4668_vm14 = vcmask 1046528  }
 0x153   : > { %5387 = vmatprep.subr.bf16.mxu1 %v6173_v11  ;;  %9016 = vst [vmem:[#allocation37_spill] sm:$0xff] %v7339_v46  ;;  %v6213_v49 = vld [vmem:[#allocation4 + $0x64] ss:$12 sps:$4 sm:$0xff]   ;;  %v6180_v50 = vld [vmem:[#allocation7 + $0x18] ss:$12 sps:$4 sm:$0xff]   ;;  %9017 = vst [vmem:[#allocation38_spill] sm:$0xff] %v7342_v51  ;;  %v7347_v54 = vadd.f32 %v755_v47, %v743_v42  ;;  %v7349_v55 = vadd.f32 %v756_v48, %v744_v43  ;;  %v7354_v60 = vpack.c.bf16 %v7344_v52, %v7342_v51  ;;  %v8946_v43 = vlaneseq }
 0x154   : > { %9018 = vst [vmem:[#allocation39_spill] sm:$0xff] %v7344_v52  ;;  %v6215_v53 = vld [vmem:[#allocation4 + $0x60] ss:$12 sps:$4 sm:$0xff]   ;;  %v6216_v56 = vld [vmem:[#allocation4 + $0x7c] ss:$12 sps:$4 sm:$0xff]   ;;  %v745_v61 = vld [vmem:[%s7304_s15 + $0x50] sm:$0xff] }
 0x155   : > { %970 = vmatpush1.bf16.msra.mxu0 %v6209_v45  ;;  %9019 = vst [vmem:[#allocation40_spill] sm:$0xff] %v7347_v54  ;;  %9020 = vst [vmem:[#allocation41_spill] sm:$0xff] %v7349_v55  ;;  %v6185_v57 = vld [vmem:[#allocation7 + $0x34] ss:$12 sps:$4 sm:$0xff]   ;;  %v6183_v58 = vld [vmem:[#allocation7 + $0x30] ss:$12 sps:$4 sm:$0xff]   ;;  %v7359_v63 = vpack.c.bf16 %v7349_v55, %v7347_v54 }
 0x156   : > { %5388 = vmatpush3.bf16.msra.mxu1 %v6173_v11  ;;  %971 = vmatprep.subr.bf16.mxu0 %v6213_v49  ;;  %v6188_v59 = vld [vmem:[#allocation7 + $0x4c] ss:$12 sps:$4 sm:$0xff]   ;;  %9021 = vst [vmem:[#allocation42_spill] sm:$0xff] %v7354_v60  ;;  %v6218_v62 = vld [vmem:[#allocation4 + $0x78] ss:$12 sps:$4 sm:$0xff]   ;;  %v772_v24 = vld [vmem:[%s7381_s27 + $0x8] sm:$0xff] }
 0x157   : > { %5389 = vmatprep.subr.bf16.mxu1 %v6174_v13  ;;  %9022 = vst [vmem:[#allocation43_spill] sm:$0xff] %v7359_v63  ;;  %v746_v1 = vld [vmem:[%s7304_s15 + $0x58] sm:$0x3]  ;;  %v757_v2 = vld [vmem:[#allocation2 + $0x50] sm:$0xff]  ;;  %v6198_v18 = vld [vmem:[#allocation7 + $0x78] ss:$12 sps:$4 sm:$0xff]  }
 0x158   : > { %v758_v3 = vld [vmem:[#allocation2 + $0x58] sm:$0x3]  ;;  %v6219_v4 = vld [vmem:[#allocation4 + $0x94] ss:$12 sps:$4 sm:$0xff]   ;;  %v6221_v5 = vld [vmem:[#allocation4 + $0x90] ss:$12 sps:$4 sm:$0xff]   ;;  %v7364_v11 = vadd.f32 %v757_v2, %v745_v61 }
 0x159   : > { %972 = vmatpush1.bf16.msra.mxu0 %v6215_v53  ;;  %v6186_v6 = vld [vmem:[#allocation7 + $0x48] ss:$12 sps:$4 sm:$0xff]   ;;  %v6194_v8 = vld [vmem:[#allocation7 + $0x64] ss:$12 sps:$4 sm:$0xff]   ;;  %v6192_v15 = vld [vmem:[#allocation7 + $0x60] ss:$12 sps:$4 sm:$0xff]  }
 0x15a   : > { %5390 = vmatpush3.bf16.msra.mxu1 %v6174_v13  ;;  %973 = vmatprep.subr.bf16.mxu0 %v6216_v56  ;;  %v6222_v7 = vld [vmem:[#allocation4 + $0xac] ss:$12 sps:$4 sm:$0xff]   ;;  %9023 = vst [vmem:[#allocation44_spill] sm:$0xff] %v7364_v11  ;;  %v7366_v13 = vadd.f32 %v758_v3, %v746_v1  ;;  %v6224_v14 = vld [vmem:[#allocation4 + $0xa8] ss:$12 sps:$4 sm:$0xff]   ;;  %v771_v23 = vld [vmem:[%s7381_s27] sm:$0xff] }
 0x15b   : > { %5391 = vmatprep.subr.bf16.mxu1 %v6175_v16  ;;  %v6206_v19 = vld [vmem:[#allocation7 + $0x94] ss:$12 sps:$4 sm:$0xff]   ;;  %v6212_v21 = vld [vmem:[#allocation7 + $0xac] ss:$12 sps:$4 sm:$0xff]   ;;  %v7394_v25 = vpack.c.bf16 %v772_v24, %v771_v23  ;;  %v779_v39 = vld [vmem:[%s7381_s27 + $0x40] sm:$0xf] }
 0x15c   : > { %9024 = vst [vmem:[#allocation45_spill] sm:$0xff] %v7366_v13  ;;  %v7371_v17 = vpack.c.bf16 %v7366_v13, %v7364_v11  ;;  %v6210_v22 = vld [vmem:[#allocation7 + $0xa8] ss:$12 sps:$4 sm:$0xff]   ;;  %v773_v26 = vld [vmem:[%s7381_s27 + $0x10] sm:$0xff]  ;;  %v775_v33 = vld [vmem:[%s7381_s27 + $0x20] sm:$0xff]  ;;  %v8949_v42 = vmov 0.0  }
 0x15d   : > { %974 = vmatpush1.bf16.msra.mxu0 %v6218_v62  ;;  %v774_v27 = vld [vmem:[%s7381_s27 + $0x18] sm:$0xff]  ;;  %v777_v36 = vld [vmem:[%s7381_s27 + $0x30] sm:$0xff]  ;;  %v7430_v44 = vshrl.u32 %v8946_v43, 7  ;;  %v818_v47 = vld [vmem:[#allocation6] sm:$0x7]  ;;  %s6904_s6 = smov 90  }
 0x15e   : > { %5392 = vmatpush3.bf16.msra.mxu1 %v6175_v16  ;;  %975 = vmatprep.subr.bf16.mxu0 %v6219_v4  ;;  %v6200_v16 = vld [vmem:[#allocation7 + $0x7c] ss:$12 sps:$4 sm:$0xff]   ;;  %9025 = vst [vmem:[#allocation46_spill] sm:$0xff] %v7371_v17  ;;  %v7402_v32 = vpack.c.bf16 %v774_v27, %v773_v26  ;;  %v778_v37 = vld [vmem:[%s7381_s27 + $0x38] sm:$0xff]  ;;  %vm5901_vm7 = vmpackc.low %vm1616_vm2, %vm1616_vm2  ;;  %vm2784_vm15 = vcmask 729088   ;;  %s5164_s23 = sshll.u32 %s9072_s24, 4 }
 0x15f   : > { %5393 = vmatprep.subr.bf16.mxu1 %v6176_v20  ;;  %v7418_v38 = vpack.c.bf16 %v778_v37, %v777_v36  ;;  %9027 = vst [vmem:[#allocation47_spill] sm:$0xff] %v7430_v44  ;;  %v8948_v45 = vsub.s32 2, %v7430_v44  ;;  %vm8474_vm9 = vmpackc.low %vm2928_vm5, %vm2928_vm5  ;;  %s9067_s28 = sld [smem:[#allocation60_spill]]  ;;  %s4979_s30 = sshll.u32 %s9072_s24, 1 }
 0x160   : > { %s9069_s26 = sld [smem:[#allocation59_spill]] }
 0x161   : > { %976 = vmatpush1.bf16.msra.mxu0 %v6221_v5 }
 0x162   : > { %5394 = vmatpush3.bf16.msra.mxu1 %v6176_v20  ;;  %977 = vmatprep.subr.bf16.mxu0 %v6222_v7  ;;  %v6204_v20 = vld [vmem:[#allocation7 + $0x90] ss:$12 sps:$4 sm:$0xff]  }
 0x163   : > { %1319 = vmatprep.subr.bf16.mxu1 %v6179_v34  ;;  %v776_v34 = vld [vmem:[%s7381_s27 + $0x28] sm:$0xff] }
 0x165   : > { %5396 = vmatmul.mubr.bf16.vlgmr.msra.gmra.mrb[0].mxu1 %v7333_v40  ;;  %978 = vmatpush1.bf16.msra.mxu0 %v6224_v14  ;;  %s733_s22 = scalar_lea.vmem %s9067_s28, %s5164_s23 }
 0x166   : > { %1320 = vmatpush1.bf16.msra.mxu1 %v6177_v35  ;;  %5399 = vmatprep.mubr.bf16.mxu1 %v7339_v46  ;;  %v7410_v35 = vpack.c.bf16 %v776_v34, %v775_v33  ;;  %s728_s17 = scalar_lea.vmem %s9069_s26, %s4979_s30 }
 0x167   : > { %1321 = vmatprep.subr.bf16.mxu1 %v6182_v41  ;;  %v7425_v41 = vpack.c.bf16 %v779_v39, %v779_v39  ;;  %5407 = vmatprep.subr.bf16.mxu0 %v8949_v42 }
 0x168   : > { %996 = vmatmul.mubr.bf16.vlgmr.msra.gmra.mrb[0].mxu0 %v7314_v12 }
 0x169   : > { %1005 = vmatprep.mubr.bf16.mxu0 %v6897_v0 }
 0x16a   : > { %1322 = vmatpush1.bf16.msra.mxu1 %v6180_v50 }
 0x16b   : > { %1323 = vmatprep.subr.bf16.mxu1 %v6185_v57 }
 0x16d   : > { %5400 = vmatmul.mubr.bf16.gmra.mrb[4].mxu1 %v7354_v60 }
 0x16e   : > { %1324 = vmatpush1.bf16.msra.mxu1 %v6183_v58  ;;  %5403 = vmatprep.mubr.bf16.mxu1 %v7359_v63 }
 0x16f   : > { %1325 = vmatprep.subr.bf16.mxu1 %v6188_v59 }
 0x170   : > { %1006 = vmatmul.mubr.bf16.gmra.mrb[4].mxu0 %v7333_v40 }
 0x171   : > { %1015 = vmatprep.mubr.bf16.mxu0 %v6897_v0 }
 0x172   : > { %1326 = vmatpush1.bf16.msra.mxu1 %v6186_v6 }
 0x173   : > { %1327 = vmatprep.subr.bf16.mxu1 %v6194_v8 }
 0x175   : > { %5404 = vmatmul.mubr.bf16.gmra.mrb[8].mxu1 %v7371_v17 }
 0x176   : > { %1328 = vmatpush1.bf16.msra.mxu1 %v6192_v15  ;;  %1351 = vmatprep.mubr.bf16.mxu1 %v6897_v0 }
 0x177   : > { %1329 = vmatprep.subr.bf16.mxu1 %v6200_v16  ;;  %v822_v16 = vsub.s32 0, %v7430_v44 }
 0x178   : > { %1016 = vmatmul.mubr.bf16.gmra.mrb[8].mxu0 %v7339_v46 }
 0x179   : > { %1025 = vmatprep.mubr.bf16.mxu0 %v6897_v0 }
 0x17a   : > { %1330 = vmatpush1.bf16.msra.mxu1 %v6198_v18  ;;  %v826_v18 = vsub.s32 1, %v7430_v44 }
 0x17b   : > { %1331 = vmatprep.subr.bf16.mxu1 %v6206_v19 }
 0x17c   : > { %v7447_v23 = vrot.slane %v818_v47, %v826_v18 }
 0x17e   : > { %1332 = vmatpush1.bf16.msra.mxu1 %v6204_v20  ;;  %v7445_v20 = vrot.slane %v818_v47, %v822_v16 }
 0x17f   : > { %1333 = vmatprep.subr.bf16.mxu1 %v6212_v21 }
 0x180   : > { %1026 = vmatmul.mubr.bf16.gmra.mrb[12].mxu0 %v7354_v60 }
 0x181   : > { %1035 = vmatprep.mubr.bf16.mxu0 %v6897_v0 }
 0x182   : > { %1334 = vmatpush1.bf16.msra.mxu1 %v6210_v22 }
 0x185   : > { %1352 = vmatmul.mubr.bf16.vlgmr.msra.gmra.mrb[12].mxu1 %v7394_v25 }
 0x186   : > { %1361 = vmatprep.mubr.bf16.mxu1 %v6897_v0 }
 0x188   : > { %1036 = vmatmul.mubr.bf16.gmra.mrb[16].mxu0 %v7359_v63 }
 0x189   : > { %1045 = vmatprep.mubr.bf16.mxu0 %v6897_v0 }
 0x18d   : > { %1362 = vmatmul.mubr.bf16.gmra.mrb[16].mxu1 %v7402_v32 }
 0x18e   : > { %1371 = vmatprep.mubr.bf16.mxu1 %v6897_v0 }
 0x190   : > { %1046 = vmatmul.mubr.bf16.gmra.mrb[20].mxu0 %v7371_v17 }
 0x195   : > { %1372 = vmatmul.mubr.bf16.gmra.mrb[20].mxu1 %v7410_v35 }
 0x196   : > { %1381 = vmatprep.mubr.bf16.mxu1 %v6897_v0 }
 0x19d   : > { %1382 = vmatmul.mubr.bf16.gmra.mrb[24].mxu1 %v7418_v38 }
 0x19e   : > { %1391 = vmatprep.mubr.bf16.mxu1 %v6897_v0  ;;  %v831_v0 = vrot.slane %v818_v47, %v8948_v45 }
 0x1a5   : > { %1392 = vmatmul.mubr.bf16.gmra.mrb[28].mxu1 %v7425_v41 }
 0x238   : > { %v5397_v48 = vpop.f32.mrb[0].mxu1 }
 0x239   : > { %v1099_v49 = vadd.f32 %v5397_v48, %v831_v0  ;;  %v1090_v50 = vpop.f32.mrb[1].mxu1 }
 0x23a   : > { %v5398_v53 = vpop.f32.mrb[2].mxu1  ;;  %v1091_v58 = vadd.f32 %v1090_v50, %v831_v0 }
 0x23b   : > { %v1102_v56 = vadd.f32 %v5398_v53, %v831_v0  ;;  %v1093_v57 = vpop.f32.mrb[3].mxu1  ;;  %v997_v34 = vpop.f32.mrb[0].mxu0 }
 0x23c   : > { %v1094_v59 = vadd.f32 %v1093_v57, %v831_v0  ;;  %v998_v37 = vadd.f32 %v997_v34, %v7445_v20  ;;  %v999_v39 = vpop.f32.mrb[1].mxu0 }
 0x23d   : > { %v7435_v61 = vpack.c.bf16 %v1102_v56, %v1099_v49  ;;  %v1000_v49 = vadd.f32 %v999_v39, %v7447_v23  ;;  %v1001_v50 = vpop.f32.mrb[2].mxu0 }
 0x23e   : > { %v7437_v62 = vpack.c.bf16 %v1094_v59, %v1091_v58  ;;  %v1473_v56 = vmul.f32 0.13130644, %v998_v37  ;;  %v1002_v47 = vadd.f32 %v1001_v50, %v7445_v20  ;;  %v1003_v57 = vpop.f32.mrb[3].mxu0 }
 0x23f   : > { %9028 = vst [vmem:[#allocation48_spill] sm:$0xff] %v7435_v61  ;;  %v1004_v58 = vadd.f32 %v1003_v57, %v7447_v23 }
 0x240   : > { %9029 = vst [vmem:[#allocation49_spill] sm:$0xff] %v7437_v62  ;;  %v5401_v1 = vpop.f32.mrb[4].mxu1  ;;  %v1474_v59 = vmul.f32 0.13130644, %v1002_v47 }
 0x241   : > { %v1115_v2 = vadd.f32 %v5401_v1, %v831_v0  ;;  %v1106_v3 = vpop.f32.mrb[5].mxu1  ;;  %v7457_v1 = vpack.c.bf16 %v1004_v58, %v1000_v49 }
 0x242   : > { %v1107_v4 = vadd.f32 %v1106_v3, %v831_v0  ;;  %v5402_v5 = vpop.f32.mrb[6].mxu1 }
 0x243   : > { %v1118_v6 = vadd.f32 %v5402_v5, %v831_v0  ;;  %v1109_v7 = vpop.f32.mrb[7].mxu1  ;;  %v1007_v3 = vpop.f32.mrb[4].mxu0 }
 0x244   : > { %v1110_v8 = vadd.f32 %v1109_v7, %v831_v0  ;;  %v1009_v5 = vpop.f32.mrb[5].mxu0 }
 0x245   : > { %v7439_v14 = vpack.c.bf16 %v1118_v6, %v1115_v2  ;;  %v7461_v2 = vpack.c.bf16 %v1474_v59, %v1473_v56  ;;  %v1010_v7 = vadd.f32 %v1009_v5, %v7447_v23 }
 0x246   : > { %v7441_v15 = vpack.c.bf16 %v1110_v8, %v1107_v4  ;;  %v1008_v4 = vadd.f32 %v1007_v3, %v7445_v20  ;;  %v1011_v8 = vpop.f32.mrb[6].mxu0 }
 0x247   : > { %9030 = vst [vmem:[#allocation50_spill] sm:$0xff] %v7439_v14  ;;  %5453 = vmatprep.mubr.msk.bf16.mxu1 %vm1501_vm0, %v7461_v2 }
 0x248   : > { %9031 = vst [vmem:[#allocation51_spill] sm:$0xff] %v7441_v15  ;;  %v5405_v19 = vpop.f32.mrb[8].mxu1 }
 0x249   : > { %v1131_v21 = vadd.f32 %v5405_v19, %v831_v0  ;;  %v1122_v22 = vpop.f32.mrb[9].mxu1  ;;  %v1475_v19 = vmul.f32 0.13130644, %v1008_v4 }
 0x24a   : > { %v1123_v24 = vadd.f32 %v1122_v22, %v831_v0  ;;  %v5406_v26 = vpop.f32.mrb[10].mxu1  ;;  %v1013_v22 = vpop.f32.mrb[7].mxu0 }
 0x24b   : > { %v1134_v27 = vadd.f32 %v5406_v26, %v831_v0  ;;  %v1125_v33 = vpop.f32.mrb[11].mxu1  ;;  %v1017_v56 = vpop.f32.mrb[8].mxu0 }
 0x24c   : > { %v1126_v36 = vadd.f32 %v1125_v33, %v831_v0  ;;  %v7459_v0 = vld [vmem:[#allocation9] sm:$0x7]  ;;  %v1019_v58 = vpop.f32.mrb[9].mxu0 }
 0x24d   : > { %v7450_v48 = vpack.c.bf16 %v1134_v27, %v1131_v21  ;;  %v7467_v6 = vrot.slane %v7459_v0, %v822_v16  ;;  %v1012_v21 = vadd.f32 %v1011_v8, %v7445_v20  ;;  %v7473_v27 = vrot.slane %v7459_v0, %v826_v18  ;;  %v1021_v5 = vpop.f32.mrb[10].mxu0 }
 0x24e   : > { %v7453_v53 = vpack.c.bf16 %v1126_v36, %v1123_v24  ;;  %v1014_v24 = vadd.f32 %v1013_v22, %v7447_v23  ;;  %v1018_v18 = vadd.f32 %v1017_v56, %v7445_v20  ;;  %v1020_v4 = vadd.f32 %v1019_v58, %v7447_v23 }
 0x24f   : > { %9032 = vst [vmem:[#allocation52_spill] sm:$0xff] %v7450_v48  ;;  %v1476_v33 = vmul.f32 0.13130644, %v1012_v21  ;;  %v1023_v21 = vpop.f32.mrb[11].mxu0 }
 0x250   : > { %9033 = vst [vmem:[#allocation53_spill] sm:$0xff] %v7453_v53  ;;  %v7476_v37 = vpack.c.bf16 %v1014_v24, %v1010_v7  ;;  %v1477_v8 = vmul.f32 0.13130644, %v1018_v18  ;;  %v1024_v24 = vadd.f32 %v1023_v21, %v7447_v23 }
 0x251   : > { %v7478_v39 = vpack.c.bf16 %v1476_v33, %v1475_v19  ;;  %v1022_v19 = vadd.f32 %v1021_v5, %v7445_v20 }
 0x253   : > { %v1027_v18 = vpop.f32.mrb[12].mxu0 }
 0x254   : > { %v1029_v5 = vpop.f32.mrb[13].mxu0 }
 0x258   : > { %v1353_v26 = vpop.f32.mrb[12].mxu1 }
 0x259   : > { %v1354_v34 = vadd.f32 %v1353_v26, %v7467_v6  ;;  %v1355_v36 = vpop.f32.mrb[13].mxu1 }
 0x25a   : > { %v1357_v16 = vpop.f32.mrb[14].mxu1  ;;  %v1356_v47 = vadd.f32 %v1355_v36, %v7473_v27 }
 0x25b   : > { %v1358_v49 = vadd.f32 %v1357_v16, %v7467_v6  ;;  %v1359_v50 = vpop.f32.mrb[15].mxu1  ;;  %v2797_v59 = vmul.f32 0.13130644, %v1354_v34  ;;  %v1478_v34 = vmul.f32 0.13130644, %v1022_v19 }
 0x25c   : > { %v1360_v57 = vadd.f32 %v1359_v50, %v7473_v27 }
 0x25d   : > { %v2798_v3 = vmul.f32 0.13130644, %v1358_v49  ;;  %v7496_v49 = vpack.c.bf16 %v1024_v24, %v1020_v4  ;;  %v7498_v56 = vpack.c.bf16 %v1478_v34, %v1477_v8  ;;  %v1031_v4 = vpop.f32.mrb[14].mxu0 }
 0x25e   : > { %v7485_v7 = vpack.c.bf16 %v1360_v57, %v1356_v47  ;;  %v1033_v34 = vpop.f32.mrb[15].mxu0 }
 0x25f   : > { %v7488_v22 = vpack.c.bf16 %v2798_v3, %v2797_v59  ;;  %v1028_v3 = vadd.f32 %v1027_v18, %v7445_v20 }
 0x260   : > { %v1363_v26 = vpop.f32.mrb[16].mxu1  ;;  %6010 = vmatprep.subr.msk.bf16.mxu1 %vm1501_vm0, %v7485_v7  ;;  %v1521_v33 = vsel %vm1501_vm0, %v7485_v7, 0 }
 0x261   : > { %v1364_v36 = vadd.f32 %v1363_v26, %v7467_v6  ;;  %v1365_v16 = vpop.f32.mrb[17].mxu1  ;;  %5444 = vmatpush3.bf16.xpose.msra.mxu1 %v1521_v33  ;;  %v1030_v26 = vadd.f32 %v1029_v5, %v7447_v23  ;;  %v1479_v8 = vmul.f32 0.13130644, %v1028_v3  ;;  %v1032_v33 = vadd.f32 %v1031_v4, %v7445_v20 }
 0x262   : > { %v1367_v50 = vpop.f32.mrb[18].mxu1  ;;  %v1366_v58 = vadd.f32 %v1365_v16, %v7473_v27  ;;  %v1034_v16 = vadd.f32 %v1033_v34, %v7447_v23 }
 0x263   : > { %v1368_v47 = vadd.f32 %v1367_v50, %v7467_v6  ;;  %v1369_v57 = vpop.f32.mrb[19].mxu1  ;;  %v2799_v19 = vmul.f32 0.13130644, %v1364_v36 }
 0x264   : > { %v1370_v59 = vadd.f32 %v1369_v57, %v7473_v27 }
 0x265   : > { %v2800_v21 = vmul.f32 0.13130644, %v1368_v47  ;;  %v1480_v47 = vmul.f32 0.13130644, %v1032_v33 }
 0x266   : > { %v7505_v24 = vpack.c.bf16 %v1370_v59, %v1366_v58  ;;  %v7516_v58 = vpack.c.bf16 %v1034_v16, %v1030_v26 }
 0x267   : > { %v7508_v50 = vpack.c.bf16 %v2800_v21, %v2799_v19  ;;  %v7518_v3 = vpack.c.bf16 %v1480_v47, %v1479_v8  ;;  %v1037_v21 = vpop.f32.mrb[16].mxu0 }
 0x268   : > { %v1373_v43 = vpop.f32.mrb[20].mxu1  ;;  %6011 = vmatprep.subr.msk.bf16.mxu1 %vm1501_vm0, %v7505_v24  ;;  %v1524_v36 = vsel %vm1501_vm0, %v7505_v24, 0  ;;  %v1038_v45 = vadd.f32 %v1037_v21, %v7445_v20  ;;  %v1039_v33 = vpop.f32.mrb[17].mxu0 }
 0x269   : > { %v1374_v57 = vadd.f32 %v1373_v43, %v7467_v6  ;;  %v1375_v18 = vpop.f32.mrb[21].mxu1  ;;  %5446 = vmatpush3.bf16.xpose.msra.mxu1 %v1524_v36  ;;  %v1040_v36 = vadd.f32 %v1039_v33, %v7447_v23  ;;  %v1041_v26 = vpop.f32.mrb[18].mxu0 }
 0x26a   : > { %v1377_v59 = vpop.f32.mrb[22].mxu1  ;;  %v1376_v4 = vadd.f32 %v1375_v18, %v7473_v27  ;;  %v1481_v8 = vmul.f32 0.13130644, %v1038_v45  ;;  %v1042_v47 = vadd.f32 %v1041_v26, %v7445_v20 }
 0x26b   : > { %v1378_v5 = vadd.f32 %v1377_v59, %v7467_v6  ;;  %v1379_v19 = vpop.f32.mrb[23].mxu1  ;;  %v2801_v42 = vmul.f32 0.13130644, %v1374_v57  ;;  %v1043_v59 = vpop.f32.mrb[19].mxu0 }
 0x26c   : > { %v1380_v34 = vadd.f32 %v1379_v19, %v7473_v27  ;;  %v1044_v18 = vadd.f32 %v1043_v59, %v7447_v23 }
 0x26d   : > { %v2802_v43 = vmul.f32 0.13130644, %v1378_v5  ;;  %v1482_v5 = vmul.f32 0.13130644, %v1042_v47 }
 0x26e   : > { %v7525_v16 = vpack.c.bf16 %v1380_v34, %v1376_v4  ;;  %v7536_v45 = vpack.c.bf16 %v1044_v18, %v1040_v36 }
 0x26f   : > { %v7528_v11 = vpack.c.bf16 %v2802_v43, %v2801_v42  ;;  %v7538_v34 = vpack.c.bf16 %v1482_v5, %v1481_v8  ;;  %v1047_v43 = vpop.f32.mrb[20].mxu0 }
 0x270   : > { %v1383_v13 = vpop.f32.mrb[24].mxu1  ;;  %6012 = vmatprep.subr.msk.bf16.mxu1 %vm1501_vm0, %v7525_v16  ;;  %v1527_v57 = vsel %vm1501_vm0, %v7525_v16, 0  ;;  %v1048_v55 = vadd.f32 %v1047_v43, %v7445_v20  ;;  %v1049_v47 = vpop.f32.mrb[21].mxu0 }
 0x271   : > { %v1384_v19 = vadd.f32 %v1383_v13, %v7467_v6  ;;  %v1385_v21 = vpop.f32.mrb[25].mxu1  ;;  %5448 = vmatpush3.bf16.xpose.msra.mxu1 %v1527_v57  ;;  %v1050_v57 = vadd.f32 %v1049_v47, %v7447_v23  ;;  %v1051_v36 = vpop.f32.mrb[22].mxu0 }
 0x272   : > { %v1387_v4 = vpop.f32.mrb[26].mxu1  ;;  %v1386_v26 = vadd.f32 %v1385_v21, %v7473_v27  ;;  %v1483_v8 = vmul.f32 0.13130644, %v1048_v55  ;;  %v1052_v5 = vadd.f32 %v1051_v36, %v7445_v20  ;;  %v6229_v36 = vld [vmem:[#allocation7 + $0x68] ss:$12 sps:$4 sm:$0xff]  }
 0x273   : > { %v1388_v42 = vadd.f32 %v1387_v4, %v7467_v6  ;;  %v1389_v33 = vpop.f32.mrb[27].mxu1  ;;  %v2803_v54 = vmul.f32 0.13130644, %v1384_v19  ;;  %v1053_v4 = vpop.f32.mrb[23].mxu0 }
 0x274   : > { %v1390_v59 = vadd.f32 %v1389_v33, %v7473_v27  ;;  %v1054_v21 = vadd.f32 %v1053_v4, %v7447_v23  ;;  %v6232_v4 = vld [vmem:[#allocation7 + $0xb0] ss:$12 sps:$4 sm:$0xff]  }
 0x275   : > { %v2804_v13 = vmul.f32 0.13130644, %v1388_v42  ;;  %v1484_v42 = vmul.f32 0.13130644, %v1052_v5  ;;  %v6231_v5 = vld [vmem:[#allocation7 + $0x98] ss:$12 sps:$4 sm:$0xff]  }
 0x276   : > { %v7545_v18 = vpack.c.bf16 %v1390_v59, %v1386_v26  ;;  %v7558_v55 = vpack.c.bf16 %v1054_v21, %v1050_v57  ;;  %v6228_v57 = vld [vmem:[#allocation7 + $0x50] ss:$12 sps:$4 sm:$0xff]  }
 0x277   : > { %v7548_v52 = vpack.c.bf16 %v2804_v13, %v2803_v54  ;;  %v7561_v26 = vpack.c.bf16 %v1484_v42, %v1483_v8  ;;  %v6227_v13 = vld [vmem:[#allocation7 + $0x38] ss:$12 sps:$4 sm:$0xff]   ;;  %v6230_v8 = vld [vmem:[#allocation7 + $0x80] ss:$12 sps:$4 sm:$0xff]  }
 0x278   : > { %v1393_v51 = vpop.f32.mrb[28].mxu1  ;;  %6013 = vmatprep.subr.msk.bf16.mxu1 %vm1501_vm0, %v7545_v18  ;;  %v1530_v19 = vsel %vm1501_vm0, %v7545_v18, 0 }
 0x279   : > { %v7556_v33 = vadd.f32 %v1393_v51, %v7467_v6  ;;  %v1395_v43 = vpop.f32.mrb[29].mxu1  ;;  %5450 = vmatpush3.bf16.xpose.msra.mxu1 %v1530_v19  ;;  %v6225_v51 = vld [vmem:[#allocation7 + $0x8] ss:$12 sps:$4 sm:$0xff]   ;;  %v6226_v6 = vld [vmem:[#allocation7 + $0x20] ss:$12 sps:$4 sm:$0xff]  }
 0x27a   : > { %v1396_v54 = vadd.f32 %v1395_v43, %v7473_v27  ;;  %v1397_v20 = vpop.f32.mrb[30].mxu1  ;;  %5408 = vmatpush3.bf16.msra.mxu0 %v6225_v51  ;;  %v9034_v27 = vmov 0.0  }
 0x27b   : > { %v1398_v23 = vpop.f32.mrb[31].mxu1  ;;  %5409 = vmatprep.subr.bf16.mxu0 %v9034_v27  ;;  %5423 = vmatprep.mubr.msk.bf16.mxu0 %vm6899_vm1, %v9034_v27 }
 0x27c   : > { %v7563_v59 = vpack.c.bf16 %v1396_v54, %v1396_v54 }
 0x27e   : > { %6014 = vmatprep.subr.msk.bf16.mxu1 %vm1501_vm0, %v7563_v59  ;;  %v1533_v47 = vsel %vm1501_vm0, %v7563_v59, 0  ;;  %5410 = vmatpush3.bf16.msra.mxu0 %v6226_v6 }
 0x27f   : > { %5411 = vmatprep.subr.bf16.mxu0 %v9034_v27 }
 0x281   : > { %5452 = vmatpush3.bf16.xpose.msra.mxu1 %v1533_v47 }
 0x282   : > { %5412 = vmatpush3.bf16.msra.mxu0 %v6227_v13 }
 0x283   : > { %5413 = vmatprep.subr.bf16.mxu0 %v9034_v27 }
 0x286   : > { %5414 = vmatpush3.bf16.msra.mxu0 %v6228_v57 }
 0x287   : > { %5415 = vmatprep.subr.bf16.mxu0 %v9034_v27 }
 0x288   : > { %5454 = vmatmul.mubr.msk.bf16.vlgmr.msra.gmra.mrb[32].mxu1 %vm1501_vm0, %v7478_v39 }
 0x289   : > { %5457 = vmatprep.mubr.msk.bf16.mxu1 %vm1501_vm0, %v7498_v56 }
 0x28a   : > { %5416 = vmatpush3.bf16.msra.mxu0 %v6229_v36 }
 0x28b   : > { %5417 = vmatprep.subr.bf16.mxu0 %v9034_v27 }
 0x28e   : > { %5418 = vmatpush3.bf16.msra.mxu0 %v6230_v8 }
 0x28f   : > { %5419 = vmatprep.subr.bf16.mxu0 %v9034_v27 }
 0x290   : > { %5458 = vmatmul.mubr.msk.bf16.gmra.mrb[36].mxu1 %vm1501_vm0, %v7518_v3 }
 0x291   : > { %5461 = vmatprep.mubr.msk.bf16.mxu1 %vm1501_vm0, %v7538_v34 }
 0x292   : > { %5420 = vmatpush3.bf16.msra.mxu0 %v6231_v5 }
 0x293   : > { %5421 = vmatprep.subr.bf16.mxu0 %v9034_v27 }
 0x296   : > { %5422 = vmatpush3.bf16.msra.mxu0 %v6232_v4 }
 0x298   : > { %5462 = vmatmul.mubr.msk.bf16.gmra.mrb[40].mxu1 %vm1501_vm0, %v7561_v26 }
 0x299   : > { %5424 = vmatmul.mubr.bf16.vlgmr.msra.gmra.mrb[24].mxu0 %v7394_v25 }
 0x29a   : > { %5427 = vmatprep.mubr.msk.bf16.mxu0 %vm6899_vm1, %v9034_v27 }
 0x2a1   : > { %5428 = vmatmul.mubr.bf16.gmra.mrb[28].mxu0 %v7402_v32 }
 0x2a2   : > { %5431 = vmatprep.mubr.msk.bf16.mxu0 %vm6899_vm1, %v9034_v27 }
 0x2a9   : > { %5432 = vmatmul.mubr.bf16.gmra.mrb[32].mxu0 %v7410_v35 }
 0x2aa   : > { %5435 = vmatprep.mubr.msk.bf16.mxu0 %vm6899_vm1, %v9034_v27 }
 0x2b1   : > { %5436 = vmatmul.mubr.bf16.gmra.mrb[36].mxu0 %v7418_v38 }
 0x2b2   : > { %5439 = vmatprep.mubr.msk.bf16.mxu0 %vm6899_vm1, %v9034_v27 }
 0x2b9   : > { %5440 = vmatmul.mubr.bf16.gmra.mrb[40].mxu0 %v7425_v41 }
 0x35b   : > { %v5455_v21 = vpop.f32.mrb[32].mxu1 }
 0x35c   : > { %v1569_v19 = vpop.f32.mrb[33].mxu1  ;;  %v1623_v42 = vsel %vm1616_vm2, %v5455_v21, -inf }
 0x35d   : > { %1624 = vmax.xlane.f32.xlu1 %v1623_v42  ;;  %v5456_v43 = vpop.f32.mrb[34].mxu1  ;;  %v1617_v54 = vsel %vm1616_vm2, %v1569_v19, -inf }
 0x35e   : > { %1618 = vmax.xlane.f32.xlu0 %v1617_v54  ;;  %v1572_v20 = vpop.f32.mrb[35].mxu1  ;;  %v1626_v23 = vsel %vm1616_vm2, %v5456_v43, -inf }
 0x35f   : > { %v1620_v47 = vsel %vm1616_vm2, %v1572_v20, -inf }
 0x361   : > { %1627 = vmax.xlane.f32.xlu1 %v1626_v23 }
 0x362   : > { %1621 = vmax.xlane.f32.xlu0 %v1620_v47 }
 0x363   : > { %v7605_v51 = vpop.f32.mrb[36].mxu1 }
 0x364   : > { %v7607_v41 = vpop.f32.mrb[37].mxu1  ;;  %v1635_v8 = vsel %vm1616_vm2, %v7605_v51, -inf }
 0x365   : > { %v7609_v6 = vpop.f32.mrb[38].mxu1  ;;  %v1629_v13 = vsel %vm1616_vm2, %v7607_v41, -inf }
 0x366   : > { %1630 = vmax.xlane.f32.xlu0 %v1629_v13  ;;  %v7613_v57 = vpop.f32.mrb[39].mxu1  ;;  %v1638_v5 = vsel %vm1616_vm2, %v7609_v6, -inf }
 0x367   : > { %v1632_v36 = vsel %vm1616_vm2, %v7613_v57, -inf }
 0x368   : > { %1633 = vmax.xlane.f32.xlu1 %v1632_v36 }
 0x36a   : > { %1636 = vmax.xlane.f32.xlu0 %v1635_v8 }
 0x36b   : > { %v7621_v4 = vpop.f32.mrb[40].mxu1 }
 0x36c   : > { %1639 = vmax.xlane.f32.xlu1 %v1638_v5  ;;  %v7623_v42 = vpop.f32.mrb[41].mxu1  ;;  %v1647_v36 = vsel %vm1616_vm2, %v7621_v4, -inf  ;;  %v9035_v5 = vsub.s32 2, %v7430_v44 }
 0x36d   : > { %v7625_v54 = vpop.f32.mrb[42].mxu1  ;;  %v1641_v23 = vsel %vm1616_vm2, %v7623_v42, -inf }
 0x36e   : > { %1642 = vmax.xlane.f32.xlu0 %v1641_v23  ;;  %v7629_v47 = vpop.f32.mrb[43].mxu1  ;;  %v1651_v8 = vsel %vm1650_vm3, %v7625_v54, -inf  ;;  %v7640_v31 = vrot.slane %v7459_v0, %v9035_v5  ;;  %v1434_v23 = vpop.f32.mrb[24].mxu0 }
 0x36f   : > { %v1644_v13 = vsel %vm1616_vm2, %v7629_v47, -inf  ;;  %v5425_v29 = vpop.f32.mrb[25].mxu0 }
 0x370   : > { %1645 = vmax.xlane.f32.xlu1 %v1644_v13  ;;  %v1435_v30 = vadd.f32 %v1434_v23, %v7640_v31  ;;  %v1437_v10 = vpop.f32.mrb[26].mxu0 }
 0x371   : > { %v1438_v13 = vadd.f32 %v1437_v10, %v7640_v31  ;;  %v5426_v63 = vpop.f32.mrb[27].mxu0 }
 0x372   : > { %1648 = vmax.xlane.f32.xlu0 %v1647_v36 }
 0x373   : > { %v7644_v36 = vpack.c.bf16 %v1438_v13, %v1435_v30 }
 0x374   : > { %1652 = vmax.xlane.f32.xlu1 %v1651_v8  ;;  %v1442_v29 = vpop.f32.mrb[28].mxu0 }
 0x375   : > { %5465 = vmatprep.subr.bf16.mxu0 %v7644_v36  ;;  %v1443_v10 = vadd.f32 %v1442_v29, %v7640_v31  ;;  %v5429_v63 = vpop.f32.mrb[29].mxu0 }
 0x376   : > { %5466 = vmatpush3.bf16.msra.mxu0 %v7644_v36 }
 0x3ea   : > { %v1625_v28 = vpop.xlane.xlu1 %1624 }
 0x3eb   : > { %v1656_v9 = vsub.f32 %v5455_v21, %v1625_v28  ;;  %v1619_v17 = vpop.xlane.xlu0 %1618 }
 0x3ec   : > { %v1654_v60 = vsub.f32 %v1569_v19, %v1619_v17 }
 0x3ed   : > { %v1670_v46 = vmul.f32 1.442695, %v1656_v9  ;;  %v1445_v9 = vpop.f32.mrb[30].mxu0 }
 0x3ee   : > { %v1666_v8 = vmul.f32 1.442695, %v1654_v60  ;;  %v1628_v44 = vpop.xlane.xlu1 %1627  ;;  %v5430_v60 = vpop.f32.mrb[31].mxu0 }
 0x3ef   : > { %6279 = vpow2.f32 %v1670_v46  ;;  %v1657_v0 = vsub.f32 %v5456_v43, %v1628_v44  ;;  %v1622_v5 = vpop.xlane.xlu0 %1621  ;;  %v1446_v46 = vadd.f32 %v1445_v9, %v7640_v31 }
 0x3f0   : > { %v1655_v23 = vsub.f32 %v1572_v20, %v1622_v5  ;;  %6281 = vpow2.f32 %v1666_v8  ;;  %v1450_v20 = vpop.f32.mrb[32].mxu0 }
 0x3f1   : > { %v1672_v28 = vmul.f32 1.442695, %v1657_v0  ;;  %v7652_v21 = vpack.c.bf16 %v1446_v46, %v1443_v10  ;;  %v1451_v0 = vadd.f32 %v1450_v20, %v7640_v31  ;;  %v5433_v5 = vpop.f32.mrb[33].mxu0 }
 0x3f2   : > { %v1668_v17 = vmul.f32 1.442695, %v1655_v23 }
 0x3f3   : > { %6283 = vpow2.f32 %v1672_v28  ;;  %v7649_v30 = vpop.xlane.xlu0 %1630  ;;  %5467 = vmatprep.subr.bf16.mxu0 %v7652_v21  ;;  %v1453_v28 = vpop.f32.mrb[34].mxu0 }
 0x3f4   : > { %6285 = vpow2.f32 %v1668_v17  ;;  %5468 = vmatpush3.bf16.msra.mxu0 %v7652_v21  ;;  %v5434_v17 = vpop.f32.mrb[35].mxu0 }
 0x3f5   : > { %v1634_v44 = vpop.xlane.xlu1 %1633 }
 0x3f6   : > { %v1659_v43 = vsub.f32 %v7613_v57, %v1634_v44  ;;  %v1454_v57 = vadd.f32 %v1453_v28, %v7640_v31  ;;  %v1458_v28 = vpop.f32.mrb[36].mxu0 }
 0x3f7   : > { %v7654_v19 = vpop.xlane.xlu0 %1636  ;;  %v5437_v17 = vpop.f32.mrb[37].mxu0 }
 0x3f8   : > { %v1676_v9 = vmul.f32 1.442695, %v1659_v43  ;;  %v7670_v20 = vpack.c.bf16 %v1454_v57, %v1451_v0  ;;  %v1459_v57 = vadd.f32 %v1458_v28, %v7640_v31  ;;  %v1461_v40 = vpop.f32.mrb[38].mxu0 }
 0x3f9   : > { %v7659_v13 = vpop.eup %6279  ;;  %v1640_v8 = vpop.xlane.xlu1 %1639 }
 0x3fa   : > { %v1661_v23 = vsub.f32 %v7609_v6, %v1640_v8  ;;  %v1696_v29 = vsel %vm1616_vm2, %v7659_v13, 0.0  ;;  %v7665_v10 = vpop.eup %6281  ;;  %5469 = vmatprep.subr.bf16.mxu0 %v7670_v20 }
 0x3fb   : > { %1697 = vadd.xlane.f32.xlu0 %v1696_v29  ;;  %v1643_v63 = vpop.xlane.xlu0 %1642  ;;  %v1690_v6 = vsel %vm1616_vm2, %v7665_v10, 0.0  ;;  %5470 = vmatpush3.bf16.msra.mxu0 %v7670_v20 }
 0x3fc   : > { %v1680_v46 = vmul.f32 1.442695, %v1661_v23  ;;  %v1662_v43 = vsub.f32 %v7623_v42, %v1643_v63  ;;  %v5438_v42 = vpop.f32.mrb[39].mxu0 }
 0x3fd   : > { %v7668_v60 = vpop.eup %6283  ;;  %v1646_v44 = vpop.xlane.xlu1 %1645 }
 0x3fe   : > { %6287 = vpow2.f32 %v1680_v46  ;;  %v1699_v8 = vsel %vm1616_vm2, %v7668_v60, 0.0  ;;  %v7676_v5 = vpop.eup %6285  ;;  %v1682_v63 = vmul.f32 1.442695, %v1662_v43  ;;  %v1466_v43 = vpop.f32.mrb[40].mxu0 }
 0x3ff   : > { %1691 = vadd.xlane.f32.xlu0 %v1690_v6  ;;  %v1649_v29 = vpop.xlane.xlu0 %1648  ;;  %1700 = vadd.xlane.f32.xlu1 %v1699_v8  ;;  %6289 = vpow2.f32 %v1676_v9  ;;  %v1693_v6 = vsel %vm1616_vm2, %v7676_v5, 0.0  ;;  %v1462_v9 = vadd.f32 %v1461_v40, %v7640_v31 }
 0x400   : > { %v1664_v23 = vsub.f32 %v7621_v4, %v1649_v29 }
 0x401   : > { %v1653_v0 = vpop.xlane.xlu1 %1652  ;;  %v7687_v8 = vpack.c.bf16 %v1462_v9, %v1459_v57 }
 0x402   : > { %v1686_v46 = vmul.f32 1.442695, %v1664_v23  ;;  %v1665_v4 = vsub.f32 %v7625_v54, %v1653_v0  ;;  %v1663_v23 = vsub.f32 %v7629_v47, %v1646_v44  ;;  %v1467_v54 = vadd.f32 %v1466_v43, %v7640_v31  ;;  %v5441_v0 = vpop.f32.mrb[41].mxu0 }
 0x403   : > { %1694 = vadd.xlane.f32.xlu1 %v1693_v6  ;;  %5471 = vmatprep.subr.bf16.mxu0 %v7687_v8 }
 0x404   : > { %6291 = vpow2.f32 %v1686_v46  ;;  %v1688_v28 = vmul.f32 1.442695, %v1665_v4  ;;  %5472 = vmatpush3.bf16.msra.mxu0 %v7687_v8  ;;  %v1684_v57 = vmul.f32 1.442695, %v1663_v23  ;;  %v1469_v46 = vpop.f32.mrb[42].mxu0  ;;  %v7701_v47 = vpack.c.bf16 %v1467_v54, %v1467_v54 }
 0x405   : > { %6293 = vpow2.f32 %v1682_v63  ;;  %v5442_v44 = vpop.f32.mrb[43].mxu0  ;;  %v1660_v54 = vsub.f32 %v7605_v51, %v7654_v19 }
 0x406   : > { %6295 = vpow2.f32 %v1688_v28  ;;  %6015 = vmatprep.subr.msk.bf16.mxu0 %vm1786_vm4, %v7701_v47  ;;  %v1788_v31 = vsel %vm1786_vm4, %v7701_v47, 0 }
 0x407   : > { %6297 = vpow2.f32 %v1684_v57  ;;  %v1678_v0 = vmul.f32 1.442695, %v1660_v54 }
 0x408   : > { %v7690_v29 = vpop.eup %6287  ;;  %5474 = vmatpush3.bf16.msra.mxu0 %v1788_v31 }
 0x409   : > { %v1711_v40 = vsel %vm1616_vm2, %v7690_v29, 0.0  ;;  %v7696_v17 = vpop.eup %6289  ;;  %6299 = vpow2.f32 %v1678_v0 }
 0x40a   : > { %1712 = vadd.xlane.f32.xlu1 %v1711_v40  ;;  %v1705_v6 = vsel %vm1616_vm2, %v7696_v17, 0.0 }
 0x40e   : > { %v7703_v9 = vpop.eup %6291  ;;  %1706 = vadd.xlane.f32.xlu1 %v1705_v6 }
 0x40f   : > { %v1720_v42 = vsel %vm1616_vm2, %v7703_v9, 0.0  ;;  %v7711_v63 = vpop.eup %6293 }
 0x410   : > { %v1714_v4 = vsel %vm1616_vm2, %v7711_v63, 0.0  ;;  %v7717_v23 = vpop.eup %6295 }
 0x411   : > { %v1723_v28 = vsel %vm1650_vm3, %v7717_v23, 0.0  ;;  %v7721_v40 = vpop.eup %6297 }
 0x412   : > { %1721 = vadd.xlane.f32.xlu1 %v1720_v42  ;;  %v1717_v43 = vsel %vm1616_vm2, %v7721_v40, 0.0 }
 0x413   : > { %v7731_v46 = vpop.eup %6299 }
 0x414   : > { %v1708_v6 = vsel %vm1616_vm2, %v7731_v46, 0.0 }
 0x415   : > { %2049 = vrot.lane.b32.xlu0 %v7485_v7, %s6900_s18  ;;  %v1658_v7 = vsub.f32 %v7607_v41, %v7649_v30 }
 0x416   : > { %1715 = vadd.xlane.f32.xlu1 %v1714_v4 }
 0x417   : > { %v1674_v57 = vmul.f32 1.442695, %v1658_v7 }
 0x419   : > { %6301 = vpow2.f32 %v1674_v57 }
 0x41a   : > { %1724 = vadd.xlane.f32.xlu1 %v1723_v28 }
 0x41e   : > { %1718 = vadd.xlane.f32.xlu1 %v1717_v43 }
 0x423   : > { %v7737_v51 = vpop.eup %6301 }
 0x424   : > { %v1702_v41 = vsel %vm1616_vm2, %v7737_v51, 0.0 }
 0x42f   : > { %2051 = vrot.lane.b32.xlu1 %v7505_v24, %s6900_s18 }
 0x433   : > { %2032 = vrot.lane.b32.xlu1 %v7461_v2, %s6900_s18 }
 0x434   : > { %1709 = vadd.xlane.f32.xlu0 %v1708_v6 }
 0x437   : > { %2036 = vrot.lane.b32.xlu1 %v7498_v56, %s6900_s18 }
 0x438   : > { %1703 = vadd.xlane.f32.xlu0 %v1702_v41 }
 0x43b   : > { %2040 = vrot.lane.b32.xlu1 %v7538_v34, %s6900_s18 }
 0x44e   : > { %2053 = vrot.lane.b32.xlu0 %v7525_v16, %s6900_s18 }
 0x452   : > { %2055 = vrot.lane.b32.xlu0 %v7545_v18, %s6900_s18 }
 0x456   : > { %2057 = vrot.lane.b32.xlu0 %v7563_v59, %s6900_s18 }
 0x45a   : > { %2034 = vrot.lane.b32.xlu0 %v7478_v39, %s6900_s18 }
 0x45e   : > { %2038 = vrot.lane.b32.xlu0 %v7518_v3, %s6900_s18 }
 0x462   : > { %2042 = vrot.lane.b32.xlu0 %v7561_v26, %s6900_s18 }
 0x488   : > { %v1698_v2 = vpop.xlane.xlu0 %1697 }
 0x48c   : > { %v1692_v56 = vpop.xlane.xlu0 %1691  ;;  %v1701_v24 = vpop.xlane.xlu1 %1700 }
 0x48d   : > { %6303 = vrcp.f32 %v1701_v24 }
 0x48e   : > { %6305 = vrcp.f32 %v1692_v56 }
 0x48f   : > { %6307 = vrcp.f32 %v1698_v2 }
 0x490   : > { %v2050_v16 = vpop.permute.xlu0 %2049  ;;  %v1695_v34 = vpop.xlane.xlu1 %1694 }
 0x491   : > { %6309 = vrcp.f32 %v1695_v34  ;;  %6016 = vmatprep.subr.msk.bf16.mxu0 %vm1501_vm0, %v2050_v16 }
 0x497   : > { %v1713_v18 = vpop.xlane.xlu1 %1712  ;;  %v6304_v59 = vpop.eup %6303 }
 0x498   : > { %v6306_v39 = vpop.eup %6305  ;;  %v7759_v3 = vmul.f32 %v6304_v59, %v7668_v60  ;;  %6311 = vrcp.f32 %v1713_v18 }
 0x499   : > { %v6308_v30 = vpop.eup %6307  ;;  %v7762_v44 = vmul.f32 %v6306_v39, %v7665_v10  ;;  %v2078_v10 = vsel %vm1501_vm0, %v2050_v16, 0 }
 0x49a   : > { %v7768_v42 = vmul.f32 %v6308_v30, %v7659_v13 }
 0x49b   : > { %v6310_v19 = vpop.eup %6309  ;;  %v1707_v26 = vpop.xlane.xlu1 %1706 }
 0x49c   : > { %v7765_v31 = vmul.f32 %v6310_v19, %v7676_v5  ;;  %v1763_v28 = vpack.c.bf16 %v7759_v3, %v7768_v42  ;;  %6313 = vrcp.f32 %v1707_v26 }
 0x49e   : > { %v1762_v4 = vpack.c.bf16 %v7765_v31, %v7762_v44 }
 0x49f   : > { %v1722_v43 = vpop.xlane.xlu1 %1721 }
 0x4a0   : > { %5475 = vmatprep.mubr.msk.bf16.mxu0 %vm1616_vm2, %v1762_v4 }
 0x4a1   : > { %5476 = vmatmul.mubr.msk.bf16.vlgmr.msra.gmra.mrb[44].mxu0 %vm1616_vm2, %v1763_v28 }
 0x4a2   : > { %5508 = vmatpush3.bf16.xpose.msra.mxu0 %v2078_v10  ;;  %v6312_v2 = vpop.eup %6311 }
 0x4a3   : > { %v1716_v60 = vpop.xlane.xlu1 %1715  ;;  %v7796_v28 = vmul.f32 %v6312_v2, %v7690_v29 }
 0x4a6   : > { %v6314_v56 = vpop.eup %6313 }
 0x4a7   : > { %v1725_v5 = vpop.xlane.xlu1 %1724  ;;  %v7789_v19 = vmul.f32 %v6314_v56, %v7696_v17 }
 0x4ab   : > { %v1719_v54 = vpop.xlane.xlu1 %1718 }
 0x4af   : > { %v2052_v7 = vpop.permute.xlu1 %2051 }
 0x4b0   : > { %6017 = vmatprep.subr.msk.bf16.mxu0 %vm1501_vm0, %v2052_v7  ;;  %v2081_v13 = vsel %vm1501_vm0, %v2052_v7, 0  ;;  %v6234_v7 = vld [vmem:[#allocation10 + $0x8] sm:$0xff]  }
 0x4b1   : > { %5510 = vmatpush3.bf16.xpose.msra.mxu0 %v2081_v13 }
 0x4c1   : > { %v1710_v0 = vpop.xlane.xlu0 %1709 }
 0x4c2   : > { %6315 = vrcp.f32 %v1710_v0  ;;  %v8971_v0 = vmov 0.0|0.0  }
 0x4c3   : > { %6317 = vrcp.f32 %v1719_v54  ;;  %v6233_v54 = vld [vmem:[#allocation10] sm:$0xff]  }
 0x4c4   : > { %6319 = vrcp.f32 %v1716_v60  ;;  %5487 = vmatprep.subr.bf16.mxu1 %v6233_v54 }
 0x4c5   : > { %v1704_v57 = vpop.xlane.xlu0 %1703  ;;  %5488 = vmatpush3.bf16.msra.mxu1 %v6233_v54 }
 0x4c6   : > { %6321 = vrcp.f32 %v1704_v57  ;;  %v2033_v57 = vpop.permute.xlu1 %2032  ;;  %5489 = vmatprep.subr.bf16.mxu1 %v6234_v7 }
 0x4c7   : > { %6323 = vrcp.f32 %v1725_v5 }
 0x4c8   : > { %6325 = vrcp.f32 %v1722_v43 }
 0x4c9   : > { %v2054_v6 = vpop.permute.xlu0 %2053  ;;  %5490 = vmatpush3.bf16.msra.mxu1 %v6234_v7 }
 0x4ca   : > { %6018 = vmatprep.subr.msk.bf16.mxu0 %vm1501_vm0, %v2054_v6  ;;  %v2084_v41 = vsel %vm1501_vm0, %v2054_v6, 0  ;;  %v2037_v6 = vpop.permute.xlu1 %2036 }
 0x4cb   : > { %5512 = vmatpush3.bf16.xpose.msra.mxu0 %v2084_v41 }
 0x4cc   : > { %v6316_v24 = vpop.eup %6315 }
 0x4cd   : > { %v2056_v16 = vpop.permute.xlu0 %2055  ;;  %v6318_v34 = vpop.eup %6317  ;;  %v7783_v39 = vmul.f32 %v6316_v24, %v7731_v46  ;;  %v6236_v24 = vld [vmem:[#allocation10 + $0x18] sm:$0xff]  }
 0x4ce   : > { %6019 = vmatprep.subr.msk.bf16.mxu0 %vm1501_vm0, %v2056_v16  ;;  %v6320_v18 = vpop.eup %6319  ;;  %v7792_v26 = vmul.f32 %v6318_v34, %v7721_v40  ;;  %v2087_v4 = vsel %vm1501_vm0, %v2056_v16, 0  ;;  %v2041_v2 = vpop.permute.xlu1 %2040  ;;  %v2845_v16 = vsel %vm1501_vm0, %v7496_v49, 0  ;;  %v2848_v34 = vsel %vm1501_vm0, %v7516_v58, 0 }
 0x4cf   : > { %v7801_v10 = vmul.f32 %v6320_v18, %v7711_v63  ;;  %v1765_v17 = vpack.c.bf16 %v7796_v28, %v7783_v39  ;;  %v2851_v18 = vsel %vm1501_vm0, %v7536_v45, 0 }
 0x4d0   : > { %v6322_v59 = vpop.eup %6321 }
 0x4d1   : > { %v7786_v30 = vmul.f32 %v6322_v59, %v7737_v51  ;;  %v2058_v43 = vpop.permute.xlu0 %2057  ;;  %v6324_v40 = vpop.eup %6323  ;;  %v1766_v29 = vpack.c.bf16 %v7792_v26, %v7801_v10  ;;  %v2854_v59 = vsel %vm1501_vm0, %v7558_v55, 0 }
 0x4d2   : > { %v6326_v51 = vpop.eup %6325  ;;  %v7812_v60 = vmul.f32 %v6324_v40, %v7717_v23  ;;  %v2090_v63 = vsel %vm1501_vm0, %v2058_v43, 0  ;;  %v6235_v23 = vld [vmem:[#allocation10 + $0x10] sm:$0xff]  }
 0x4d3   : > { %5514 = vmatpush3.bf16.xpose.msra.mxu0 %v2087_v4  ;;  %v1764_v46 = vpack.c.bf16 %v7789_v19, %v7786_v30  ;;  %v7816_v5 = vmul.f32 %v6326_v51, %v7703_v9  ;;  %5491 = vmatprep.subr.bf16.mxu1 %v6235_v23  ;;  %v2805_v4 = vmul.f32 0.13130644, %v7556_v33 }
 0x4d4   : > { %6020 = vmatprep.subr.msk.bf16.mxu0 %vm1501_vm0, %v2058_v43  ;;  %5492 = vmatpush3.bf16.msra.mxu1 %v6235_v23 }
 0x4d5   : > { %5479 = vmatprep.mubr.msk.bf16.mxu0 %vm1616_vm2, %v1764_v46  ;;  %v1767_v13 = vpack.c.bf16 %v7812_v60, %v7816_v5  ;;  %v2035_v9 = vpop.permute.xlu0 %2034  ;;  %5493 = vmatprep.subr.bf16.mxu1 %v6236_v24  ;;  %v7878_v43 = vpack.c.bf16 %v2805_v4, %v2805_v4 }
 0x4d6   : > { %5480 = vmatmul.mubr.msk.bf16.gmra.mrb[48].mxu0 %vm1616_vm2, %v1765_v17 }
 0x4d7   : > { %5483 = vmatprep.mubr.msk.bf16.mxu0 %vm1616_vm2, %v1766_v29 }
 0x4d8   : > { %5494 = vmatpush3.bf16.msra.mxu1 %v6236_v24 }
 0x4d9   : > { %v2039_v41 = vpop.permute.xlu0 %2038 }
 0x4db   : > { %5516 = vmatpush3.bf16.xpose.msra.mxu0 %v2090_v63 }
 0x4dc   : > { %5887 = vmatprep.subr.bf16.mxu0 %v8971_v0 }
 0x4dd   : > { %v2043_v56 = vpop.permute.xlu0 %2042 }
 0x4de   : > { %5484 = vmatmul.mubr.msk.bf16.gmra.mrb[52].mxu0 %vm1616_vm2, %v1767_v13 }
 0x4df   : > { %5517 = vmatprep.mubr.msk.bf16.mxu0 %vm1501_vm0, %v2033_v57 }
 0x4e6   : > { %5518 = vmatmul.mubr.msk.bf16.vlgmr.msra.gmra.mrb[56].mxu0 %vm1501_vm0, %v2035_v9 }
 0x4e7   : > { %5889 = vmatpush3.bf16.xpose.msra.mxu0 %v7394_v25  ;;  %5521 = vmatprep.mubr.msk.bf16.mxu0 %vm1501_vm0, %v2037_v6  ;;  %v6497_v25 = vld [vmem:[%s7381_s27 + $0x40] sm:$0xf] }
 0x4e8   : > { %5890 = vmatprep.subr.bf16.mxu0 %v8971_v0 }
 0x4ee   : > { %5522 = vmatmul.mubr.msk.bf16.gmra.mrb[60].mxu0 %vm1501_vm0, %v2039_v41 }
 0x4ef   : > { %5892 = vmatpush3.bf16.xpose.msra.mxu0 %v7402_v32  ;;  %5525 = vmatprep.mubr.msk.bf16.mxu0 %vm1501_vm0, %v2041_v2  ;;  %v8970_v32 = vmov 1.0  }
 0x4f0   : > { %5893 = vmatprep.subr.bf16.mxu0 %v8971_v0 }
 0x4f6   : > { %5526 = vmatmul.mubr.msk.bf16.gmra.mrb[64].mxu0 %vm1501_vm0, %v2043_v56 }
 0x4f7   : > { %5895 = vmatpush3.bf16.xpose.msra.mxu0 %v7410_v35  ;;  %5589 = vmatprep.mubr.msk.f32.mxu0 %vm6899_vm1, %v9034_v27  ;;  %v2839_v35 = vsel %vm1501_vm0, %v7457_v1, 0 }
 0x4f8   : > { %5896 = vmatprep.subr.bf16.mxu0 %v8971_v0 }
 0x4ff   : > { %5898 = vmatpush3.bf16.xpose.msra.mxu0 %v7418_v38  ;;  %v2842_v38 = vsel %vm1501_vm0, %v7476_v37, 0 }
 0x500   : > { %5587 = vmatprep.subr.mxu0 %v9034_v27 }
 0x507   : > { %5588 = vmatpush3.xpose.msra.mxu0 %v6497_v25 }
 0x508   : > { %5619 = vmatprep.subr.bf16.mxu0 %v9034_v27 }
 0x50a   : > { %5590 = vmatmul.mubr.f32.vlgmr.msra.gmra.mrb[68].mxu0 %v8970_v32 }
 0x50b   : > { %5620 = vmatpush3.bf16.xpose.msra.mxu0 %v2839_v35  ;;  %5631 = vmatprep.mubr.msk.bf16.mxu0 %vm6899_vm1, %v9034_v27 }
 0x50c   : > { %5621 = vmatprep.subr.bf16.mxu0 %v9034_v27 }
 0x513   : > { %5622 = vmatpush3.bf16.xpose.msra.mxu0 %v2842_v38 }
 0x514   : > { %5623 = vmatprep.subr.bf16.mxu0 %v9034_v27 }
 0x51b   : > { %5624 = vmatpush3.bf16.xpose.msra.mxu0 %v2845_v16 }
 0x51c   : > { %5625 = vmatprep.subr.bf16.mxu0 %v9034_v27 }
 0x523   : > { %5626 = vmatpush3.bf16.xpose.msra.mxu0 %v2848_v34 }
 0x524   : > { %5627 = vmatprep.subr.bf16.mxu0 %v9034_v27 }
 0x52b   : > { %5628 = vmatpush3.bf16.xpose.msra.mxu0 %v2851_v18 }
 0x52c   : > { %5629 = vmatprep.subr.bf16.mxu0 %v9034_v27 }
 0x533   : > { %5630 = vmatpush3.bf16.xpose.msra.mxu0 %v2854_v59 }
 0x534   : > { %5683 = vmatprep.subr.bf16.mxu0 %v9034_v27 }
 0x53a   : > { %5632 = vmatmul.mubr.msk.bf16.vlgmr.msra.gmra.mrb[72].mxu0 %vm1501_vm0, %v7488_v22 }
 0x53b   : > { %5635 = vmatprep.mubr.msk.bf16.mxu0 %vm6899_vm1, %v9034_v27 }
 0x542   : > { %5636 = vmatmul.mubr.msk.bf16.gmra.mrb[76].mxu0 %vm1501_vm0, %v7508_v50 }
 0x543   : > { %5639 = vmatprep.mubr.msk.bf16.mxu0 %vm6899_vm1, %v9034_v27 }
 0x54a   : > { %5640 = vmatmul.mubr.msk.bf16.gmra.mrb[80].mxu0 %vm1501_vm0, %v7528_v11 }
 0x54b   : > { %5643 = vmatprep.mubr.msk.bf16.mxu0 %vm6899_vm1, %v9034_v27 }
 0x552   : > { %5644 = vmatmul.mubr.msk.bf16.gmra.mrb[84].mxu0 %vm1501_vm0, %v7548_v52 }
 0x553   : > { %5647 = vmatprep.mubr.msk.bf16.mxu0 %vm6899_vm1, %v9034_v27 }
 0x55a   : > { %5648 = vmatmul.mubr.msk.bf16.gmra.mrb[88].mxu0 %vm1501_vm0, %v7878_v43 }
 0x55b   : > { %5691 = vmatprep.mubr.msk.bf16.mxu0 %vm6899_vm1, %v9034_v27 }
 0x574   : > { %v5477_v46 = vpop.f32.mrb[44].mxu0 }
 0x575   : > { %v1824_v17 = vpop.f32.mrb[45].mxu0 }
 0x576   : > { %v5478_v40 = vpop.f32.mrb[46].mxu0 }
 0x577   : > { %v1872_v29 = vpack.c.bf16 %v5478_v40, %v5477_v46  ;;  %v1827_v51 = vpop.f32.mrb[47].mxu0 }
 0x578   : > { %v1871_v63 = vpack.c.bf16 %v1827_v51, %v1824_v17 }
 0x57a   : > { %5495 = vmatprep.mubr.msk.bf16.mxu1 %vm1501_vm0, %v1871_v63 }
 0x57b   : > { %5496 = vmatmul.mubr.msk.bf16.vlgmr.msra.gmra.mrb[44].mxu1 %vm1501_vm0, %v1872_v29 }
 0x5a9   : > { %v5481_v54 = vpop.f32.mrb[48].mxu0 }
 0x5aa   : > { %v1840_v33 = vpop.f32.mrb[49].mxu0 }
 0x5ab   : > { %v5482_v7 = vpop.f32.mrb[50].mxu0 }
 0x5ac   : > { %v1874_v13 = vpack.c.bf16 %v5482_v7, %v5481_v54  ;;  %v1843_v57 = vpop.f32.mrb[51].mxu0 }
 0x5ad   : > { %v1873_v23 = vpack.c.bf16 %v1843_v57, %v1840_v33 }
 0x5af   : > { %5499 = vmatprep.mubr.msk.bf16.mxu1 %vm1501_vm0, %v1873_v23 }
 0x5b0   : > { %5500 = vmatmul.mubr.msk.bf16.gmra.mrb[48].mxu1 %vm1501_vm0, %v1874_v13 }
 0x5b1   : > { %v5485_v9 = vpop.f32.mrb[52].mxu0 }
 0x5b2   : > { %v1856_v6 = vpop.f32.mrb[53].mxu0 }
 0x5b3   : > { %v5486_v41 = vpop.f32.mrb[54].mxu0 }
 0x5b4   : > { %v1876_v2 = vpack.c.bf16 %v5486_v41, %v5485_v9  ;;  %v1859_v56 = vpop.f32.mrb[55].mxu0 }
 0x5b5   : > { %v1875_v24 = vpack.c.bf16 %v1859_v56, %v1856_v6 }
 0x5b7   : > { %5503 = vmatprep.mubr.msk.bf16.mxu1 %vm1501_vm0, %v1875_v24 }
 0x5b8   : > { %5504 = vmatmul.mubr.msk.bf16.gmra.mrb[52].mxu1 %vm1501_vm0, %v1876_v2 }
 0x5b9   : > { %v7890_v25 = vpop.f32.mrb[56].mxu0 }
 0x5ba   : > { %v7892_v35 = vpop.f32.mrb[57].mxu0  ;;  %v2179_v38 = vsel %vm1616_vm2, %v7890_v25, -inf }
 0x5bb   : > { %2180 = vmax.xlane.f32.xlu0 %v2179_v38  ;;  %v7896_v16 = vpop.f32.mrb[58].mxu0  ;;  %v2173_v34 = vsel %vm1616_vm2, %v7892_v35, -inf }
 0x5bc   : > { %2174 = vmax.xlane.f32.xlu1 %v2173_v34  ;;  %v7900_v18 = vpop.f32.mrb[59].mxu0  ;;  %v2182_v17 = vsel %vm1616_vm2, %v7896_v16, -inf }
 0x5bd   : > { %v2176_v59 = vsel %vm1616_vm2, %v7900_v18, -inf }
 0x5bf   : > { %2177 = vmax.xlane.f32.xlu0 %v2176_v59 }
 0x5c1   : > { %v7904_v4 = vpop.f32.mrb[60].mxu0 }
 0x5c2   : > { %v7906_v46 = vpop.f32.mrb[61].mxu0  ;;  %v2191_v40 = vsel %vm1616_vm2, %v7904_v4, -inf }
 0x5c3   : > { %2183 = vmax.xlane.f32.xlu0 %v2182_v17  ;;  %2192 = vmax.xlane.f32.xlu1 %v2191_v40  ;;  %v7912_v29 = vpop.f32.mrb[62].mxu0  ;;  %v2185_v54 = vsel %vm1616_vm2, %v7906_v46, -inf }
 0x5c4   : > { %v7914_v51 = vpop.f32.mrb[63].mxu0  ;;  %v2194_v13 = vsel %vm1616_vm2, %v7912_v29, -inf }
 0x5c5   : > { %v2188_v63 = vsel %vm1616_vm2, %v7914_v51, -inf }
 0x5c7   : > { %2186 = vmax.xlane.f32.xlu1 %v2185_v54  ;;  %2189 = vmax.xlane.f32.xlu0 %v2188_v63 }
 0x5c9   : > { %v7920_v33 = vpop.f32.mrb[64].mxu0 }
 0x5ca   : > { %v7922_v7 = vpop.f32.mrb[65].mxu0  ;;  %v2203_v57 = vsel %vm1616_vm2, %v7920_v33, -inf }
 0x5cb   : > { %2195 = vmax.xlane.f32.xlu0 %v2194_v13  ;;  %2204 = vmax.xlane.f32.xlu1 %v2203_v57  ;;  %v7928_v23 = vpop.f32.mrb[66].mxu0  ;;  %v2197_v41 = vsel %vm1616_vm2, %v7922_v7, -inf }
 0x5cc   : > { %v7930_v9 = vpop.f32.mrb[67].mxu0  ;;  %v2206_v2 = vsel %vm1650_vm3, %v7928_v23, -inf }
 0x5cd   : > { %v2200_v6 = vsel %vm1616_vm2, %v7930_v9, -inf }
 0x5cf   : > { %2198 = vmax.xlane.f32.xlu1 %v2197_v41  ;;  %2201 = vmax.xlane.f32.xlu0 %v2200_v6 }
 0x5d3   : > { %2207 = vmax.xlane.f32.xlu0 %v2206_v2 }
 0x5dd   : > { %v7938_v56 = vpop.f32.mrb[68].mxu0 }
 0x5de   : > { %9036 = vst [vmem:[#allocation54_spill] sm:$0xff] %v7938_v56  ;;  %v5591_v24 = vpop.f32.mrb[69].mxu0 }
 0x5e0   : > { %2328 = vrot.lane.b32.xlu1 %v7644_v36, %s6900_s18 }
 0x60d   : > { %v7942_v38 = vpop.f32.mrb[72].mxu0 }
 0x60e   : > { %v5633_v34 = vpop.f32.mrb[73].mxu0 }
 0x60f   : > { %v7944_v59 = vpop.f32.mrb[74].mxu0 }
 0x610   : > { %v5634_v17 = vpop.f32.mrb[75].mxu0 }
 0x615   : > { %v7946_v40 = vpop.f32.mrb[76].mxu0 }
 0x616   : > { %v5637_v63 = vpop.f32.mrb[77].mxu0 }
 0x617   : > { %v7948_v54 = vpop.f32.mrb[78].mxu0 }
 0x618   : > { %v5638_v13 = vpop.f32.mrb[79].mxu0 }
 0x61d   : > { %v7950_v57 = vpop.f32.mrb[80].mxu0 }
 0x61e   : > { %v5641_v6 = vpop.f32.mrb[81].mxu0 }
 0x61f   : > { %v7952_v41 = vpop.f32.mrb[82].mxu0 }
 0x620   : > { %v5642_v2 = vpop.f32.mrb[83].mxu0 }
 0x625   : > { %v7954_v24 = vpop.f32.mrb[84].mxu0 }
 0x626   : > { %v5645_v36 = vpop.f32.mrb[85].mxu0 }
 0x627   : > { %v7956_v32 = vpop.f32.mrb[86].mxu0 }
 0x628   : > { %v5646_v34 = vpop.f32.mrb[87].mxu0 }
 0x62d   : > { %v7958_v0 = vpop.f32.mrb[88].mxu0 }
 0x62e   : > { %v5649_v17 = vpop.f32.mrb[89].mxu0 }
 0x62f   : > { %v2925_v12 = vpop.f32.mrb[90].mxu0 }
 0x630   : > { %v5650_v63 = vpop.f32.mrb[91].mxu0 }
 0x648   : > { %v2181_v48 = vpop.xlane.xlu0 %2180 }
 0x649   : > { %v2211_v13 = vsub.f32 %v7890_v25, %v2181_v48  ;;  %v2175_v53 = vpop.xlane.xlu1 %2174 }
 0x64a   : > { %v2209_v6 = vsub.f32 %v7892_v35, %v2175_v53 }
 0x64b   : > { %v2225_v14 = vmul.f32 1.442695, %v2211_v13 }
 0x64c   : > { %v2221_v15 = vmul.f32 1.442695, %v2209_v6  ;;  %v2178_v2 = vpop.xlane.xlu0 %2177 }
 0x64d   : > { %6327 = vpow2.f32 %v2225_v14  ;;  %v2210_v36 = vsub.f32 %v7900_v18, %v2178_v2 }
 0x64e   : > { %6329 = vpow2.f32 %v2221_v15 }
 0x64f   : > { %v2223_v17 = vmul.f32 1.442695, %v2210_v36 }
 0x650   : > { %v2184_v61 = vpop.xlane.xlu0 %2183  ;;  %v2193_v34 = vpop.xlane.xlu1 %2192 }
 0x651   : > { %v2212_v62 = vsub.f32 %v7896_v16, %v2184_v61 }
 0x653   : > { %v2227_v12 = vmul.f32 1.442695, %v2212_v62 }
 0x654   : > { %v2187_v63 = vpop.xlane.xlu1 %2186  ;;  %v2190_v13 = vpop.xlane.xlu0 %2189 }
 0x655   : > { %6331 = vpow2.f32 %v2227_v12  ;;  %v2214_v2 = vsub.f32 %v7914_v51, %v2190_v13  ;;  %v2215_v12 = vsub.f32 %v7904_v4, %v2193_v34 }
 0x656   : > { %6333 = vpow2.f32 %v2223_v17  ;;  %v2213_v17 = vsub.f32 %v7906_v46, %v2187_v63 }
 0x657   : > { %v7964_v56 = vpop.eup %6327 }
 0x658   : > { %v2205_v48 = vpop.xlane.xlu1 %2204  ;;  %v2251_v53 = vsel %vm1616_vm2, %v7964_v56, 0.0  ;;  %v7968_v25 = vpop.eup %6329 }
 0x659   : > { %2252 = vadd.xlane.f32.xlu1 %v2251_v53  ;;  %v2245_v15 = vsel %vm1616_vm2, %v7968_v25, 0.0  ;;  %v2196_v6 = vpop.xlane.xlu0 %2195  ;;  %v2231_v53 = vmul.f32 1.442695, %v2214_v2  ;;  %v2219_v4 = vsub.f32 %v7920_v33, %v2205_v48 }
 0x65b   : > { %6335 = vpow2.f32 %v2231_v53  ;;  %v2932_v53 = vsel %vm2928_vm5, %v7944_v59, -inf }
 0x65c   : > { %v2199_v14 = vpop.xlane.xlu1 %2198 }
 0x65d   : > { %2246 = vadd.xlane.f32.xlu1 %v2245_v15  ;;  %v2202_v36 = vpop.xlane.xlu0 %2201  ;;  %v2217_v46 = vsub.f32 %v7922_v7, %v2199_v14 }
 0x65e   : > { %v2218_v15 = vsub.f32 %v7930_v9, %v2202_v36 }
 0x65f   : > { %v7972_v61 = vpop.eup %6331  ;;  %v2237_v34 = vmul.f32 1.442695, %v2217_v46  ;;  %v2941_v46 = vsel %vm2928_vm5, %v7950_v57, -inf }
 0x660   : > { %v2329_v62 = vpop.permute.xlu1 %2328  ;;  %v2254_v35 = vsel %vm1616_vm2, %v7972_v61, 0.0  ;;  %v7976_v16 = vpop.eup %6333 }
 0x661   : > { %2255 = vadd.xlane.f32.xlu0 %v2254_v35  ;;  %5529 = vmatprep.subr.bf16.mxu1 %v2329_v62  ;;  %v2248_v18 = vsel %vm1616_vm2, %v7976_v16, 0.0  ;;  %v2239_v35 = vmul.f32 1.442695, %v2218_v15 }
 0x662   : > { %5530 = vmatpush3.bf16.msra.mxu1 %v2329_v62  ;;  %v2233_v62 = vmul.f32 1.442695, %v2215_v12 }
 0x665   : > { %2249 = vadd.xlane.f32.xlu0 %v2248_v18  ;;  %v7996_v9 = vpop.eup %6335 }
 0x66e   : > { %2332 = vrot.lane.b32.xlu1 %v7670_v20, %s6900_s18  ;;  %v2229_v20 = vmul.f32 1.442695, %v2213_v17 }
 0x670   : > { %6337 = vpow2.f32 %v2229_v20 }
 0x671   : > { %6339 = vpow2.f32 %v2233_v62 }
 0x672   : > { %2334 = vrot.lane.b32.xlu1 %v7687_v8, %s6900_s18  ;;  %v2208_v8 = vpop.xlane.xlu0 %2207  ;;  %6341 = vpow2.f32 %v2239_v35  ;;  %v2929_v35 = vsel %vm2928_vm5, %v7942_v38, -inf }
 0x676   : > { %2336 = vrot.lane.b32.xlu1 %v7701_v47, %s6900_s18  ;;  %v2216_v47 = vsub.f32 %v7912_v29, %v2196_v6  ;;  %v2241_v29 = vmul.f32 1.442695, %v2219_v4  ;;  %v2954_v4 = vsel %vm2953_vm6, %v7958_v0, -inf }
 0x678   : > { %v2235_v51 = vmul.f32 1.442695, %v2216_v47  ;;  %v2944_v47 = vsel %vm2928_vm5, %v7952_v41, -inf }
 0x67a   : > { %6343 = vpow2.f32 %v2235_v51  ;;  %v7998_v18 = vpop.eup %6337  ;;  %v2935_v51 = vsel %vm2928_vm5, %v7946_v40, -inf }
 0x67b   : > { %2330 = vrot.lane.b32.xlu0 %v7652_v21, %s6900_s18  ;;  %v2220_v21 = vsub.f32 %v7928_v23, %v2208_v8  ;;  %v8000_v13 = vpop.eup %6339  ;;  %v2260_v23 = vsel %vm1616_vm2, %v7996_v9, 0.0  ;;  %v2257_v7 = vsel %vm1616_vm2, %v7998_v18, 0.0  ;;  %v2938_v8 = vsel %vm2928_vm5, %v7948_v54, -inf }
 0x67c   : > { %v8006_v14 = vpop.eup %6341  ;;  %v2263_v6 = vsel %vm1616_vm2, %v8000_v13, 0.0 }
 0x67d   : > { %v2243_v63 = vmul.f32 1.442695, %v2220_v21  ;;  %v2272_v48 = vsel %vm1616_vm2, %v8006_v14, 0.0  ;;  %v2950_v21 = vsel %vm2928_vm5, %v7956_v32, -inf }
 0x67f   : > { %6345 = vpow2.f32 %v2243_v63  ;;  %v2947_v63 = vsel %vm2928_vm5, %v7954_v24, -inf }
 0x680   : > { %6347 = vpow2.f32 %v2237_v34 }
 0x681   : > { %6349 = vpow2.f32 %v2241_v29 }
 0x684   : > { %v8008_v33 = vpop.eup %6343 }
 0x685   : > { %v2266_v17 = vsel %vm1616_vm2, %v8008_v33, 0.0 }
 0x689   : > { %v8014_v2 = vpop.eup %6345 }
 0x68a   : > { %v2278_v36 = vsel %vm1650_vm3, %v8014_v2, 0.0  ;;  %v8020_v12 = vpop.eup %6347 }
 0x68b   : > { %v2269_v20 = vsel %vm1616_vm2, %v8020_v12, 0.0  ;;  %v8026_v15 = vpop.eup %6349 }
 0x68c   : > { %v2275_v62 = vsel %vm1616_vm2, %v8026_v15, 0.0 }
 0x69a   : > { %2261 = vadd.xlane.f32.xlu1 %v2260_v23  ;;  %2258 = vadd.xlane.f32.xlu0 %v2257_v7 }
 0x69e   : > { %2273 = vadd.xlane.f32.xlu1 %v2272_v48  ;;  %2264 = vadd.xlane.f32.xlu0 %v2263_v6 }
 0x6a2   : > { %2279 = vadd.xlane.f32.xlu1 %v2278_v36  ;;  %2267 = vadd.xlane.f32.xlu0 %v2266_v17 }
 0x6a6   : > { %2933 = vmax.xlane.f32.xlu1 %v2932_v53  ;;  %2270 = vadd.xlane.f32.xlu0 %v2269_v20 }
 0x6aa   : > { %2939 = vmax.xlane.f32.xlu1 %v2938_v8  ;;  %2276 = vadd.xlane.f32.xlu0 %v2275_v62 }
 0x6ae   : > { %2945 = vmax.xlane.f32.xlu1 %v2944_v47  ;;  %2930 = vmax.xlane.f32.xlu0 %v2929_v35 }
 0x6b2   : > { %2951 = vmax.xlane.f32.xlu1 %v2950_v21  ;;  %2936 = vmax.xlane.f32.xlu0 %v2935_v51 }
 0x6b6   : > { %2942 = vmax.xlane.f32.xlu0 %v2941_v46 }
 0x6ba   : > { %2948 = vmax.xlane.f32.xlu0 %v2947_v63 }
 0x6be   : > { %2955 = vmax.xlane.f32.xlu0 %v2954_v4 }
 0x6e6   : > { %v2253_v34 = vpop.xlane.xlu1 %2252 }
 0x6e7   : > { %6351 = vrcp.f32 %v2253_v34 }
 0x6ea   : > { %v2247_v29 = vpop.xlane.xlu1 %2246 }
 0x6eb   : > { %6353 = vrcp.f32 %v2247_v29 }
 0x6ee   : > { %v2256_v23 = vpop.xlane.xlu0 %2255  ;;  %v2333_v6 = vpop.permute.xlu1 %2332 }
 0x6ef   : > { %6355 = vrcp.f32 %v2256_v23 }
 0x6f1   : > { %v6352_v48 = vpop.eup %6351 }
 0x6f2   : > { %v2250_v7 = vpop.xlane.xlu0 %2249  ;;  %v2295_v36 = vmul.f32 %v6352_v48, %v7964_v56  ;;  %v2335_v47 = vpop.permute.xlu1 %2334 }
 0x6f3   : > { %6357 = vrcp.f32 %v2250_v7 }
 0x6f4   : > { %v2307_v8 = vadd.f32 %v2295_v36, %v7768_v42 }
 0x6f5   : > { %v6354_v53 = vpop.eup %6353 }
 0x6f6   : > { %v2331_v17 = vpop.permute.xlu0 %2330  ;;  %v2293_v35 = vmul.f32 %v6354_v53, %v7968_v25  ;;  %v8053_v63 = vmul.f32 0.5, %v2307_v8  ;;  %v2337_v34 = vpop.permute.xlu1 %2336 }
 0x6f7   : > { %5531 = vmatprep.subr.bf16.mxu1 %v2331_v17 }
 0x6f8   : > { %5532 = vmatpush3.bf16.msra.mxu1 %v2331_v17  ;;  %v2305_v46 = vadd.f32 %v2293_v35, %v7762_v44  ;;  %v2361_v44 = vsel %vm1786_vm4, %v2337_v34, 0 }
 0x6f9   : > { %v6356_v20 = vpop.eup %6355  ;;  %5533 = vmatprep.subr.bf16.mxu1 %v2333_v6 }
 0x6fa   : > { %v2296_v62 = vmul.f32 %v6356_v20, %v7972_v61 }
 0x6fc   : > { %5534 = vmatpush3.bf16.msra.mxu1 %v2333_v6  ;;  %v2308_v21 = vadd.f32 %v2296_v62, %v7759_v3  ;;  %v8062_v3 = vmul.f32 0.5, %v2305_v46  ;;  %v2318_v23 = vpack.c.bf16 %v2296_v62, %v2295_v36 }
 0x6fd   : > { %v6358_v51 = vpop.eup %6357  ;;  %5535 = vmatprep.subr.bf16.mxu1 %v2335_v47 }
 0x6fe   : > { %v2294_v56 = vmul.f32 %v6358_v51, %v7976_v16  ;;  %v8055_v4 = vmul.f32 0.5, %v2308_v21 }
 0x700   : > { %5536 = vmatpush3.bf16.msra.mxu1 %v2335_v47  ;;  %v2306_v42 = vadd.f32 %v2294_v56, %v7765_v31  ;;  %v2317_v61 = vpack.c.bf16 %v2294_v56, %v2293_v35  ;;  %v5904_v25 = vpack.c.bf16 %v8055_v4, %v8053_v63 }
 0x701   : > { %6021 = vmatprep.subr.msk.bf16.mxu1 %vm1786_vm4, %v2337_v34 }
 0x702   : > { %5539 = vmatprep.mubr.msk.bf16.mxu1 %vm1616_vm2, %v2317_v61  ;;  %v8064_v16 = vmul.f32 0.5, %v2306_v42 }
 0x704   : > { %5538 = vmatpush3.bf16.msra.mxu1 %v2361_v44  ;;  %v5900_v29 = vpack.c.bf16 %v8064_v16, %v8062_v3 }
 0x707   : > { %5540 = vmatmul.mubr.msk.bf16.vlgmr.msra.gmra.mrb[56].mxu1 %vm1616_vm2, %v2318_v23 }
 0x727   : > { %v2259_v31 = vpop.xlane.xlu0 %2258  ;;  %v2262_v7 = vpop.xlane.xlu1 %2261 }
 0x728   : > { %6359 = vrcp.f32 %v2259_v31  ;;  %v6237_v31 = vld [vmem:[#allocation10 + $0x20] sm:$0xff]  }
 0x729   : > { %6361 = vrcp.f32 %v2262_v7  ;;  %v6238_v7 = vld [vmem:[#allocation10 + $0x28] sm:$0xff]   ;;  %5551 = vmatprep.subr.bf16.mxu1 %v6237_v31 }
 0x72a   : > { %5552 = vmatpush3.bf16.msra.mxu1 %v6237_v31 }
 0x72b   : > { %v2265_v48 = vpop.xlane.xlu0 %2264  ;;  %v2274_v6 = vpop.xlane.xlu1 %2273  ;;  %5553 = vmatprep.subr.bf16.mxu1 %v6238_v7 }
 0x72c   : > { %6363 = vrcp.f32 %v2265_v48 }
 0x72d   : > { %6365 = vrcp.f32 %v2274_v6 }
 0x72e   : > { %5554 = vmatpush3.bf16.msra.mxu1 %v6238_v7 }
 0x72f   : > { %v2268_v17 = vpop.xlane.xlu0 %2267  ;;  %v2280_v53 = vpop.xlane.xlu1 %2279 }
 0x730   : > { %6367 = vrcp.f32 %v2268_v17 }
 0x731   : > { %6369 = vrcp.f32 %v2280_v53 }
 0x732   : > { %v6360_v20 = vpop.eup %6359 }
 0x733   : > { %v6362_v8 = vpop.eup %6361  ;;  %v2271_v47 = vpop.xlane.xlu0 %2270  ;;  %v2297_v36 = vmul.f32 %v6360_v20, %v7998_v18 }
 0x734   : > { %v2934_v35 = vpop.xlane.xlu1 %2933  ;;  %6371 = vrcp.f32 %v2271_v47  ;;  %v2298_v21 = vmul.f32 %v6362_v8, %v7996_v9 }
 0x735   : > { %v2958_v62 = vsub.f32 %v7944_v59, %v2934_v35  ;;  %v2309_v51 = vadd.f32 %v2297_v36, %v7786_v30 }
 0x736   : > { %v6364_v56 = vpop.eup %6363  ;;  %v2310_v34 = vadd.f32 %v2298_v21, %v7789_v19  ;;  %v2319_v42 = vpack.c.bf16 %v2298_v21, %v2297_v36 }
 0x737   : > { %v2968_v46 = vmul.f32 1.442695, %v2958_v62  ;;  %v2277_v61 = vpop.xlane.xlu0 %2276  ;;  %v8075_v44 = vmul.f32 0.5, %v2309_v51  ;;  %v6366_v48 = vpop.eup %6365  ;;  %v2299_v30 = vmul.f32 %v6364_v56, %v8000_v13 }
 0x738   : > { %v2940_v23 = vpop.xlane.xlu1 %2939  ;;  %5543 = vmatprep.mubr.msk.bf16.mxu1 %vm1616_vm2, %v2319_v42  ;;  %v8078_v59 = vmul.f32 0.5, %v2310_v34  ;;  %v2302_v20 = vmul.f32 %v6366_v48, %v8006_v14 }
 0x739   : > { %6373 = vpow2.f32 %v2968_v46  ;;  %v2960_v9 = vsub.f32 %v7948_v54, %v2940_v23  ;;  %v2311_v54 = vadd.f32 %v2299_v30, %v7783_v39 }
 0x73a   : > { %6375 = vrcp.f32 %v2277_v61  ;;  %v6368_v19 = vpop.eup %6367  ;;  %v5908_v6 = vpack.c.bf16 %v8078_v59, %v8075_v44 }
 0x73b   : > { %v2972_v18 = vmul.f32 1.442695, %v2960_v9  ;;  %v2931_v17 = vpop.xlane.xlu0 %2930  ;;  %v2300_v53 = vmul.f32 %v6368_v19, %v8008_v33  ;;  %v6370_v13 = vpop.eup %6369  ;;  %v2314_v33 = vadd.f32 %v2302_v20, %v7792_v26  ;;  %v8095_v39 = vmul.f32 0.5, %v2311_v54 }
 0x73c   : > { %v2957_v8 = vsub.f32 %v7942_v38, %v2931_v17 }
 0x73d   : > { %6377 = vpow2.f32 %v2972_v18  ;;  %v2312_v47 = vadd.f32 %v2300_v53, %v7796_v28  ;;  %v2320_v35 = vpack.c.bf16 %v2300_v53, %v2299_v30  ;;  %v2304_v28 = vmul.f32 %v6370_v13, %v8014_v2 }
 0x73e   : > { %v6372_v36 = vpop.eup %6371  ;;  %v2966_v62 = vmul.f32 1.442695, %v2957_v8 }
 0x73f   : > { %v2937_v21 = vpop.xlane.xlu0 %2936  ;;  %5544 = vmatmul.mubr.msk.bf16.gmra.mrb[60].mxu1 %vm1616_vm2, %v2320_v35  ;;  %v8090_v51 = vmul.f32 0.5, %v2312_v47  ;;  %v2301_v14 = vmul.f32 %v6372_v36, %v8020_v12  ;;  %v2316_v7 = vadd.f32 %v2304_v28, %v7812_v60  ;;  %v6239_v47 = vld [vmem:[#allocation10 + $0x30] sm:$0xff]   ;;  %v6240_v35 = vld [vmem:[#allocation10 + $0x38] sm:$0xff]   ;;  %v9037_v36 = vmov 0.0|0.0  }
 0x740   : > { %6379 = vpow2.f32 %v2966_v62  ;;  %v2959_v38 = vsub.f32 %v7946_v40, %v2937_v21  ;;  %v8106_v40 = vmul.f32 0.5, %v2314_v33  ;;  %5555 = vmatprep.subr.bf16.mxu1 %v6239_v47  ;;  %v2946_v62 = vpop.xlane.xlu1 %2945 }
 0x741   : > { %v2313_v56 = vadd.f32 %v2301_v14, %v7801_v10  ;;  %v2321_v46 = vpack.c.bf16 %v2302_v20, %v2301_v14  ;;  %v5912_v61 = vpack.c.bf16 %v8090_v51, %v8095_v39  ;;  %5556 = vmatpush3.bf16.msra.mxu1 %v6239_v47  ;;  %v2962_v21 = vsub.f32 %v7952_v41, %v2946_v62  ;;  %v9039_v51 = vld [vmem:[#allocation49_spill] sm:$0xff] }
 0x742   : > { %v2970_v42 = vmul.f32 1.442695, %v2959_v38  ;;  %5557 = vmatprep.subr.bf16.mxu1 %v6240_v35 }
 0x743   : > { %v8099_v34 = vpop.eup %6373  ;;  %v2943_v12 = vpop.xlane.xlu0 %2942  ;;  %5547 = vmatprep.mubr.msk.bf16.mxu1 %vm1616_vm2, %v2321_v46  ;;  %v8104_v26 = vmul.f32 0.5, %v2313_v56  ;;  %v2976_v33 = vmul.f32 1.442695, %v2962_v21 }
 0x744   : > { %v6376_v23 = vpop.eup %6375  ;;  %v2987_v2 = vsel %vm2928_vm5, %v8099_v34, 0.0  ;;  %6381 = vpow2.f32 %v2970_v42  ;;  %v2961_v10 = vsub.f32 %v7950_v57, %v2943_v12 }
 0x745   : > { %2988 = vadd.xlane.f32.xlu0 %v2987_v2  ;;  %v2303_v31 = vmul.f32 %v6376_v23, %v8026_v15  ;;  %v5916_v48 = vpack.c.bf16 %v8106_v40, %v8104_v26  ;;  %v8123_v15 = vmul.f32 0.5, %v2316_v7  ;;  %5558 = vmatpush3.bf16.msra.mxu1 %v6240_v35  ;;  %v9040_v26 = vld [vmem:[#allocation48_spill] sm:$0xff]  ;;  %v9041_v40 = vld [vmem:[#allocation51_spill] sm:$0xff] }
 0x746   : > { %v2974_v30 = vmul.f32 1.442695, %v2961_v10  ;;  %5899 = vmatprep.subr.bf16.mxu1 %v9037_v36  ;;  %v9044_v35 = vld [vmem:[#allocation52_spill] sm:$0xff] }
 0x747   : > { %v8115_v9 = vpop.eup %6377  ;;  %v2315_v19 = vadd.f32 %v2303_v31, %v7816_v5  ;;  %v2322_v18 = vpack.c.bf16 %v2304_v28, %v2303_v31  ;;  %v2949_v14 = vpop.xlane.xlu0 %2948  ;;  %v3060_v62 = vsel %vm3058_vm8, %v9044_v35, 0 }
 0x748   : > { %v2993_v17 = vsel %vm2928_vm5, %v8115_v9, 0.0  ;;  %6383 = vpow2.f32 %v2974_v30  ;;  %v2963_v38 = vsub.f32 %v7954_v24, %v2949_v14  ;;  %v2952_v28 = vpop.xlane.xlu1 %2951 }
 0x749   : > { %5548 = vmatmul.mubr.msk.bf16.gmra.mrb[64].mxu1 %vm1616_vm2, %v2322_v18  ;;  %v8121_v57 = vmul.f32 0.5, %v2315_v19  ;;  %2994 = vadd.xlane.f32.xlu0 %v2993_v17  ;;  %6385 = vpow2.f32 %v2976_v33  ;;  %v2964_v56 = vsub.f32 %v7956_v32, %v2952_v28  ;;  %v9042_v18 = vld [vmem:[#allocation50_spill] sm:$0xff] }
 0x74a   : > { %v8125_v60 = vpop.eup %6379  ;;  %v2978_v46 = vmul.f32 1.442695, %v2963_v38 }
 0x74b   : > { %v5920_v53 = vpack.c.bf16 %v8123_v15, %v8121_v57  ;;  %v2984_v5 = vsel %vm2928_vm5, %v8125_v60, 0.0  ;;  %v2956_v42 = vpop.xlane.xlu0 %2955  ;;  %v2980_v23 = vmul.f32 1.442695, %v2964_v56 }
 0x74c   : > { %2985 = vadd.xlane.f32.xlu1 %v2984_v5  ;;  %6387 = vpow2.f32 %v2978_v46 }
 0x74d   : > { %6389 = vpow2.f32 %v2980_v23 }
 0x74e   : > { %v8131_v20 = vpop.eup %6381 }
 0x74f   : > { %v2990_v8 = vsel %vm2928_vm5, %v8131_v20, 0.0 }
 0x750   : > { %2991 = vadd.xlane.f32.xlu1 %v2990_v8 }
 0x752   : > { %v8135_v54 = vpop.eup %6383 }
 0x753   : > { %v2996_v13 = vsel %vm2928_vm5, %v8135_v54, 0.0  ;;  %v8148_v2 = vpop.eup %6385 }
 0x754   : > { %2997 = vadd.xlane.f32.xlu1 %v2996_v13 }
 0x756   : > { %v8152_v41 = vpop.eup %6387 }
 0x757   : > { %v3002_v32 = vsel %vm2928_vm5, %v8152_v41, 0.0  ;;  %v8156_v24 = vpop.eup %6389 }
 0x75f   : > { %3296 = vrot.lane.b32.xlu0 %v7476_v37, %s6900_s18  ;;  %v2965_v37 = vsub.f32 %v7958_v0, %v2956_v42  ;;  %v3005_v0 = vsel %vm2928_vm5, %v8156_v24, 0.0 }
 0x761   : > { %v2982_v12 = vmul.f32 1.442695, %v2965_v37 }
 0x763   : > { %6391 = vpow2.f32 %v2982_v12 }
 0x765   : > { %3294 = vrot.lane.b32.xlu1 %v7457_v1, %s6900_s18  ;;  %v2999_v1 = vsel %vm2928_vm5, %v8148_v2, 0.0 }
 0x76d   : > { %v8160_v10 = vpop.eup %6391 }
 0x76e   : > { %v3008_v31 = vsel %vm2953_vm6, %v8160_v10, 0.0 }
 0x77e   : > { %3000 = vadd.xlane.f32.xlu0 %v2999_v1 }
 0x782   : > { %3003 = vadd.xlane.f32.xlu0 %v3002_v32 }
 0x786   : > { %3006 = vadd.xlane.f32.xlu0 %v3005_v0 }
 0x789   : > { %3009 = vadd.xlane.f32.xlu1 %v3008_v31 }
 0x79a   : > { %3280 = vrot.lane.b32.xlu1 %v7508_v50, %s6900_s18 }
 0x79c   : > { %3298 = vrot.lane.b32.xlu0 %v7496_v49, %s6900_s18 }
 0x7a0   : > { %3300 = vrot.lane.b32.xlu0 %v7516_v58, %s6900_s18 }
 0x7a4   : > { %3302 = vrot.lane.b32.xlu0 %v7536_v45, %s6900_s18 }
 0x7a8   : > { %3304 = vrot.lane.b32.xlu0 %v7558_v55, %s6900_s18 }
 0x7ac   : > { %3278 = vrot.lane.b32.xlu0 %v7488_v22, %s6900_s18 }
 0x7b0   : > { %3282 = vrot.lane.b32.xlu0 %v7528_v11, %s6900_s18 }
 0x7b4   : > { %3284 = vrot.lane.b32.xlu0 %v7548_v52, %s6900_s18 }
 0x7b8   : > { %3286 = vrot.lane.b32.xlu0 %v7878_v43, %s6900_s18 }
 0x7d2   : > { %v2989_v59 = vpop.xlane.xlu0 %2988 }
 0x7d9   : > { %v2986_v39 = vpop.xlane.xlu1 %2985 }
 0x7da   : > { %v5541_v49 = vpop.f32.mrb[56].mxu1  ;;  %6393 = vrcp.f32 %v2986_v39 }
 0x7db   : > { %v2397_v50 = vpop.f32.mrb[57].mxu1  ;;  %6395 = vrcp.f32 %v2989_v59  ;;  %v9048_v59 = vld [vmem:[#allocation42_spill] sm:$0xff] }
 0x7dc   : > { %v5542_v58 = vpop.f32.mrb[58].mxu1 }
 0x7dd   : > { %v2445_v7 = vpack.c.bf16 %v5542_v58, %v5541_v49  ;;  %v2400_v45 = vpop.f32.mrb[59].mxu1  ;;  %v2992_v19 = vpop.xlane.xlu1 %2991 }
 0x7de   : > { %v2444_v30 = vpack.c.bf16 %v2400_v45, %v2397_v50  ;;  %6397 = vrcp.f32 %v2992_v19  ;;  %v9051_v19 = vmov 1.0  }
 0x7e0   : > { %5559 = vmatprep.mubr.msk.bf16.mxu1 %vm1501_vm0, %v2444_v30 }
 0x7e1   : > { %5560 = vmatmul.mubr.msk.bf16.vlgmr.msra.gmra.mrb[44].mxu1 %vm1501_vm0, %v2445_v7  ;;  %v2998_v13 = vpop.xlane.xlu1 %2997 }
 0x7e2   : > { %5902 = vmatpush3.bf16.xpose.msk.msra.mxu1 %vm5901_vm7, %v5900_v29 }
 0x7e3   : > { %5903 = vmatprep.subr.bf16.mxu1 %v9037_v36 }
 0x7e4   : > { %v6394_v57 = vpop.eup %6393 }
 0x7e5   : > { %v6396_v15 = vpop.eup %6395  ;;  %v8230_v5 = vmul.f32 %v6394_v57, %v8125_v60 }
 0x7e6   : > { %v8234_v8 = vmul.f32 %v6396_v15, %v8099_v34  ;;  %v3295_v34 = vpop.permute.xlu1 %3294 }
 0x7e7   : > { %v3322_v56 = vsel %vm1501_vm0, %v3295_v34, 0 }
 0x7e8   : > { %v3038_v21 = vpack.c.bf16 %v8234_v8, %v8230_v5  ;;  %v6398_v14 = vpop.eup %6397 }
 0x7e9   : > { %v8245_v38 = vmul.f32 %v6398_v14, %v8131_v20 }
 0x7ea   : > { %5906 = vmatpush3.bf16.xpose.msk.msra.mxu1 %vm5901_vm7, %v5904_v25 }
 0x7eb   : > { %5907 = vmatprep.subr.bf16.mxu1 %v9037_v36 }
 0x7f2   : > { %5910 = vmatpush3.bf16.xpose.msk.msra.mxu1 %vm5901_vm7, %v5908_v6  ;;  %v9038_v6 = vld [vmem:[#allocation54_spill] sm:$0xff] }
 0x7f3   : > { %5911 = vmatprep.subr.bf16.mxu1 %v9037_v36 }
 0x7fa   : > { %5914 = vmatpush3.bf16.xpose.msk.msra.mxu1 %vm5901_vm7, %v5912_v61  ;;  %v2995_v61 = vpop.xlane.xlu0 %2994 }
 0x7fb   : > { %5915 = vmatprep.subr.bf16.mxu1 %v9037_v36  ;;  %6399 = vrcp.f32 %v2995_v61  ;;  %v9049_v61 = vld [vmem:[#allocation43_spill] sm:$0xff] }
 0x802   : > { %5918 = vmatpush3.bf16.xpose.msk.msra.mxu1 %vm5901_vm7, %v5916_v48  ;;  %v3297_v48 = vpop.permute.xlu0 %3296 }
 0x803   : > { %5919 = vmatprep.subr.bf16.mxu1 %v9037_v36  ;;  %v3325_v12 = vsel %vm1501_vm0, %v3297_v48, 0  ;;  %v9050_v48 = vld [vmem:[#allocation46_spill] sm:$0xff] }
 0x805   : > { %v6400_v60 = vpop.eup %6399 }
 0x806   : > { %v8248_v28 = vmul.f32 %v6400_v60, %v8115_v9 }
 0x808   : > { %v3039_v46 = vpack.c.bf16 %v8248_v28, %v8245_v38 }
 0x80a   : > { %5922 = vmatpush3.bf16.xpose.msk.msra.mxu1 %vm5901_vm7, %v5920_v53  ;;  %v9043_v53 = vld [vmem:[#allocation53_spill] sm:$0xff] }
 0x80b   : > { %5651 = vmatprep.subr.bf16.mxu1 %v9034_v27  ;;  %v3001_v17 = vpop.xlane.xlu0 %3000 }
 0x80c   : > { %6401 = vrcp.f32 %v3001_v17 }
 0x80d   : > { %6403 = vrcp.f32 %v2998_v13 }
 0x80f   : > { %v3004_v47 = vpop.xlane.xlu0 %3003 }
 0x812   : > { %v5545_v52 = vpop.f32.mrb[60].mxu1 }
 0x813   : > { %v2413_v11 = vpop.f32.mrb[61].mxu1  ;;  %v3007_v33 = vpop.xlane.xlu0 %3006 }
 0x814   : > { %v5546_v22 = vpop.f32.mrb[62].mxu1  ;;  %6405 = vrcp.f32 %v3007_v33 }
 0x815   : > { %v2447_v55 = vpack.c.bf16 %v5546_v22, %v5545_v52  ;;  %v2416_v43 = vpop.f32.mrb[63].mxu1  ;;  %6407 = vrcp.f32 %v3004_v47 }
 0x816   : > { %v2446_v63 = vpack.c.bf16 %v2416_v43, %v2413_v11  ;;  %v6402_v42 = vpop.eup %6401  ;;  %v3010_v20 = vpop.xlane.xlu1 %3009 }
 0x817   : > { %v6404_v23 = vpop.eup %6403  ;;  %v8258_v9 = vmul.f32 %v6402_v42, %v8148_v2  ;;  %6409 = vrcp.f32 %v3010_v20  ;;  %v3299_v2 = vpop.permute.xlu0 %3298 }
 0x818   : > { %5563 = vmatprep.mubr.msk.bf16.mxu1 %vm1501_vm0, %v2446_v63  ;;  %v8261_v37 = vmul.f32 %v6404_v23, %v8135_v54  ;;  %v3328_v49 = vsel %vm1501_vm0, %v3299_v2, 0  ;;  %v6241_v63 = vld [vmem:[#allocation13] sm:$0xff]  }
 0x819   : > { %5564 = vmatmul.mubr.msk.bf16.gmra.mrb[48].mxu1 %vm1501_vm0, %v2447_v55  ;;  %v9045_v55 = vld [vmem:[#allocation31_spill] sm:$0xff]  ;;  %5684 = vmatpush3.bf16.msra.mxu0 %v6241_v63 }
 0x81a   : > { %v3040_v1 = vpack.c.bf16 %v8258_v9, %v8261_v37  ;;  %v3281_v43 = vpop.permute.xlu1 %3280  ;;  %5685 = vmatprep.subr.bf16.mxu0 %v9034_v27 }
 0x81b   : > { %v3301_v7 = vpop.permute.xlu0 %3300 }
 0x81c   : > { %v5549_v4 = vpop.f32.mrb[64].mxu1 }
 0x81d   : > { %v2429_v25 = vpop.f32.mrb[65].mxu1 }
 0x81e   : > { %v5550_v3 = vpop.f32.mrb[66].mxu1  ;;  %v6406_v32 = vpop.eup %6405 }
 0x81f   : > { %v2449_v16 = vpack.c.bf16 %v5550_v3, %v5549_v4  ;;  %v2432_v29 = vpop.f32.mrb[67].mxu1  ;;  %v6408_v0 = vpop.eup %6407  ;;  %v8271_v54 = vmul.f32 %v6406_v32, %v8156_v24  ;;  %v6242_v4 = vld [vmem:[#allocation13 + $0x8] sm:$0xff]   ;;  %v6243_v3 = vld [vmem:[#allocation13 + $0x10] sm:$0xff]  }
 0x820   : > { %v2448_v44 = vpack.c.bf16 %v2432_v29, %v2429_v25  ;;  %v8274_v31 = vmul.f32 %v6408_v0, %v8152_v41  ;;  %v3331_v41 = vsel %vm1501_vm0, %v3301_v7, 0  ;;  %v3303_v30 = vpop.permute.xlu0 %3302  ;;  %v9046_v25 = vld [vmem:[#allocation36_spill] sm:$0xff]  ;;  %5686 = vmatpush3.bf16.msra.mxu0 %v6242_v4  ;;  %v9047_v29 = vld [vmem:[#allocation37_spill] sm:$0xff] }
 0x821   : > { %v6410_v58 = vpop.eup %6409  ;;  %v3334_v52 = vsel %vm1501_vm0, %v3303_v30, 0  ;;  %5687 = vmatprep.subr.bf16.mxu0 %v9034_v27 }
 0x822   : > { %5567 = vmatprep.mubr.msk.bf16.mxu1 %vm1501_vm0, %v2448_v44  ;;  %v3041_v50 = vpack.c.bf16 %v8271_v54, %v8274_v31  ;;  %v8284_v24 = vmul.f32 %v6410_v58, %v8160_v10 }
 0x823   : > { %5568 = vmatmul.mubr.msk.bf16.gmra.mrb[52].mxu1 %vm1501_vm0, %v2449_v16 }
 0x824   : > { %5616 = vmatprep.mubr.msk.f32.mxu1 %vm6899_vm1, %v9034_v27  ;;  %v3042_v45 = vpack.c.bf16 %v8284_v24, %v8284_v24  ;;  %v3305_v10 = vpop.permute.xlu0 %3304  ;;  %5688 = vmatpush3.bf16.msra.mxu0 %v6243_v3 }
 0x825   : > { %v3337_v11 = vsel %vm1501_vm0, %v3305_v10, 0  ;;  %5689 = vmatprep.subr.bf16.mxu0 %v9034_v27 }
 0x828   : > { %v3279_v22 = vpop.permute.xlu0 %3278 }
 0x82b   : > { %5617 = vmatmul.mubr.msk.f32.vlgmr.msra.gmra.mrb[68].mxu1 %vm1616_vm2, %v9038_v6  ;;  %v6244_v6 = vld [vmem:[#allocation13 + $0x18] sm:$0xff]  }
 0x82c   : > { %5652 = vmatpush3.bf16.msra.mxu1 %v9039_v51  ;;  %5663 = vmatprep.mubr.msk.bf16.mxu1 %vm6899_vm1, %v9034_v27  ;;  %v3283_v16 = vpop.permute.xlu0 %3282 }
 0x82d   : > { %5653 = vmatprep.subr.bf16.mxu1 %v9034_v27  ;;  %5690 = vmatpush3.bf16.msra.mxu0 %v6244_v6 }
 0x82e   : > { %5743 = vmatprep.subr.bf16.mxu0 %v9034_v27 }
 0x830   : > { %5654 = vmatpush3.bf16.msra.mxu1 %v9040_v26  ;;  %v3285_v44 = vpop.permute.xlu0 %3284 }
 0x831   : > { %5655 = vmatprep.subr.bf16.mxu1 %v9034_v27 }
 0x834   : > { %5656 = vmatpush3.bf16.msra.mxu1 %v9041_v40  ;;  %v3287_v39 = vpop.permute.xlu0 %3286 }
 0x835   : > { %5657 = vmatprep.subr.bf16.mxu1 %v9034_v27 }
 0x838   : > { %5658 = vmatpush3.bf16.msra.mxu1 %v9042_v18 }
 0x839   : > { %5659 = vmatprep.subr.bf16.mxu1 %v9034_v27 }
 0x83c   : > { %5660 = vmatpush3.bf16.msra.mxu1 %v9043_v53 }
 0x83d   : > { %5661 = vmatprep.subr.bf16.mxu1 %v9034_v27 }
 0x840   : > { %5662 = vmatpush3.bf16.msra.mxu1 %v3060_v62 }
 0x841   : > { %5711 = vmatprep.subr.bf16.mxu1 %v9034_v27 }
 0x843   : > { %5664 = vmatmul.mubr.msk.bf16.vlgmr.msra.gmra.mrb[72].mxu1 %vm2928_vm5, %v3038_v21 }
 0x844   : > { %5667 = vmatprep.mubr.msk.bf16.mxu1 %vm6899_vm1, %v9034_v27 }
 0x849   : > { %5712 = vmatpush3.bf16.xpose.msra.mxu1 %v3322_v56 }
 0x84a   : > { %5713 = vmatprep.subr.bf16.mxu1 %v9034_v27 }
 0x84b   : > { %5668 = vmatmul.mubr.msk.bf16.gmra.mrb[76].mxu1 %vm2928_vm5, %v3039_v46 }
 0x84c   : > { %5671 = vmatprep.mubr.msk.bf16.mxu1 %vm6899_vm1, %v9034_v27 }
 0x851   : > { %5714 = vmatpush3.bf16.xpose.msra.mxu1 %v3325_v12 }
 0x852   : > { %5715 = vmatprep.subr.bf16.mxu1 %v9034_v27 }
 0x853   : > { %5672 = vmatmul.mubr.msk.bf16.gmra.mrb[80].mxu1 %vm2928_vm5, %v3040_v1 }
 0x854   : > { %5675 = vmatprep.mubr.msk.bf16.mxu1 %vm6899_vm1, %v9034_v27 }
 0x859   : > { %5716 = vmatpush3.bf16.xpose.msra.mxu1 %v3328_v49 }
 0x85a   : > { %5717 = vmatprep.subr.bf16.mxu1 %v9034_v27 }
 0x85b   : > { %5676 = vmatmul.mubr.msk.bf16.gmra.mrb[84].mxu1 %vm2928_vm5, %v3041_v50 }
 0x85c   : > { %5679 = vmatprep.mubr.msk.bf16.mxu1 %vm6899_vm1, %v9034_v27 }
 0x861   : > { %5718 = vmatpush3.bf16.xpose.msra.mxu1 %v3331_v41 }
 0x862   : > { %5719 = vmatprep.subr.bf16.mxu1 %v9034_v27 }
 0x863   : > { %5680 = vmatmul.mubr.msk.bf16.gmra.mrb[88].mxu1 %vm2928_vm5, %v3042_v45 }
 0x864   : > { %5723 = vmatprep.mubr.msk.bf16.mxu1 %vm6899_vm1, %v9034_v27 }
 0x869   : > { %5720 = vmatpush3.bf16.xpose.msra.mxu1 %v3334_v52 }
 0x86a   : > { %5721 = vmatprep.subr.bf16.mxu1 %v9034_v27 }
 0x871   : > { %5722 = vmatpush3.bf16.xpose.msra.mxu1 %v3337_v11 }
 0x872   : > { %5923 = vmatprep.subr.bf16.mxu1 %v9037_v36 }
 0x878   : > { %5724 = vmatmul.mubr.msk.bf16.vlgmr.msra.gmra.mrb[92].mxu1 %vm1501_vm0, %v3279_v22 }
 0x879   : > { %5727 = vmatprep.mubr.msk.bf16.mxu1 %vm6899_vm1, %v9034_v27  ;;  %5925 = vmatpush3.bf16.xpose.msra.mxu1 %v9045_v55 }
 0x87a   : > { %5926 = vmatprep.subr.bf16.mxu1 %v9037_v36 }
 0x880   : > { %5728 = vmatmul.mubr.msk.bf16.gmra.mrb[96].mxu1 %vm1501_vm0, %v3281_v43 }
 0x881   : > { %5731 = vmatprep.mubr.msk.bf16.mxu1 %vm6899_vm1, %v9034_v27  ;;  %5928 = vmatpush3.bf16.xpose.msra.mxu1 %v9046_v25 }
 0x882   : > { %5929 = vmatprep.subr.bf16.mxu1 %v9037_v36 }
 0x888   : > { %5732 = vmatmul.mubr.msk.bf16.gmra.mrb[100].mxu1 %vm1501_vm0, %v3283_v16 }
 0x889   : > { %5735 = vmatprep.mubr.msk.bf16.mxu1 %vm6899_vm1, %v9034_v27  ;;  %5931 = vmatpush3.bf16.xpose.msra.mxu1 %v9047_v29 }
 0x88a   : > { %5932 = vmatprep.subr.bf16.mxu1 %v9037_v36 }
 0x890   : > { %5736 = vmatmul.mubr.msk.bf16.gmra.mrb[104].mxu1 %vm1501_vm0, %v3285_v44 }
 0x891   : > { %5739 = vmatprep.mubr.msk.bf16.mxu1 %vm6899_vm1, %v9034_v27  ;;  %5934 = vmatpush3.bf16.xpose.msra.mxu1 %v9048_v59 }
 0x892   : > { %5935 = vmatprep.subr.bf16.mxu1 %v9037_v36 }
 0x898   : > { %5740 = vmatmul.mubr.msk.bf16.gmra.mrb[108].mxu1 %vm1501_vm0, %v3287_v39 }
 0x899   : > { %5827 = vmatprep.mubr.msk.f32.mxu1 %vm6899_vm1, %v9034_v27  ;;  %5937 = vmatpush3.bf16.xpose.msra.mxu1 %v9049_v61 }
 0x89a   : > { %5938 = vmatprep.subr.bf16.mxu1 %v9037_v36 }
 0x8a1   : > { %5940 = vmatpush3.bf16.xpose.msra.mxu1 %v9050_v48 }
 0x8a2   : > { %5941 = vmatprep.subr.bf16.mxu1 %v9037_v36 }
 0x8a8   : > { %5828 = vmatmul.mubr.f32.vlgmr.msra.gmra.mrb[70].mxu1 %v9051_v19 }
 0x8a9   : > { %5848 = vmatprep.mubr.msk.f32.mxu1 %vm6899_vm1, %v9034_v27 }
 0x8b4   : > { %v8331_v17 = vpop.f32.mrb[44].mxu1 }
 0x8b5   : > { %v8333_v57 = vpop.f32.mrb[45].mxu1 }
 0x8b6   : > { %v8335_v15 = vpop.f32.mrb[46].mxu1 }
 0x8b7   : > { %v8337_v13 = vpop.f32.mrb[47].mxu1 }
 0x8ec   : > { %v8339_v47 = vpop.f32.mrb[48].mxu1 }
 0x8ed   : > { %v8341_v62 = vpop.f32.mrb[49].mxu1 }
 0x8ee   : > { %v8343_v21 = vpop.f32.mrb[50].mxu1 }
 0x8ef   : > { %v8345_v14 = vpop.f32.mrb[51].mxu1 }
 0x8f6   : > { %v8347_v60 = vpop.f32.mrb[52].mxu1 }
 0x8f7   : > { %v8349_v34 = vpop.f32.mrb[53].mxu1 }
 0x8f8   : > { %v8351_v33 = vpop.f32.mrb[54].mxu1 }
 0x8f9   : > { %v8353_v56 = vpop.f32.mrb[55].mxu1 }
 0x8fe   : > { %v8355_v46 = vpop.f32.mrb[68].mxu1 }
 0x8ff   : > { %v5618_v42 = vpop.f32.mrb[69].mxu1 }
 0x916   : > { %v3096_v23 = vpop.f32.mrb[72].mxu1 }
 0x917   : > { %v5665_v20 = vpop.f32.mrb[73].mxu1 }
 0x918   : > { %v3099_v12 = vpop.f32.mrb[74].mxu1 }
 0x919   : > { %v3134_v1 = vpack.c.bf16 %v3099_v12, %v3096_v23  ;;  %v5666_v32 = vpop.f32.mrb[75].mxu1 }
 0x91b   : > { %5692 = vmatmul.mubr.msk.bf16.vlgmr.msra.gmra.mrb[92].mxu0 %vm1501_vm0, %v3134_v1 }
 0x91c   : > { %5695 = vmatprep.mubr.msk.bf16.mxu0 %vm6899_vm1, %v9034_v27 }
 0x91e   : > { %v3104_v0 = vpop.f32.mrb[76].mxu1 }
 0x91f   : > { %v5669_v2 = vpop.f32.mrb[77].mxu1 }
 0x920   : > { %v3107_v49 = vpop.f32.mrb[78].mxu1 }
 0x921   : > { %v3135_v50 = vpack.c.bf16 %v3107_v49, %v3104_v0  ;;  %v5670_v58 = vpop.f32.mrb[79].mxu1 }
 0x923   : > { %5696 = vmatmul.mubr.msk.bf16.gmra.mrb[96].mxu0 %vm1501_vm0, %v3135_v50 }
 0x924   : > { %5699 = vmatprep.mubr.msk.bf16.mxu0 %vm6899_vm1, %v9034_v27 }
 0x926   : > { %v3112_v7 = vpop.f32.mrb[80].mxu1 }
 0x927   : > { %v5673_v41 = vpop.f32.mrb[81].mxu1 }
 0x928   : > { %v3115_v45 = vpop.f32.mrb[82].mxu1 }
 0x929   : > { %v3136_v30 = vpack.c.bf16 %v3115_v45, %v3112_v7  ;;  %v5674_v52 = vpop.f32.mrb[83].mxu1 }
 0x92b   : > { %5700 = vmatmul.mubr.msk.bf16.gmra.mrb[100].mxu0 %vm1501_vm0, %v3136_v30 }
 0x92c   : > { %5703 = vmatprep.mubr.msk.bf16.mxu0 %vm6899_vm1, %v9034_v27 }
 0x92e   : > { %v3120_v10 = vpop.f32.mrb[84].mxu1 }
 0x92f   : > { %v5677_v11 = vpop.f32.mrb[85].mxu1 }
 0x930   : > { %v3123_v22 = vpop.f32.mrb[86].mxu1 }
 0x931   : > { %v3137_v55 = vpack.c.bf16 %v3123_v22, %v3120_v10  ;;  %v5678_v43 = vpop.f32.mrb[87].mxu1 }
 0x933   : > { %5704 = vmatmul.mubr.msk.bf16.gmra.mrb[104].mxu0 %vm1501_vm0, %v3137_v55 }
 0x934   : > { %5707 = vmatprep.mubr.msk.bf16.mxu0 %vm6899_vm1, %v9034_v27 }
 0x936   : > { %v3128_v63 = vpop.f32.mrb[88].mxu1 }
 0x937   : > { %v5681_v4 = vpop.f32.mrb[89].mxu1  ;;  %v3138_v3 = vpack.c.bf16 %v3128_v63, %v3128_v63 }
 0x938   : > { %v3131_v25 = vpop.f32.mrb[90].mxu1 }
 0x939   : > { %v5682_v16 = vpop.f32.mrb[91].mxu1 }
 0x93b   : > { %5708 = vmatmul.mubr.msk.bf16.gmra.mrb[108].mxu0 %vm1501_vm0, %v3138_v3 }
 0x93c   : > { %5755 = vmatprep.mubr.msk.bf16.mxu0 %vm6899_vm1, %v9034_v27 }
 0x94b   : > { %v3373_v29 = vpop.f32.mrb[92].mxu1 }
 0x94c   : > { %v5725_v44 = vpop.f32.mrb[93].mxu1  ;;  %v3411_v59 = vsel %vm2928_vm5, %v3373_v29, -inf }
 0x94d   : > { %3412 = vmax.xlane.f32.xlu0 %v3411_v59  ;;  %v3376_v6 = vpop.f32.mrb[94].mxu1 }
 0x94e   : > { %v5726_v39 = vpop.f32.mrb[95].mxu1  ;;  %v3414_v61 = vsel %vm2928_vm5, %v3376_v6, -inf }
 0x94f   : > { %3415 = vmax.xlane.f32.xlu1 %v3414_v61 }
 0x953   : > { %v3381_v48 = vpop.f32.mrb[96].mxu1 }
 0x954   : > { %v5729_v19 = vpop.f32.mrb[97].mxu1  ;;  %v3417_v42 = vsel %vm2928_vm5, %v3381_v48, -inf }
 0x955   : > { %3418 = vmax.xlane.f32.xlu0 %v3417_v42  ;;  %v3384_v23 = vpop.f32.mrb[98].mxu1 }
 0x956   : > { %v5730_v20 = vpop.f32.mrb[99].mxu1  ;;  %v3420_v12 = vsel %vm2928_vm5, %v3384_v23, -inf }
 0x959   : > { %3421 = vmax.xlane.f32.xlu0 %v3420_v12 }
 0x95b   : > { %v3389_v1 = vpop.f32.mrb[100].mxu1 }
 0x95c   : > { %v5733_v32 = vpop.f32.mrb[101].mxu1  ;;  %v3423_v0 = vsel %vm2928_vm5, %v3389_v1, -inf }
 0x95d   : > { %3424 = vmax.xlane.f32.xlu0 %v3423_v0  ;;  %v8377_v2 = vpop.f32.mrb[102].mxu1 }
 0x95e   : > { %v5734_v49 = vpop.f32.mrb[103].mxu1 }
 0x960   : > { %3530 = vrot.lane.b32.xlu1 %v9039_v51, %s6900_s18  ;;  %v3426_v51 = vsel %vm2928_vm5, %v8377_v2, -inf }
 0x963   : > { %v3397_v50 = vpop.f32.mrb[104].mxu1 }
 0x964   : > { %v5737_v58 = vpop.f32.mrb[105].mxu1  ;;  %v3429_v7 = vsel %vm2928_vm5, %v3397_v50, -inf }
 0x965   : > { %3430 = vmax.xlane.f32.xlu0 %v3429_v7  ;;  %v8382_v41 = vpop.f32.mrb[106].mxu1 }
 0x966   : > { %v5738_v45 = vpop.f32.mrb[107].mxu1  ;;  %v3432_v55 = vsel %vm2928_vm5, %v8382_v41, -inf }
 0x96b   : > { %v8384_v30 = vpop.f32.mrb[108].mxu1 }
 0x96c   : > { %v5741_v52 = vpop.f32.mrb[109].mxu1  ;;  %v3435_v10 = vsel %vm2953_vm6, %v8384_v30, -inf }
 0x96d   : > { %3436 = vmax.xlane.f32.xlu0 %v3435_v10  ;;  %v3408_v11 = vpop.f32.mrb[110].mxu1 }
 0x96e   : > { %v5742_v22 = vpop.f32.mrb[111].mxu1 }
 0x983   : > { %3532 = vrot.lane.b32.xlu0 %v9040_v26, %s6900_s18 }
 0x984   : > { %3427 = vmax.xlane.f32.xlu1 %v3426_v51 }
 0x988   : > { %3433 = vmax.xlane.f32.xlu1 %v3432_v55 }
 0x999   : > { %3534 = vrot.lane.b32.xlu1 %v9041_v40, %s6900_s18 }
 0x99d   : > { %3536 = vrot.lane.b32.xlu1 %v9042_v18, %s6900_s18 }
 0x9da   : > { %v3413_v43 = vpop.xlane.xlu0 %3412 }
 0x9db   : > { %v3438_v63 = vsub.f32 %v3373_v29, %v3413_v43 }
 0x9dc   : > { %v3416_v4 = vpop.xlane.xlu1 %3415 }
 0x9dd   : > { %v3447_v25 = vmul.f32 1.442695, %v3438_v63  ;;  %v3439_v3 = vsub.f32 %v3376_v6, %v3416_v4 }
 0x9df   : > { %6411 = vpow2.f32 %v3447_v25  ;;  %v3449_v26 = vmul.f32 1.442695, %v3439_v3 }
 0x9e0   : > { %v3531_v16 = vpop.permute.xlu1 %3530 }
 0x9e1   : > { %6413 = vpow2.f32 %v3449_v26  ;;  %5744 = vmatpush3.bf16.msra.mxu0 %v3531_v16 }
 0x9e2   : > { %v3419_v44 = vpop.xlane.xlu0 %3418  ;;  %5745 = vmatprep.subr.bf16.mxu0 %v9034_v27 }
 0x9e3   : > { %v3440_v59 = vsub.f32 %v3381_v48, %v3419_v44 }
 0x9e5   : > { %v3451_v39 = vmul.f32 1.442695, %v3440_v59 }
 0x9e6   : > { %v3422_v61 = vpop.xlane.xlu0 %3421 }
 0x9e7   : > { %6415 = vpow2.f32 %v3451_v39  ;;  %v3441_v40 = vsub.f32 %v3384_v23, %v3422_v61 }
 0x9e9   : > { %v8399_v19 = vpop.eup %6411  ;;  %v3453_v18 = vmul.f32 1.442695, %v3441_v40 }
 0x9ea   : > { %v3425_v29 = vpop.xlane.xlu0 %3424  ;;  %v3465_v6 = vsel %vm2928_vm5, %v8399_v19, 0.0 }
 0x9eb   : > { %v8403_v42 = vpop.eup %6413  ;;  %6417 = vpow2.f32 %v3453_v18  ;;  %v3442_v20 = vsub.f32 %v3389_v1, %v3425_v29  ;;  %3466 = vadd.xlane.f32.xlu1 %v3465_v6 }
 0x9ec   : > { %v3468_v12 = vsel %vm2928_vm5, %v8403_v42, 0.0 }
 0x9ed   : > { %v3455_v48 = vmul.f32 1.442695, %v3442_v20  ;;  %3469 = vadd.xlane.f32.xlu0 %v3468_v12 }
 0x9ef   : > { %6419 = vpow2.f32 %v3455_v48 }
 0x9f1   : > { %v8407_v32 = vpop.eup %6415 }
 0x9f2   : > { %v3431_v23 = vpop.xlane.xlu0 %3430  ;;  %v3471_v0 = vsel %vm2928_vm5, %v8407_v32, 0.0 }
 0x9f3   : > { %v3444_v49 = vsub.f32 %v3397_v50, %v3431_v23  ;;  %3472 = vadd.xlane.f32.xlu0 %v3471_v0 }
 0x9f5   : > { %v8411_v58 = vpop.eup %6417  ;;  %v3459_v7 = vmul.f32 1.442695, %v3444_v49 }
 0x9f6   : > { %v3474_v1 = vsel %vm2928_vm5, %v8411_v58, 0.0 }
 0x9f7   : > { %6421 = vpow2.f32 %v3459_v7  ;;  %3475 = vadd.xlane.f32.xlu0 %v3474_v1 }
 0x9f9   : > { %v8415_v45 = vpop.eup %6419 }
 0x9fa   : > { %v3437_v52 = vpop.xlane.xlu0 %3436  ;;  %v3477_v10 = vsel %vm2928_vm5, %v8415_v45, 0.0 }
 0x9fb   : > { %v3446_v11 = vsub.f32 %v8384_v30, %v3437_v52  ;;  %3478 = vadd.xlane.f32.xlu1 %v3477_v10 }
 0x9fd   : > { %v3463_v59 = vmul.f32 1.442695, %v3446_v11 }
 0x9fe   : > { %v3533_v22 = vpop.permute.xlu0 %3532 }
 0x9ff   : > { %5746 = vmatpush3.bf16.msra.mxu0 %v3533_v22 }
 0xa00   : > { %5747 = vmatprep.subr.bf16.mxu0 %v9034_v27 }
 0xa01   : > { %v8421_v50 = vpop.eup %6421 }
 0xa02   : > { %v3483_v51 = vsel %vm2928_vm5, %v8421_v50, 0.0 }
 0xa03   : > { %3484 = vadd.xlane.f32.xlu1 %v3483_v51 }
 0xa11   : > { %v3428_v55 = vpop.xlane.xlu1 %3427 }
 0xa12   : > { %v3443_v43 = vsub.f32 %v8377_v2, %v3428_v55  ;;  %v8434_v2 = vld [vmem:[#allocation12] ss:$0 sm:$0xff] }
 0xa13   : > { %v8463_v18 = vadd.f32 %v8351_v33, %v8434_v2 }
 0xa14   : > { %v3457_v63 = vmul.f32 1.442695, %v3443_v43  ;;  %3540 = vrot.lane.b32.xlu1 %v9044_v35, %s6900_s18  ;;  %v8438_v35 = vadd.f32 %v8347_v60, %v8434_v2 }
 0xa15   : > { %v3434_v4 = vpop.xlane.xlu1 %3433  ;;  %v4020_v29 = vsel %vm1786_vm4, %v8463_v18, 0.0 }
 0xa16   : > { %6423 = vpow2.f32 %v3457_v63  ;;  %v3445_v16 = vsub.f32 %v8382_v41, %v3434_v4  ;;  %v8459_v41 = vadd.f32 %v8434_v2, %v8353_v56 }
 0xa18   : > { %v3461_v44 = vmul.f32 1.442695, %v3445_v16 }
 0xa19   : > { %v3535_v30 = vpop.permute.xlu1 %3534 }
 0xa1a   : > { %5748 = vmatpush3.bf16.msra.mxu0 %v3535_v30  ;;  %6425 = vpow2.f32 %v3461_v44 }
 0xa1b   : > { %5749 = vmatprep.subr.bf16.mxu0 %v9034_v27  ;;  %6427 = vpow2.f32 %v3463_v59 }
 0xa1d   : > { %v3537_v25 = vpop.permute.xlu1 %3536 }
 0xa1e   : > { %5750 = vmatpush3.bf16.msra.mxu0 %v3537_v25 }
 0xa1f   : > { %5751 = vmatprep.subr.bf16.mxu0 %v9034_v27 }
 0xa20   : > { %v8430_v3 = vpop.eup %6423 }
 0xa21   : > { %v3480_v26 = vsel %vm2928_vm5, %v8430_v3, 0.0 }
 0xa22   : > { %3481 = vadd.xlane.f32.xlu0 %v3480_v26  ;;  %v6245_v26 = vld [vmem:[#allocation13 + $0x20] sm:$0xff]  }
 0xa24   : > { %v8444_v39 = vpop.eup %6425 }
 0xa25   : > { %v3486_v61 = vsel %vm2928_vm5, %v8444_v39, 0.0  ;;  %v8448_v40 = vpop.eup %6427 }
 0xa26   : > { %v3489_v60 = vsel %vm2953_vm6, %v8448_v40, 0.0 }
 0xa38   : > { %4018 = vadd.xlane.f32.xlu1 %v8438_v35  ;;  %3538 = vrot.lane.b32.xlu0 %v9043_v53, %s6900_s18  ;;  %v8454_v53 = vadd.f32 %v8434_v2, %v8349_v34 }
 0xa57   : > { %3487 = vadd.xlane.f32.xlu0 %v3486_v61 }
 0xa5b   : > { %3490 = vadd.xlane.f32.xlu0 %v3489_v60  ;;  %v6246_v60 = vld [vmem:[#allocation13 + $0x28] sm:$0xff]  }
 0xa5f   : > { %4014 = vadd.xlane.f32.xlu0 %v8454_v53 }
 0xa63   : > { %4016 = vadd.xlane.f32.xlu0 %v8459_v41 }
 0xa67   : > { %4021 = vadd.xlane.f32.xlu0 %v4020_v29 }
 0xa78   : > { %v3467_v6 = vpop.xlane.xlu1 %3466 }
 0xa79   : > { %6429 = vrcp.f32 %v3467_v6 }
 0xa7a   : > { %v3470_v34 = vpop.xlane.xlu0 %3469 }
 0xa7b   : > { %6431 = vrcp.f32 %v3470_v34 }
 0xa80   : > { %v3473_v20 = vpop.xlane.xlu0 %3472 }
 0xa81   : > { %6433 = vrcp.f32 %v3473_v20 }
 0xa83   : > { %v6430_v12 = vpop.eup %6429 }
 0xa84   : > { %v3501_v56 = vmul.f32 %v6430_v12, %v8399_v19  ;;  %v3476_v48 = vpop.xlane.xlu0 %3475 }
 0xa85   : > { %v6432_v23 = vpop.eup %6431  ;;  %6435 = vrcp.f32 %v3476_v48 }
 0xa86   : > { %v3510_v33 = vadd.f32 %v3501_v56, %v8230_v5  ;;  %v3502_v0 = vmul.f32 %v6432_v23, %v8403_v42 }
 0xa88   : > { %v3511_v49 = vadd.f32 %v3502_v0, %v8234_v8  ;;  %v3770_v7 = vmul.f32 0.5, %v3510_v33  ;;  %v3519_v16 = vpack.c.bf16 %v3502_v0, %v3501_v56 }
 0xa8a   : > { %v3771_v1 = vmul.f32 0.5, %v3511_v49 }
 0xa8b   : > { %v6434_v52 = vpop.eup %6433 }
 0xa8c   : > { %v3503_v19 = vmul.f32 %v6434_v52, %v8407_v32  ;;  %v5942_v11 = vpack.c.bf16 %v3771_v1, %v3770_v7  ;;  %v3479_v32 = vpop.xlane.xlu1 %3478 }
 0xa8d   : > { %6437 = vrcp.f32 %v3479_v32 }
 0xa8e   : > { %5944 = vmatpush3.bf16.xpose.msk.msra.mxu1 %vm8474_vm9, %v5942_v11  ;;  %v3512_v8 = vadd.f32 %v3503_v19, %v8245_v38 }
 0xa8f   : > { %v6436_v5 = vpop.eup %6435  ;;  %5945 = vmatprep.subr.bf16.mxu1 %v9037_v36 }
 0xa90   : > { %v3504_v42 = vmul.f32 %v6436_v5, %v8411_v58  ;;  %v3772_v51 = vmul.f32 0.5, %v3512_v8  ;;  %v3485_v63 = vpop.xlane.xlu1 %3484 }
 0xa92   : > { %v3513_v22 = vadd.f32 %v3504_v42, %v8248_v28  ;;  %v3520_v34 = vpack.c.bf16 %v3504_v42, %v3503_v19 }
 0xa94   : > { %v3773_v55 = vmul.f32 0.5, %v3513_v22  ;;  %v3541_v38 = vpop.permute.xlu1 %3540 }
 0xa95   : > { %v3563_v58 = vsel %vm3058_vm8, %v3541_v38, 0 }
 0xa96   : > { %v5946_v43 = vpack.c.bf16 %v3773_v55, %v3772_v51 }
 0xa97   : > { %v6438_v25 = vpop.eup %6437 }
 0xa98   : > { %5948 = vmatpush3.bf16.xpose.msk.msra.mxu1 %vm8474_vm9, %v5946_v43  ;;  %v3505_v28 = vmul.f32 %v6438_v25, %v8415_v45 }
 0xa99   : > { %5949 = vmatprep.subr.bf16.mxu1 %v9037_v36 }
 0xa9a   : > { %v3514_v59 = vadd.f32 %v3505_v28, %v8261_v37  ;;  %v6247_v37 = vld [vmem:[#allocation13 + $0x30] sm:$0xff]  }
 0xa9c   : > { %v3774_v29 = vmul.f32 0.5, %v3514_v59 }
 0xaaf   : > { %v3482_v4 = vpop.xlane.xlu0 %3481 }
 0xab0   : > { %6439 = vrcp.f32 %v3482_v4 }
 0xab1   : > { %6441 = vrcp.f32 %v3485_v63 }
 0xab3   : > { %v3539_v30 = vpop.permute.xlu0 %3538 }
 0xab4   : > { %5752 = vmatpush3.bf16.msra.mxu0 %v3539_v30 }
 0xab5   : > { %5753 = vmatprep.subr.bf16.mxu0 %v9034_v27 }
 0xab8   : > { %5754 = vmatpush3.bf16.msra.mxu0 %v3563_v58 }
 0xab9   : > { %5775 = vmatprep.subr.bf16.mxu0 %v9034_v27 }
 0xaba   : > { %v6440_v44 = vpop.eup %6439 }
 0xabb   : > { %v3506_v61 = vmul.f32 %v6440_v44, %v8430_v3  ;;  %5756 = vmatmul.mubr.msk.bf16.vlgmr.msra.gmra.mrb[112].mxu0 %vm2928_vm5, %v3519_v16  ;;  %v6442_v56 = vpop.eup %6441 }
 0xabc   : > { %5759 = vmatprep.mubr.msk.bf16.mxu0 %vm6899_vm1, %v9034_v27  ;;  %5776 = vmatpush3.bf16.msra.mxu0 %v6245_v26  ;;  %v3507_v48 = vmul.f32 %v6442_v56, %v8421_v50 }
 0xabd   : > { %v3515_v45 = vadd.f32 %v3506_v61, %v8258_v9  ;;  %5777 = vmatprep.subr.bf16.mxu0 %v9034_v27  ;;  %v3521_v9 = vpack.c.bf16 %v3506_v61, %v3505_v28 }
 0xabe   : > { %v3516_v33 = vadd.f32 %v3507_v48, %v8274_v31 }
 0xabf   : > { %v3775_v6 = vmul.f32 0.5, %v3515_v45 }
 0xac0   : > { %5778 = vmatpush3.bf16.msra.mxu0 %v6246_v60  ;;  %v3776_v1 = vmul.f32 0.5, %v3516_v33 }
 0xac1   : > { %v5950_v20 = vpack.c.bf16 %v3775_v6, %v3774_v29  ;;  %5779 = vmatprep.subr.bf16.mxu0 %v9034_v27  ;;  %v5107_v29 = vld [vmem:[#allocation15] ss:$0 sm:$0xff] }
 0xac3   : > { %5760 = vmatmul.mubr.msk.bf16.gmra.mrb[116].mxu0 %vm2928_vm5, %v3520_v34  ;;  %5952 = vmatpush3.bf16.xpose.msk.msra.mxu1 %vm8474_vm9, %v5950_v20 }
 0xac4   : > { %5763 = vmatprep.mubr.msk.bf16.mxu0 %vm6899_vm1, %v9034_v27  ;;  %5953 = vmatprep.subr.bf16.mxu1 %v9037_v36 }
 0xac5   : > { %5780 = vmatpush3.bf16.msra.mxu0 %v6247_v37 }
 0xac6   : > { %5781 = vmatprep.subr.bf16.mxu0 %v9034_v27 }
 0xacb   : > { %5764 = vmatmul.mubr.msk.bf16.gmra.mrb[120].mxu0 %vm2928_vm5, %v3521_v9 }
 0xacc   : > { %5767 = vmatprep.mubr.msk.bf16.mxu0 %vm6899_vm1, %v9034_v27 }
 0xae4   : > { %v3488_v3 = vpop.xlane.xlu0 %3487 }
 0xae5   : > { %6443 = vrcp.f32 %v3488_v3 }
 0xae8   : > { %v3491_v12 = vpop.xlane.xlu0 %3490 }
 0xae9   : > { %6445 = vrcp.f32 %v3491_v12 }
 0xaef   : > { %v6444_v23 = vpop.eup %6443 }
 0xaf0   : > { %v3508_v36 = vmul.f32 %v6444_v23, %v8444_v39  ;;  %v6248_v39 = vld [vmem:[#allocation13 + $0x38] sm:$0xff]  }
 0xaf1   : > { %5782 = vmatpush3.bf16.msra.mxu0 %v6248_v39  ;;  %v4019_v39 = vpop.xlane.xlu1 %4018 }
 0xaf2   : > { %v3517_v0 = vadd.f32 %v3508_v36, %v8271_v54  ;;  %v3522_v49 = vpack.c.bf16 %v3508_v36, %v3507_v48  ;;  %5851 = vmatprep.subr.bf16.mxu0 %v9034_v27 }
 0xaf3   : > { %v6446_v7 = vpop.eup %6445 }
 0xaf4   : > { %5768 = vmatmul.mubr.msk.bf16.gmra.mrb[124].mxu0 %vm2928_vm5, %v3522_v49  ;;  %v3777_v52 = vmul.f32 0.5, %v3517_v0  ;;  %v3509_v11 = vmul.f32 %v6446_v7, %v8448_v40 }
 0xaf5   : > { %5771 = vmatprep.mubr.msk.bf16.mxu0 %vm6899_vm1, %v9034_v27 }
 0xaf6   : > { %v5954_v19 = vpack.c.bf16 %v3777_v52, %v3776_v1  ;;  %v3518_v31 = vadd.f32 %v3509_v11, %v8284_v24  ;;  %v3523_v54 = vpack.c.bf16 %v3509_v11, %v3509_v11  ;;  %v4015_v11 = vpop.xlane.xlu0 %4014 }
 0xaf8   : > { %5956 = vmatpush3.bf16.xpose.msk.msra.mxu1 %vm8474_vm9, %v5954_v19  ;;  %v3778_v50 = vmul.f32 0.5, %v3518_v31 }
 0xaf9   : > { %5846 = vmatprep.subr.mxu1 %v9034_v27 }
 0xafc   : > { %5772 = vmatmul.mubr.msk.bf16.gmra.mrb[128].mxu0 %vm2928_vm5, %v3523_v54  ;;  %v9054_v54 = vlaneseq }
 0xafd   : > { %5783 = vmatprep.mubr.msk.bf16.mxu0 %vm6899_vm1, %v9034_v27 }
 0xb00   : > { %5847 = vmatpush3.xpose.msk.msra.mxu1 %vm2928_vm5, %v3778_v50  ;;  %v3994_v50 = vand.u32 127, %v9054_v54 }
 0xb01   : > { %5865 = vmatprep.subr.bf16.mxu1 %v9034_v27 }
 0xb02   : > { %vm3995_vm10 = vcmp.lt.s32.totalorder %v3994_v50, 116 }
 0xb8e   : > { %v3599_v40 = vpop.f32.mrb[112].mxu0 }
 0xb8f   : > { %v5757_v10 = vpop.f32.mrb[113].mxu0 }
 0xb90   : > { %v3602_v5 = vpop.f32.mrb[114].mxu0 }
 0xb91   : > { %v3637_v8 = vpack.c.bf16 %v3602_v5, %v3599_v40  ;;  %v5758_v24 = vpop.f32.mrb[115].mxu0  ;;  %v4031_v40 = vmul.f32 0.00862069, %v4015_v11 }
 0xb93   : > { %5784 = vmatmul.mubr.msk.bf16.vlgmr.msra.gmra.mrb[92].mxu0 %vm1501_vm0, %v3637_v8  ;;  %v4017_v8 = vpop.xlane.xlu0 %4016 }
 0xb94   : > { %5787 = vmatprep.mubr.msk.bf16.mxu0 %vm6899_vm1, %v9034_v27 }
 0xb96   : > { %v3607_v42 = vpop.f32.mrb[116].mxu0 }
 0xb97   : > { %v5761_v22 = vpop.f32.mrb[117].mxu0 }
 0xb98   : > { %v3610_v51 = vpop.f32.mrb[118].mxu0  ;;  %v4033_v22 = vmul.f32 0.00862069, %v4019_v39 }
 0xb99   : > { %v3638_v55 = vpack.c.bf16 %v3610_v51, %v3607_v42  ;;  %v5762_v43 = vpop.f32.mrb[119].mxu0  ;;  %v4043_v51 = vsub.f32 %v8454_v53, %v4031_v40 }
 0xb9a   : > { %v4032_v43 = vmul.f32 0.00862069, %v4017_v8 }
 0xb9b   : > { %5788 = vmatmul.mubr.msk.bf16.gmra.mrb[96].mxu0 %vm1501_vm0, %v3638_v55 }
 0xb9c   : > { %5791 = vmatprep.mubr.msk.bf16.mxu0 %vm6899_vm1, %v9034_v27 }
 0xb9e   : > { %v3615_v32 = vpop.f32.mrb[120].mxu0 }
 0xb9f   : > { %v5765_v63 = vpop.f32.mrb[121].mxu0 }
 0xba0   : > { %v3618_v4 = vpop.f32.mrb[122].mxu0  ;;  %v4022_v63 = vpop.xlane.xlu0 %4021 }
 0xba1   : > { %v3639_v30 = vpack.c.bf16 %v3618_v4, %v3615_v32  ;;  %v5766_v25 = vpop.f32.mrb[123].mxu0  ;;  %v8570_v32 = vsel %vm3995_vm10, 1.0, %v9034_v27 }
 0xba2   : > { %v4045_v25 = vsub.f32 %v8438_v35, %v4033_v22 }
 0xba3   : > { %5792 = vmatmul.mubr.msk.bf16.gmra.mrb[100].mxu0 %vm1501_vm0, %v3639_v30  ;;  %v8574_v30 = vadd.f32 %v8434_v2, %v8333_v57 }
 0xba4   : > { %5795 = vmatprep.mubr.msk.bf16.mxu0 %vm6899_vm1, %v9034_v27  ;;  %v8587_v57 = vmul.f32 %v8570_v32, %v4045_v25  ;;  %v8668_v25 = vadd.f32 %v8343_v21, %v8434_v2 }
 0xbc7   : > { %v3623_v38 = vpop.f32.mrb[124].mxu0 }
 0xbc8   : > { %v5769_v28 = vpop.f32.mrb[125].mxu0 }
 0xbc9   : > { %v3626_v58 = vpop.f32.mrb[126].mxu0 }
 0xbca   : > { %v3640_v26 = vpack.c.bf16 %v3626_v58, %v3623_v38  ;;  %v5770_v16 = vpop.f32.mrb[127].mxu0  ;;  %v8578_v38 = vmul.f32 %v8570_v32, %v4043_v51  ;;  %v4044_v58 = vsub.f32 %v8459_v41, %v4032_v43 }
 0xbcb   : > { %v4034_v16 = vmul.f32 0.00862069, %v4022_v63 }
 0xbcc   : > { %5796 = vmatmul.mubr.msk.bf16.gmra.mrb[104].mxu0 %vm1501_vm0, %v3640_v26  ;;  %v4067_v35 = vmul.f32 %v8578_v38, %v8578_v38  ;;  %v8596_v41 = vmul.f32 %v8570_v32, %v4044_v58 }
 0xbcd   : > { %5799 = vmatprep.mubr.msk.bf16.mxu0 %vm6899_vm1, %v9034_v27 }
 0xbcf   : > { %v3631_v44 = vpop.f32.mrb[128].mxu0 }
 0xbd0   : > { %v5773_v59 = vpop.f32.mrb[129].mxu0  ;;  %v3641_v60 = vpack.c.bf16 %v3631_v44, %v3631_v44 }
 0xbd1   : > { %v3634_v61 = vpop.f32.mrb[130].mxu0 }
 0xbd2   : > { %v5774_v45 = vpop.f32.mrb[131].mxu0  ;;  %v8593_v61 = vadd.f32 %v8434_v2, %v8337_v13  ;;  %v8609_v13 = vadd.f32 %v8335_v15, %v8434_v2 }
 0xbd3   : > { %v4069_v45 = vmul.f32 %v8587_v57, %v8587_v57 }
 0xbd4   : > { %5800 = vmatmul.mubr.msk.bf16.gmra.mrb[108].mxu0 %vm1501_vm0, %v3641_v60  ;;  %v4046_v60 = vsub.f32 %v8463_v18, %v4034_v16  ;;  %v8613_v18 = vadd.f32 %v8331_v17, %v8434_v2  ;;  %v8627_v17 = vadd.f32 %v8434_v2, %v8345_v14  ;;  %vm3966_vm0 = vcmask 244736  }
 0xbd5   : > { %5861 = vmatprep.mubr.msk.bf16.mxu0 %vm6899_vm1, %v9034_v27 }
 0xc66   : > { %v3723_v6 = vpop.f32.mrb[92].mxu0 }
 0xc67   : > { %v8543_v34 = vadd.f32 %v5107_v29, %v3723_v6  ;;  %v5785_v20 = vpop.f32.mrb[93].mxu0  ;;  %v8605_v6 = vmul.f32 %v8570_v32, %v4046_v60 }
 0xc68   : > { %v3726_v37 = vpop.f32.mrb[94].mxu0 }
 0xc69   : > { %4180 = vadd.xlane.f32.xlu0 %v8543_v34  ;;  %v5786_v9 = vpop.f32.mrb[95].mxu0  ;;  %v8546_v3 = vadd.f32 %v5107_v29, %v3726_v37  ;;  %v4070_v20 = vmul.f32 %v8605_v6, %v8605_v6  ;;  %v8621_v37 = vadd.f32 %v8434_v2, %v8341_v62 }
 0xc6a   : > { %v3845_v9 = vpop.f32.mrb[70].mxu1 }
 0xc6b   : > { %v4093_v15 = vsel %vm1786_vm4, %v4070_v20, 0.0  ;;  %5849 = vmatmul.mubr.msk.f32.vlgmr.msra.gmra.mrb[112].mxu1 %vm2928_vm5, %v3845_v9 }
 0xc6c   : > { %5869 = vmatprep.mubr.msk.bf16.mxu1 %vm6899_vm1, %v9034_v27 }
 0xc6d   : > { %4182 = vadd.xlane.f32.xlu0 %v8546_v3 }
 0xc6e   : > { %v3731_v12 = vpop.f32.mrb[96].mxu0 }
 0xc6f   : > { %v8549_v56 = vadd.f32 %v5107_v29, %v3731_v12  ;;  %v5789_v48 = vpop.f32.mrb[97].mxu0  ;;  %v5829_v12 = vpop.f32.mrb[71].mxu1 }
 0xc70   : > { %v3734_v23 = vpop.f32.mrb[98].mxu0 }
 0xc71   : > { %4184 = vadd.xlane.f32.xlu0 %v8549_v56  ;;  %v5790_v36 = vpop.f32.mrb[99].mxu0  ;;  %v8552_v33 = vadd.f32 %v5107_v29, %v3734_v23 }
 0xc75   : > { %4186 = vadd.xlane.f32.xlu0 %v8552_v33 }
 0xc76   : > { %v3739_v0 = vpop.f32.mrb[100].mxu0 }
 0xc77   : > { %v8555_v49 = vadd.f32 %v5107_v29, %v3739_v0  ;;  %v5793_v7 = vpop.f32.mrb[101].mxu0 }
 0xc78   : > { %v3742_v1 = vpop.f32.mrb[102].mxu0 }
 0xc79   : > { %4188 = vadd.xlane.f32.xlu0 %v8555_v49  ;;  %v5794_v52 = vpop.f32.mrb[103].mxu0  ;;  %v8558_v19 = vadd.f32 %v5107_v29, %v3742_v1 }
 0xc7d   : > { %4190 = vadd.xlane.f32.xlu0 %v8558_v19 }
 0xc9f   : > { %v3747_v31 = vpop.f32.mrb[104].mxu0 }
 0xca0   : > { %v8562_v10 = vadd.f32 %v5107_v29, %v3747_v31  ;;  %v5797_v5 = vpop.f32.mrb[105].mxu0 }
 0xca1   : > { %v3750_v24 = vpop.f32.mrb[106].mxu0 }
 0xca2   : > { %4192 = vadd.xlane.f32.xlu0 %v8562_v10  ;;  %v5798_v42 = vpop.f32.mrb[107].mxu0  ;;  %v8566_v55 = vadd.f32 %v5107_v29, %v3750_v24 }
 0xca6   : > { %4194 = vadd.xlane.f32.xlu0 %v8566_v55 }
 0xca7   : > { %v3755_v4 = vpop.f32.mrb[108].mxu0 }
 0xca8   : > { %v8580_v53 = vadd.f32 %v5107_v29, %v3755_v4  ;;  %v5801_v28 = vpop.f32.mrb[109].mxu0  ;;  %v4068_v29 = vmul.f32 %v8596_v41, %v8596_v41 }
 0xca9   : > { %v3758_v26 = vpop.f32.mrb[110].mxu0 }
 0xcaa   : > { %3998 = vadd.xlane.f32.xlu0 %v8574_v30  ;;  %v5802_v44 = vpop.f32.mrb[111].mxu0  ;;  %v4197_v59 = vsel %vm4196_vm11, %v8580_v53, 0.0 }
 0xcab   : > { %4198 = vadd.xlane.f32.xlu1 %v4197_v59 }
 0xcae   : > { %4087 = vadd.xlane.f32.xlu0 %v4067_v35 }
 0xcaf   : > { %4000 = vadd.xlane.f32.xlu1 %v8593_v61 }
 0xcb2   : > { %4091 = vadd.xlane.f32.xlu0 %v4069_v45 }
 0xcb3   : > { %4089 = vadd.xlane.f32.xlu1 %v4068_v29 }
 0xcb6   : > { %4004 = vadd.xlane.f32.xlu0 %v8609_v13 }
 0xcb7   : > { %4002 = vadd.xlane.f32.xlu1 %v8613_v18 }
 0xcba   : > { %4006 = vadd.xlane.f32.xlu0 %v8621_v37 }
 0xcbb   : > { %4094 = vadd.xlane.f32.xlu1 %v4093_v15 }
 0xcbf   : > { %4008 = vadd.xlane.f32.xlu1 %v8627_v17 }
 0xcf6   : > { %v4181_v62 = vpop.xlane.xlu0 %4180 }
 0xcf7   : > { %v4200_v48 = vmul.f32 0.00862069, %v4181_v62 }
 0xcf9   : > { %v4209_v23 = vsub.f32 %v8543_v34, %v4200_v48 }
 0xcfa   : > { %v4183_v36 = vpop.xlane.xlu0 %4182 }
 0xcfb   : > { %v8635_v0 = vmul.f32 %v8570_v32, %v4209_v23  ;;  %v4201_v7 = vmul.f32 0.00862069, %v4183_v36 }
 0xcfd   : > { %v4210_v14 = vsub.f32 %v8546_v3, %v4201_v7  ;;  %v4227_v1 = vmul.f32 %v8635_v0, %v8635_v0 }
 0xcfe   : > { %v4185_v52 = vpop.xlane.xlu0 %4184 }
 0xcff   : > { %v8641_v11 = vmul.f32 %v8570_v32, %v4210_v14  ;;  %v4202_v31 = vmul.f32 0.00862069, %v4185_v52  ;;  %4236 = vadd.xlane.f32.xlu0 %v4227_v1 }
 0xd01   : > { %v4211_v50 = vsub.f32 %v8549_v56, %v4202_v31  ;;  %v4228_v34 = vmul.f32 %v8641_v11, %v8641_v11  ;;  %v8657_v56 = vadd.f32 %v8339_v47, %v8434_v2 }
 0xd02   : > { %v4187_v39 = vpop.xlane.xlu0 %4186 }
 0xd03   : > { %v8647_v40 = vmul.f32 %v8570_v32, %v4211_v50  ;;  %v4203_v5 = vmul.f32 0.00862069, %v4187_v39  ;;  %4238 = vadd.xlane.f32.xlu1 %v4228_v34 }
 0xd05   : > { %v4212_v3 = vsub.f32 %v8552_v33, %v4203_v5  ;;  %v4229_v8 = vmul.f32 %v8647_v40, %v8647_v40 }
 0xd06   : > { %v4189_v24 = vpop.xlane.xlu0 %4188 }
 0xd07   : > { %v8653_v42 = vmul.f32 %v8570_v32, %v4212_v3  ;;  %v4204_v22 = vmul.f32 0.00862069, %v4189_v24  ;;  %4240 = vadd.xlane.f32.xlu0 %v4229_v8 }
 0xd09   : > { %v4213_v51 = vsub.f32 %v8555_v49, %v4204_v22  ;;  %v4230_v43 = vmul.f32 %v8653_v42, %v8653_v42 }
 0xd0a   : > { %v4191_v63 = vpop.xlane.xlu0 %4190 }
 0xd0b   : > { %v8663_v33 = vmul.f32 %v8570_v32, %v4213_v51  ;;  %v4205_v4 = vmul.f32 0.00862069, %v4191_v63  ;;  %4242 = vadd.xlane.f32.xlu1 %v4230_v43  ;;  %4010 = vadd.xlane.f32.xlu0 %v8657_v56 }
 0xd0d   : > { %v4214_v47 = vsub.f32 %v8558_v19, %v4205_v4  ;;  %v4231_v49 = vmul.f32 %v8663_v33, %v8663_v33 }
 0xd0f   : > { %v8674_v28 = vmul.f32 %v8570_v32, %v4214_v47  ;;  %4012 = vadd.xlane.f32.xlu1 %v8668_v25  ;;  %4244 = vadd.xlane.f32.xlu0 %v4231_v49 }
 0xd11   : > { %v4232_v58 = vmul.f32 %v8674_v28, %v8674_v28 }
 0xd13   : > { %4246 = vadd.xlane.f32.xlu1 %v4232_v58 }
 0xd2f   : > { %v4193_v26 = vpop.xlane.xlu0 %4192 }
 0xd30   : > { %v4206_v16 = vmul.f32 0.00862069, %v4193_v26 }
 0xd32   : > { %v4215_v21 = vsub.f32 %v8562_v10, %v4206_v16 }
 0xd33   : > { %v4195_v2 = vpop.xlane.xlu0 %4194 }
 0xd34   : > { %v8681_v19 = vmul.f32 %v8570_v32, %v4215_v21  ;;  %v4207_v44 = vmul.f32 0.00862069, %v4195_v2 }
 0xd36   : > { %v4216_v59 = vsub.f32 %v8566_v55, %v4207_v44  ;;  %v4233_v35 = vmul.f32 %v8681_v19, %v8681_v19 }
 0xd37   : > { %v3999_v60 = vpop.xlane.xlu0 %3998 }
 0xd38   : > { %v8687_v45 = vmul.f32 %v8570_v32, %v4216_v59  ;;  %v4023_v29 = vmul.f32 0.00862069, %v3999_v60  ;;  %4248 = vadd.xlane.f32.xlu0 %v4233_v35  ;;  %v4199_v20 = vpop.xlane.xlu1 %4198 }
 0xd39   : > { %v4208_v15 = vmul.f32 0.00862069, %v4199_v20 }
 0xd3a   : > { %v4035_v10 = vsub.f32 %v8574_v30, %v4023_v29  ;;  %v4234_v9 = vmul.f32 %v8687_v45, %v8687_v45 }
 0xd3b   : > { %v4217_v12 = vsub.f32 %v8580_v53, %v4208_v15  ;;  %v4088_v62 = vpop.xlane.xlu0 %4087 }
 0xd3c   : > { %v8694_v55 = vmul.f32 %v8570_v32, %v4035_v10  ;;  %v4104_v48 = vmul.f32 0.00862069, %v4088_v62  ;;  %4250 = vadd.xlane.f32.xlu1 %v4234_v9  ;;  %v4001_v23 = vpop.xlane.xlu1 %4000 }
 0xd3d   : > { %v8697_v36 = vmul.f32 %v8570_v32, %v4217_v12  ;;  %v4024_v7 = vmul.f32 0.00862069, %v4001_v23 }
 0xd3e   : > { %v4116_v14 = vadd.f32 1e-05, %v4104_v48  ;;  %v4059_v30 = vmul.f32 %v8694_v55, %v8694_v55 }
 0xd3f   : > { %v4036_v1 = vsub.f32 %v8593_v61, %v4024_v7  ;;  %v4092_v52 = vpop.xlane.xlu0 %4091  ;;  %v4235_v53 = vmul.f32 %v8697_v36, %v8697_v36 }
 0xd40   : > { %6447 = vrsqrt.f32 %v4116_v14  ;;  %v4106_v31 = vmul.f32 0.00862069, %v4092_v52  ;;  %4071 = vadd.xlane.f32.xlu1 %v4059_v30  ;;  %v4090_v50 = vpop.xlane.xlu1 %4089 }
 0xd41   : > { %v8705_v34 = vmul.f32 %v8570_v32, %v4036_v1  ;;  %v4105_v39 = vmul.f32 0.00862069, %v4090_v50  ;;  %v4252_v5 = vsel %vm4196_vm11, %v4235_v53, 0.0 }
 0xd42   : > { %v4118_v3 = vadd.f32 1e-05, %v4106_v31  ;;  %4253 = vadd.xlane.f32.xlu0 %v4252_v5 }
 0xd43   : > { %v4117_v8 = vadd.f32 1e-05, %v4105_v39  ;;  %v4005_v24 = vpop.xlane.xlu0 %4004  ;;  %v4060_v61 = vmul.f32 %v8705_v34, %v8705_v34 }
 0xd44   : > { %6449 = vrsqrt.f32 %v4118_v3  ;;  %v4026_v22 = vmul.f32 0.00862069, %v4005_v24  ;;  %v4003_v51 = vpop.xlane.xlu1 %4002 }
 0xd45   : > { %6451 = vrsqrt.f32 %v4117_v8  ;;  %v4025_v43 = vmul.f32 0.00862069, %v4003_v51  ;;  %v9055_v8 = vld [vmem:[#allocation29_spill] sm:$0xff] }
 0xd46   : > { %v4038_v63 = vsub.f32 %v8609_v13, %v4026_v22  ;;  %4073 = vadd.xlane.f32.xlu0 %v4060_v61  ;;  %v8721_v13 = vld [vmem:[#allocation16] ss:$0 sm:$0xff]  ;;  %v9056_v61 = vld [vmem:[#allocation30_spill] sm:$0xff] }
 0xd47   : > { %v4037_v4 = vsub.f32 %v8613_v18, %v4025_v43  ;;  %v4007_v47 = vpop.xlane.xlu0 %4006 }
 0xd48   : > { %v8713_v49 = vmul.f32 %v8570_v32, %v4038_v63  ;;  %v4027_v58 = vmul.f32 0.00862069, %v4007_v47  ;;  %v4095_v26 = vpop.xlane.xlu1 %4094 }
 0xd49   : > { %v8716_v16 = vmul.f32 %v8570_v32, %v4037_v4  ;;  %v4107_v21 = vmul.f32 0.00862069, %v4095_v26 }
 0xd4a   : > { %v6448_v2 = vpop.eup %6447  ;;  %v4039_v44 = vsub.f32 %v8621_v37, %v4027_v58  ;;  %v4062_v59 = vmul.f32 %v8713_v49, %v8713_v49 }
 0xd4b   : > { %v4140_v18 = vmul.f32 %v6448_v2, %v8578_v38  ;;  %v4119_v35 = vadd.f32 1e-05, %v4107_v21  ;;  %v4061_v60 = vmul.f32 %v8716_v16, %v8716_v16  ;;  %v8732_v38 = vld [vmem:[#allocation18] ss:$0 sm:$0xff]  ;;  %v8761_v21 = vld [vmem:[#allocation19] sm:$0xf] }
 0xd4c   : > { %v8727_v29 = vmul.f32 %v8570_v32, %v4039_v44  ;;  %4077 = vadd.xlane.f32.xlu0 %v4062_v59  ;;  %v4009_v20 = vpop.xlane.xlu1 %4008 }
 0xd4d   : > { %6453 = vrsqrt.f32 %v4119_v35  ;;  %v4028_v15 = vmul.f32 0.00862069, %v4009_v20  ;;  %4075 = vadd.xlane.f32.xlu1 %v4061_v60  ;;  %v4158_v10 = vmul.f32 %v8721_v13, %v4140_v18 }
 0xd4e   : > { %v6450_v37 = vpop.eup %6449  ;;  %v4063_v9 = vmul.f32 %v8727_v29, %v8727_v29 }
 0xd4f   : > { %v6452_v12 = vpop.eup %6451  ;;  %v4142_v62 = vmul.f32 %v6450_v37, %v8587_v57  ;;  %v4040_v48 = vsub.f32 %v8627_v17, %v4028_v15  ;;  %v8742_v30 = vadd.f32 %v8732_v38, %v4158_v10 }
 0xd50   : > { %v4141_v23 = vmul.f32 %v6452_v12, %v8596_v41 }
 0xd51   : > { %v4160_v7 = vmul.f32 %v8721_v13, %v4142_v62  ;;  %v8739_v14 = vmul.f32 %v8570_v32, %v4040_v48  ;;  %4079 = vadd.xlane.f32.xlu1 %v4063_v9  ;;  %v4322_v53 = vrot.slane %v8742_v30, 4 }
 0xd52   : > { %v4159_v1 = vmul.f32 %v8721_v13, %v4141_v23 }
 0xd53   : > { %v4064_v52 = vmul.f32 %v8739_v14, %v8739_v14  ;;  %v4178_v57 = vadd.f32 %v8732_v38, %v4160_v7 }
 0xd54   : > { %v4177_v17 = vadd.f32 %v8732_v38, %v4159_v1 }
 0xd55   : > { %4081 = vadd.xlane.f32.xlu0 %v4064_v52  ;;  %v4325_v41 = vrot.slane %v4178_v57, 4 }
 0xd56   : > { %v4323_v31 = vrot.slane %v4177_v17, 4 }
 0xd57   : > { %v6454_v50 = vpop.eup %6453 }
 0xd58   : > { %v4143_v39 = vmul.f32 %v6454_v50, %v8605_v6  ;;  %v4324_v5 = vsel %vm4196_vm11, %v4322_v53, %v4323_v31  ;;  %v4326_v3 = vsel %vm4196_vm11, %v4323_v31, %v4325_v41  ;;  %v9057_v6 = vld [vmem:[#allocation32_spill] sm:$0xff] }
 0xd59   : > { %v4332_v24 = vadd.f32 %v4324_v5, %v9055_v8  ;;  %v4333_v22 = vadd.f32 %v4326_v3, %v9056_v61 }
 0xd5a   : > { %v4161_v51 = vmul.f32 %v8721_v13, %v4143_v39 }
 0xd5b   : > { %v4428_v43 = vpack.c.bf16 %v4333_v22, %v4332_v24 }
 0xd5c   : > { %v4179_v63 = vadd.f32 %v8732_v38, %v4161_v51 }
 0xd5d   : > { %5866 = vmatpush3.bf16.xpose.msra.mxu1 %v4428_v43 }
 0xd5e   : > { %5867 = vmatprep.subr.bf16.mxu1 %v9034_v27  ;;  %v4327_v4 = vrot.slane %v4179_v63, 4 }
 0xd60   : > { %v4328_v47 = vsel %vm4196_vm11, %v4325_v41, %v4327_v4 }
 0xd61   : > { %v4334_v58 = vadd.f32 %v4328_v47, %v9057_v6 }
 0xd63   : > { %v4429_v26 = vpack.c.bf16 %v4334_v58, %v4334_v58 }
 0xd65   : > { %5868 = vmatpush3.bf16.xpose.msra.mxu1 %v4429_v26 }
 0xd66   : > { %5873 = vmatprep.subr.bf16.mxu1 %v9034_v27 }
 0xd6c   : > { %5870 = vmatmul.mubr.bf16.vlgmr.msra.gmra.mrb[116].mxu1 %v8761_v21 }
 0xd6d   : > { %5883 = vmatprep.mubr.msk.bf16.mxu1 %vm6899_vm1, %v9034_v27  ;;  %vm3988_vm1 = vcmp.lt.s32.totalorder %v9054_v54, 256 }
 0xd8c   : > { %v4237_v2 = vpop.xlane.xlu0 %4236 }
 0xd8d   : > { %v4255_v44 = vmul.f32 0.00862069, %v4237_v2 }
 0xd8f   : > { %v4264_v59 = vadd.f32 1e-05, %v4255_v44 }
 0xd90   : > { %v4239_v18 = vpop.xlane.xlu1 %4238 }
 0xd91   : > { %6455 = vrsqrt.f32 %v4264_v59  ;;  %v4256_v35 = vmul.f32 0.00862069, %v4239_v18 }
 0xd93   : > { %v4265_v60 = vadd.f32 1e-05, %v4256_v35 }
 0xd94   : > { %v4241_v20 = vpop.xlane.xlu0 %4240 }
 0xd95   : > { %6457 = vrsqrt.f32 %v4265_v60  ;;  %v4257_v15 = vmul.f32 0.00862069, %v4241_v20  ;;  %v9058_v20 = vld [vmem:[#allocation33_spill] sm:$0xff] }
 0xd97   : > { %v4266_v37 = vadd.f32 1e-05, %v4257_v15 }
 0xd98   : > { %v4011_v10 = vpop.xlane.xlu0 %4010  ;;  %v4243_v9 = vpop.xlane.xlu1 %4242 }
 0xd99   : > { %6459 = vrsqrt.f32 %v4266_v37  ;;  %v4029_v12 = vmul.f32 0.00862069, %v4011_v10  ;;  %v4258_v62 = vmul.f32 0.00862069, %v4243_v9 }
 0xd9b   : > { %v6456_v48 = vpop.eup %6455  ;;  %v4041_v23 = vsub.f32 %v8657_v56, %v4029_v12  ;;  %v4267_v7 = vadd.f32 1e-05, %v4258_v62 }
 0xd9c   : > { %v4282_v1 = vmul.f32 %v6456_v48, %v8635_v0  ;;  %v4245_v52 = vpop.xlane.xlu0 %4244  ;;  %v4013_v57 = vpop.xlane.xlu1 %4012 }
 0xd9d   : > { %v8769_v17 = vmul.f32 %v8570_v32, %v4041_v23  ;;  %6461 = vrsqrt.f32 %v4267_v7  ;;  %v4259_v41 = vmul.f32 0.00862069, %v4245_v52  ;;  %v4030_v53 = vmul.f32 0.00862069, %v4013_v57  ;;  %v9059_v7 = vld [vmem:[#allocation34_spill] sm:$0xff] }
 0xd9e   : > { %v4291_v56 = vmul.f32 %v8721_v13, %v4282_v1  ;;  %v9060_v1 = vld [vmem:[#allocation35_spill] sm:$0xff] }
 0xd9f   : > { %v6458_v31 = vpop.eup %6457  ;;  %v4268_v50 = vadd.f32 1e-05, %v4259_v41  ;;  %v4042_v39 = vsub.f32 %v8668_v25, %v4030_v53  ;;  %v4065_v5 = vmul.f32 %v8769_v17, %v8769_v17 }
 0xda0   : > { %v4283_v3 = vmul.f32 %v6458_v31, %v8641_v11  ;;  %v4247_v0 = vpop.xlane.xlu1 %4246  ;;  %v4300_v63 = vadd.f32 %v8732_v38, %v4291_v56 }
 0xda1   : > { %6463 = vrsqrt.f32 %v4268_v50  ;;  %v8777_v8 = vmul.f32 %v8570_v32, %v4042_v39  ;;  %v4260_v24 = vmul.f32 0.00862069, %v4247_v0  ;;  %4083 = vadd.xlane.f32.xlu1 %v4065_v5  ;;  %v9061_v0 = vld [vmem:[#allocation38_spill] sm:$0xff] }
 0xda2   : > { %v4292_v61 = vmul.f32 %v8721_v13, %v4283_v3  ;;  %v4345_v2 = vrot.slane %v4300_v63, 2 }
 0xda3   : > { %v6460_v22 = vpop.eup %6459  ;;  %v4269_v51 = vadd.f32 1e-05, %v4260_v24  ;;  %v4066_v25 = vmul.f32 %v8777_v8, %v8777_v8 }
 0xda4   : > { %v4284_v43 = vmul.f32 %v6460_v22, %v8647_v40  ;;  %v4301_v11 = vadd.f32 %v8732_v38, %v4292_v61  ;;  %v4372_v12 = vadd.f32 %v4345_v2, %v9057_v6  ;;  %v9062_v61 = vld [vmem:[#allocation39_spill] sm:$0xff] }
 0xda5   : > { %6465 = vrsqrt.f32 %v4269_v51  ;;  %4085 = vadd.xlane.f32.xlu0 %v4066_v25 }
 0xda6   : > { %v4293_v32 = vmul.f32 %v8721_v13, %v4284_v43  ;;  %v4346_v4 = vrot.slane %v4301_v11, 2  ;;  %v8811_v43 = vpop.f32.mrb[112].mxu1 }
 0xda7   : > { %v6462_v47 = vpop.eup %6461  ;;  %v5850_v11 = vpop.f32.mrb[113].mxu1 }
 0xda8   : > { %v4285_v58 = vmul.f32 %v6462_v47, %v8653_v42  ;;  %v4302_v26 = vadd.f32 %v8732_v38, %v4293_v32  ;;  %v4347_v40 = vsel %vm4344_vm12, %v4345_v2, %v4346_v4 }
 0xda9   : > { %v4373_v15 = vadd.f32 %v4347_v40, %v9058_v20 }
 0xdaa   : > { %v4294_v44 = vmul.f32 %v8721_v13, %v4285_v58  ;;  %v4348_v59 = vrot.slane %v4302_v26, 2 }
 0xdab   : > { %v6464_v18 = vpop.eup %6463  ;;  %v4470_v57 = vpack.c.bf16 %v4373_v15, %v4372_v12 }
 0xdac   : > { %v4286_v35 = vmul.f32 %v6464_v18, %v8663_v33  ;;  %v4303_v60 = vadd.f32 %v8732_v38, %v4294_v44  ;;  %v4349_v10 = vsel %vm4344_vm12, %v4346_v4, %v4348_v59 }
 0xdad   : > { %v4374_v33 = vadd.f32 %v4349_v10, %v9059_v7  ;;  %v4481_v39 = vrot.slane %v4470_v57, 3 }
 0xdae   : > { %v4295_v37 = vmul.f32 %v8721_v13, %v4286_v35  ;;  %v4350_v42 = vrot.slane %v4303_v60, 2 }
 0xdaf   : > { %v6466_v9 = vpop.eup %6465 }
 0xdb0   : > { %v4287_v62 = vmul.f32 %v6466_v9, %v8674_v28  ;;  %v4351_v48 = vsel %vm4344_vm12, %v4348_v59, %v4350_v42  ;;  %v4304_v23 = vadd.f32 %v8732_v38, %v4295_v37 }
 0xdb1   : > { %v4375_v52 = vadd.f32 %v4351_v48, %v9060_v1 }
 0xdb2   : > { %v4296_v41 = vmul.f32 %v8721_v13, %v4287_v62  ;;  %v4352_v53 = vrot.slane %v4304_v23, 2 }
 0xdb3   : > { %v4471_v31 = vpack.c.bf16 %v4375_v52, %v4374_v33 }
 0xdb4   : > { %v4305_v50 = vadd.f32 %v8732_v38, %v4296_v41  ;;  %v4353_v6 = vsel %vm4344_vm12, %v4350_v42, %v4352_v53 }
 0xdb5   : > { %v4482_v5 = vrot.slane %v4471_v31, 3  ;;  %v4376_v24 = vadd.f32 %v4353_v6, %v9061_v0 }
 0xdb6   : > { %v4354_v28 = vrot.slane %v4305_v50, 2 }
 0xdb7   : > { %v4483_v56 = vsel %vm3058_vm8, %v4481_v39, %v4482_v5 }
 0xdb8   : > { %5874 = vmatpush3.bf16.xpose.msra.mxu1 %v4483_v56  ;;  %v4355_v3 = vsel %vm4344_vm12, %v4352_v53, %v4354_v28 }
 0xdb9   : > { %5875 = vmatprep.subr.bf16.mxu1 %v9034_v27  ;;  %v4377_v22 = vadd.f32 %v4355_v3, %v9062_v61 }
 0xdbb   : > { %v4472_v51 = vpack.c.bf16 %v4377_v22, %v4376_v24 }
 0xdbd   : > { %v8809_v25 = vrot.slane %v4472_v51, 3 }
 0xdbf   : > { %v4485_v63 = vsel %vm3058_vm8, %v4482_v5, %v8809_v25 }
 0xdc0   : > { %5876 = vmatpush3.bf16.xpose.msra.mxu1 %v4485_v63  ;;  %v9063_v63 = vld [vmem:[#allocation40_spill] sm:$0xff] }
 0xdc1   : > { %5877 = vmatprep.subr.bf16.mxu1 %v9034_v27 }
 0xdc5   : > { %v4249_v32 = vpop.xlane.xlu0 %4248 }
 0xdc6   : > { %v4261_v4 = vmul.f32 0.00862069, %v4249_v32  ;;  %v9064_v32 = vld [vmem:[#allocation41_spill] sm:$0xff] }
 0xdc8   : > { %v4270_v47 = vadd.f32 1e-05, %v4261_v4 }
 0xdc9   : > { %v4251_v58 = vpop.xlane.xlu1 %4250 }
 0xdca   : > { %6467 = vrsqrt.f32 %v4270_v47  ;;  %v4262_v26 = vmul.f32 0.00862069, %v4251_v58 }
 0xdcc   : > { %v4271_v2 = vadd.f32 1e-05, %v4262_v26 }
 0xdcd   : > { %v4072_v44 = vpop.xlane.xlu1 %4071 }
 0xdce   : > { %6469 = vrsqrt.f32 %v4271_v2  ;;  %v4096_v40 = vmul.f32 0.00862069, %v4072_v44 }
 0xdcf   : > { %v4254_v59 = vpop.xlane.xlu0 %4253 }
 0xdd0   : > { %v4108_v18 = vadd.f32 1e-05, %v4096_v40  ;;  %v4263_v35 = vmul.f32 0.00862069, %v4254_v59 }
 0xdd2   : > { %6471 = vrsqrt.f32 %v4108_v18  ;;  %v4272_v60 = vadd.f32 1e-05, %v4263_v35 }
 0xdd3   : > { %v4074_v20 = vpop.xlane.xlu0 %4073 }
 0xdd4   : > { %v6468_v15 = vpop.eup %6467  ;;  %6473 = vrsqrt.f32 %v4272_v60  ;;  %v4097_v37 = vmul.f32 0.00862069, %v4074_v20 }
 0xdd5   : > { %v4288_v10 = vmul.f32 %v6468_v15, %v8681_v19 }
 0xdd6   : > { %v4109_v42 = vadd.f32 1e-05, %v4097_v37  ;;  %v9066_v37 = vld [vmem:[#allocation44_spill] sm:$0xff] }
 0xdd7   : > { %v4297_v9 = vmul.f32 %v8721_v13, %v4288_v10 }
 0xdd8   : > { %v6470_v12 = vpop.eup %6469  ;;  %6475 = vrsqrt.f32 %v4109_v42 }
 0xdd9   : > { %v4289_v62 = vmul.f32 %v6470_v12, %v8687_v45  ;;  %v4078_v48 = vpop.xlane.xlu0 %4077  ;;  %v4306_v23 = vadd.f32 %v8732_v38, %v4297_v9  ;;  %v6498_v12 = vld [vmem:[%s7381_s27] sm:$0xff] }
 0xdda   : > { %v4099_v7 = vmul.f32 0.00862069, %v4078_v48  ;;  %v4076_v33 = vpop.xlane.xlu1 %4075  ;;  %v6499_v48 = vld [vmem:[%s7381_s27 + $0x8] sm:$0xff] }
 0xddb   : > { %v4298_v1 = vmul.f32 %v8721_v13, %v4289_v62  ;;  %v4098_v52 = vmul.f32 0.00862069, %v4076_v33  ;;  %v4356_v57 = vrot.slane %v4306_v23, 2 }
 0xddc   : > { %v6472_v41 = vpop.eup %6471  ;;  %v4111_v53 = vadd.f32 1e-05, %v4099_v7 }
 0xddd   : > { %v4132_v19 = vmul.f32 %v6472_v41, %v8694_v55  ;;  %v4110_v31 = vadd.f32 1e-05, %v4098_v52  ;;  %v4307_v50 = vadd.f32 %v8732_v38, %v4298_v1  ;;  %v4357_v45 = vsel %vm4344_vm12, %v4354_v28, %v4356_v57 }
 0xdde   : > { %v6474_v39 = vpop.eup %6473  ;;  %6477 = vrsqrt.f32 %v4111_v53  ;;  %v4080_v5 = vpop.xlane.xlu1 %4079  ;;  %v4378_v11 = vadd.f32 %v4357_v45, %v9063_v63 }
 0xddf   : > { %v4290_v6 = vmul.f32 %v6474_v39, %v8697_v36  ;;  %6479 = vrsqrt.f32 %v4110_v31  ;;  %v4100_v56 = vmul.f32 0.00862069, %v4080_v5  ;;  %v4358_v3 = vrot.slane %v4307_v50, 2  ;;  %v6501_v39 = vld [vmem:[%s7381_s27 + $0x10] sm:$0xff] }
 0xde0   : > { %v4150_v55 = vmul.f32 %v8721_v13, %v4132_v19  ;;  %v6500_v19 = vld [vmem:[%s7381_s27 + $0x18] sm:$0xff] }
 0xde1   : > { %v4299_v0 = vmul.f32 %v8721_v13, %v4290_v6  ;;  %v4112_v24 = vadd.f32 1e-05, %v4100_v56  ;;  %v4359_v61 = vsel %vm4344_vm12, %v4356_v57, %v4358_v3 }
 0xde2   : > { %v6476_v22 = vpop.eup %6475  ;;  %v4082_v51 = vpop.xlane.xlu0 %4081  ;;  %v4379_v4 = vadd.f32 %v4359_v61, %v9064_v32  ;;  %v4168_v44 = vadd.f32 %v8732_v38, %v4150_v55  ;;  %v6502_v61 = vld [vmem:[%s7381_s27 + $0x20] sm:$0xff] }
 0xde3   : > { %v4133_v28 = vmul.f32 %v6476_v22, %v8705_v34  ;;  %6481 = vrsqrt.f32 %v4112_v24  ;;  %v4101_v36 = vmul.f32 0.00862069, %v4082_v51  ;;  %v4308_v47 = vadd.f32 %v8732_v38, %v4299_v0  ;;  %v9065_v34 = vld [vmem:[#allocation45_spill] sm:$0xff]  ;;  %v6503_v22 = vld [vmem:[%s7381_s27 + $0x28] sm:$0xff] }
 0xde4   : > { %v4473_v58 = vpack.c.bf16 %v4379_v4, %v4378_v11  ;;  %v4309_v62 = vadd.f32 %v6498_v12, %v4168_v44  ;;  %v6249_v12 = vld [vmem:[%s7389_s21] ss:$8 sps:$4 sm:$0xff]  }
 0xde5   : > { %v4113_v26 = vadd.f32 1e-05, %v4101_v36  ;;  %v4151_v2 = vmul.f32 %v8721_v13, %v4133_v28  ;;  %v4360_v40 = vrot.slane %v4308_v47, 2 }
 0xde6   : > { %v4486_v59 = vrot.slane %v4473_v58, 3 }
 0xde7   : > { %6483 = vrsqrt.f32 %v4113_v26  ;;  %v4169_v18 = vadd.f32 %v8732_v38, %v4151_v2  ;;  %v4361_v35 = vsel %vm4344_vm12, %v4358_v3, %v4360_v40  ;;  %v4381_v60 = vadd.f32 %v4360_v40, %v9065_v34 }
 0xde8   : > { %v6478_v20 = vpop.eup %6477  ;;  %v4487_v15 = vsel %vm3058_vm8, %v8809_v25, %v4486_v59  ;;  %v4380_v10 = vadd.f32 %v4361_v35, %v9066_v37  ;;  %v6505_v37 = vld [vmem:[%s7381_s27 + $0x38] sm:$0xff] }
 0xde9   : > { %v6480_v42 = vpop.eup %6479  ;;  %v4135_v9 = vmul.f32 %v6478_v20, %v8713_v49  ;;  %5878 = vmatpush3.bf16.xpose.msra.mxu1 %v4487_v15  ;;  %v4310_v23 = vadd.f32 %v6499_v48, %v4169_v18  ;;  %v6257_v48 = vld [vmem:[%s7389_s21 + $0x24] ss:$8 sps:$4 sm:$0xff]  }
 0xdea   : > { %v4134_v7 = vmul.f32 %v6480_v42, %v8716_v16  ;;  %5879 = vmatprep.subr.bf16.mxu1 %v9034_v27  ;;  %v4474_v33 = vpack.c.bf16 %v4381_v60, %v4380_v10 }
 0xdeb   : > { %v4383_v1 = vpack.c.bf16 %v4310_v23, %v4309_v62  ;;  %v4153_v25 = vmul.f32 %v8721_v13, %v4135_v9  ;;  %v6251_v62 = vld [vmem:[%s7389_s21 + $0x4] ss:$8 sps:$4 sm:$0xff]   ;;  %v6260_v23 = vld [vmem:[%s7389_s21 + $0x34] ss:$8 sps:$4 sm:$0xff]  }
 0xdec   : > { %v4488_v52 = vrot.slane %v4474_v33, 3  ;;  %v4152_v57 = vmul.f32 %v8721_v13, %v4134_v7  ;;  %v6258_v7 = vld [vmem:[%s7389_s21 + $0x30] ss:$8 sps:$4 sm:$0xff]   ;;  %v6263_v33 = vld [vmem:[%s7389_s21 + $0x44] ss:$8 sps:$4 sm:$0xff]  }
 0xded   : > { %v6482_v41 = vpop.eup %6481  ;;  %5852 = vmatpush3.bf16.xpose.msra.mxu0 %v4383_v1  ;;  %v4171_v49 = vadd.f32 %v8732_v38, %v4153_v25  ;;  %v6261_v1 = vld [vmem:[%s7389_s21 + $0x40] ss:$8 sps:$4 sm:$0xff]   ;;  %v6266_v25 = vld [vmem:[%s7389_s21 + $0x54] ss:$8 sps:$4 sm:$0xff]  }
 0xdee   : > { %v4136_v53 = vmul.f32 %v6482_v41, %v8727_v29  ;;  %5853 = vmatprep.subr.bf16.mxu0 %v9034_v27  ;;  %v4170_v16 = vadd.f32 %v8732_v38, %v4152_v57  ;;  %v4489_v50 = vsel %vm3058_vm8, %v4486_v59, %v4488_v52  ;;  %v6269_v57 = vld [vmem:[%s7389_s21 + $0x64] ss:$8 sps:$4 sm:$0xff]   ;;  %v6267_v41 = vld [vmem:[%s7389_s21 + $0x60] ss:$8 sps:$4 sm:$0xff]  }
 0xdef   : > { %v4312_v31 = vadd.f32 %v6500_v19, %v4171_v49  ;;  %v6272_v49 = vld [vmem:[%s7389_s21 + $0x74] ss:$8 sps:$4 sm:$0xff]   ;;  %v6273_v19 = vld [vmem:[%s7389_s21 + $0x80] ss:$8 sps:$4 sm:$0xff]  }
 0xdf0   : > { %v4311_v5 = vadd.f32 %v6501_v39, %v4170_v16  ;;  %v4154_v45 = vmul.f32 %v8721_v13, %v4136_v53  ;;  %v6270_v53 = vld [vmem:[%s7389_s21 + $0x70] ss:$8 sps:$4 sm:$0xff]   ;;  %v6275_v16 = vld [vmem:[%s7389_s21 + $0x84] ss:$8 sps:$4 sm:$0xff]  }
 0xdf1   : > { %v6484_v6 = vpop.eup %6483  ;;  %5880 = vmatpush3.bf16.xpose.msra.mxu1 %v4489_v50  ;;  %v6278_v50 = vld [vmem:[%s7389_s21 + $0x90] ss:$8 sps:$4 sm:$0x7f]  }
 0xdf2   : > { %v4137_v56 = vmul.f32 %v6484_v6, %v8739_v14  ;;  %v4384_v3 = vpack.c.bf16 %v4312_v31, %v4311_v5  ;;  %5881 = vmatprep.subr.bf16.mxu1 %v9034_v27  ;;  %v4172_v0 = vadd.f32 %v8732_v38, %v4154_v45  ;;  %v6276_v31 = vld [vmem:[%s7389_s21 + $0x94] ss:$8 sps:$4 sm:$0x7f]   ;;  %v4670_v39 = vsel %vm4668_vm14, %v6278_v50, 0 }
 0xdf4   : > { %v4155_v29 = vmul.f32 %v8721_v13, %v4137_v56  ;;  %v4313_v55 = vadd.f32 %v6502_v61, %v4172_v0 }
 0xdf5   : > { %5854 = vmatpush3.bf16.xpose.msra.mxu0 %v4384_v3 }
 0xdf6   : > { %5855 = vmatprep.subr.bf16.mxu0 %v9034_v27  ;;  %v4173_v24 = vadd.f32 %v8732_v38, %v4155_v29 }
 0xdf8   : > { %v4314_v51 = vadd.f32 %v6503_v22, %v4173_v24  ;;  %v2785_v24 = vsel %vm2784_vm15, %v8355_v46, -inf }
 0xdf9   : > { %5882 = vmatpush3.bf16.xpose.msra.mxu1 %v4488_v52  ;;  %v6264_v52 = vld [vmem:[%s7389_s21 + $0x50] ss:$8 sps:$4 sm:$0xff]  }
 0xdfa   : > { %v4385_v63 = vpack.c.bf16 %v4314_v51, %v4313_v55 }
 0xdfd   : > { %5856 = vmatpush3.bf16.xpose.msra.mxu0 %v4385_v63 }
 0xdfe   : > { %5857 = vmatprep.subr.bf16.mxu0 %v9034_v27 }
 0xe00   : > { %5884 = vmatmul.mubr.bf16.vlgmr.msra.gmra.mrb[120].mxu1 %v8761_v21 }
 0xe2e   : > { %v4084_v14 = vpop.xlane.xlu1 %4083 }
 0xe2f   : > { %v4102_v11 = vmul.f32 0.00862069, %v4084_v14 }
 0xe31   : > { %v4114_v32 = vadd.f32 1e-05, %v4102_v11 }
 0xe32   : > { %v4086_v4 = vpop.xlane.xlu0 %4085 }
 0xe33   : > { %6485 = vrsqrt.f32 %v4114_v32  ;;  %v4103_v28 = vmul.f32 0.00862069, %v4086_v4 }
 0xe35   : > { %v4115_v36 = vadd.f32 1e-05, %v4103_v28 }
 0xe37   : > { %6487 = vrsqrt.f32 %v4115_v36 }
 0xe3d   : > { %v6486_v47 = vpop.eup %6485 }
 0xe3e   : > { %v4138_v58 = vmul.f32 %v6486_v47, %v8769_v17  ;;  %v6504_v17 = vld [vmem:[%s7381_s27 + $0x30] sm:$0xff] }
 0xe3f   : > { %v4464_v26 = vpop.f32.mrb[116].mxu1 }
 0xe40   : > { %4536 = vrot.lane.b32.xlu1 %v4464_v26, %s6903_s4  ;;  %v4156_v2 = vmul.f32 %v8721_v13, %v4138_v58  ;;  %v5871_v44 = vpop.f32.mrb[117].mxu1 }
 0xe41   : > { %v6488_v40 = vpop.eup %6487  ;;  %v4467_v59 = vpop.f32.mrb[118].mxu1 }
 0xe42   : > { %v4139_v18 = vmul.f32 %v6488_v40, %v8777_v8  ;;  %v5872_v35 = vpop.f32.mrb[119].mxu1  ;;  %v4174_v60 = vadd.f32 %v8732_v38, %v4156_v2  ;;  %v6506_v8 = vld [vmem:[%s7381_s27 + $0x40] sm:$0xf] }
 0xe44   : > { %v4157_v34 = vmul.f32 %v8721_v13, %v4139_v18  ;;  %v4315_v15 = vadd.f32 %v6504_v17, %v4174_v60  ;;  %v4317_v13 = vadd.f32 %v6506_v8, %v8742_v30  ;;  %v6252_v30 = vld [vmem:[%s7389_s21 + $0x10] ss:$8 sps:$4 sm:$0xff]  }
 0xe46   : > { %v4175_v20 = vadd.f32 %v8732_v38, %v4157_v34  ;;  %v4387_v9 = vpack.c.bf16 %v4317_v13, %v4317_v13  ;;  %v3950_v38 = vsel %vm3949_vm13, %v8811_v43, -inf }
 0xe48   : > { %v4316_v10 = vadd.f32 %v6505_v37, %v4175_v20  ;;  %v6905_v37 = vmov 1966171168  }
 0xe4a   : > { %v4386_v42 = vpack.c.bf16 %v4316_v10, %v4315_v15  ;;  %v3972_v10 = vunpack.c.l.s4 %v6905_v37 }
 0xe4c   : > { %5858 = vmatpush3.bf16.xpose.msra.mxu0 %v4386_v42  ;;  %v3973_v42 = vunpack.c.0.s8 %v3972_v10 }
 0xe4d   : > { %5859 = vmatprep.subr.bf16.mxu0 %v9034_v27  ;;  %v6254_v27 = vld [vmem:[%s7389_s21 + $0x14] ss:$8 sps:$4 sm:$0xff]  }
 0xe54   : > { %5860 = vmatpush3.bf16.xpose.msra.mxu0 %v4387_v9 }
 0xe55   : > { %4675 = vmatprep.subr.bf16.mxu0 %v6251_v62 }
 0xe5b   : > { %5862 = vmatmul.mubr.bf16.vlgmr.msra.gmra.mrb[132].mxu0 %v8761_v21  ;;  %v6255_v21 = vld [vmem:[%s7389_s21 + $0x20] ss:$8 sps:$4 sm:$0xff]  }
 0xe5c   : > { %4676 = vmatpush1.bf16.msra.mxu0 %v6249_v12 }
 0xe5d   : > { %4677 = vmatprep.subr.bf16.mxu0 %v6254_v27 }
 0xe60   : > { %4678 = vmatpush1.bf16.msra.mxu0 %v6252_v30 }
 0xe61   : > { %4679 = vmatprep.subr.bf16.mxu0 %v6257_v48 }
 0xe64   : > { %3951 = vmax.xlane.f32.xlu1 %v3950_v38  ;;  %4680 = vmatpush1.bf16.msra.mxu0 %v6255_v21  ;;  %v9068_v38 = vld [vmem:[#allocation47_spill] sm:$0xff] }
 0xe65   : > { %4681 = vmatprep.subr.bf16.mxu0 %v6260_v23  ;;  %v3976_v12 = vsub.s32 %v3973_v42, %v9068_v38 }
 0xe68   : > { %4682 = vmatpush1.bf16.msra.mxu0 %v6258_v7 }
 0xe69   : > { %4683 = vmatprep.subr.bf16.mxu0 %v6263_v33 }
 0xe6c   : > { %4684 = vmatpush1.bf16.msra.mxu0 %v6261_v1 }
 0xe6d   : > { %4685 = vmatprep.subr.bf16.mxu0 %v6266_v25 }
 0xe70   : > { %4686 = vmatpush1.bf16.msra.mxu0 %v6264_v52 }
 0xe71   : > { %4687 = vmatprep.subr.bf16.mxu0 %v6269_v57 }
 0xe74   : > { %4688 = vmatpush1.bf16.msra.mxu0 %v6267_v41 }
 0xe75   : > { %4689 = vmatprep.subr.bf16.mxu0 %v6272_v49 }
 0xe78   : > { %4690 = vmatpush1.bf16.msra.mxu0 %v6270_v53 }
 0xe79   : > { %4691 = vmatprep.subr.bf16.mxu0 %v6275_v16 }
 0xe7c   : > { %4692 = vmatpush1.bf16.msra.mxu0 %v6273_v19 }
 0xe7d   : > { %5160 = vmatprep.subr.msk.bf16.mxu0 %vm4668_vm14, %v6276_v31 }
 0xe80   : > { %4694 = vmatpush1.bf16.msra.mxu0 %v4670_v39 }
 0xeb2   : > { %v4537_v3 = vpop.permute.xlu1 %4536 }
 0xed3   : > { %v4529_v5 = vpop.f32.mrb[120].mxu1 }
 0xed4   : > { %4540 = vrot.lane.b32.xlu0 %v4529_v5, %s6904_s6  ;;  %v5885_v45 = vpop.f32.mrb[121].mxu1 }
 0xed5   : > { %v4532_v6 = vpop.f32.mrb[122].mxu1 }
 0xed6   : > { %v5886_v56 = vpop.f32.mrb[123].mxu1 }
 0xef1   : > { %v3952_v29 = vpop.xlane.xlu1 %3951 }
 0xef2   : > { %v3953_v0 = vsub.f32 %v8811_v43, %v3952_v29 }
 0xef3   : > { %2786 = vmax.xlane.f32.xlu0 %v2785_v24 }
 0xef4   : > { %v3954_v61 = vmul.f32 1.442695, %v3953_v0 }
 0xef6   : > { %6489 = vpow2.f32 %v3954_v61 }
 0xf00   : > { %v6490_v55 = vpop.eup %6489 }
 0xf01   : > { %v3956_v22 = vsel %vm3949_vm13, %v6490_v55, 0.0 }
 0xf02   : > { %3957 = vadd.xlane.f32.xlu1 %v3956_v22 }
 0xf2e   : > { %v4422_v51 = vpop.f32.mrb[132].mxu0 }
 0xf2f   : > { %v4543_v63 = vsel %vm1616_vm2, %v4422_v51, %v4537_v3  ;;  %v5863_v14 = vpop.f32.mrb[133].mxu0 }
 0xf30   : > { %v4425_v11 = vpop.f32.mrb[134].mxu0 }
 0xf31   : > { %v5864_v32 = vpop.f32.mrb[135].mxu0 }
 0xf46   : > { %v4541_v4 = vpop.permute.xlu0 %4540 }
 0xf47   : > { %v4544_v43 = vsel %vm2928_vm5, %v4543_v63, %v4541_v4  ;;  %v4546_v28 = vpack.c.bf16 %v4541_v4, %v4541_v4 }
 0xf48   : > { %v4545_v36 = vpack.c.bf16 %v4544_v43, %v4544_v43 }
 0xf49   : > { %5161 = vmatprep.mubr.msk.bf16.mxu0 %vm3966_vm0, %v4546_v28 }
 0xf4a   : > { %4708 = vmatmul.mubr.bf16.vlgmr.msra.gmra.mrb[136].mxu0 %v4545_v36 }
 0xf80   : > { %v2787_v47 = vpop.xlane.xlu0 %2786 }
 0xf81   : > { %v2788_v58 = vsub.f32 %v8355_v46, %v2787_v47 }
 0xf83   : > { %v2789_v26 = vmul.f32 1.442695, %v2788_v58 }
 0xf85   : > { %6491 = vpow2.f32 %v2789_v26 }
 0xf8f   : > { %v6492_v2 = vpop.eup %6491  ;;  %v3958_v44 = vpop.xlane.xlu1 %3957 }
 0xf90   : > { %6493 = vrcp.f32 %v3958_v44  ;;  %v2791_v40 = vsel %vm2784_vm15, %v6492_v2, 0.0 }
 0xf91   : > { %2792 = vadd.xlane.f32.xlu0 %v2791_v40 }
 0xf9a   : > { %v6494_v59 = vpop.eup %6493 }
 0xf9b   : > { %v3960_v18 = vmul.f32 %v6494_v59, %v6490_v55 }
 0xf9d   : > { %3962 = vrot.lane.b32.xlu1 %v3960_v18, %s6904_s6 }
0x100f   : > { %v3963_v13 = vpop.permute.xlu1 %3962 }
0x1010   : > { %v3967_v62 = vsel %vm3966_vm0, %v3963_v13, 0.0 }
0x101d   : > { %v4709_v35 = vpop.f32.mrb[136].mxu0 }
0x101e   : > { %v4716_v34 = vmax.f32 %v4709_v35, 0.0  ;;  %v2793_v46 = vpop.xlane.xlu0 %2792  ;;  %v4711_v60 = vpop.f32.mrb[137].mxu0 }
0x101f   : > { %6495 = vrcp.f32 %v2793_v46  ;;  %v4717_v20 = vmax.f32 %v4711_v60, 0.0  ;;  %v4713_v17 = vpop.f32.mrb[138].mxu0 }
0x1020   : > { %4718 = vst [vmem:[%s733_s22] sm:$0xff] %v4716_v34  ;;  %v4714_v15 = vpop.f32.mrb[139].mxu0 }
0x1021   : > { %4719 = vst.msk [vmem:[%s733_s22 + $0x8] sm:$0xff] %vm3966_vm0, %v4717_v20 }
0x1029   : > { %v6496_v8 = vpop.eup %6495 }
0x102a   : > { %v2795_v9 = vmul.f32 %v6496_v8, %v6492_v2 }
0x102c   : > { %v3965_v27 = vsel %vm2928_vm5, %v2795_v9, %v3963_v13 }
0x102d   : > { %v3970_v30 = vcombine.low %v3965_v27, %v3967_v62 }
0x102f   : > { %v3977_v48 = vrot.slane %v3970_v30, %v3976_v12 }
0x1031   : > { %v3984_v21 = vrot.slane %v3977_v48, %v3976_v12 }
0x1033   : > { %3990 = vst.msk [vmem:[%s728_s17] sm:$0x3] %vm3988_vm1, %v3984_v21 }
0x1034 PF: > { %s9070_s0 = sld [smem:[#allocation28_spill]] }
0x103a   : > { %s34_s21 = sadd.s32 1, %s9070_s0  }
0x103b   : > { %p31_p7 = scmp.ge.s32.totalorder %s34_s21, 4  }
0x103d   :  { %33 = sbr.rel (!%p31_p7) target bundleno = 14 (0xe), region = 177 }
0x1044   :  { %4755 = vsyncpa [#allocation3], 1 }
0x1045   :  { %4757 = vsyncpa [#allocation3 + $0x1], 1 }
0x1046   :  { %4758 = vsyncpa [#allocation5], 1 }
0x1047   :  { %4759 = vsyncpa [#allocation8], 1 }
0x1048   :  { %4760 = vsyncpa [#allocation11], 1 }
0x1049   :  { %4761 = vsyncpa [#allocation14], 1 }
0x104a   :  { %4762 = vsyncpa [#allocation17], 1 }
0x104b   :  { %4763 = vsyncpa [#allocation20], 1 }

// kernel: mca_gcn_forward.3
= control target key start
LH: loop header
LB: loop body
LE: loop exit
PB: predicated region body
PF: predicated region fallthrough
CT: control target
= control target key end

     0   :  { %12 = vsyncpa [#allocation3], 0  ;;  %s8043_s0 = inlined_call_operand.vmem [shape: f32[2,1264], index: 0, kind: input, shape index: {}]   ;;  %s8044_s1 = inlined_call_operand.vmem [shape: bf16[1264,640], index: 1, kind: input, shape index: {}]   ;;  %s8045_s2 = inlined_call_operand.vmem [shape: f32[1,640], index: 2, kind: input, shape index: {}]   ;;  %s8046_s3 = inlined_call_operand.vmem [shape: bf16[640,384], index: 3, kind: input, shape index: {}]   ;;  %s8047_s4 = inlined_call_operand.vmem [shape: f32[1,384], index: 4, kind: input, shape index: {}]   ;;  %s8048_s5 = inlined_call_operand.hbm [shape: bf16[384,128], index: 5, kind: input, shape index: {}]   ;;  %s8049_s6 = inlined_call_operand.vmem [shape: f32[1,128], index: 6, kind: input, shape index: {}]   ;;  %s8050_s7 = inlined_call_operand.hbm [shape: f32[2,128], index: 7, kind: output, shape index: {}]  }
   0x1   :  { %13 = vsyncpa [#allocation4], 0  ;;  %s6247_s24 = smov [#allocation2]   ;;  %s6199_s28 = scalar_lea.hbm %s8048_s5, 3072 }
   0x2   :  { %s29_s25 = sshll.u32 %s6247_s24, 4  ;;  %p6200_p0 = scmp.ne.s32.totalorder %s8048_s5, %s6199_s28  ;;  %s30_s25 = int_to_ptr.vmem [resolvable:$true] %s29_s25 }
   0x3   :  { %p6203_p1 = scmp.lt.u32.totalorder %s6199_s28, %s8048_s5 }
   0x5   :  { %p6205_p2 = pnand %p6203_p1, %p6200_p0 }
   0x7   :  { %6208 = shalt.err (!%p6205_p2)
}
   0x8   :  { %s6209_s10 = scalar_lea.vmem %s30_s25, 3072  ;;  %p6214_p4 = scmp.lt.s32.totalorder %s30_s25, %s30_s25 }
   0x9   :  { %p6210_p3 = scmp.ne.s32.totalorder %s30_s25, %s6209_s10  ;;  %p6215_p5 = scmp.lt.s32.totalorder %s6209_s10, %s6209_s10 }
   0xb   :  { %p6216_p6 = por %p6215_p5, %p6214_p4 }
   0xd   :  { %p6217_p7 = pnand %p6216_p6, %p6210_p3 }
   0xf   :  { %6220 = shalt.err (!%p6217_p7)
}
  0x10   :  { %s6248_s11 = smov 64   ;;  %s6249_s12 = smov 4  }
  0x11   :  { %35 = dma.hbm_to_vmem [thread:$0]  %s8048_s5, 3072, %s30_s25, [#allocation3], %s6248_s11, %s6248_s11, %s6249_s12  }
  0x12   :  { %6243 = dma.done.wait [#allocation3], 3072  }
  0x13   :  { %6244 = vsyncadd [#allocation3], 4294964224  ;;  %v5460_v0 = vld [vmem:[%s8044_s1 + $0x4] ss:$20 sps:$4 sm:$0xff]   ;;  %v5462_v1 = vld [vmem:[%s8044_s1 + $0xc] ss:$20 sps:$4 sm:$0xff]   ;;  %v52_v38 = vlaneseq }
  0x14   :  { %2669 = vmatprep.subr.bf16.mxu0 %v5460_v0  ;;  %v5464_v2 = vld [vmem:[%s8044_s1] ss:$20 sps:$4 sm:$0xff]   ;;  %v5465_v3 = vld [vmem:[%s8044_s1 + $0x8] ss:$20 sps:$4 sm:$0xff]   ;;  %2874 = vmatprep.subr.bf16.mxu1 %v5462_v1  ;;  %v5471_v7 = vld [vmem:[%s8044_s1 + $0x30] ss:$20 sps:$4 sm:$0xff]  }
  0x15   :  { %v5466_v4 = vld [vmem:[%s8044_s1 + $0x2c] ss:$20 sps:$4 sm:$0xff]   ;;  %2670 = vmatpush1.bf16.msra.mxu0 %v5464_v2  ;;  %2875 = vmatpush1.bf16.msra.mxu1 %v5465_v3  ;;  %v5468_v5 = vld [vmem:[%s8044_s1 + $0x34] ss:$20 sps:$4 sm:$0xff]   ;;  %v5474_v9 = vld [vmem:[%s8044_s1 + $0x5c] ss:$20 sps:$4 sm:$0xff]  }
  0x16   :  { %v5470_v6 = vld [vmem:[%s8044_s1 + $0x28] ss:$20 sps:$4 sm:$0xff]   ;;  %2671 = vmatprep.subr.bf16.mxu0 %v5466_v4  ;;  %2876 = vmatprep.subr.bf16.mxu1 %v5468_v5  ;;  %v5476_v10 = vld [vmem:[%s8044_s1 + $0x50] ss:$20 sps:$4 sm:$0xff]   ;;  %v5477_v11 = vld [vmem:[%s8044_s1 + $0x58] ss:$20 sps:$4 sm:$0xff]  }
  0x17   :  { %v5472_v8 = vld [vmem:[%s8044_s1 + $0x54] ss:$20 sps:$4 sm:$0xff]   ;;  %v5478_v12 = vld [vmem:[%s8044_s1 + $0x7c] ss:$20 sps:$4 sm:$0xff]   ;;  %v5480_v13 = vld [vmem:[%s8044_s1 + $0x84] ss:$20 sps:$4 sm:$0xff]  }
  0x18   :  { %v5482_v14 = vld [vmem:[%s8044_s1 + $0x78] ss:$20 sps:$4 sm:$0xff]   ;;  %v5483_v15 = vld [vmem:[%s8044_s1 + $0x80] ss:$20 sps:$4 sm:$0xff]   ;;  %v5489_v19 = vld [vmem:[%s8044_s1 + $0xa8] ss:$20 sps:$4 sm:$0xff]  }
  0x19   :  { %2672 = vmatpush1.bf16.msra.mxu0 %v5470_v6  ;;  %2877 = vmatpush1.bf16.msra.mxu1 %v5471_v7  ;;  %v5484_v16 = vld [vmem:[%s8044_s1 + $0xa4] ss:$20 sps:$4 sm:$0xff]   ;;  %v5486_v17 = vld [vmem:[%s8044_s1 + $0xac] ss:$20 sps:$4 sm:$0xff]   ;;  %v5492_v21 = vld [vmem:[%s8044_s1 + $0xd4] ss:$20 sps:$4 sm:$0xff]  }
  0x1a   :  { %2673 = vmatprep.subr.bf16.mxu0 %v5472_v8  ;;  %2878 = vmatprep.subr.bf16.mxu1 %v5474_v9  ;;  %v5488_v18 = vld [vmem:[%s8044_s1 + $0xa0] ss:$20 sps:$4 sm:$0xff]   ;;  %v5494_v22 = vld [vmem:[%s8044_s1 + $0xc8] ss:$20 sps:$4 sm:$0xff]   ;;  %v5495_v23 = vld [vmem:[%s8044_s1 + $0xd0] ss:$20 sps:$4 sm:$0xff]  }
  0x1b   :  { %v5490_v20 = vld [vmem:[%s8044_s1 + $0xcc] ss:$20 sps:$4 sm:$0xff]   ;;  %v5496_v24 = vld [vmem:[%s8044_s1 + $0xf4] ss:$20 sps:$4 sm:$0xff]   ;;  %v5498_v25 = vld [vmem:[%s8044_s1 + $0xfc] ss:$20 sps:$4 sm:$0xff]  }
  0x1c   :  { %v5500_v26 = vld [vmem:[%s8044_s1 + $0xf0] ss:$20 sps:$4 sm:$0xff]   ;;  %v5501_v27 = vld [vmem:[%s8044_s1 + $0xf8] ss:$20 sps:$4 sm:$0xff]   ;;  %v5507_v31 = vld [vmem:[%s8044_s1 + $0x120] ss:$20 sps:$4 sm:$0xff]  }
  0x1d   :  { %2674 = vmatpush1.bf16.msra.mxu0 %v5476_v10  ;;  %2879 = vmatpush1.bf16.msra.mxu1 %v5477_v11  ;;  %v5502_v28 = vld [vmem:[%s8044_s1 + $0x11c] ss:$20 sps:$4 sm:$0xff]   ;;  %v5504_v29 = vld [vmem:[%s8044_s1 + $0x124] ss:$20 sps:$4 sm:$0xff]   ;;  %v5510_v33 = vld [vmem:[%s8044_s1 + $0x14c] ss:$20 sps:$4 sm:$0xff]  }
  0x1e   :  { %2675 = vmatprep.subr.bf16.mxu0 %v5478_v12  ;;  %2880 = vmatprep.subr.bf16.mxu1 %v5480_v13  ;;  %v5506_v30 = vld [vmem:[%s8044_s1 + $0x118] ss:$20 sps:$4 sm:$0xff]   ;;  %v5512_v34 = vld [vmem:[%s8044_s1 + $0x140] ss:$20 sps:$4 sm:$0xff]   ;;  %v5513_v35 = vld [vmem:[%s8044_s1 + $0x148] ss:$20 sps:$4 sm:$0xff]  }
  0x1f   :  { %v5508_v32 = vld [vmem:[%s8044_s1 + $0x144] ss:$20 sps:$4 sm:$0xff]   ;;  %v6250_v36 = vmov 1983009808   ;;  %v5514_v39 = vld [vmem:[%s8044_s1 + $0x16c] ss:$20 sps:$4 sm:$0xff]  }
  0x20   :  { %v50_v37 = vunpack.c.l.s4 %v6250_v36  ;;  %v5516_v40 = vld [vmem:[%s8044_s1 + $0x174] ss:$20 sps:$4 sm:$0xff]   ;;  %v6424_v43 = vshrl.u32 %v52_v38, 7  ;;  %v5519_v44 = vld [vmem:[%s8044_s1 + $0x170] ss:$20 sps:$4 sm:$0xff]   ;;  %vm2665_vm0 = vcmask 916480  }
  0x21   :  { %2676 = vmatpush1.bf16.msra.mxu0 %v5482_v14  ;;  %2881 = vmatpush1.bf16.msra.mxu1 %v5483_v15  ;;  %v5518_v41 = vld [vmem:[%s8044_s1 + $0x168] ss:$20 sps:$4 sm:$0xff]   ;;  %v5524_v47 = vld [vmem:[%s8044_s1 + $0x190] ss:$20 sps:$4 sm:$0xff]   ;;  %v5525_v48 = vld [vmem:[%s8044_s1 + $0x198] ss:$20 sps:$4 sm:$0xff]  }
  0x22   :  { %2677 = vmatprep.subr.bf16.mxu0 %v5484_v16  ;;  %2882 = vmatprep.subr.bf16.mxu1 %v5486_v17  ;;  %v51_v42 = vunpack.c.0.s8 %v50_v37  ;;  %v5520_v45 = vld [vmem:[%s8044_s1 + $0x194] ss:$20 sps:$4 sm:$0xff]   ;;  %v5522_v46 = vld [vmem:[%s8044_s1 + $0x19c] ss:$20 sps:$4 sm:$0xff]   ;;  %v5528_v51 = vld [vmem:[%s8044_s1 + $0x1c4] ss:$20 sps:$4 sm:$0xff]  }
  0x23   :  { %v5526_v50 = vld [vmem:[%s8044_s1 + $0x1bc] ss:$20 sps:$4 sm:$0xff]   ;;  %v42_v52 = vld [vmem:[%s8043_s0] sm:$0xff]  ;;  %v5530_v53 = vld [vmem:[%s8044_s1 + $0x1b8] ss:$20 sps:$4 sm:$0xff]   ;;  %vm6253_vm1 = vmmov 0  }
  0x24   :  { %v6442_v49 = vsub.s32 %v51_v42, %v6424_v43  ;;  %v5531_v55 = vld [vmem:[%s8044_s1 + $0x1c0] ss:$20 sps:$4 sm:$0xff]   ;;  %v5532_v56 = vld [vmem:[%s8044_s1 + $0x1e4] ss:$20 sps:$4 sm:$0xff]   ;;  %v5537_v61 = vld [vmem:[%s8044_s1 + $0x1e8] ss:$20 sps:$4 sm:$0xff]   ;;  %v48_v4 = vcombine.high %v42_v52, %v42_v52 }
  0x25   :  { %2678 = vmatpush1.bf16.msra.mxu0 %v5488_v18  ;;  %2883 = vmatpush1.bf16.msra.mxu1 %v5489_v19  ;;  %v5534_v57 = vld [vmem:[%s8044_s1 + $0x1ec] ss:$20 sps:$4 sm:$0xff]   ;;  %v5540_v63 = vld [vmem:[%s8044_s1 + $0x214] ss:$20 sps:$4 sm:$0xff]   ;;  %v5543_v1 = vld [vmem:[%s8044_s1 + $0x210] ss:$20 sps:$4 sm:$0xff]  }
  0x26   :  { %2679 = vmatprep.subr.bf16.mxu0 %v5490_v20  ;;  %2884 = vmatprep.subr.bf16.mxu1 %v5492_v21  ;;  %v55_v54 = vrot.slane %v42_v52, %v6442_v49  ;;  %v5536_v59 = vld [vmem:[%s8044_s1 + $0x1e0] ss:$20 sps:$4 sm:$0xff]   ;;  %v5542_v0 = vld [vmem:[%s8044_s1 + $0x208] ss:$20 sps:$4 sm:$0xff]   ;;  %v5548_v5 = vld [vmem:[%s8044_s1 + $0x230] ss:$20 sps:$4 sm:$0xff]   ;;  %v6507_v9 = vrot.slane %v48_v4, %v6442_v49 }
  0x27   :  { %v5538_v62 = vld [vmem:[%s8044_s1 + $0x20c] ss:$20 sps:$4 sm:$0xff]   ;;  %v5544_v2 = vld [vmem:[%s8044_s1 + $0x234] ss:$20 sps:$4 sm:$0xff]   ;;  %v5546_v3 = vld [vmem:[%s8044_s1 + $0x23c] ss:$20 sps:$4 sm:$0xff]  }
  0x28   :  { %v63_v58 = vcombine.high %v55_v54, %v55_v54  ;;  %v5549_v6 = vld [vmem:[%s8044_s1 + $0x238] ss:$20 sps:$4 sm:$0xff]   ;;  %v5550_v7 = vld [vmem:[%s8044_s1 + $0x25c] ss:$20 sps:$4 sm:$0xff]   ;;  %v5555_v11 = vld [vmem:[%s8044_s1 + $0x260] ss:$20 sps:$4 sm:$0xff]   ;;  %v64_v14 = vcombine.high %v6507_v9, %v6507_v9  ;;  %v6526_v16 = vpack.c.bf16 %v55_v54, %v55_v54 }
  0x29   :  { %2680 = vmatpush1.bf16.msra.mxu0 %v5494_v22  ;;  %2885 = vmatpush1.bf16.msra.mxu1 %v5495_v23  ;;  %v5552_v8 = vld [vmem:[%s8044_s1 + $0x264] ss:$20 sps:$4 sm:$0xff]   ;;  %v5561_v13 = vld [vmem:[%s8044_s1 + $0x28c] ss:$20 sps:$4 sm:$0xff]   ;;  %v5559_v17 = vld [vmem:[%s8044_s1 + $0x288] ss:$20 sps:$4 sm:$0xff]  }
  0x2a   :  { %2681 = vmatprep.subr.bf16.mxu0 %v5496_v24  ;;  %2886 = vmatprep.subr.bf16.mxu1 %v5498_v25  ;;  %v6469_v60 = vpack.c.bf16 %v63_v58, %v63_v58  ;;  %v5554_v10 = vld [vmem:[%s8044_s1 + $0x258] ss:$20 sps:$4 sm:$0xff]   ;;  %v5556_v15 = vld [vmem:[%s8044_s1 + $0x280] ss:$20 sps:$4 sm:$0xff]   ;;  %v6537_v20 = vpack.c.bf16 %v64_v14, %v64_v14  ;;  %v5562_v21 = vld [vmem:[%s8044_s1 + $0x2a8] ss:$20 sps:$4 sm:$0xff]  }
  0x2b   :  { %v5558_v12 = vld [vmem:[%s8044_s1 + $0x284] ss:$20 sps:$4 sm:$0xff]   ;;  %v5564_v18 = vld [vmem:[%s8044_s1 + $0x2ac] ss:$20 sps:$4 sm:$0xff]   ;;  %v5567_v19 = vld [vmem:[%s8044_s1 + $0x2b4] ss:$20 sps:$4 sm:$0xff]  }
  0x2c   :  { %2701 = vmatprep.mubr.bf16.mxu0 %v6469_v60  ;;  %2906 = vmatprep.mubr.bf16.mxu1 %v6469_v60  ;;  %v5565_v22 = vld [vmem:[%s8044_s1 + $0x2b0] ss:$20 sps:$4 sm:$0xff]   ;;  %v5570_v23 = vld [vmem:[%s8044_s1 + $0x2d4] ss:$20 sps:$4 sm:$0xff]   ;;  %v5595_v42 = vld [vmem:[%s8044_s1 + $0x378] ss:$20 sps:$4 sm:$0xff]  }
  0x2d   :  { %2682 = vmatpush1.bf16.msra.mxu0 %v5500_v26  ;;  %2887 = vmatpush1.bf16.msra.mxu1 %v5501_v27  ;;  %v5573_v24 = vld [vmem:[%s8044_s1 + $0x2dc] ss:$20 sps:$4 sm:$0xff]   ;;  %v5571_v26 = vld [vmem:[%s8044_s1 + $0x2d8] ss:$20 sps:$4 sm:$0xff]   ;;  %v5591_v36 = vld [vmem:[%s8044_s1 + $0x354] ss:$20 sps:$4 sm:$0xff]  }
  0x2e   :  { %2683 = vmatprep.subr.bf16.mxu0 %v5502_v28  ;;  %2888 = vmatprep.subr.bf16.mxu1 %v5504_v29  ;;  %v5568_v25 = vld [vmem:[%s8044_s1 + $0x2d0] ss:$20 sps:$4 sm:$0xff]   ;;  %v5574_v29 = vld [vmem:[%s8044_s1 + $0x2f8] ss:$20 sps:$4 sm:$0xff]   ;;  %v5586_v37 = vld [vmem:[%s8044_s1 + $0x348] ss:$20 sps:$4 sm:$0xff]  }
  0x2f   :  { %v5576_v27 = vld [vmem:[%s8044_s1 + $0x2fc] ss:$20 sps:$4 sm:$0xff]   ;;  %v5579_v28 = vld [vmem:[%s8044_s1 + $0x304] ss:$20 sps:$4 sm:$0xff]   ;;  %v5615_v54 = vld [vmem:[%s8044_s1 + $0x3f4] ss:$20 sps:$4 sm:$0xff]  }
  0x30   :  { %v5589_v38 = vld [vmem:[%s8044_s1 + $0x350] ss:$20 sps:$4 sm:$0xff]   ;;  %v5607_v52 = vld [vmem:[%s8044_s1 + $0x3c8] ss:$20 sps:$4 sm:$0xff]   ;;  %v5628_v4 = vld [vmem:[%s8044_s1 + $0x460] ss:$20 sps:$4 sm:$0xff]  }
  0x31   :  { %2684 = vmatpush1.bf16.msra.mxu0 %v5506_v30  ;;  %2889 = vmatpush1.bf16.msra.mxu1 %v5507_v31  ;;  %v5577_v30 = vld [vmem:[%s8044_s1 + $0x300] ss:$20 sps:$4 sm:$0xff]   ;;  %v5582_v31 = vld [vmem:[%s8044_s1 + $0x324] ss:$20 sps:$4 sm:$0xff]   ;;  %v5621_v58 = vld [vmem:[%s8044_s1 + $0x41c] ss:$20 sps:$4 sm:$0xff]  }
  0x32   :  { %2685 = vmatprep.subr.bf16.mxu0 %v5508_v32  ;;  %2890 = vmatprep.subr.bf16.mxu1 %v5510_v33  ;;  %v5585_v32 = vld [vmem:[%s8044_s1 + $0x32c] ss:$20 sps:$4 sm:$0xff]   ;;  %s6254_s13 = smov [#allocation5]  }
  0x33   :  { %v5580_v33 = vld [vmem:[%s8044_s1 + $0x320] ss:$20 sps:$4 sm:$0xff]   ;;  %v5643_v14 = vld [vmem:[%s8044_s1 + $0x4b8] ss:$20 sps:$4 sm:$0xff]   ;;  %s4641_s14 = sshll.u32 %s6254_s13, 4  ;;  %s4642_s14 = int_to_ptr.vmem [resolvable:$true] %s4641_s14 }
  0x34   :  { %s6221_s15 = scalar_lea.vmem %s4642_s14, 32  ;;  %p6226_p9 = scmp.lt.s32.totalorder %s4642_s14, %s4642_s14 }
  0x35   :  { %2686 = vmatpush1.bf16.msra.mxu0 %v5512_v34  ;;  %2891 = vmatpush1.bf16.msra.mxu1 %v5513_v35  ;;  %v5583_v34 = vld [vmem:[%s8044_s1 + $0x328] ss:$20 sps:$4 sm:$0xff]   ;;  %v5588_v35 = vld [vmem:[%s8044_s1 + $0x34c] ss:$20 sps:$4 sm:$0xff]   ;;  %p6222_p8 = scmp.ne.s32.totalorder %s4642_s14, %s6221_s15  ;;  %p6227_p10 = scmp.lt.s32.totalorder %s6221_s15, %s6221_s15 }
  0x36   :  { %2687 = vmatprep.subr.bf16.mxu0 %v5514_v39  ;;  %2892 = vmatprep.subr.bf16.mxu1 %v5516_v40  ;;  %v5594_v39 = vld [vmem:[%s8044_s1 + $0x374] ss:$20 sps:$4 sm:$0xff]   ;;  %v5597_v40 = vld [vmem:[%s8044_s1 + $0x37c] ss:$20 sps:$4 sm:$0xff]  }
  0x37   :  { %p6228_p11 = por %p6227_p10, %p6226_p9 }
  0x39   :  { %2688 = vmatpush1.bf16.msra.mxu0 %v5518_v41  ;;  %2893 = vmatpush1.bf16.msra.mxu1 %v5519_v44  ;;  %v5592_v41 = vld [vmem:[%s8044_s1 + $0x370] ss:$20 sps:$4 sm:$0xff]   ;;  %p6229_p12 = pnand %p6228_p11, %p6222_p8 }
  0x3a   :  { %2689 = vmatprep.subr.bf16.mxu0 %v5520_v45  ;;  %2894 = vmatprep.subr.bf16.mxu1 %v5522_v46  ;;  %v5600_v44 = vld [vmem:[%s8044_s1 + $0x39c] ss:$20 sps:$4 sm:$0xff]   ;;  %v5603_v45 = vld [vmem:[%s8044_s1 + $0x3a4] ss:$20 sps:$4 sm:$0xff]  }
  0x3b   :  { %v5598_v46 = vld [vmem:[%s8044_s1 + $0x398] ss:$20 sps:$4 sm:$0xff]  }
  0x3d   :  { %2690 = vmatpush1.bf16.msra.mxu0 %v5524_v47  ;;  %2895 = vmatpush1.bf16.msra.mxu1 %v5525_v48  ;;  %v5601_v47 = vld [vmem:[%s8044_s1 + $0x3a0] ss:$20 sps:$4 sm:$0xff]   ;;  %v5606_v48 = vld [vmem:[%s8044_s1 + $0x3c4] ss:$20 sps:$4 sm:$0xff]  }
  0x3e   :  { %2691 = vmatprep.subr.bf16.mxu0 %v5526_v50  ;;  %2896 = vmatprep.subr.bf16.mxu1 %v5528_v51  ;;  %v5609_v50 = vld [vmem:[%s8044_s1 + $0x3cc] ss:$20 sps:$4 sm:$0xff]  }
  0x3f   :  { %v5604_v51 = vld [vmem:[%s8044_s1 + $0x3c0] ss:$20 sps:$4 sm:$0xff]  }
  0x41   :  { %2692 = vmatpush1.bf16.msra.mxu0 %v5530_v53  ;;  %2897 = vmatpush1.bf16.msra.mxu1 %v5531_v55  ;;  %v5612_v53 = vld [vmem:[%s8044_s1 + $0x3ec] ss:$20 sps:$4 sm:$0xff]   ;;  %v5610_v55 = vld [vmem:[%s8044_s1 + $0x3e8] ss:$20 sps:$4 sm:$0xff]  }
  0x42   :  { %2693 = vmatprep.subr.bf16.mxu0 %v5532_v56  ;;  %2898 = vmatprep.subr.bf16.mxu1 %v5534_v57  ;;  %v5613_v56 = vld [vmem:[%s8044_s1 + $0x3f0] ss:$20 sps:$4 sm:$0xff]   ;;  %v5618_v57 = vld [vmem:[%s8044_s1 + $0x414] ss:$20 sps:$4 sm:$0xff]  }
  0x45   :  { %2694 = vmatpush1.bf16.msra.mxu0 %v5536_v59  ;;  %2899 = vmatpush1.bf16.msra.mxu1 %v5537_v61  ;;  %v5616_v59 = vld [vmem:[%s8044_s1 + $0x410] ss:$20 sps:$4 sm:$0xff]   ;;  %v5619_v61 = vld [vmem:[%s8044_s1 + $0x418] ss:$20 sps:$4 sm:$0xff]  }
  0x46   :  { %2695 = vmatprep.subr.bf16.mxu0 %v5538_v62  ;;  %2900 = vmatprep.subr.bf16.mxu1 %v5540_v63  ;;  %v5624_v62 = vld [vmem:[%s8044_s1 + $0x43c] ss:$20 sps:$4 sm:$0xff]   ;;  %v5627_v63 = vld [vmem:[%s8044_s1 + $0x444] ss:$20 sps:$4 sm:$0xff]  }
  0x49   :  { %2696 = vmatpush1.bf16.msra.mxu0 %v5542_v0  ;;  %2901 = vmatpush1.bf16.msra.mxu1 %v5543_v1  ;;  %v5622_v0 = vld [vmem:[%s8044_s1 + $0x438] ss:$20 sps:$4 sm:$0xff]   ;;  %v5625_v1 = vld [vmem:[%s8044_s1 + $0x440] ss:$20 sps:$4 sm:$0xff]  }
  0x4a   :  { %2697 = vmatprep.subr.bf16.mxu0 %v5544_v2  ;;  %2902 = vmatprep.subr.bf16.mxu1 %v5546_v3  ;;  %v5630_v2 = vld [vmem:[%s8044_s1 + $0x464] ss:$20 sps:$4 sm:$0xff]   ;;  %v5633_v3 = vld [vmem:[%s8044_s1 + $0x46c] ss:$20 sps:$4 sm:$0xff]  }
  0x4d   :  { %2698 = vmatpush1.bf16.msra.mxu0 %v5548_v5  ;;  %2903 = vmatpush1.bf16.msra.mxu1 %v5549_v6  ;;  %v5631_v5 = vld [vmem:[%s8044_s1 + $0x468] ss:$20 sps:$4 sm:$0xff]   ;;  %v5636_v6 = vld [vmem:[%s8044_s1 + $0x48c] ss:$20 sps:$4 sm:$0xff]  }
  0x4e   :  { %2699 = vmatprep.subr.bf16.mxu0 %v5550_v7  ;;  %2904 = vmatprep.subr.bf16.mxu1 %v5552_v8  ;;  %v5639_v7 = vld [vmem:[%s8044_s1 + $0x494] ss:$20 sps:$4 sm:$0xff]  }
  0x4f   :  { %v5634_v8 = vld [vmem:[%s8044_s1 + $0x488] ss:$20 sps:$4 sm:$0xff]  }
  0x51   :  { %2700 = vmatpush1.bf16.msra.mxu0 %v5554_v10  ;;  %2905 = vmatpush1.bf16.msra.mxu1 %v5555_v11  ;;  %v5637_v10 = vld [vmem:[%s8044_s1 + $0x490] ss:$20 sps:$4 sm:$0xff]   ;;  %v5642_v11 = vld [vmem:[%s8044_s1 + $0x4b4] ss:$20 sps:$4 sm:$0xff]  }
  0x52   :  { %2710 = vmatprep.subr.bf16.mxu0 %v5558_v12  ;;  %2915 = vmatprep.subr.bf16.mxu1 %v5561_v13  ;;  %v5645_v12 = vld [vmem:[%s8044_s1 + $0x4bc] ss:$20 sps:$4 sm:$0xff]  }
  0x53   :  { %v5640_v13 = vld [vmem:[%s8044_s1 + $0x4b0] ss:$20 sps:$4 sm:$0xff]  }
  0x54   :  { %2702 = vmatmul.mubr.bf16.vlgmr.msra.gmra.mrb[0].mxu0 %v6526_v16  ;;  %2907 = vmatmul.mubr.bf16.vlgmr.msra.gmra.mrb[0].mxu1 %v6526_v16 }
  0x55   :  { %2711 = vmatpush1.bf16.msra.mxu0 %v5556_v15  ;;  %2916 = vmatpush1.bf16.msra.mxu1 %v5559_v17  ;;  %v5648_v15 = vld [vmem:[%s8044_s1 + $0x4dc] ss:$20 sps:$4 sm:$0xff]   ;;  %v5651_v17 = vld [vmem:[%s8044_s1 + $0x4e4] ss:$20 sps:$4 sm:$0xff]  }
  0x56   :  { %2712 = vmatprep.subr.bf16.mxu0 %v5564_v18  ;;  %2917 = vmatprep.subr.bf16.mxu1 %v5567_v19  ;;  %v5646_v18 = vld [vmem:[%s8044_s1 + $0x4d8] ss:$20 sps:$4 sm:$0xff]   ;;  %v5649_v19 = vld [vmem:[%s8044_s1 + $0x4e0] ss:$20 sps:$4 sm:$0xff]  }
  0x57   :  { %2742 = vmatprep.mubr.bf16.mxu0 %v6537_v20  ;;  %2947 = vmatprep.mubr.bf16.mxu1 %v6537_v20 }
  0x59   :  { %2713 = vmatpush1.bf16.msra.mxu0 %v5562_v21  ;;  %2918 = vmatpush1.bf16.msra.mxu1 %v5565_v22  ;;  %v5655_v21 = vld [vmem:[%s8044_s1 + $0x504] ss:$20 sps:$4 sm:$0xff]   ;;  %v5658_v22 = vld [vmem:[%s8044_s1 + $0x50c] ss:$20 sps:$4 sm:$0xff]  }
  0x5a   :  { %2714 = vmatprep.subr.bf16.mxu0 %v5570_v23  ;;  %2919 = vmatprep.subr.bf16.mxu1 %v5573_v24  ;;  %v5653_v23 = vld [vmem:[%s8044_s1 + $0x500] ss:$20 sps:$4 sm:$0xff]   ;;  %v6728_v24 = vpack.c.bf16 %v6507_v9, %v6507_v9 }
  0x5b   :  { %v5664_v9 = vld [vmem:[%s8044_s1 + $0x534] ss:$20 sps:$4 sm:$0xff]  }
  0x5d   :  { %2715 = vmatpush1.bf16.msra.mxu0 %v5568_v25  ;;  %2920 = vmatpush1.bf16.msra.mxu1 %v5571_v26  ;;  %v5656_v25 = vld [vmem:[%s8044_s1 + $0x508] ss:$20 sps:$4 sm:$0xff]  }
  0x5e   :  { %2716 = vmatprep.subr.bf16.mxu0 %v5576_v27  ;;  %2921 = vmatprep.subr.bf16.mxu1 %v5579_v28  ;;  %v6736_v26 = vld [vmem:[%s8043_s0 + $0x8] sm:$0xff] }
  0x5f   :  { %v5661_v27 = vld [vmem:[%s8044_s1 + $0x52c] ss:$20 sps:$4 sm:$0xff]   ;;  %v6746_v28 = vrot.slane %v6736_v26, %v6442_v49 }
  0x61   :  { %2717 = vmatpush1.bf16.msra.mxu0 %v5574_v29  ;;  %2922 = vmatpush1.bf16.msra.mxu1 %v5577_v30  ;;  %v80_v29 = vcombine.high %v6746_v28, %v6746_v28  ;;  %v5659_v30 = vld [vmem:[%s8044_s1 + $0x528] ss:$20 sps:$4 sm:$0xff]  }
  0x62   :  { %2718 = vmatprep.subr.bf16.mxu0 %v5582_v31  ;;  %2923 = vmatprep.subr.bf16.mxu1 %v5585_v32  ;;  %v5662_v31 = vld [vmem:[%s8044_s1 + $0x530] ss:$20 sps:$4 sm:$0xff]   ;;  %v5667_v32 = vld [vmem:[%s8044_s1 + $0x554] ss:$20 sps:$4 sm:$0xff]  }
  0x65   :  { %2719 = vmatpush1.bf16.msra.mxu0 %v5580_v33  ;;  %2924 = vmatpush1.bf16.msra.mxu1 %v5583_v34  ;;  %v5670_v33 = vld [vmem:[%s8044_s1 + $0x55c] ss:$20 sps:$4 sm:$0xff]   ;;  %v6764_v34 = vpack.c.bf16 %v80_v29, %v80_v29  ;;  %v5740_v29 = vld [vmem:[%s8044_s1 + $0x738] ss:$20 sps:$4 sm:$0xff]  }
  0x66   :  { %2720 = vmatprep.subr.bf16.mxu0 %v5588_v35  ;;  %2925 = vmatprep.subr.bf16.mxu1 %v5591_v36  ;;  %v5665_v35 = vld [vmem:[%s8044_s1 + $0x550] ss:$20 sps:$4 sm:$0xff]   ;;  %v5668_v36 = vld [vmem:[%s8044_s1 + $0x558] ss:$20 sps:$4 sm:$0xff]  }
  0x69   :  { %2721 = vmatpush1.bf16.msra.mxu0 %v5586_v37  ;;  %2926 = vmatpush1.bf16.msra.mxu1 %v5589_v38  ;;  %v5673_v37 = vld [vmem:[%s8044_s1 + $0x57c] ss:$20 sps:$4 sm:$0xff]   ;;  %v5676_v38 = vld [vmem:[%s8044_s1 + $0x584] ss:$20 sps:$4 sm:$0xff]  }
  0x6a   :  { %2722 = vmatprep.subr.bf16.mxu0 %v5594_v39  ;;  %2927 = vmatprep.subr.bf16.mxu1 %v5597_v40  ;;  %v5671_v39 = vld [vmem:[%s8044_s1 + $0x578] ss:$20 sps:$4 sm:$0xff]   ;;  %v5674_v40 = vld [vmem:[%s8044_s1 + $0x580] ss:$20 sps:$4 sm:$0xff]  }
  0x6d   :  { %2723 = vmatpush1.bf16.msra.mxu0 %v5592_v41  ;;  %2928 = vmatpush1.bf16.msra.mxu1 %v5595_v42  ;;  %v5679_v41 = vld [vmem:[%s8044_s1 + $0x5a4] ss:$20 sps:$4 sm:$0xff]   ;;  %v5682_v42 = vld [vmem:[%s8044_s1 + $0x5ac] ss:$20 sps:$4 sm:$0xff]  }
  0x6e   :  { %2724 = vmatprep.subr.bf16.mxu0 %v5600_v44  ;;  %2929 = vmatprep.subr.bf16.mxu1 %v5603_v45  ;;  %v5677_v44 = vld [vmem:[%s8044_s1 + $0x5a0] ss:$20 sps:$4 sm:$0xff]   ;;  %v5680_v45 = vld [vmem:[%s8044_s1 + $0x5a8] ss:$20 sps:$4 sm:$0xff]  }
  0x71   :  { %2725 = vmatpush1.bf16.msra.mxu0 %v5598_v46  ;;  %2930 = vmatpush1.bf16.msra.mxu1 %v5601_v47  ;;  %v5685_v46 = vld [vmem:[%s8044_s1 + $0x5cc] ss:$20 sps:$4 sm:$0xff]   ;;  %v5688_v47 = vld [vmem:[%s8044_s1 + $0x5d4] ss:$20 sps:$4 sm:$0xff]  }
  0x72   :  { %2726 = vmatprep.subr.bf16.mxu0 %v5606_v48  ;;  %2931 = vmatprep.subr.bf16.mxu1 %v5609_v50  ;;  %v5683_v48 = vld [vmem:[%s8044_s1 + $0x5c8] ss:$20 sps:$4 sm:$0xff]   ;;  %v5686_v50 = vld [vmem:[%s8044_s1 + $0x5d0] ss:$20 sps:$4 sm:$0xff]  }
  0x75   :  { %2727 = vmatpush1.bf16.msra.mxu0 %v5604_v51  ;;  %2932 = vmatpush1.bf16.msra.mxu1 %v5607_v52  ;;  %v5691_v51 = vld [vmem:[%s8044_s1 + $0x5f4] ss:$20 sps:$4 sm:$0xff]   ;;  %v5694_v52 = vld [vmem:[%s8044_s1 + $0x5fc] ss:$20 sps:$4 sm:$0xff]  }
  0x76   :  { %2728 = vmatprep.subr.bf16.mxu0 %v5612_v53  ;;  %2933 = vmatprep.subr.bf16.mxu1 %v5615_v54  ;;  %v5689_v53 = vld [vmem:[%s8044_s1 + $0x5f0] ss:$20 sps:$4 sm:$0xff]   ;;  %v5692_v54 = vld [vmem:[%s8044_s1 + $0x5f8] ss:$20 sps:$4 sm:$0xff]  }
  0x79   :  { %2729 = vmatpush1.bf16.msra.mxu0 %v5610_v55  ;;  %2934 = vmatpush1.bf16.msra.mxu1 %v5613_v56  ;;  %v5697_v55 = vld [vmem:[%s8044_s1 + $0x61c] ss:$20 sps:$4 sm:$0xff]   ;;  %v5700_v56 = vld [vmem:[%s8044_s1 + $0x624] ss:$20 sps:$4 sm:$0xff]  }
  0x7a   :  { %2730 = vmatprep.subr.bf16.mxu0 %v5618_v57  ;;  %2935 = vmatprep.subr.bf16.mxu1 %v5621_v58  ;;  %v5695_v57 = vld [vmem:[%s8044_s1 + $0x618] ss:$20 sps:$4 sm:$0xff]   ;;  %v5698_v58 = vld [vmem:[%s8044_s1 + $0x620] ss:$20 sps:$4 sm:$0xff]  }
  0x7d   :  { %2731 = vmatpush1.bf16.msra.mxu0 %v5616_v59  ;;  %2936 = vmatpush1.bf16.msra.mxu1 %v5619_v61  ;;  %v5703_v59 = vld [vmem:[%s8044_s1 + $0x644] ss:$20 sps:$4 sm:$0xff]   ;;  %v5706_v61 = vld [vmem:[%s8044_s1 + $0x64c] ss:$20 sps:$4 sm:$0xff]  }
  0x7e   :  { %2732 = vmatprep.subr.bf16.mxu0 %v5624_v62  ;;  %2937 = vmatprep.subr.bf16.mxu1 %v5627_v63  ;;  %v5701_v62 = vld [vmem:[%s8044_s1 + $0x640] ss:$20 sps:$4 sm:$0xff]   ;;  %v5704_v63 = vld [vmem:[%s8044_s1 + $0x648] ss:$20 sps:$4 sm:$0xff]  }
  0x81   :  { %2733 = vmatpush1.bf16.msra.mxu0 %v5622_v0  ;;  %2938 = vmatpush1.bf16.msra.mxu1 %v5625_v1  ;;  %v5709_v0 = vld [vmem:[%s8044_s1 + $0x66c] ss:$20 sps:$4 sm:$0xff]   ;;  %v5712_v1 = vld [vmem:[%s8044_s1 + $0x674] ss:$20 sps:$4 sm:$0xff]  }
  0x82   :  { %2734 = vmatprep.subr.bf16.mxu0 %v5630_v2  ;;  %2939 = vmatprep.subr.bf16.mxu1 %v5633_v3  ;;  %v5707_v2 = vld [vmem:[%s8044_s1 + $0x668] ss:$20 sps:$4 sm:$0xff]   ;;  %v5710_v3 = vld [vmem:[%s8044_s1 + $0x670] ss:$20 sps:$4 sm:$0xff]  }
  0x85   :  { %2735 = vmatpush1.bf16.msra.mxu0 %v5628_v4  ;;  %2940 = vmatpush1.bf16.msra.mxu1 %v5631_v5  ;;  %v5715_v4 = vld [vmem:[%s8044_s1 + $0x694] ss:$20 sps:$4 sm:$0xff]   ;;  %v5718_v5 = vld [vmem:[%s8044_s1 + $0x69c] ss:$20 sps:$4 sm:$0xff]  }
  0x86   :  { %2736 = vmatprep.subr.bf16.mxu0 %v5636_v6  ;;  %2941 = vmatprep.subr.bf16.mxu1 %v5639_v7  ;;  %v5713_v6 = vld [vmem:[%s8044_s1 + $0x690] ss:$20 sps:$4 sm:$0xff]   ;;  %v5716_v7 = vld [vmem:[%s8044_s1 + $0x698] ss:$20 sps:$4 sm:$0xff]  }
  0x89   :  { %2737 = vmatpush1.bf16.msra.mxu0 %v5634_v8  ;;  %2942 = vmatpush1.bf16.msra.mxu1 %v5637_v10  ;;  %v5721_v8 = vld [vmem:[%s8044_s1 + $0x6bc] ss:$20 sps:$4 sm:$0xff]   ;;  %v5724_v10 = vld [vmem:[%s8044_s1 + $0x6c4] ss:$20 sps:$4 sm:$0xff]  }
  0x8a   :  { %2738 = vmatprep.subr.bf16.mxu0 %v5642_v11  ;;  %2943 = vmatprep.subr.bf16.mxu1 %v5645_v12  ;;  %v5719_v11 = vld [vmem:[%s8044_s1 + $0x6b8] ss:$20 sps:$4 sm:$0xff]   ;;  %v5722_v12 = vld [vmem:[%s8044_s1 + $0x6c0] ss:$20 sps:$4 sm:$0xff]  }
  0x8d   :  { %2739 = vmatpush1.bf16.msra.mxu0 %v5640_v13  ;;  %2944 = vmatpush1.bf16.msra.mxu1 %v5643_v14  ;;  %v5727_v13 = vld [vmem:[%s8044_s1 + $0x6e4] ss:$20 sps:$4 sm:$0xff]   ;;  %v5730_v14 = vld [vmem:[%s8044_s1 + $0x6ec] ss:$20 sps:$4 sm:$0xff]  }
  0x8e   :  { %2740 = vmatprep.subr.bf16.mxu0 %v5648_v15  ;;  %2945 = vmatprep.subr.bf16.mxu1 %v5651_v17  ;;  %v5725_v15 = vld [vmem:[%s8044_s1 + $0x6e0] ss:$20 sps:$4 sm:$0xff]   ;;  %v5728_v17 = vld [vmem:[%s8044_s1 + $0x6e8] ss:$20 sps:$4 sm:$0xff]  }
  0x91   :  { %2741 = vmatpush1.bf16.msra.mxu0 %v5646_v18  ;;  %2946 = vmatpush1.bf16.msra.mxu1 %v5649_v19  ;;  %v5733_v18 = vld [vmem:[%s8044_s1 + $0x70c] ss:$20 sps:$4 sm:$0xff]   ;;  %v5736_v19 = vld [vmem:[%s8044_s1 + $0x714] ss:$20 sps:$4 sm:$0xff]  }
  0x92   :  { %2751 = vmatprep.subr.bf16.mxu0 %v5655_v21  ;;  %2956 = vmatprep.subr.bf16.mxu1 %v5658_v22  ;;  %v5731_v21 = vld [vmem:[%s8044_s1 + $0x708] ss:$20 sps:$4 sm:$0xff]   ;;  %v5734_v22 = vld [vmem:[%s8044_s1 + $0x710] ss:$20 sps:$4 sm:$0xff]  }
  0x94   :  { %2743 = vmatmul.mubr.bf16.vlgmr.msra.gmra.mrb[0].mxu0 %v6728_v24  ;;  %2948 = vmatmul.mubr.bf16.vlgmr.msra.gmra.mrb[0].mxu1 %v6728_v24 }
  0x95   :  { %2752 = vmatpush1.bf16.msra.mxu0 %v5653_v23  ;;  %2957 = vmatpush1.bf16.msra.mxu1 %v5656_v25  ;;  %v5739_v23 = vld [vmem:[%s8044_s1 + $0x734] ss:$20 sps:$4 sm:$0xff]   ;;  %v5742_v25 = vld [vmem:[%s8044_s1 + $0x73c] ss:$20 sps:$4 sm:$0xff]  }
  0x96   :  { %2753 = vmatprep.subr.bf16.mxu0 %v5661_v27  ;;  %2958 = vmatprep.subr.bf16.mxu1 %v5664_v9  ;;  %v65_v27 = vcombine.high %v6736_v26, %v6736_v26  ;;  %v5737_v9 = vld [vmem:[%s8044_s1 + $0x730] ss:$20 sps:$4 sm:$0xff]  }
  0x97   :  { %2783 = vmatprep.mubr.bf16.mxu0 %v6764_v34  ;;  %2988 = vmatprep.mubr.bf16.mxu1 %v6764_v34  ;;  %v5748_v26 = vld [vmem:[%s8044_s1 + $0x764] ss:$20 sps:$4 sm:$0xff]  }
  0x99   :  { %2754 = vmatpush1.bf16.msra.mxu0 %v5659_v30  ;;  %2959 = vmatpush1.bf16.msra.mxu1 %v5662_v31  ;;  %v5745_v30 = vld [vmem:[%s8044_s1 + $0x75c] ss:$20 sps:$4 sm:$0xff]   ;;  %v6927_v31 = vrot.slane %v65_v27, %v6442_v49  ;;  %v5754_v49 = vld [vmem:[%s8044_s1 + $0x78c] ss:$20 sps:$4 sm:$0xff]  }
  0x9a   :  { %2755 = vmatprep.subr.bf16.mxu0 %v5667_v32  ;;  %2960 = vmatprep.subr.bf16.mxu1 %v5670_v33  ;;  %v5743_v32 = vld [vmem:[%s8044_s1 + $0x758] ss:$20 sps:$4 sm:$0xff]   ;;  %v5746_v33 = vld [vmem:[%s8044_s1 + $0x760] ss:$20 sps:$4 sm:$0xff]  }
  0x9b   :  { %v5818_v27 = vld [vmem:[%s8044_s1 + $0x940] ss:$20 sps:$4 sm:$0xff]  }
  0x9d   :  { %2756 = vmatpush1.bf16.msra.mxu0 %v5665_v35  ;;  %2961 = vmatpush1.bf16.msra.mxu1 %v5668_v36  ;;  %v5751_v35 = vld [vmem:[%s8044_s1 + $0x784] ss:$20 sps:$4 sm:$0xff]   ;;  %v81_v36 = vcombine.high %v6927_v31, %v6927_v31 }
  0x9e   :  { %2757 = vmatprep.subr.bf16.mxu0 %v5673_v37  ;;  %2962 = vmatprep.subr.bf16.mxu1 %v5676_v38  ;;  %v6945_v37 = vpack.c.bf16 %v6746_v28, %v6746_v28  ;;  %v5749_v38 = vld [vmem:[%s8044_s1 + $0x780] ss:$20 sps:$4 sm:$0xff]  }
  0x9f   :  { %v5760_v28 = vld [vmem:[%s8044_s1 + $0x7b4] ss:$20 sps:$4 sm:$0xff]  }
  0xa1   :  { %2758 = vmatpush1.bf16.msra.mxu0 %v5671_v39  ;;  %2963 = vmatpush1.bf16.msra.mxu1 %v5674_v40  ;;  %v5752_v39 = vld [vmem:[%s8044_s1 + $0x788] ss:$20 sps:$4 sm:$0xff]   ;;  %v5757_v40 = vld [vmem:[%s8044_s1 + $0x7ac] ss:$20 sps:$4 sm:$0xff]  }
  0xa2   :  { %2759 = vmatprep.subr.bf16.mxu0 %v5679_v41  ;;  %2964 = vmatprep.subr.bf16.mxu1 %v5682_v42  ;;  %v6959_v41 = vpack.c.bf16 %v81_v36, %v81_v36  ;;  %v5755_v42 = vld [vmem:[%s8044_s1 + $0x7a8] ss:$20 sps:$4 sm:$0xff]  }
  0xa3   :  { %v5835_v36 = vld [vmem:[%s8044_s1 + $0x9b4] ss:$20 sps:$4 sm:$0xff]  }
  0xa5   :  { %2760 = vmatpush1.bf16.msra.mxu0 %v5677_v44  ;;  %2965 = vmatpush1.bf16.msra.mxu1 %v5680_v45  ;;  %v5758_v44 = vld [vmem:[%s8044_s1 + $0x7b0] ss:$20 sps:$4 sm:$0xff]   ;;  %v5763_v45 = vld [vmem:[%s8044_s1 + $0x7d4] ss:$20 sps:$4 sm:$0xff]  }
  0xa6   :  { %2761 = vmatprep.subr.bf16.mxu0 %v5685_v46  ;;  %2966 = vmatprep.subr.bf16.mxu1 %v5688_v47  ;;  %v5766_v46 = vld [vmem:[%s8044_s1 + $0x7dc] ss:$20 sps:$4 sm:$0xff]  }
  0xa7   :  { %v5761_v47 = vld [vmem:[%s8044_s1 + $0x7d0] ss:$20 sps:$4 sm:$0xff]  }
  0xa9   :  { %2762 = vmatpush1.bf16.msra.mxu0 %v5683_v48  ;;  %2967 = vmatpush1.bf16.msra.mxu1 %v5686_v50  ;;  %v5764_v48 = vld [vmem:[%s8044_s1 + $0x7d8] ss:$20 sps:$4 sm:$0xff]   ;;  %v5769_v50 = vld [vmem:[%s8044_s1 + $0x7fc] ss:$20 sps:$4 sm:$0xff]  }
  0xaa   :  { %2763 = vmatprep.subr.bf16.mxu0 %v5691_v51  ;;  %2968 = vmatprep.subr.bf16.mxu1 %v5694_v52  ;;  %v5772_v51 = vld [vmem:[%s8044_s1 + $0x804] ss:$20 sps:$4 sm:$0xff]  }
  0xab   :  { %v5767_v52 = vld [vmem:[%s8044_s1 + $0x7f8] ss:$20 sps:$4 sm:$0xff]  }
  0xad   :  { %2764 = vmatpush1.bf16.msra.mxu0 %v5689_v53  ;;  %2969 = vmatpush1.bf16.msra.mxu1 %v5692_v54  ;;  %v5770_v53 = vld [vmem:[%s8044_s1 + $0x800] ss:$20 sps:$4 sm:$0xff]   ;;  %v5775_v54 = vld [vmem:[%s8044_s1 + $0x824] ss:$20 sps:$4 sm:$0xff]  }
  0xae   :  { %2765 = vmatprep.subr.bf16.mxu0 %v5697_v55  ;;  %2970 = vmatprep.subr.bf16.mxu1 %v5700_v56  ;;  %v5778_v55 = vld [vmem:[%s8044_s1 + $0x82c] ss:$20 sps:$4 sm:$0xff]  }
  0xaf   :  { %v5773_v56 = vld [vmem:[%s8044_s1 + $0x820] ss:$20 sps:$4 sm:$0xff]  }
  0xb1   :  { %2766 = vmatpush1.bf16.msra.mxu0 %v5695_v57  ;;  %2971 = vmatpush1.bf16.msra.mxu1 %v5698_v58  ;;  %v5776_v57 = vld [vmem:[%s8044_s1 + $0x828] ss:$20 sps:$4 sm:$0xff]   ;;  %v5781_v58 = vld [vmem:[%s8044_s1 + $0x84c] ss:$20 sps:$4 sm:$0xff]  }
  0xb2   :  { %2767 = vmatprep.subr.bf16.mxu0 %v5703_v59  ;;  %2972 = vmatprep.subr.bf16.mxu1 %v5706_v61  ;;  %v5784_v59 = vld [vmem:[%s8044_s1 + $0x854] ss:$20 sps:$4 sm:$0xff]  }
  0xb3   :  { %v5779_v61 = vld [vmem:[%s8044_s1 + $0x848] ss:$20 sps:$4 sm:$0xff]  }
  0xb5   :  { %2768 = vmatpush1.bf16.msra.mxu0 %v5701_v62  ;;  %2973 = vmatpush1.bf16.msra.mxu1 %v5704_v63  ;;  %v5782_v62 = vld [vmem:[%s8044_s1 + $0x850] ss:$20 sps:$4 sm:$0xff]   ;;  %v5787_v63 = vld [vmem:[%s8044_s1 + $0x874] ss:$20 sps:$4 sm:$0xff]  }
  0xb6   :  { %2769 = vmatprep.subr.bf16.mxu0 %v5709_v0  ;;  %2974 = vmatprep.subr.bf16.mxu1 %v5712_v1  ;;  %v5790_v0 = vld [vmem:[%s8044_s1 + $0x87c] ss:$20 sps:$4 sm:$0xff]  }
  0xb7   :  { %v5785_v1 = vld [vmem:[%s8044_s1 + $0x870] ss:$20 sps:$4 sm:$0xff]  }
  0xb9   :  { %2770 = vmatpush1.bf16.msra.mxu0 %v5707_v2  ;;  %2975 = vmatpush1.bf16.msra.mxu1 %v5710_v3  ;;  %v5788_v2 = vld [vmem:[%s8044_s1 + $0x878] ss:$20 sps:$4 sm:$0xff]   ;;  %v5793_v3 = vld [vmem:[%s8044_s1 + $0x89c] ss:$20 sps:$4 sm:$0xff]  }
  0xba   :  { %2771 = vmatprep.subr.bf16.mxu0 %v5715_v4  ;;  %2976 = vmatprep.subr.bf16.mxu1 %v5718_v5  ;;  %v5796_v4 = vld [vmem:[%s8044_s1 + $0x8a4] ss:$20 sps:$4 sm:$0xff]  }
  0xbb   :  { %v5791_v5 = vld [vmem:[%s8044_s1 + $0x898] ss:$20 sps:$4 sm:$0xff]  }
  0xbd   :  { %2772 = vmatpush1.bf16.msra.mxu0 %v5713_v6  ;;  %2977 = vmatpush1.bf16.msra.mxu1 %v5716_v7  ;;  %v5794_v6 = vld [vmem:[%s8044_s1 + $0x8a0] ss:$20 sps:$4 sm:$0xff]   ;;  %v5799_v7 = vld [vmem:[%s8044_s1 + $0x8c4] ss:$20 sps:$4 sm:$0xff]  }
  0xbe   :  { %2773 = vmatprep.subr.bf16.mxu0 %v5721_v8  ;;  %2978 = vmatprep.subr.bf16.mxu1 %v5724_v10  ;;  %v5802_v8 = vld [vmem:[%s8044_s1 + $0x8cc] ss:$20 sps:$4 sm:$0xff]  }
  0xbf   :  { %v5797_v10 = vld [vmem:[%s8044_s1 + $0x8c0] ss:$20 sps:$4 sm:$0xff]  }
  0xc1   :  { %2774 = vmatpush1.bf16.msra.mxu0 %v5719_v11  ;;  %2979 = vmatpush1.bf16.msra.mxu1 %v5722_v12  ;;  %v5800_v11 = vld [vmem:[%s8044_s1 + $0x8c8] ss:$20 sps:$4 sm:$0xff]   ;;  %v5805_v12 = vld [vmem:[%s8044_s1 + $0x8ec] ss:$20 sps:$4 sm:$0xff]  }
  0xc2   :  { %2775 = vmatprep.subr.bf16.mxu0 %v5727_v13  ;;  %2980 = vmatprep.subr.bf16.mxu1 %v5730_v14  ;;  %v5808_v13 = vld [vmem:[%s8044_s1 + $0x8f4] ss:$20 sps:$4 sm:$0xff]  }
  0xc3   :  { %v5803_v14 = vld [vmem:[%s8044_s1 + $0x8e8] ss:$20 sps:$4 sm:$0xff]  }
  0xc5   :  { %2776 = vmatpush1.bf16.msra.mxu0 %v5725_v15  ;;  %2981 = vmatpush1.bf16.msra.mxu1 %v5728_v17  ;;  %v5806_v15 = vld [vmem:[%s8044_s1 + $0x8f0] ss:$20 sps:$4 sm:$0xff]   ;;  %v5811_v17 = vld [vmem:[%s8044_s1 + $0x914] ss:$20 sps:$4 sm:$0xff]  }
  0xc6   :  { %2777 = vmatprep.subr.bf16.mxu0 %v5733_v18  ;;  %2982 = vmatprep.subr.bf16.mxu1 %v5736_v19  ;;  %v5814_v18 = vld [vmem:[%s8044_s1 + $0x91c] ss:$20 sps:$4 sm:$0xff]  }
  0xc7   :  { %v5809_v19 = vld [vmem:[%s8044_s1 + $0x910] ss:$20 sps:$4 sm:$0xff]  }
  0xc9   :  { %2778 = vmatpush1.bf16.msra.mxu0 %v5731_v21  ;;  %2983 = vmatpush1.bf16.msra.mxu1 %v5734_v22  ;;  %v5812_v21 = vld [vmem:[%s8044_s1 + $0x918] ss:$20 sps:$4 sm:$0xff]   ;;  %v5817_v22 = vld [vmem:[%s8044_s1 + $0x93c] ss:$20 sps:$4 sm:$0xff]  }
  0xca   :  { %2779 = vmatprep.subr.bf16.mxu0 %v5739_v23  ;;  %2984 = vmatprep.subr.bf16.mxu1 %v5742_v25  ;;  %v5820_v23 = vld [vmem:[%s8044_s1 + $0x944] ss:$20 sps:$4 sm:$0xff]  }
  0xcb   :  { %v5815_v25 = vld [vmem:[%s8044_s1 + $0x938] ss:$20 sps:$4 sm:$0xff]  }
  0xcd   :  { %2780 = vmatpush1.bf16.msra.mxu0 %v5737_v9  ;;  %2985 = vmatpush1.bf16.msra.mxu1 %v5740_v29  ;;  %v5823_v9 = vld [vmem:[%s8044_s1 + $0x964] ss:$20 sps:$4 sm:$0xff]   ;;  %v5826_v29 = vld [vmem:[%s8044_s1 + $0x96c] ss:$20 sps:$4 sm:$0xff]  }
  0xce   :  { %2781 = vmatprep.subr.bf16.mxu0 %v5745_v30  ;;  %2986 = vmatprep.subr.bf16.mxu1 %v5748_v26  ;;  %v5821_v30 = vld [vmem:[%s8044_s1 + $0x960] ss:$20 sps:$4 sm:$0xff]   ;;  %v5824_v26 = vld [vmem:[%s8044_s1 + $0x968] ss:$20 sps:$4 sm:$0xff]  }
  0xd1   :  { %2782 = vmatpush1.bf16.msra.mxu0 %v5743_v32  ;;  %2987 = vmatpush1.bf16.msra.mxu1 %v5746_v33  ;;  %v5829_v32 = vld [vmem:[%s8044_s1 + $0x98c] ss:$20 sps:$4 sm:$0xff]   ;;  %v5832_v33 = vld [vmem:[%s8044_s1 + $0x994] ss:$20 sps:$4 sm:$0xff]  }
  0xd2   :  { %2792 = vmatprep.subr.bf16.mxu0 %v5751_v35  ;;  %2997 = vmatprep.subr.bf16.mxu1 %v5754_v49  ;;  %v5827_v35 = vld [vmem:[%s8044_s1 + $0x988] ss:$20 sps:$4 sm:$0xff]   ;;  %v5830_v49 = vld [vmem:[%s8044_s1 + $0x990] ss:$20 sps:$4 sm:$0xff]  }
  0xd4   :  { %2784 = vmatmul.mubr.bf16.vlgmr.msra.gmra.mrb[0].mxu0 %v6945_v37  ;;  %2989 = vmatmul.mubr.bf16.vlgmr.msra.gmra.mrb[0].mxu1 %v6945_v37 }
  0xd5   :  { %2793 = vmatpush1.bf16.msra.mxu0 %v5749_v38  ;;  %2998 = vmatpush1.bf16.msra.mxu1 %v5752_v39  ;;  %v5838_v38 = vld [vmem:[%s8044_s1 + $0x9bc] ss:$20 sps:$4 sm:$0xff]  }
  0xd6   :  { %2794 = vmatprep.subr.bf16.mxu0 %v5757_v40  ;;  %2999 = vmatprep.subr.bf16.mxu1 %v5760_v28  ;;  %v5833_v39 = vld [vmem:[%s8044_s1 + $0x9b0] ss:$20 sps:$4 sm:$0xff]   ;;  %v5836_v40 = vld [vmem:[%s8044_s1 + $0x9b8] ss:$20 sps:$4 sm:$0xff]  }
  0xd7   :  { %2824 = vmatprep.mubr.bf16.mxu0 %v6959_v41  ;;  %3029 = vmatprep.mubr.bf16.mxu1 %v6959_v41  ;;  %v5841_v28 = vld [vmem:[%s8044_s1 + $0x9dc] ss:$20 sps:$4 sm:$0xff]  }
  0xd9   :  { %2795 = vmatpush1.bf16.msra.mxu0 %v5755_v42  ;;  %3000 = vmatpush1.bf16.msra.mxu1 %v5758_v44  ;;  %v5844_v42 = vld [vmem:[%s8044_s1 + $0x9e4] ss:$20 sps:$4 sm:$0xff]   ;;  %v7136_v44 = vld.sshfl [vmem:[%s8043_s0 + $0x10] sm:$0x33 pattern:$0x76325410] }
  0xda   :  { %2796 = vmatprep.subr.bf16.mxu0 %v5763_v45  ;;  %3001 = vmatprep.subr.bf16.mxu1 %v5766_v46  ;;  %v5839_v45 = vld [vmem:[%s8044_s1 + $0x9d8] ss:$20 sps:$4 sm:$0xff]   ;;  %v5842_v46 = vld [vmem:[%s8044_s1 + $0x9e0] ss:$20 sps:$4 sm:$0xff]  }
  0xdd   :  { %2797 = vmatpush1.bf16.msra.mxu0 %v5761_v47  ;;  %3002 = vmatpush1.bf16.msra.mxu1 %v5764_v48  ;;  %v5848_v47 = vld [vmem:[%s8044_s1 + $0xa04] ss:$20 sps:$4 sm:$0xff]   ;;  %v5851_v48 = vld [vmem:[%s8044_s1 + $0xa0c] ss:$20 sps:$4 sm:$0xff]  }
  0xde   :  { %2798 = vmatprep.subr.bf16.mxu0 %v5769_v50  ;;  %3003 = vmatprep.subr.bf16.mxu1 %v5772_v51  ;;  %v5846_v50 = vld [vmem:[%s8044_s1 + $0xa00] ss:$20 sps:$4 sm:$0xff]   ;;  %v89_v51 = vcombine.high %v7136_v44, %v7136_v44 }
  0xe1   :  { %2799 = vmatpush1.bf16.msra.mxu0 %v5767_v52  ;;  %3004 = vmatpush1.bf16.msra.mxu1 %v5770_v53  ;;  %v5849_v52 = vld [vmem:[%s8044_s1 + $0xa08] ss:$20 sps:$4 sm:$0xff]   ;;  %v7160_v53 = vpack.c.bf16 %v6927_v31, %v6927_v31  ;;  %v5855_v31 = vld [vmem:[%s8044_s1 + $0xa30] ss:$20 sps:$4 sm:$0xff]  }
  0xe2   :  { %2800 = vmatprep.subr.bf16.mxu0 %v5775_v54  ;;  %3005 = vmatprep.subr.bf16.mxu1 %v5778_v55  ;;  %v5854_v54 = vld [vmem:[%s8044_s1 + $0xa2c] ss:$20 sps:$4 sm:$0xff]   ;;  %v5857_v55 = vld [vmem:[%s8044_s1 + $0xa34] ss:$20 sps:$4 sm:$0xff]  }
  0xe5   :  { %2801 = vmatpush1.bf16.msra.mxu0 %v5773_v56  ;;  %3006 = vmatpush1.bf16.msra.mxu1 %v5776_v57  ;;  %v5852_v56 = vld [vmem:[%s8044_s1 + $0xa28] ss:$20 sps:$4 sm:$0xff]   ;;  %v7174_v57 = vpack.c.bf16 %v89_v51, %v89_v51  ;;  %v5927_v51 = vld [vmem:[%s8044_s1 + $0xc10] ss:$20 sps:$4 sm:$0xff]  }
  0xe6   :  { %2802 = vmatprep.subr.bf16.mxu0 %v5781_v58  ;;  %3007 = vmatprep.subr.bf16.mxu1 %v5784_v59  ;;  %v5860_v58 = vld [vmem:[%s8044_s1 + $0xa54] ss:$20 sps:$4 sm:$0xff]   ;;  %v5863_v59 = vld [vmem:[%s8044_s1 + $0xa5c] ss:$20 sps:$4 sm:$0xff]  }
  0xe9   :  { %2803 = vmatpush1.bf16.msra.mxu0 %v5779_v61  ;;  %3008 = vmatpush1.bf16.msra.mxu1 %v5782_v62  ;;  %v5858_v61 = vld [vmem:[%s8044_s1 + $0xa50] ss:$20 sps:$4 sm:$0xff]   ;;  %v5861_v62 = vld [vmem:[%s8044_s1 + $0xa58] ss:$20 sps:$4 sm:$0xff]  }
  0xea   :  { %2804 = vmatprep.subr.bf16.mxu0 %v5787_v63  ;;  %3009 = vmatprep.subr.bf16.mxu1 %v5790_v0  ;;  %v5866_v63 = vld [vmem:[%s8044_s1 + $0xa7c] ss:$20 sps:$4 sm:$0xff]   ;;  %v5869_v0 = vld [vmem:[%s8044_s1 + $0xa84] ss:$20 sps:$4 sm:$0xff]  }
  0xed   :  { %2805 = vmatpush1.bf16.msra.mxu0 %v5785_v1  ;;  %3010 = vmatpush1.bf16.msra.mxu1 %v5788_v2  ;;  %v5864_v1 = vld [vmem:[%s8044_s1 + $0xa78] ss:$20 sps:$4 sm:$0xff]   ;;  %v5867_v2 = vld [vmem:[%s8044_s1 + $0xa80] ss:$20 sps:$4 sm:$0xff]  }
  0xee   :  { %2806 = vmatprep.subr.bf16.mxu0 %v5793_v3  ;;  %3011 = vmatprep.subr.bf16.mxu1 %v5796_v4  ;;  %v5872_v3 = vld [vmem:[%s8044_s1 + $0xaa4] ss:$20 sps:$4 sm:$0xff]   ;;  %v5875_v4 = vld [vmem:[%s8044_s1 + $0xaac] ss:$20 sps:$4 sm:$0xff]  }
  0xf1   :  { %2807 = vmatpush1.bf16.msra.mxu0 %v5791_v5  ;;  %3012 = vmatpush1.bf16.msra.mxu1 %v5794_v6  ;;  %v5870_v5 = vld [vmem:[%s8044_s1 + $0xaa0] ss:$20 sps:$4 sm:$0xff]   ;;  %v5873_v6 = vld [vmem:[%s8044_s1 + $0xaa8] ss:$20 sps:$4 sm:$0xff]  }
  0xf2   :  { %2808 = vmatprep.subr.bf16.mxu0 %v5799_v7  ;;  %3013 = vmatprep.subr.bf16.mxu1 %v5802_v8  ;;  %v5878_v7 = vld [vmem:[%s8044_s1 + $0xacc] ss:$20 sps:$4 sm:$0xff]   ;;  %v5881_v8 = vld [vmem:[%s8044_s1 + $0xad4] ss:$20 sps:$4 sm:$0xff]  }
  0xf5   :  { %2809 = vmatpush1.bf16.msra.mxu0 %v5797_v10  ;;  %3014 = vmatpush1.bf16.msra.mxu1 %v5800_v11  ;;  %v5876_v10 = vld [vmem:[%s8044_s1 + $0xac8] ss:$20 sps:$4 sm:$0xff]   ;;  %v5879_v11 = vld [vmem:[%s8044_s1 + $0xad0] ss:$20 sps:$4 sm:$0xff]  }
  0xf6   :  { %2810 = vmatprep.subr.bf16.mxu0 %v5805_v12  ;;  %3015 = vmatprep.subr.bf16.mxu1 %v5808_v13  ;;  %v5884_v12 = vld [vmem:[%s8044_s1 + $0xaf4] ss:$20 sps:$4 sm:$0xff]   ;;  %v5887_v13 = vld [vmem:[%s8044_s1 + $0xafc] ss:$20 sps:$4 sm:$0xff]  }
  0xf9   :  { %2811 = vmatpush1.bf16.msra.mxu0 %v5803_v14  ;;  %3016 = vmatpush1.bf16.msra.mxu1 %v5806_v15  ;;  %v5882_v14 = vld [vmem:[%s8044_s1 + $0xaf0] ss:$20 sps:$4 sm:$0xff]   ;;  %v5885_v15 = vld [vmem:[%s8044_s1 + $0xaf8] ss:$20 sps:$4 sm:$0xff]  }
  0xfa   :  { %2812 = vmatprep.subr.bf16.mxu0 %v5811_v17  ;;  %3017 = vmatprep.subr.bf16.mxu1 %v5814_v18  ;;  %v5890_v17 = vld [vmem:[%s8044_s1 + $0xb1c] ss:$20 sps:$4 sm:$0xff]   ;;  %v5893_v18 = vld [vmem:[%s8044_s1 + $0xb24] ss:$20 sps:$4 sm:$0xff]  }
  0xfd   :  { %2813 = vmatpush1.bf16.msra.mxu0 %v5809_v19  ;;  %3018 = vmatpush1.bf16.msra.mxu1 %v5812_v21  ;;  %v5888_v19 = vld [vmem:[%s8044_s1 + $0xb18] ss:$20 sps:$4 sm:$0xff]   ;;  %v5891_v21 = vld [vmem:[%s8044_s1 + $0xb20] ss:$20 sps:$4 sm:$0xff]  }
  0xfe   :  { %2814 = vmatprep.subr.bf16.mxu0 %v5817_v22  ;;  %3019 = vmatprep.subr.bf16.mxu1 %v5820_v23  ;;  %v5896_v22 = vld [vmem:[%s8044_s1 + $0xb44] ss:$20 sps:$4 sm:$0xff]   ;;  %v5899_v23 = vld [vmem:[%s8044_s1 + $0xb4c] ss:$20 sps:$4 sm:$0xff]  }
 0x101   :  { %2815 = vmatpush1.bf16.msra.mxu0 %v5815_v25  ;;  %3020 = vmatpush1.bf16.msra.mxu1 %v5818_v27  ;;  %v5894_v25 = vld [vmem:[%s8044_s1 + $0xb40] ss:$20 sps:$4 sm:$0xff]   ;;  %v5897_v27 = vld [vmem:[%s8044_s1 + $0xb48] ss:$20 sps:$4 sm:$0xff]  }
 0x102   :  { %2816 = vmatprep.subr.bf16.mxu0 %v5823_v9  ;;  %3021 = vmatprep.subr.bf16.mxu1 %v5826_v29  ;;  %v5902_v9 = vld [vmem:[%s8044_s1 + $0xb6c] ss:$20 sps:$4 sm:$0xff]   ;;  %v5905_v29 = vld [vmem:[%s8044_s1 + $0xb74] ss:$20 sps:$4 sm:$0xff]  }
 0x105   :  { %2817 = vmatpush1.bf16.msra.mxu0 %v5821_v30  ;;  %3022 = vmatpush1.bf16.msra.mxu1 %v5824_v26  ;;  %v5900_v30 = vld [vmem:[%s8044_s1 + $0xb68] ss:$20 sps:$4 sm:$0xff]   ;;  %v5903_v26 = vld [vmem:[%s8044_s1 + $0xb70] ss:$20 sps:$4 sm:$0xff]  }
 0x106   :  { %2818 = vmatprep.subr.bf16.mxu0 %v5829_v32  ;;  %3023 = vmatprep.subr.bf16.mxu1 %v5832_v33  ;;  %v5908_v32 = vld [vmem:[%s8044_s1 + $0xb94] ss:$20 sps:$4 sm:$0xff]   ;;  %v5911_v33 = vld [vmem:[%s8044_s1 + $0xb9c] ss:$20 sps:$4 sm:$0xff]  }
 0x109   :  { %2819 = vmatpush1.bf16.msra.mxu0 %v5827_v35  ;;  %3024 = vmatpush1.bf16.msra.mxu1 %v5830_v49  ;;  %v5906_v35 = vld [vmem:[%s8044_s1 + $0xb90] ss:$20 sps:$4 sm:$0xff]   ;;  %v5909_v49 = vld [vmem:[%s8044_s1 + $0xb98] ss:$20 sps:$4 sm:$0xff]  }
 0x10a   :  { %2820 = vmatprep.subr.bf16.mxu0 %v5835_v36  ;;  %3025 = vmatprep.subr.bf16.mxu1 %v5838_v38  ;;  %v5914_v36 = vld [vmem:[%s8044_s1 + $0xbbc] ss:$20 sps:$4 sm:$0xff]   ;;  %v5917_v38 = vld [vmem:[%s8044_s1 + $0xbc4] ss:$20 sps:$4 sm:$0xff]  }
 0x10d   :  { %2821 = vmatpush1.bf16.msra.mxu0 %v5833_v39  ;;  %3026 = vmatpush1.bf16.msra.mxu1 %v5836_v40  ;;  %v5912_v39 = vld [vmem:[%s8044_s1 + $0xbb8] ss:$20 sps:$4 sm:$0xff]   ;;  %v5915_v40 = vld [vmem:[%s8044_s1 + $0xbc0] ss:$20 sps:$4 sm:$0xff]  }
 0x10e   :  { %2822 = vmatprep.subr.bf16.mxu0 %v5841_v28  ;;  %3027 = vmatprep.subr.bf16.mxu1 %v5844_v42  ;;  %v5920_v28 = vld [vmem:[%s8044_s1 + $0xbe4] ss:$20 sps:$4 sm:$0xff]   ;;  %v5923_v42 = vld [vmem:[%s8044_s1 + $0xbec] ss:$20 sps:$4 sm:$0xff]  }
 0x111   :  { %2823 = vmatpush1.bf16.msra.mxu0 %v5839_v45  ;;  %3028 = vmatpush1.bf16.msra.mxu1 %v5842_v46  ;;  %v5918_v45 = vld [vmem:[%s8044_s1 + $0xbe0] ss:$20 sps:$4 sm:$0xff]   ;;  %v5921_v46 = vld [vmem:[%s8044_s1 + $0xbe8] ss:$20 sps:$4 sm:$0xff]  }
 0x112   :  { %2833 = vmatprep.subr.bf16.mxu0 %v5848_v47  ;;  %3038 = vmatprep.subr.bf16.mxu1 %v5851_v48  ;;  %v5926_v47 = vld [vmem:[%s8044_s1 + $0xc0c] ss:$20 sps:$4 sm:$0xff]   ;;  %v5929_v48 = vld [vmem:[%s8044_s1 + $0xc14] ss:$20 sps:$4 sm:$0xff]  }
 0x114   :  { %2825 = vmatmul.mubr.bf16.vlgmr.msra.gmra.mrb[0].mxu0 %v7160_v53  ;;  %3030 = vmatmul.mubr.bf16.vlgmr.msra.gmra.mrb[0].mxu1 %v7160_v53 }
 0x115   :  { %2834 = vmatpush1.bf16.msra.mxu0 %v5846_v50  ;;  %3039 = vmatpush1.bf16.msra.mxu1 %v5849_v52  ;;  %v5924_v50 = vld [vmem:[%s8044_s1 + $0xc08] ss:$20 sps:$4 sm:$0xff]  }
 0x116   :  { %2835 = vmatprep.subr.bf16.mxu0 %v5854_v54  ;;  %3040 = vmatprep.subr.bf16.mxu1 %v5857_v55  ;;  %v5932_v52 = vld [vmem:[%s8044_s1 + $0xc34] ss:$20 sps:$4 sm:$0xff]   ;;  %v5935_v54 = vld [vmem:[%s8044_s1 + $0xc3c] ss:$20 sps:$4 sm:$0xff]  }
 0x117   :  { %5046 = vmatprep.mubr.msk.bf16.mxu0 %vm2665_vm0, %v7174_v57  ;;  %5047 = vmatprep.mubr.msk.bf16.mxu1 %vm2665_vm0, %v7174_v57  ;;  %v5930_v55 = vld [vmem:[%s8044_s1 + $0xc30] ss:$20 sps:$4 sm:$0xff]  }
 0x119   :  { %2836 = vmatpush1.bf16.msra.mxu0 %v5852_v56  ;;  %3041 = vmatpush1.bf16.msra.mxu1 %v5855_v31  ;;  %v5933_v56 = vld [vmem:[%s8044_s1 + $0xc38] ss:$20 sps:$4 sm:$0xff]   ;;  %v5936_v31 = vld [vmem:[%s8044_s1 + $0x150] ss:$20 sps:$4 sm:$0xff]  }
 0x11a   :  { %2837 = vmatprep.subr.bf16.mxu0 %v5860_v58  ;;  %3042 = vmatprep.subr.bf16.mxu1 %v5863_v59  ;;  %v5938_v58 = vld [vmem:[%s8044_s1 + $0x3d0] ss:$20 sps:$4 sm:$0xff]   ;;  %v7346_v59 = vpack.c.bf16 %v7136_v44, %v7136_v44  ;;  %v5942_v44 = vld [vmem:[%s8044_s1 + $0x3f8] ss:$20 sps:$4 sm:$0xff]  }
 0x11d   :  { %2838 = vmatpush1.bf16.msra.mxu0 %v5858_v61  ;;  %3043 = vmatpush1.bf16.msra.mxu1 %v5861_v62  ;;  %v5937_v61 = vld [vmem:[%s8044_s1 + $0x10] ss:$20 sps:$4 sm:$0xff]  }
 0x11e   :  { %2839 = vmatprep.subr.bf16.mxu0 %v5866_v63  ;;  %3044 = vmatprep.subr.bf16.mxu1 %v5869_v0  ;;  %v5939_v62 = vld [vmem:[%s8044_s1 + $0x290] ss:$20 sps:$4 sm:$0xff]   ;;  %v5940_v63 = vld [vmem:[%s8044_s1 + $0x178] ss:$20 sps:$4 sm:$0xff]  }
 0x11f   :  { %v5941_v0 = vld [vmem:[%s8044_s1 + $0x38] ss:$20 sps:$4 sm:$0xff]  }
 0x121   :  { %2840 = vmatpush1.bf16.msra.mxu0 %v5864_v1  ;;  %3045 = vmatpush1.bf16.msra.mxu1 %v5867_v2  ;;  %v5943_v1 = vld [vmem:[%s8044_s1 + $0x2b8] ss:$20 sps:$4 sm:$0xff]   ;;  %v5944_v2 = vld [vmem:[%s8044_s1 + $0x1a0] ss:$20 sps:$4 sm:$0xff]  }
 0x122   :  { %2841 = vmatprep.subr.bf16.mxu0 %v5872_v3  ;;  %3046 = vmatprep.subr.bf16.mxu1 %v5875_v4  ;;  %v5946_v3 = vld [vmem:[%s8044_s1 + $0x420] ss:$20 sps:$4 sm:$0xff]  }
 0x123   :  { %v5945_v4 = vld [vmem:[%s8044_s1 + $0x60] ss:$20 sps:$4 sm:$0xff]  }
 0x125   :  { %2842 = vmatpush1.bf16.msra.mxu0 %v5870_v5  ;;  %3047 = vmatpush1.bf16.msra.mxu1 %v5873_v6  ;;  %v5947_v5 = vld [vmem:[%s8044_s1 + $0x2e0] ss:$20 sps:$4 sm:$0xff]   ;;  %v5948_v6 = vld [vmem:[%s8044_s1 + $0x1c8] ss:$20 sps:$4 sm:$0xff]  }
 0x126   :  { %2843 = vmatprep.subr.bf16.mxu0 %v5878_v7  ;;  %3048 = vmatprep.subr.bf16.mxu1 %v5881_v8  ;;  %v5951_v7 = vld [vmem:[%s8044_s1 + $0x308] ss:$20 sps:$4 sm:$0xff]   ;;  %v5952_v8 = vld [vmem:[%s8044_s1 + $0x1f0] ss:$20 sps:$4 sm:$0xff]  }
 0x129   :  { %2844 = vmatpush1.bf16.msra.mxu0 %v5876_v10  ;;  %3049 = vmatpush1.bf16.msra.mxu1 %v5879_v11  ;;  %v5954_v10 = vld [vmem:[%s8044_s1 + $0x470] ss:$20 sps:$4 sm:$0xff]  }
 0x12a   :  { %2845 = vmatprep.subr.bf16.mxu0 %v5884_v12  ;;  %3050 = vmatprep.subr.bf16.mxu1 %v5887_v13  ;;  %v5953_v11 = vld [vmem:[%s8044_s1 + $0xb0] ss:$20 sps:$4 sm:$0xff]   ;;  %v5956_v13 = vld [vmem:[%s8044_s1 + $0x218] ss:$20 sps:$4 sm:$0xff]  }
 0x12b   :  { %v5955_v12 = vld [vmem:[%s8044_s1 + $0x330] ss:$20 sps:$4 sm:$0xff]  }
 0x12d   :  { %2846 = vmatpush1.bf16.msra.mxu0 %v5882_v14  ;;  %3051 = vmatpush1.bf16.msra.mxu1 %v5885_v15  ;;  %v5958_v14 = vld [vmem:[%s8044_s1 + $0x498] ss:$20 sps:$4 sm:$0xff]  }
 0x12e   :  { %2847 = vmatprep.subr.bf16.mxu0 %v5890_v17  ;;  %3052 = vmatprep.subr.bf16.mxu1 %v5893_v18  ;;  %v5957_v15 = vld [vmem:[%s8044_s1 + $0xd8] ss:$20 sps:$4 sm:$0xff]   ;;  %v5960_v18 = vld [vmem:[%s8044_s1 + $0x240] ss:$20 sps:$4 sm:$0xff]  }
 0x12f   :  { %v5959_v17 = vld [vmem:[%s8044_s1 + $0x358] ss:$20 sps:$4 sm:$0xff]  }
 0x131   :  { %2848 = vmatpush1.bf16.msra.mxu0 %v5888_v19  ;;  %3053 = vmatpush1.bf16.msra.mxu1 %v5891_v21  ;;  %v5962_v19 = vld [vmem:[%s8044_s1 + $0x4c0] ss:$20 sps:$4 sm:$0xff]  }
 0x132   :  { %2849 = vmatprep.subr.bf16.mxu0 %v5896_v22  ;;  %3054 = vmatprep.subr.bf16.mxu1 %v5899_v23  ;;  %v5961_v21 = vld [vmem:[%s8044_s1 + $0x100] ss:$20 sps:$4 sm:$0xff]   ;;  %v5964_v23 = vld [vmem:[%s8044_s1 + $0x268] ss:$20 sps:$4 sm:$0xff]  }
 0x133   :  { %v5963_v22 = vld [vmem:[%s8044_s1 + $0x380] ss:$20 sps:$4 sm:$0xff]  }
 0x135   :  { %2850 = vmatpush1.bf16.msra.mxu0 %v5894_v25  ;;  %3055 = vmatpush1.bf16.msra.mxu1 %v5897_v27  ;;  %v5966_v25 = vld [vmem:[%s8044_s1 + $0x4e8] ss:$20 sps:$4 sm:$0xff]  }
 0x136   :  { %2851 = vmatprep.subr.bf16.mxu0 %v5902_v9  ;;  %3056 = vmatprep.subr.bf16.mxu1 %v5905_v29  ;;  %v5965_v27 = vld [vmem:[%s8044_s1 + $0x128] ss:$20 sps:$4 sm:$0xff]   ;;  %v5968_v29 = vld [vmem:[%s8044_s1 + $0x650] ss:$20 sps:$4 sm:$0xff]  }
 0x137   :  { %v5967_v9 = vld [vmem:[%s8044_s1 + $0x3a8] ss:$20 sps:$4 sm:$0xff]  }
 0x139   :  { %2852 = vmatpush1.bf16.msra.mxu0 %v5900_v30  ;;  %3057 = vmatpush1.bf16.msra.mxu1 %v5903_v26  ;;  %v5970_v30 = vld [vmem:[%s8044_s1 + $0x8d0] ss:$20 sps:$4 sm:$0xff]  }
 0x13a   :  { %2853 = vmatprep.subr.bf16.mxu0 %v5908_v32  ;;  %3058 = vmatprep.subr.bf16.mxu1 %v5911_v33  ;;  %v5969_v26 = vld [vmem:[%s8044_s1 + $0x510] ss:$20 sps:$4 sm:$0xff]   ;;  %v5972_v33 = vld [vmem:[%s8044_s1 + $0x678] ss:$20 sps:$4 sm:$0xff]  }
 0x13b   :  { %v5971_v32 = vld [vmem:[%s8044_s1 + $0x790] ss:$20 sps:$4 sm:$0xff]  }
 0x13d   :  { %2854 = vmatpush1.bf16.msra.mxu0 %v5906_v35  ;;  %3059 = vmatpush1.bf16.msra.mxu1 %v5909_v49  ;;  %v5974_v35 = vld [vmem:[%s8044_s1 + $0x8f8] ss:$20 sps:$4 sm:$0xff]  }
 0x13e   :  { %2855 = vmatprep.subr.bf16.mxu0 %v5914_v36  ;;  %3060 = vmatprep.subr.bf16.mxu1 %v5917_v38  ;;  %v5973_v49 = vld [vmem:[%s8044_s1 + $0x538] ss:$20 sps:$4 sm:$0xff]   ;;  %v5976_v38 = vld [vmem:[%s8044_s1 + $0x6a0] ss:$20 sps:$4 sm:$0xff]  }
 0x13f   :  { %v5975_v36 = vld [vmem:[%s8044_s1 + $0x7b8] ss:$20 sps:$4 sm:$0xff]  }
 0x141   :  { %2856 = vmatpush1.bf16.msra.mxu0 %v5912_v39  ;;  %3061 = vmatpush1.bf16.msra.mxu1 %v5915_v40  ;;  %v5978_v39 = vld [vmem:[%s8044_s1 + $0x920] ss:$20 sps:$4 sm:$0xff]  }
 0x142   :  { %2857 = vmatprep.subr.bf16.mxu0 %v5920_v28  ;;  %3062 = vmatprep.subr.bf16.mxu1 %v5923_v42  ;;  %v5977_v40 = vld [vmem:[%s8044_s1 + $0x560] ss:$20 sps:$4 sm:$0xff]   ;;  %v5982_v28 = vld [vmem:[%s8044_s1 + $0x948] ss:$20 sps:$4 sm:$0xff]  }
 0x143   :  { %v5981_v42 = vld [vmem:[%s8044_s1 + $0x588] ss:$20 sps:$4 sm:$0xff]  }
 0x145   :  { %2858 = vmatpush1.bf16.msra.mxu0 %v5918_v45  ;;  %3063 = vmatpush1.bf16.msra.mxu1 %v5921_v46  ;;  %v5986_v45 = vld [vmem:[%s8044_s1 + $0x970] ss:$20 sps:$4 sm:$0xff]  }
 0x146   :  { %2859 = vmatprep.subr.bf16.mxu0 %v5926_v47  ;;  %3064 = vmatprep.subr.bf16.mxu1 %v5929_v48  ;;  %v5985_v46 = vld [vmem:[%s8044_s1 + $0x5b0] ss:$20 sps:$4 sm:$0xff]   ;;  %v5988_v48 = vld [vmem:[%s8044_s1 + $0x718] ss:$20 sps:$4 sm:$0xff]  }
 0x147   :  { %v5987_v47 = vld [vmem:[%s8044_s1 + $0x830] ss:$20 sps:$4 sm:$0xff]  }
 0x149   :  { %2860 = vmatpush1.bf16.msra.mxu0 %v5924_v50  ;;  %3065 = vmatpush1.bf16.msra.mxu1 %v5927_v51  ;;  %v5990_v50 = vld [vmem:[%s8044_s1 + $0x998] ss:$20 sps:$4 sm:$0xff]  }
 0x14a   :  { %2861 = vmatprep.subr.bf16.mxu0 %v5932_v52  ;;  %3066 = vmatprep.subr.bf16.mxu1 %v5935_v54  ;;  %v5989_v51 = vld [vmem:[%s8044_s1 + $0x5d8] ss:$20 sps:$4 sm:$0xff]   ;;  %v5992_v54 = vld [vmem:[%s8044_s1 + $0x740] ss:$20 sps:$4 sm:$0xff]  }
 0x14b   :  { %v5991_v52 = vld [vmem:[%s8044_s1 + $0x858] ss:$20 sps:$4 sm:$0xff]  }
 0x14d   :  { %2862 = vmatpush1.bf16.msra.mxu0 %v5930_v55  ;;  %3067 = vmatpush1.bf16.msra.mxu1 %v5933_v56  ;;  %v5994_v55 = vld [vmem:[%s8044_s1 + $0x9c0] ss:$20 sps:$4 sm:$0xff]  }
 0x14e   :  { %5194 = vmatprep.subr.bf16.mxu0 %v5936_v31  ;;  %5216 = vmatprep.subr.bf16.mxu1 %v5938_v58  ;;  %v5993_v56 = vld [vmem:[%s8044_s1 + $0x600] ss:$20 sps:$4 sm:$0xff]   ;;  %v5996_v58 = vld [vmem:[%s8044_s1 + $0x768] ss:$20 sps:$4 sm:$0xff]  }
 0x14f   :  { %v5995_v31 = vld [vmem:[%s8044_s1 + $0x880] ss:$20 sps:$4 sm:$0xff]  }
 0x150   :  { %2866 = vmatmul.mubr.bf16.vlgmr.msra.gmra.mrb[0].mxu0 %v7346_v59  ;;  %3071 = vmatmul.mubr.bf16.vlgmr.msra.gmra.mrb[0].mxu1 %v7346_v59 }
 0x151   :  { %5195 = vmatpush3.bf16.msra.mxu0 %v5937_v61  ;;  %5217 = vmatpush3.bf16.msra.mxu1 %v5939_v62  ;;  %v5998_v61 = vld [vmem:[%s8044_s1 + $0x9e8] ss:$20 sps:$4 sm:$0xff]  }
 0x152   :  { %5196 = vmatprep.subr.bf16.mxu0 %v5940_v63  ;;  %5218 = vmatprep.subr.bf16.mxu1 %v5942_v44  ;;  %v5997_v62 = vld [vmem:[%s8044_s1 + $0x628] ss:$20 sps:$4 sm:$0xff]   ;;  %v6017_v44 = vld [vmem:[%s8046_s3 + $0x4] ss:$12 sps:$4 sm:$0xff]  }
 0x153   :  { %3111 = vmatprep.mubr.bf16.mxu0 %v6469_v60  ;;  %3151 = vmatprep.mubr.bf16.mxu1 %v6537_v20  ;;  %v5950_v60 = vld [vmem:[%s8044_s1 + $0x448] ss:$20 sps:$4 sm:$0xff]  }
 0x154   :  { %v5949_v20 = vld [vmem:[%s8044_s1 + $0x88] ss:$20 sps:$4 sm:$0xff]  }
 0x155   :  { %5197 = vmatpush3.bf16.msra.mxu0 %v5941_v0  ;;  %5219 = vmatpush3.bf16.msra.mxu1 %v5943_v1  ;;  %v5999_v63 = vld [vmem:[%s8044_s1 + $0x8a8] ss:$20 sps:$4 sm:$0xff]   ;;  %v6000_v0 = vld [vmem:[%s8044_s1 + $0xa10] ss:$20 sps:$4 sm:$0xff]   ;;  %v6251_v1 = vmov 0  }
 0x156   :  { %5198 = vmatprep.subr.bf16.mxu0 %v5944_v2  ;;  %5220 = vmatprep.subr.bf16.mxu1 %v5946_v3  ;;  %v6015_v2 = vld [vmem:[%s8046_s3] ss:$12 sps:$4 sm:$0xff]   ;;  %v6020_v3 = vld [vmem:[%s8046_s3 + $0x1c] ss:$12 sps:$4 sm:$0xff]  }
 0x159   :  { %5199 = vmatpush3.bf16.msra.mxu0 %v5945_v4  ;;  %5221 = vmatpush3.bf16.msra.mxu1 %v5947_v5  ;;  %v6001_v4 = vld [vmem:[%s8044_s1 + $0xa38] ss:$20 sps:$4 sm:$0xff]  }
 0x15a   :  { %5200 = vmatprep.subr.bf16.mxu0 %v5948_v6  ;;  %5222 = vmatprep.subr.bf16.mxu1 %v5950_v60  ;;  %v6018_v5 = vld [vmem:[%s8046_s3 + $0x18] ss:$12 sps:$4 sm:$0xff]   ;;  %v6003_v60 = vld [vmem:[%s8044_s1 + $0xa88] ss:$20 sps:$4 sm:$0xff]  }
 0x15b   :  { %v6026_v6 = vld [vmem:[%s8046_s3 + $0x4c] ss:$12 sps:$4 sm:$0xff]  }
 0x15d   :  { %5201 = vmatpush3.bf16.msra.mxu0 %v5949_v20  ;;  %5223 = vmatpush3.bf16.msra.mxu1 %v5951_v7  ;;  %v6024_v20 = vld [vmem:[%s8046_s3 + $0x48] ss:$12 sps:$4 sm:$0xff]   ;;  %v6029_v7 = vld [vmem:[%s8046_s3 + $0x64] ss:$12 sps:$4 sm:$0xff]  }
 0x15e   :  { %5202 = vmatprep.subr.bf16.mxu0 %v5952_v8  ;;  %5224 = vmatprep.subr.bf16.mxu1 %v5954_v10  ;;  %v6004_v8 = vld [vmem:[%s8044_s1 + $0xab0] ss:$20 sps:$4 sm:$0xff]   ;;  %v6027_v10 = vld [vmem:[%s8046_s3 + $0x60] ss:$12 sps:$4 sm:$0xff]  }
 0x161   :  { %5203 = vmatpush3.bf16.msra.mxu0 %v5953_v11  ;;  %5225 = vmatpush3.bf16.msra.mxu1 %v5955_v12  ;;  %v6032_v11 = vld [vmem:[%s8046_s3 + $0x7c] ss:$12 sps:$4 sm:$0xff]   ;;  %v6005_v12 = vld [vmem:[%s8044_s1 + $0xad8] ss:$20 sps:$4 sm:$0xff]  }
 0x162   :  { %5204 = vmatprep.subr.bf16.mxu0 %v5956_v13  ;;  %5226 = vmatprep.subr.bf16.mxu1 %v5958_v14  ;;  %v6030_v13 = vld [vmem:[%s8046_s3 + $0x78] ss:$12 sps:$4 sm:$0xff]   ;;  %v6035_v14 = vld [vmem:[%s8046_s3 + $0x94] ss:$12 sps:$4 sm:$0xff]  }
 0x165   :  { %5205 = vmatpush3.bf16.msra.mxu0 %v5957_v15  ;;  %5227 = vmatpush3.bf16.msra.mxu1 %v5959_v17  ;;  %v6006_v15 = vld [vmem:[%s8044_s1 + $0xb00] ss:$20 sps:$4 sm:$0xff]   ;;  %v6033_v17 = vld [vmem:[%s8046_s3 + $0x90] ss:$12 sps:$4 sm:$0xff]  }
 0x166   :  { %5206 = vmatprep.subr.bf16.mxu0 %v5960_v18  ;;  %5228 = vmatprep.subr.bf16.mxu1 %v5962_v19  ;;  %v6038_v18 = vld [vmem:[%s8046_s3 + $0xac] ss:$12 sps:$4 sm:$0xff]   ;;  %v6007_v19 = vld [vmem:[%s8044_s1 + $0xb28] ss:$20 sps:$4 sm:$0xff]  }
 0x169   :  { %5207 = vmatpush3.bf16.msra.mxu0 %v5961_v21  ;;  %5229 = vmatpush3.bf16.msra.mxu1 %v5963_v22  ;;  %v6036_v21 = vld [vmem:[%s8046_s3 + $0xa8] ss:$12 sps:$4 sm:$0xff]   ;;  %v6041_v22 = vld [vmem:[%s8046_s3 + $0xc4] ss:$12 sps:$4 sm:$0xff]  }
 0x16a   :  { %5208 = vmatprep.subr.bf16.mxu0 %v5964_v23  ;;  %5230 = vmatprep.subr.bf16.mxu1 %v5966_v25  ;;  %v6008_v23 = vld [vmem:[%s8044_s1 + $0xb50] ss:$20 sps:$4 sm:$0xff]   ;;  %v6039_v25 = vld [vmem:[%s8046_s3 + $0xc0] ss:$12 sps:$4 sm:$0xff]  }
 0x16d   :  { %5209 = vmatpush3.bf16.msra.mxu0 %v5965_v27  ;;  %5231 = vmatpush3.bf16.msra.mxu1 %v5967_v9  ;;  %v6046_v27 = vld [vmem:[%s8046_s3 + $0xdc] ss:$12 sps:$4 sm:$0xff]   ;;  %v6009_v9 = vld [vmem:[%s8044_s1 + $0xb78] ss:$20 sps:$4 sm:$0xff]  }
 0x16e   :  { %5238 = vmatprep.subr.bf16.mxu0 %v5968_v29  ;;  %5260 = vmatprep.subr.bf16.mxu1 %v5970_v30  ;;  %v6044_v29 = vld [vmem:[%s8046_s3 + $0xd8] ss:$12 sps:$4 sm:$0xff]   ;;  %v6051_v30 = vld [vmem:[%s8046_s3 + $0xf4] ss:$12 sps:$4 sm:$0xff]  }
 0x170   :  { %3112 = vmatmul.mubr.bf16.vlgmr.msra.gmra.mrb[4].mxu0 %v6526_v16  ;;  %3152 = vmatmul.mubr.bf16.vlgmr.msra.gmra.mrb[4].mxu1 %v6728_v24  ;;  %v5979_v16 = vld [vmem:[%s8044_s1 + $0x7e0] ss:$20 sps:$4 sm:$0xff]   ;;  %v5980_v24 = vld [vmem:[%s8044_s1 + $0x6c8] ss:$20 sps:$4 sm:$0xff]  }
 0x171   :  { %5239 = vmatpush3.bf16.msra.mxu0 %v5969_v26  ;;  %5261 = vmatpush3.bf16.msra.mxu1 %v5971_v32  ;;  %v6010_v26 = vld [vmem:[%s8044_s1 + $0xba0] ss:$20 sps:$4 sm:$0xff]   ;;  %v6049_v32 = vld [vmem:[%s8046_s3 + $0xf0] ss:$12 sps:$4 sm:$0xff]  }
 0x172   :  { %5240 = vmatprep.subr.bf16.mxu0 %v5972_v33  ;;  %5262 = vmatprep.subr.bf16.mxu1 %v5974_v35  ;;  %v6056_v33 = vld [vmem:[%s8046_s3 + $0x10c] ss:$12 sps:$4 sm:$0xff]   ;;  %v6011_v35 = vld [vmem:[%s8044_s1 + $0xbc8] ss:$20 sps:$4 sm:$0xff]  }
 0x173   :  { %3191 = vmatprep.mubr.bf16.mxu0 %v6764_v34  ;;  %3231 = vmatprep.mubr.bf16.mxu1 %v6959_v41  ;;  %v5983_v34 = vld [vmem:[%s8044_s1 + $0x808] ss:$20 sps:$4 sm:$0xff]   ;;  %v5984_v41 = vld [vmem:[%s8044_s1 + $0x6f0] ss:$20 sps:$4 sm:$0xff]  }
 0x175   :  { %5241 = vmatpush3.bf16.msra.mxu0 %v5973_v49  ;;  %5263 = vmatpush3.bf16.msra.mxu1 %v5975_v36  ;;  %v6054_v49 = vld [vmem:[%s8046_s3 + $0x108] ss:$12 sps:$4 sm:$0xff]   ;;  %v6061_v36 = vld [vmem:[%s8046_s3 + $0x124] ss:$12 sps:$4 sm:$0xff]  }
 0x176   :  { %5242 = vmatprep.subr.bf16.mxu0 %v5976_v38  ;;  %5264 = vmatprep.subr.bf16.mxu1 %v5978_v39  ;;  %v6012_v38 = vld [vmem:[%s8044_s1 + $0xbf0] ss:$20 sps:$4 sm:$0xff]   ;;  %v6059_v39 = vld [vmem:[%s8046_s3 + $0x120] ss:$12 sps:$4 sm:$0xff]  }
 0x179   :  { %5243 = vmatpush3.bf16.msra.mxu0 %v5977_v40  ;;  %5265 = vmatpush3.bf16.msra.mxu1 %v5979_v16  ;;  %v6066_v40 = vld [vmem:[%s8046_s3 + $0x13c] ss:$12 sps:$4 sm:$0xff]   ;;  %v6013_v16 = vld [vmem:[%s8044_s1 + $0xc18] ss:$20 sps:$4 sm:$0xff]  }
 0x17a   :  { %5244 = vmatprep.subr.bf16.mxu0 %v5980_v24  ;;  %5266 = vmatprep.subr.bf16.mxu1 %v5982_v28  ;;  %v6064_v24 = vld [vmem:[%s8046_s3 + $0x138] ss:$12 sps:$4 sm:$0xff]   ;;  %v6071_v28 = vld [vmem:[%s8046_s3 + $0x154] ss:$12 sps:$4 sm:$0xff]  }
 0x17d   :  { %5245 = vmatpush3.bf16.msra.mxu0 %v5981_v42  ;;  %5267 = vmatpush3.bf16.msra.mxu1 %v5983_v34  ;;  %v6014_v42 = vld [vmem:[%s8044_s1 + $0xc40] ss:$20 sps:$4 sm:$0xff]  }
 0x17e   :  { %5246 = vmatprep.subr.bf16.mxu0 %v5984_v41  ;;  %5268 = vmatprep.subr.bf16.mxu1 %v5986_v45  ;;  %v6042_v34 = vld [vmem:[%s8046_s3 + $0xc8] ss:$12 sps:$4 sm:$0xff]   ;;  %v6069_v41 = vld [vmem:[%s8046_s3 + $0x150] ss:$12 sps:$4 sm:$0xff]   ;;  %v6076_v45 = vld [vmem:[%s8046_s3 + $0x16c] ss:$12 sps:$4 sm:$0xff]  }
 0x181   :  { %5247 = vmatpush3.bf16.msra.mxu0 %v5985_v46  ;;  %5269 = vmatpush3.bf16.msra.mxu1 %v5987_v47  ;;  %v6043_v46 = vld [vmem:[%s8046_s3 + $0x8] ss:$12 sps:$4 sm:$0xff]   ;;  %v6047_v47 = vld [vmem:[%s8046_s3 + $0xe0] ss:$12 sps:$4 sm:$0xff]  }
 0x182   :  { %5248 = vmatprep.subr.bf16.mxu0 %v5988_v48  ;;  %5270 = vmatprep.subr.bf16.mxu1 %v5990_v50  ;;  %v6074_v48 = vld [vmem:[%s8046_s3 + $0x168] ss:$12 sps:$4 sm:$0xff]   ;;  %v6081_v50 = vld [vmem:[%s8046_s3 + $0x184] ss:$12 sps:$4 sm:$0xff]  }
 0x185   :  { %5249 = vmatpush3.bf16.msra.mxu0 %v5989_v51  ;;  %5271 = vmatpush3.bf16.msra.mxu1 %v5991_v52  ;;  %v6048_v51 = vld [vmem:[%s8046_s3 + $0x20] ss:$12 sps:$4 sm:$0xff]   ;;  %v6052_v52 = vld [vmem:[%s8046_s3 + $0xf8] ss:$12 sps:$4 sm:$0xff]  }
 0x186   :  { %5250 = vmatprep.subr.bf16.mxu0 %v5992_v54  ;;  %5272 = vmatprep.subr.bf16.mxu1 %v5994_v55  ;;  %v6053_v54 = vld [vmem:[%s8046_s3 + $0x38] ss:$12 sps:$4 sm:$0xff]   ;;  %v6058_v55 = vld [vmem:[%s8046_s3 + $0x50] ss:$12 sps:$4 sm:$0xff]  }
 0x189   :  { %5251 = vmatpush3.bf16.msra.mxu0 %v5993_v56  ;;  %5273 = vmatpush3.bf16.msra.mxu1 %v5995_v31  ;;  %v6062_v56 = vld [vmem:[%s8046_s3 + $0x128] ss:$12 sps:$4 sm:$0xff]  }
 0x18a   :  { %5252 = vmatprep.subr.bf16.mxu0 %v5996_v58  ;;  %5274 = vmatprep.subr.bf16.mxu1 %v5998_v61  ;;  %v6063_v31 = vld [vmem:[%s8046_s3 + $0x68] ss:$12 sps:$4 sm:$0xff]   ;;  %v6067_v58 = vld [vmem:[%s8046_s3 + $0x140] ss:$12 sps:$4 sm:$0xff]  }
 0x18b   :  { %v6068_v61 = vld [vmem:[%s8046_s3 + $0x80] ss:$12 sps:$4 sm:$0xff]  }
 0x18d   :  { %5253 = vmatpush3.bf16.msra.mxu0 %v5997_v62  ;;  %5275 = vmatpush3.bf16.msra.mxu1 %v5999_v63  ;;  %v6072_v62 = vld [vmem:[%s8046_s3 + $0x158] ss:$12 sps:$4 sm:$0xff]  }
 0x18e   :  { %3239 = vmatprep.subr.bf16.mxu0 %v6251_v1  ;;  %4106 = vmatprep.subr.bf16.mxu1 %v6017_v44  ;;  %v6073_v63 = vld [vmem:[%s8046_s3 + $0x98] ss:$12 sps:$4 sm:$0xff]   ;;  %v6077_v44 = vld [vmem:[%s8046_s3 + $0x170] ss:$12 sps:$4 sm:$0xff]  }
 0x190   :  { %3192 = vmatmul.mubr.bf16.vlgmr.msra.gmra.mrb[8].mxu0 %v6945_v37  ;;  %3232 = vmatmul.mubr.bf16.vlgmr.msra.gmra.mrb[8].mxu1 %v7160_v53  ;;  %v6023_v37 = vld [vmem:[%s8046_s3 + $0x34] ss:$12 sps:$4 sm:$0xff]  }
 0x191   :  { %3240 = vmatpush1.bf16.msra.mxu0 %v6000_v0  ;;  %5048 = vmatprep.mubr.msk.bf16.mxu0 %vm2665_vm0, %v7174_v57  ;;  %v6002_v53 = vld [vmem:[%s8044_s1 + $0xa60] ss:$20 sps:$4 sm:$0xff]   ;;  %v6021_v57 = vld [vmem:[%s8046_s3 + $0x30] ss:$12 sps:$4 sm:$0xff]  }
 0x192   :  { %3241 = vmatprep.subr.bf16.mxu0 %v6251_v1  ;;  %4107 = vmatpush1.bf16.msra.mxu1 %v6015_v2  ;;  %v6078_v0 = vld [vmem:[%s8046_s3 + $0xb0] ss:$12 sps:$4 sm:$0xff]   ;;  %v6082_v2 = vld [vmem:[%s8046_s3 + $0x248] ss:$12 sps:$4 sm:$0xff]  }
 0x193   :  { %4108 = vmatprep.subr.bf16.mxu1 %v6020_v3  ;;  %v588_v3 = vsub.s32 0, %v6424_v43 }
 0x195   :  { %3242 = vmatpush1.bf16.msra.mxu0 %v6001_v4  ;;  %v7761_v4 = vld [vmem:[%s8045_s2] sm:$0x1f] }
 0x196   :  { %3243 = vmatprep.subr.bf16.mxu0 %v6251_v1  ;;  %4109 = vmatpush1.bf16.msra.mxu1 %v6018_v5  ;;  %v592_v5 = vsub.s32 1, %v6424_v43 }
 0x197   :  { %4110 = vmatprep.subr.bf16.mxu1 %v6023_v37  ;;  %v600_v37 = vsub.s32 3, %v6424_v43 }
 0x199   :  { %3244 = vmatpush1.bf16.msra.mxu0 %v6002_v53  ;;  %v589_v53 = vrot.slane %v7761_v4, %v588_v3 }
 0x19a   :  { %3245 = vmatprep.subr.bf16.mxu0 %v6251_v1  ;;  %4111 = vmatpush1.bf16.msra.mxu1 %v6021_v57  ;;  %v593_v57 = vrot.slane %v7761_v4, %v592_v5 }
 0x19b   :  { %4112 = vmatprep.subr.bf16.mxu1 %v6026_v6  ;;  %v601_v6 = vrot.slane %v7761_v4, %v600_v37 }
 0x19d   :  { %3246 = vmatpush1.bf16.msra.mxu0 %v6003_v60 }
 0x19e   :  { %3247 = vmatprep.subr.bf16.mxu0 %v6251_v1  ;;  %4113 = vmatpush1.bf16.msra.mxu1 %v6024_v20 }
 0x19f   :  { %4114 = vmatprep.subr.bf16.mxu1 %v6029_v7 }
 0x1a1   :  { %3248 = vmatpush1.bf16.msra.mxu0 %v6004_v8 }
 0x1a2   :  { %3249 = vmatprep.subr.bf16.mxu0 %v6251_v1  ;;  %4115 = vmatpush1.bf16.msra.mxu1 %v6027_v10 }
 0x1a3   :  { %4116 = vmatprep.subr.bf16.mxu1 %v6032_v11 }
 0x1a5   :  { %3250 = vmatpush1.bf16.msra.mxu0 %v6005_v12 }
 0x1a6   :  { %3251 = vmatprep.subr.bf16.mxu0 %v6251_v1  ;;  %4117 = vmatpush1.bf16.msra.mxu1 %v6030_v13 }
 0x1a7   :  { %4118 = vmatprep.subr.bf16.mxu1 %v6035_v14 }
 0x1a9   :  { %3252 = vmatpush1.bf16.msra.mxu0 %v6006_v15 }
 0x1aa   :  { %3253 = vmatprep.subr.bf16.mxu0 %v6251_v1  ;;  %4119 = vmatpush1.bf16.msra.mxu1 %v6033_v17 }
 0x1ab   :  { %4120 = vmatprep.subr.bf16.mxu1 %v6038_v18 }
 0x1ad   :  { %3254 = vmatpush1.bf16.msra.mxu0 %v6007_v19 }
 0x1ae   :  { %3255 = vmatprep.subr.bf16.mxu0 %v6251_v1  ;;  %4121 = vmatpush1.bf16.msra.mxu1 %v6036_v21 }
 0x1af   :  { %4122 = vmatprep.subr.bf16.mxu1 %v6041_v22 }
 0x1b1   :  { %3256 = vmatpush1.bf16.msra.mxu0 %v6008_v23  ;;  %v6079_v23 = vld [vmem:[%s8046_s3 + $0x180] ss:$12 sps:$4 sm:$0xff]  }
 0x1b2   :  { %3257 = vmatprep.subr.bf16.mxu0 %v6251_v1  ;;  %4123 = vmatpush1.bf16.msra.mxu1 %v6039_v25  ;;  %v6083_v25 = vld [vmem:[%s8046_s3 + $0x188] ss:$12 sps:$4 sm:$0xff]  }
 0x1b3   :  { %4124 = vmatprep.subr.bf16.mxu1 %v6046_v27 }
 0x1b5   :  { %3258 = vmatpush1.bf16.msra.mxu0 %v6009_v9  ;;  %v6086_v9 = vld [vmem:[%s8046_s3 + $0x19c] ss:$12 sps:$4 sm:$0xff]  }
 0x1b6   :  { %3259 = vmatprep.subr.bf16.mxu0 %v6251_v1  ;;  %4125 = vmatpush1.bf16.msra.mxu1 %v6044_v29  ;;  %v6087_v29 = vld [vmem:[%s8046_s3 + $0x260] ss:$12 sps:$4 sm:$0xff]  }
 0x1b7   :  { %4126 = vmatprep.subr.bf16.mxu1 %v6051_v30 }
 0x1b9   :  { %3260 = vmatpush1.bf16.msra.mxu0 %v6010_v26  ;;  %v6084_v26 = vld [vmem:[%s8046_s3 + $0x198] ss:$12 sps:$4 sm:$0xff]  }
 0x1ba   :  { %3261 = vmatprep.subr.bf16.mxu0 %v6251_v1  ;;  %4127 = vmatpush1.bf16.msra.mxu1 %v6049_v32  ;;  %v6088_v32 = vld [vmem:[%s8046_s3 + $0x1a0] ss:$12 sps:$4 sm:$0xff]  }
 0x1bb   :  { %4128 = vmatprep.subr.bf16.mxu1 %v6056_v33  ;;  %v6091_v33 = vld [vmem:[%s8046_s3 + $0x1b4] ss:$12 sps:$4 sm:$0xff]  }
 0x1bd   :  { %3262 = vmatpush1.bf16.msra.mxu0 %v6011_v35  ;;  %v6092_v35 = vld [vmem:[%s8046_s3 + $0x278] ss:$12 sps:$4 sm:$0xff]  }
 0x1be   :  { %3263 = vmatprep.subr.bf16.mxu0 %v6251_v1  ;;  %4129 = vmatpush1.bf16.msra.mxu1 %v6054_v49  ;;  %v6089_v49 = vld [vmem:[%s8046_s3 + $0x1b0] ss:$12 sps:$4 sm:$0xff]  }
 0x1bf   :  { %4130 = vmatprep.subr.bf16.mxu1 %v6061_v36  ;;  %v6093_v36 = vld [vmem:[%s8046_s3 + $0x1b8] ss:$12 sps:$4 sm:$0xff]  }
 0x1c1   :  { %3264 = vmatpush1.bf16.msra.mxu0 %v6012_v38  ;;  %v6096_v38 = vld [vmem:[%s8046_s3 + $0x1cc] ss:$12 sps:$4 sm:$0xff]  }
 0x1c2   :  { %3265 = vmatprep.subr.bf16.mxu0 %v6251_v1  ;;  %4131 = vmatpush1.bf16.msra.mxu1 %v6059_v39  ;;  %v6097_v39 = vld [vmem:[%s8046_s3 + $0x290] ss:$12 sps:$4 sm:$0xff]  }
 0x1c3   :  { %4132 = vmatprep.subr.bf16.mxu1 %v6066_v40  ;;  %v6094_v40 = vld [vmem:[%s8046_s3 + $0x1c8] ss:$12 sps:$4 sm:$0xff]  }
 0x1c5   :  { %3266 = vmatpush1.bf16.msra.mxu0 %v6013_v16  ;;  %v6098_v16 = vld [vmem:[%s8046_s3 + $0x1d0] ss:$12 sps:$4 sm:$0xff]  }
 0x1c6   :  { %3267 = vmatprep.subr.bf16.mxu0 %v6251_v1  ;;  %4133 = vmatpush1.bf16.msra.mxu1 %v6064_v24  ;;  %v6101_v24 = vld [vmem:[%s8046_s3 + $0x1e4] ss:$12 sps:$4 sm:$0xff]  }
 0x1c7   :  { %4134 = vmatprep.subr.bf16.mxu1 %v6071_v28  ;;  %v6102_v28 = vld [vmem:[%s8046_s3 + $0x2a8] ss:$12 sps:$4 sm:$0xff]  }
 0x1c9   :  { %3268 = vmatpush1.bf16.msra.mxu0 %v6014_v42  ;;  %v6099_v42 = vld [vmem:[%s8046_s3 + $0x1e0] ss:$12 sps:$4 sm:$0xff]  }
 0x1ca   :  { %5282 = vmatprep.subr.bf16.mxu0 %v6042_v34  ;;  %4135 = vmatpush1.bf16.msra.mxu1 %v6069_v41  ;;  %v6103_v34 = vld [vmem:[%s8046_s3 + $0x1e8] ss:$12 sps:$4 sm:$0xff]   ;;  %v596_v41 = vsub.s32 2, %v6424_v43 }
 0x1cb   :  { %4136 = vmatprep.subr.bf16.mxu1 %v6076_v45  ;;  %v6106_v45 = vld [vmem:[%s8046_s3 + $0x1fc] ss:$12 sps:$4 sm:$0xff]  }
 0x1cc   :  { %3272 = vmatmul.mubr.bf16.vlgmr.msra.gmra.mrb[12].mxu0 %v7346_v59  ;;  %v6057_v59 = vld [vmem:[%s8046_s3 + $0x110] ss:$12 sps:$4 sm:$0xff]  }
 0x1cd   :  { %5283 = vmatpush3.bf16.msra.mxu0 %v6043_v46  ;;  %v6107_v46 = vld [vmem:[%s8046_s3 + $0x2c0] ss:$12 sps:$4 sm:$0xff]  }
 0x1ce   :  { %5284 = vmatprep.subr.bf16.mxu0 %v6047_v47  ;;  %4137 = vmatpush1.bf16.msra.mxu1 %v6074_v48  ;;  %v6104_v47 = vld [vmem:[%s8046_s3 + $0x1f8] ss:$12 sps:$4 sm:$0xff]   ;;  %v6108_v48 = vld [vmem:[%s8046_s3 + $0x200] ss:$12 sps:$4 sm:$0xff]  }
 0x1cf   :  { %4147 = vmatprep.subr.bf16.mxu1 %v6081_v50  ;;  %v597_v50 = vrot.slane %v7761_v4, %v596_v41 }
 0x1d1   :  { %5285 = vmatpush3.bf16.msra.mxu0 %v6048_v51  ;;  %v6111_v51 = vld [vmem:[%s8046_s3 + $0x214] ss:$12 sps:$4 sm:$0xff]  }
 0x1d2   :  { %5286 = vmatprep.subr.bf16.mxu0 %v6052_v52  ;;  %v6112_v52 = vld [vmem:[%s8046_s3 + $0x2d8] ss:$12 sps:$4 sm:$0xff]  }
 0x1d5   :  { %5287 = vmatpush3.bf16.msra.mxu0 %v6053_v54  ;;  %v604_v54 = vsub.s32 4, %v6424_v43 }
 0x1d6   :  { %5288 = vmatprep.subr.bf16.mxu0 %v6057_v59  ;;  %v6109_v59 = vld [vmem:[%s8046_s3 + $0x210] ss:$12 sps:$4 sm:$0xff]  }
 0x1d9   :  { %5289 = vmatpush3.bf16.msra.mxu0 %v6058_v55  ;;  %v6113_v55 = vld [vmem:[%s8046_s3 + $0x218] ss:$12 sps:$4 sm:$0xff]  }
 0x1da   :  { %5290 = vmatprep.subr.bf16.mxu0 %v6062_v56 }
 0x1dd   :  { %5291 = vmatpush3.bf16.msra.mxu0 %v6063_v31  ;;  %v6116_v31 = vld [vmem:[%s8046_s3 + $0x22c] ss:$12 sps:$4 sm:$0xff]  }
 0x1de   :  { %5292 = vmatprep.subr.bf16.mxu0 %v6067_v58  ;;  %v6117_v58 = vld [vmem:[%s8046_s3 + $0x2f0] ss:$12 sps:$4 sm:$0xff]  }
 0x1e1   :  { %5293 = vmatpush3.bf16.msra.mxu0 %v6068_v61 }
 0x1e2   :  { %5294 = vmatprep.subr.bf16.mxu0 %v6072_v62  ;;  %v605_v62 = vrot.slane %v7761_v4, %v604_v54  ;;  %v6121_v4 = vld [vmem:[%s8046_s3 + $0x244] ss:$12 sps:$4 sm:$0xff]  }
 0x1e5   :  { %5295 = vmatpush3.bf16.msra.mxu0 %v6073_v63 }
 0x1e6   :  { %5296 = vmatprep.subr.bf16.mxu0 %v6077_v44 }
 0x1e9   :  { %5297 = vmatpush3.bf16.msra.mxu0 %v6078_v0 }
 0x1ea   :  { %5304 = vmatprep.subr.bf16.mxu0 %v6082_v2 }
 0x223   :  { %v2867_v60 = vpop.f32.mrb[0].mxu0  ;;  %v7772_v20 = vpop.f32.mrb[0].mxu1 }
 0x224   :  { %v5406_v7 = vadd.f32 %v2867_v60, %v589_v53  ;;  %v2869_v8 = vpop.f32.mrb[1].mxu0  ;;  %v3074_v10 = vpop.f32.mrb[1].mxu1  ;;  %v5408_v56 = vadd.f32 %v7772_v20, %v597_v50 }
 0x225   :  { %v5407_v11 = vadd.f32 %v2869_v8, %v593_v57  ;;  %v5409_v12 = vadd.f32 %v3074_v10, %v601_v6  ;;  %v2871_v13 = vpop.f32.mrb[2].mxu0  ;;  %v3076_v14 = vpop.f32.mrb[2].mxu1  ;;  %v6114_v57 = vld [vmem:[%s8046_s3 + $0x228] ss:$12 sps:$4 sm:$0xff]   ;;  %v6118_v6 = vld [vmem:[%s8046_s3 + $0x230] ss:$12 sps:$4 sm:$0xff]  }
 0x226   :  { %v3279_v15 = vmax.f32 %v5406_v7, 0.0  ;;  %v2872_v17 = vpop.f32.mrb[3].mxu0  ;;  %v3077_v18 = vpop.f32.mrb[3].mxu1  ;;  %v3281_v20 = vmax.f32 %v5408_v56, 0.0  ;;  %v6146_v13 = vld [vmem:[%s8046_s3 + $0x308] ss:$12 sps:$4 sm:$0xff]  }
 0x227   :  { %v3280_v19 = vmax.f32 %v5407_v11, 0.0  ;;  %v3282_v21 = vmax.f32 %v5409_v12, 0.0  ;;  %v6119_v12 = vld [vmem:[%s8046_s3 + $0x240] ss:$12 sps:$4 sm:$0xff]   ;;  %v6252_v17 = vmov 0.0  }
 0x228   :  { %v3284_v27 = vpack.c.bf16 %v3279_v15, %v3279_v15  ;;  %v7882_v14 = vpack.c.bf16 %v3281_v20, %v3281_v20  ;;  %v6124_v15 = vld [vmem:[%s8046_s3 + $0x25c] ss:$12 sps:$4 sm:$0xff]   ;;  %v6122_v18 = vld [vmem:[%s8046_s3 + $0x258] ss:$12 sps:$4 sm:$0xff]  }
 0x229   :  { %v3285_v22 = vpack.c.bf16 %v3280_v19, %v3280_v19  ;;  %v3287_v30 = vpack.c.bf16 %v3282_v21, %v3282_v21  ;;  %v6150_v19 = vld [vmem:[%s8046_s3 + $0x320] ss:$12 sps:$4 sm:$0xff]   ;;  %v6149_v56 = vld [vmem:[%s8046_s3 + $0x31c] ss:$12 sps:$4 sm:$0xff]  }
 0x22a   :  { %v6127_v21 = vld [vmem:[%s8046_s3 + $0x274] ss:$12 sps:$4 sm:$0xff]  }
 0x22b   :  { %4138 = vmatprep.mubr.bf16.mxu1 %v3285_v22  ;;  %4261 = vmatprep.mubr.bf16.mxu0 %v3285_v22  ;;  %v6125_v22 = vld [vmem:[%s8046_s3 + $0x270] ss:$12 sps:$4 sm:$0xff]  }
 0x22c   :  { %4139 = vmatmul.mubr.bf16.vlgmr.msra.gmra.mrb[12].mxu1 %v3284_v27  ;;  %4262 = vmatmul.mubr.bf16.vlgmr.msra.gmra.mrb[16].mxu0 %v3284_v27  ;;  %v6128_v27 = vld [vmem:[%s8046_s3 + $0x288] ss:$12 sps:$4 sm:$0xff]  }
 0x22d   :  { %4148 = vmatpush1.bf16.msra.mxu1 %v6079_v23  ;;  %5305 = vmatpush3.bf16.msra.mxu0 %v6083_v25  ;;  %v6154_v23 = vld [vmem:[%s8046_s3 + $0x338] ss:$12 sps:$4 sm:$0xff]  }
 0x22e   :  { %4179 = vmatprep.mubr.bf16.mxu1 %v3287_v30  ;;  %4301 = vmatprep.mubr.bf16.mxu0 %v3287_v30  ;;  %v6130_v25 = vld [vmem:[%s8046_s3 + $0x28c] ss:$12 sps:$4 sm:$0xff]  }
 0x22f   :  { %4149 = vmatprep.subr.bf16.mxu1 %v6086_v9  ;;  %5306 = vmatprep.subr.bf16.mxu0 %v6087_v29  ;;  %v6158_v9 = vld [vmem:[%s8046_s3 + $0x350] ss:$12 sps:$4 sm:$0xff]   ;;  %v6131_v30 = vld [vmem:[%s8046_s3 + $0x2a0] ss:$12 sps:$4 sm:$0xff]  }
 0x230   :  { %v6133_v29 = vld [vmem:[%s8046_s3 + $0x2a4] ss:$12 sps:$4 sm:$0xff]  }
 0x231   :  { %4150 = vmatpush1.bf16.msra.mxu1 %v6084_v26  ;;  %5307 = vmatpush3.bf16.msra.mxu0 %v6088_v32  ;;  %v6162_v26 = vld [vmem:[%s8046_s3 + $0x368] ss:$12 sps:$4 sm:$0xff]  }
 0x232   :  { %4151 = vmatprep.subr.bf16.mxu1 %v6091_v33  ;;  %5308 = vmatprep.subr.bf16.mxu0 %v6092_v35  ;;  %v6136_v32 = vld [vmem:[%s8046_s3 + $0x2bc] ss:$12 sps:$4 sm:$0xff]   ;;  %v6134_v33 = vld [vmem:[%s8046_s3 + $0x2b8] ss:$12 sps:$4 sm:$0xff]   ;;  %v6166_v35 = vld [vmem:[%s8046_s3 + $0x380] ss:$12 sps:$4 sm:$0xff]  }
 0x235   :  { %4152 = vmatpush1.bf16.msra.mxu1 %v6089_v49  ;;  %5309 = vmatpush3.bf16.msra.mxu0 %v6093_v36  ;;  %v6139_v49 = vld [vmem:[%s8046_s3 + $0x2d4] ss:$12 sps:$4 sm:$0xff]   ;;  %v6137_v36 = vld [vmem:[%s8046_s3 + $0x2d0] ss:$12 sps:$4 sm:$0xff]  }
 0x236   :  { %4153 = vmatprep.subr.bf16.mxu1 %v6096_v38  ;;  %5310 = vmatprep.subr.bf16.mxu0 %v6097_v39  ;;  %v6170_v38 = vld [vmem:[%s8046_s3 + $0x398] ss:$12 sps:$4 sm:$0xff]  }
 0x237   :  { %v6142_v39 = vld [vmem:[%s8046_s3 + $0x2ec] ss:$12 sps:$4 sm:$0xff]  }
 0x239   :  { %4154 = vmatpush1.bf16.msra.mxu1 %v6094_v40  ;;  %5311 = vmatpush3.bf16.msra.mxu0 %v6098_v16 }
 0x23a   :  { %4155 = vmatprep.subr.bf16.mxu1 %v6101_v24  ;;  %5312 = vmatprep.subr.bf16.mxu0 %v6102_v28 }
 0x23d   :  { %4156 = vmatpush1.bf16.msra.mxu1 %v6099_v42  ;;  %5313 = vmatpush3.bf16.msra.mxu0 %v6103_v34 }
 0x23e   :  { %4157 = vmatprep.subr.bf16.mxu1 %v6106_v45  ;;  %5314 = vmatprep.subr.bf16.mxu0 %v6107_v46  ;;  %v6140_v46 = vld [vmem:[%s8046_s3 + $0x2e8] ss:$12 sps:$4 sm:$0xff]  }
 0x241   :  { %4158 = vmatpush1.bf16.msra.mxu1 %v6104_v47  ;;  %5315 = vmatpush3.bf16.msra.mxu0 %v6108_v48  ;;  %v6174_v48 = vld [vmem:[%s8046_s3 + $0x3b0] ss:$12 sps:$4 sm:$0xff]  }
 0x242   :  { %4159 = vmatprep.subr.bf16.mxu1 %v6111_v51  ;;  %5316 = vmatprep.subr.bf16.mxu0 %v6112_v52  ;;  %v6145_v51 = vld [vmem:[%s8046_s3 + $0x304] ss:$12 sps:$4 sm:$0xff]  }
 0x243   :  { %v5210_v61 = vpop.f32.mrb[4].mxu0  ;;  %v5232_v63 = vpop.f32.mrb[4].mxu1 }
 0x244   :  { %v5211_v44 = vpop.f32.mrb[5].mxu0  ;;  %v5233_v0 = vpop.f32.mrb[5].mxu1 }
 0x245   :  { %v5212_v2 = vadd.f32 %v5211_v44, %v5210_v61  ;;  %4160 = vmatpush1.bf16.msra.mxu1 %v6109_v59  ;;  %5317 = vmatpush3.bf16.msra.mxu0 %v6113_v55  ;;  %v5213_v37 = vpop.f32.mrb[6].mxu0  ;;  %v5234_v53 = vadd.f32 %v5233_v0, %v5232_v63  ;;  %v5235_v60 = vpop.f32.mrb[6].mxu1  ;;  %v6143_v59 = vld [vmem:[%s8046_s3 + $0x300] ss:$12 sps:$4 sm:$0xff]   ;;  %v6151_v61 = vld [vmem:[%s8046_s3 + $0x330] ss:$12 sps:$4 sm:$0xff]  }
 0x246   :  { %v5214_v7 = vpop.f32.mrb[7].mxu0  ;;  %4161 = vmatprep.subr.bf16.mxu1 %v6116_v31  ;;  %5318 = vmatprep.subr.bf16.mxu0 %v6117_v58  ;;  %v5236_v8 = vpop.f32.mrb[7].mxu1  ;;  %v6147_v31 = vld [vmem:[%s8046_s3 + $0x318] ss:$12 sps:$4 sm:$0xff]   ;;  %v6153_v58 = vld [vmem:[%s8046_s3 + $0x334] ss:$12 sps:$4 sm:$0xff]  }
 0x247   :  { %v3114_v10 = vadd.f32 %v5212_v2, %v605_v62  ;;  %v6157_v62 = vld [vmem:[%s8046_s3 + $0x34c] ss:$12 sps:$4 sm:$0xff]   ;;  %v6161_v63 = vld [vmem:[%s8046_s3 + $0x364] ss:$12 sps:$4 sm:$0xff]   ;;  %v6165_v0 = vld [vmem:[%s8046_s3 + $0x37c] ss:$12 sps:$4 sm:$0xff]  }
 0x248   :  { %v6159_v44 = vld [vmem:[%s8046_s3 + $0x360] ss:$12 sps:$4 sm:$0xff]   ;;  %v6163_v2 = vld [vmem:[%s8046_s3 + $0x378] ss:$12 sps:$4 sm:$0xff]  }
 0x249   :  { %v7874_v11 = vadd.f32 %v5234_v53, %v3114_v10  ;;  %4162 = vmatpush1.bf16.msra.mxu1 %v6114_v57  ;;  %5319 = vmatpush3.bf16.msra.mxu0 %v6118_v6  ;;  %v6169_v37 = vld [vmem:[%s8046_s3 + $0x394] ss:$12 sps:$4 sm:$0xff]   ;;  %v6167_v53 = vld [vmem:[%s8046_s3 + $0x390] ss:$12 sps:$4 sm:$0xff]   ;;  %v6173_v57 = vld [vmem:[%s8046_s3 + $0x3ac] ss:$12 sps:$4 sm:$0xff]  }
 0x24a   :  { %4163 = vmatprep.subr.bf16.mxu1 %v6121_v4  ;;  %5366 = vmatprep.subr.bf16.mxu0 %v6252_v17  ;;  %v6171_v6 = vld [vmem:[%s8046_s3 + $0x3a8] ss:$12 sps:$4 sm:$0xff]  }
 0x24c   :  { %4302 = vmatmul.mubr.bf16.vlgmr.msra.gmra.mrb[20].mxu0 %v7882_v14 }
 0x24d   :  { %4164 = vmatpush1.bf16.msra.mxu1 %v6119_v12  ;;  %5367 = vmatpush3.bf16.msra.mxu0 %v6146_v13  ;;  %v6175_v12 = vld [vmem:[#allocation2 + $0x80] sm:$0xff]  }
 0x24e   :  { %4165 = vmatprep.subr.bf16.mxu1 %v6124_v15  ;;  %5368 = vmatprep.subr.bf16.mxu0 %v6252_v17  ;;  %v6177_v13 = vld [vmem:[#allocation2] sm:$0xff]   ;;  %v6179_v15 = vld [vmem:[#allocation2 + $0x48] sm:$0xff]  }
 0x24f   :  { %5382 = vmatprep.mubr.msk.bf16.mxu0 %vm6253_vm1, %v6252_v17 }
 0x251   :  { %4166 = vmatpush1.bf16.msra.mxu1 %v6122_v18  ;;  %5369 = vmatpush3.bf16.msra.mxu0 %v6150_v19  ;;  %v6178_v18 = vld [vmem:[#allocation2 + $0x88] sm:$0xff]  }
 0x252   :  { %4167 = vmatprep.subr.bf16.mxu1 %v6127_v21  ;;  %5370 = vmatprep.subr.bf16.mxu0 %v6252_v17  ;;  %v6180_v19 = vld [vmem:[#allocation2 + $0x8] sm:$0xff]   ;;  %v6182_v21 = vld [vmem:[#allocation2 + $0x50] sm:$0xff]  }
 0x255   :  { %4168 = vmatpush1.bf16.msra.mxu1 %v6125_v22  ;;  %5371 = vmatpush3.bf16.msra.mxu0 %v6154_v23  ;;  %v6181_v22 = vld [vmem:[#allocation2 + $0x90] sm:$0xff]  }
 0x256   :  { %4169 = vmatprep.subr.bf16.mxu1 %v6130_v25  ;;  %5372 = vmatprep.subr.bf16.mxu0 %v6252_v17  ;;  %v6183_v23 = vld [vmem:[#allocation2 + $0x10] sm:$0xff]   ;;  %v6185_v25 = vld [vmem:[#allocation2 + $0x58] sm:$0xff]  }
 0x259   :  { %4170 = vmatpush1.bf16.msra.mxu1 %v6128_v27  ;;  %5373 = vmatpush3.bf16.msra.mxu0 %v6158_v9  ;;  %v6184_v27 = vld [vmem:[#allocation2 + $0x98] sm:$0xff]  }
 0x25a   :  { %4171 = vmatprep.subr.bf16.mxu1 %v6133_v29  ;;  %5374 = vmatprep.subr.bf16.mxu0 %v6252_v17  ;;  %v6186_v9 = vld [vmem:[#allocation2 + $0x18] sm:$0xff]   ;;  %v6188_v29 = vld [vmem:[#allocation2 + $0x60] sm:$0xff]  }
 0x25d   :  { %4172 = vmatpush1.bf16.msra.mxu1 %v6131_v30  ;;  %5375 = vmatpush3.bf16.msra.mxu0 %v6162_v26  ;;  %v6187_v30 = vld [vmem:[#allocation2 + $0xa0] sm:$0xff]  }
 0x25e   :  { %4173 = vmatprep.subr.bf16.mxu1 %v6136_v32  ;;  %5376 = vmatprep.subr.bf16.mxu0 %v6252_v17  ;;  %v6189_v26 = vld [vmem:[#allocation2 + $0x20] sm:$0xff]   ;;  %v6191_v32 = vld [vmem:[#allocation2 + $0x68] sm:$0xff]  }
 0x261   :  { %4174 = vmatpush1.bf16.msra.mxu1 %v6134_v33  ;;  %5377 = vmatpush3.bf16.msra.mxu0 %v6166_v35  ;;  %v6190_v33 = vld [vmem:[#allocation2 + $0xa8] sm:$0xff]  }
 0x262   :  { %4175 = vmatprep.subr.bf16.mxu1 %v6139_v49  ;;  %5378 = vmatprep.subr.bf16.mxu0 %v6252_v17  ;;  %v6192_v35 = vld [vmem:[#allocation2 + $0x28] sm:$0xff]   ;;  %v6193_v49 = vld [vmem:[#allocation2 + $0xb0] sm:$0xff]  }
 0x263   :  { %v5254_v40 = vpop.f32.mrb[8].mxu0  ;;  %v5276_v16 = vpop.f32.mrb[8].mxu1 }
 0x264   :  { %v5255_v24 = vpop.f32.mrb[9].mxu0  ;;  %v5277_v28 = vpop.f32.mrb[9].mxu1 }
 0x265   :  { %v5256_v42 = vadd.f32 %v5255_v24, %v5254_v40  ;;  %4176 = vmatpush1.bf16.msra.mxu1 %v6137_v36  ;;  %v5257_v34 = vpop.f32.mrb[10].mxu0  ;;  %v5278_v45 = vadd.f32 %v5277_v28, %v5276_v16  ;;  %v5279_v47 = vpop.f32.mrb[10].mxu1  ;;  %5379 = vmatpush3.bf16.msra.mxu0 %v6170_v38  ;;  %v6194_v36 = vld [vmem:[#allocation2 + $0x70] sm:$0xff]   ;;  %v6197_v40 = vld [vmem:[#allocation2 + $0x78] sm:$0xff]  }
 0x266   :  { %v5258_v50 = vpop.f32.mrb[11].mxu0  ;;  %4177 = vmatprep.subr.bf16.mxu1 %v6142_v39  ;;  %v5280_v52 = vpop.f32.mrb[11].mxu1  ;;  %5380 = vmatprep.subr.bf16.mxu0 %v6252_v17  ;;  %v6195_v38 = vld [vmem:[#allocation2 + $0x30] sm:$0xff]   ;;  %v6196_v39 = vld [vmem:[#allocation2 + $0xb8] sm:$0xff]  }
 0x267   :  { %v3194_v54 = vadd.f32 %v5256_v42, %v7874_v11  ;;  %v6176_v11 = vld [vmem:[#allocation2 + $0x40] sm:$0xff]   ;;  %v6198_v16 = vld [vmem:[#allocation2 + $0x38] sm:$0xff]  }
 0x269   :  { %4178 = vmatpush1.bf16.msra.mxu1 %v6140_v46  ;;  %v3234_v55 = vadd.f32 %v5278_v45, %v3194_v54  ;;  %5381 = vmatpush3.bf16.msra.mxu0 %v6174_v48  ;;  %v3449_v46 = vld [vmem:[%s8047_s4] sm:$0x7] }
 0x26a   :  { %4188 = vmatprep.subr.bf16.mxu1 %v6145_v51  ;;  %5335 = vmatprep.subr.bf16.mxu0 %v6176_v11  ;;  %v3462_v47 = vrot.slane %v3449_v46, %v596_v41 }
 0x26c   :  { %4180 = vmatmul.mubr.bf16.vlgmr.msra.gmra.mrb[12].mxu1 %v7882_v14 }
 0x26d   :  { %4189 = vmatpush1.bf16.msra.mxu1 %v6143_v59  ;;  %4220 = vmatprep.mubr.bf16.mxu1 %v6251_v1  ;;  %v6155_v1 = vld [vmem:[%s8046_s3 + $0x348] ss:$12 sps:$4 sm:$0xff]  }
 0x26e   :  { %4190 = vmatprep.subr.bf16.mxu1 %v6149_v56  ;;  %v3458_v56 = vrot.slane %v3449_v46, %v592_v5 }
 0x271   :  { %4191 = vmatpush1.bf16.msra.mxu1 %v6147_v31 }
 0x272   :  { %4192 = vmatprep.subr.bf16.mxu1 %v6153_v58 }
 0x275   :  { %4193 = vmatpush1.bf16.msra.mxu1 %v6151_v61 }
 0x276   :  { %4194 = vmatprep.subr.bf16.mxu1 %v6157_v62 }
 0x279   :  { %4195 = vmatpush1.bf16.msra.mxu1 %v6155_v1 }
 0x27a   :  { %4196 = vmatprep.subr.bf16.mxu1 %v6161_v63 }
 0x27d   :  { %4197 = vmatpush1.bf16.msra.mxu1 %v6159_v44 }
 0x27e   :  { %4198 = vmatprep.subr.bf16.mxu1 %v6165_v0 }
 0x281   :  { %4199 = vmatpush1.bf16.msra.mxu1 %v6163_v2 }
 0x282   :  { %4200 = vmatprep.subr.bf16.mxu1 %v6169_v37 }
 0x285   :  { %4201 = vmatpush1.bf16.msra.mxu1 %v6167_v53 }
 0x286   :  { %4202 = vmatprep.subr.bf16.mxu1 %v6173_v57 }
 0x289   :  { %4203 = vmatpush1.bf16.msra.mxu1 %v6171_v6 }
 0x28a   :  { %5386 = vmatprep.subr.bf16.mxu1 %v6252_v17 }
 0x29f   :  { %v3273_v60 = vpop.f32.mrb[12].mxu0 }
 0x2a0   :  { %v3274_v20 = vadd.f32 %v3273_v60, %v3234_v55  ;;  %v3275_v7 = vpop.f32.mrb[13].mxu0  ;;  %v3454_v55 = vrot.slane %v3449_v46, %v588_v3 }
 0x2a1   :  { %v3276_v4 = vpop.f32.mrb[14].mxu0 }
 0x2a2   :  { %v3283_v8 = vmax.f32 %v3274_v20, 0.0  ;;  %v3277_v10 = vpop.f32.mrb[15].mxu0 }
 0x2a4   :  { %v3288_v14 = vpack.c.bf16 %v3283_v8, %v3283_v8  ;;  %v5169_v8 = vld [vmem:[%s8049_s6] ss:$0 sm:$0xff] }
 0x2a6   :  { %4221 = vmatmul.mubr.bf16.vlgmr.msra.gmra.mrb[12].mxu1 %v3288_v14  ;;  %5383 = vmatmul.mubr.bf16.vlgmr.msra.gmra.mrb[24].mxu0 %v3288_v14 }
 0x2a7   :  { %5387 = vmatpush3.bf16.msra.mxu1 %v6175_v12  ;;  %5336 = vmatpush3.bf16.msra.mxu0 %v6177_v13 }
 0x2a8   :  { %5388 = vmatprep.subr.bf16.mxu1 %v6252_v17  ;;  %5337 = vmatprep.subr.bf16.mxu0 %v6179_v15 }
 0x2a9   :  { %5402 = vmatprep.mubr.msk.bf16.mxu1 %vm6253_vm1, %v6252_v17 }
 0x2ab   :  { %5389 = vmatpush3.bf16.msra.mxu1 %v6178_v18  ;;  %5338 = vmatpush3.bf16.msra.mxu0 %v6180_v19 }
 0x2ac   :  { %5390 = vmatprep.subr.bf16.mxu1 %v6252_v17  ;;  %5339 = vmatprep.subr.bf16.mxu0 %v6182_v21 }
 0x2af   :  { %5391 = vmatpush3.bf16.msra.mxu1 %v6181_v22  ;;  %5340 = vmatpush3.bf16.msra.mxu0 %v6183_v23 }
 0x2b0   :  { %5392 = vmatprep.subr.bf16.mxu1 %v6252_v17  ;;  %5341 = vmatprep.subr.bf16.mxu0 %v6185_v25 }
 0x2b3   :  { %5393 = vmatpush3.bf16.msra.mxu1 %v6184_v27  ;;  %5342 = vmatpush3.bf16.msra.mxu0 %v6186_v9 }
 0x2b4   :  { %5394 = vmatprep.subr.bf16.mxu1 %v6252_v17  ;;  %5343 = vmatprep.subr.bf16.mxu0 %v6188_v29 }
 0x2b7   :  { %5395 = vmatpush3.bf16.msra.mxu1 %v6187_v30  ;;  %5344 = vmatpush3.bf16.msra.mxu0 %v6189_v26 }
 0x2b8   :  { %5396 = vmatprep.subr.bf16.mxu1 %v6252_v17  ;;  %5345 = vmatprep.subr.bf16.mxu0 %v6191_v32 }
 0x2bb   :  { %5397 = vmatpush3.bf16.msra.mxu1 %v6190_v33  ;;  %5346 = vmatpush3.bf16.msra.mxu0 %v6192_v35 }
 0x2bc   :  { %5398 = vmatprep.subr.bf16.mxu1 %v6252_v17  ;;  %5347 = vmatprep.subr.bf16.mxu0 %v6194_v36 }
 0x2bf   :  { %5399 = vmatpush3.bf16.msra.mxu1 %v6193_v49  ;;  %5348 = vmatpush3.bf16.msra.mxu0 %v6195_v38 }
 0x2c0   :  { %5400 = vmatprep.subr.bf16.mxu1 %v6252_v17  ;;  %5349 = vmatprep.subr.bf16.mxu0 %v6197_v40 }
 0x2c3   :  { %5401 = vmatpush3.bf16.msra.mxu1 %v6196_v39  ;;  %5350 = vmatpush3.bf16.msra.mxu0 %v6198_v16 }
 0x2ff   :  { %v5298_v24 = vpop.f32.mrb[16].mxu0 }
 0x300   :  { %v5299_v28 = vpop.f32.mrb[17].mxu0 }
 0x301   :  { %v5300_v42 = vadd.f32 %v5299_v28, %v5298_v24  ;;  %v5301_v34 = vpop.f32.mrb[18].mxu0 }
 0x302   :  { %v5302_v45 = vpop.f32.mrb[19].mxu0 }
 0x303   :  { %v4264_v50 = vadd.f32 %v5300_v42, %v3462_v47 }
 0x31f   :  { %v5320_v17 = vpop.f32.mrb[20].mxu0 }
 0x320   :  { %v5321_v48 = vpop.f32.mrb[21].mxu0 }
 0x321   :  { %v5322_v51 = vadd.f32 %v5321_v48, %v5320_v17  ;;  %v5323_v52 = vpop.f32.mrb[22].mxu0 }
 0x322   :  { %v5324_v54 = vpop.f32.mrb[23].mxu0 }
 0x323   :  { %v4304_v59 = vadd.f32 %v5322_v51, %v4264_v50 }
 0x379   :  { %v4222_v31 = vpop.f32.mrb[12].mxu1  ;;  %v4343_v58 = vpop.f32.mrb[24].mxu0 }
 0x37a   :  { %v5410_v61 = vadd.f32 %v4222_v31, %v3454_v55  ;;  %v4344_v62 = vadd.f32 %v4343_v58, %v4304_v59  ;;  %v4224_v1 = vpop.f32.mrb[13].mxu1  ;;  %v5384_v63 = vpop.f32.mrb[25].mxu0 }
 0x37b   :  { %v5411_v41 = vadd.f32 %v4224_v1, %v3458_v56  ;;  %v4226_v44 = vpop.f32.mrb[14].mxu1  ;;  %v4346_v0 = vpop.f32.mrb[26].mxu0 }
 0x37c   :  { %v4349_v2 = vmax.f32 %v5410_v61, 0.0  ;;  %v4351_v37 = vmax.f32 %v4344_v62, 0.0  ;;  %v4227_v53 = vpop.f32.mrb[15].mxu1  ;;  %v5385_v57 = vpop.f32.mrb[27].mxu0 }
 0x37d   :  { %v4350_v6 = vmax.f32 %v5411_v41, 0.0 }
 0x37e   :  { %v4354_v60 = vpack.c.bf16 %v4351_v37, %v4351_v37  ;;  %v4352_v3 = vpack.c.bf16 %v4349_v2, %v4349_v2 }
 0x37f   :  { %v4353_v20 = vpack.c.bf16 %v4350_v6, %v4350_v6 }
 0x380   :  { %5403 = vmatmul.mubr.bf16.vlgmr.msra.gmra.mrb[16].mxu1 %v4354_v60 }
 0x381   :  { %4586 = vmatprep.mubr.bf16.mxu0 %v4353_v20 }
 0x382   :  { %4587 = vmatmul.mubr.bf16.vlgmr.msra.gmra.mrb[28].mxu0 %v4352_v3 }
 0x453   :  { %v4628_v43 = vpop.f32.mrb[16].mxu1 }
 0x454   :  { %v5404_v5 = vpop.f32.mrb[17].mxu1 }
 0x455   :  { %v5351_v7 = vpop.f32.mrb[28].mxu0  ;;  %v4631_v4 = vpop.f32.mrb[18].mxu1 }
 0x456   :  { %v5352_v10 = vpop.f32.mrb[29].mxu0  ;;  %v5405_v11 = vpop.f32.mrb[19].mxu1 }
 0x457   :  { %v5353_v12 = vadd.f32 %v5352_v10, %v5351_v7  ;;  %v5354_v13 = vpop.f32.mrb[30].mxu0 }
 0x458   :  { %v5355_v14 = vpop.f32.mrb[31].mxu0 }
 0x459   :  { %v4589_v15 = vadd.f32 %v5353_v12, %v5169_v8 }
 0x45b   :  { %v4629_v18 = vadd.f32 %v4628_v43, %v4589_v15 }
 0x45d   :  { %4634 = vst [vmem:[#allocation5] sm:$0x3] %v4629_v18 }
 0x45e   :  { %6232 = shalt.err (!%p6229_p12)
}
 0x45f   :  { %s6233_s17 = scalar_lea.hbm %s8050_s7, 32 }
 0x460   :  { %p6234_p13 = scmp.ne.s32.totalorder %s8050_s7, %s6233_s17  ;;  %p6237_p0 = scmp.lt.u32.totalorder %s6233_s17, %s8050_s7 }
 0x462   :  { %p6239_p1 = pnand %p6237_p0, %p6234_p13 }
 0x464   :  { %6242 = shalt.err (!%p6239_p1)
}
 0x465   :  { %4644 = dma.vmem_to_hbm [thread:$0]  %s4642_s14, 32, %s8050_s7, [#allocation4]  }
 0x466   :  { %6245 = dma.done.wait [#allocation4], 32  }
 0x467   :  { %6246 = vsyncadd [#allocation4], 4294967264 }
 0x468   :  { %4648 = vsyncpa [#allocation3], 1 }
 0x469   :  { %4649 = vsyncpa [#allocation4], 1 }

</bundles_post_ra>
